<compile_context>
chip_gen: v5e
topology: v5e:2x2
jax: 0.10.0
libtpu: 0.0.40
codegen_flags: <defaults>
</compile_context>

<pallas_src>
import functools

import jax
import jax.numpy as jnp
from jax import lax
from jax.experimental import pallas as pl
from jax.experimental.pallas import tpu as pltpu

EPS = 1e-5


def _residual_kernel(x_ref, bw1_ref, bw2_ref, sup_ref, sdn_ref, proj_ref,
                     g1_ref, be1_ref, g2_ref, be2_ref, out_ref,
                     *, n, h, w, c):
    """relu(bn2(conv2(relu(bn1(conv1(X))))) + X), folded (N*H, W*C) layout.

    x_ref    : (N*H, W*C)      input, W and C folded into the lane axis
    bw*_ref  : (3, W*C, W*C)   banded conv weights, one dense matrix per dy tap
    sup_ref  : (N*H, N*H)      0/1 "row above" gather (zero at top row of image)
    sdn_ref  : (N*H, N*H)      0/1 "row below" gather (zero at bottom row)
    proj_ref : (W*C, W*C)      channel-sum projector  P[p, q] = (p % C == q % C)
    g*_ref   : (1, W*C)        BN gamma, tiled over W
    be*_ref  : (1, W*C)        BN beta,  tiled over W
    out_ref  : (N*H, W*C)      output
    """
    wc = w * c
    inv_cnt = 1.0 / float(n * h * w)

    sup = sup_ref[...]                    # hoisted loads (used twice each)
    sdn = sdn_ref[...]
    proj = proj_ref[...]

    def conv3x3(src2d, bw_ref):
        # Vertical taps via exact 0/1 shift matmuls (SAME H-padding baked in);
        # horizontal taps + SAME W-padding are baked into the banded weights.
        up = jnp.dot(sup, src2d, preferred_element_type=jnp.float32)   # src[r-1]
        dn = jnp.dot(sdn, src2d, preferred_element_type=jnp.float32)   # src[r+1]
        acc = jnp.dot(up, bw_ref[0], preferred_element_type=jnp.float32)
        acc += jnp.dot(src2d, bw_ref[1], preferred_element_type=jnp.float32)
        acc += jnp.dot(dn, bw_ref[2], preferred_element_type=jnp.float32)
        return acc

    def batchnorm(z, g_ref, be_ref):
        # Training-mode BN: per-channel (= lane % C) stats over N*H*W, computed
        # lane-dense via the channel-sum projection matmul (exact: P is 0/1).
        mean = jnp.dot(jnp.sum(z, axis=0, keepdims=True), proj,
                       preferred_element_type=jnp.float32) * inv_cnt
        zc = z - mean
        var = jnp.dot(jnp.sum(zc * zc, axis=0, keepdims=True), proj,
                      preferred_element_type=jnp.float32) * inv_cnt
        scale = g_ref[...] * lax.rsqrt(var + EPS)    # gamma folded into scale
        return zc * scale + be_ref[...]

    x2d = x_ref[...].astype(jnp.float32)                       # (N*H, W*C)
    # Stage 1: relu(bn1(conv1(X)))  (conv bias cancelled by BN mean-subtract)
    y1 = jnp.maximum(batchnorm(conv3x3(x2d, bw1_ref), g1_ref, be1_ref), 0.0)
    # Stage 2: relu(bn2(conv2(Y)) + X)
    y2 = batchnorm(conv3x3(y1, bw2_ref), g2_ref, be2_ref)
    out_ref[...] = jnp.maximum(y2 + x2d, 0.0).astype(out_ref.dtype)


def _band_weights(w_hwio, width):
    """(3, 3, Cin, Cout) HWIO weights -> (3, W*Cin, W*Cout) banded matrices.

    band[dy, wi*Cin+ci, wo*Cout+co] = w[dy, wi-wo+1, ci, co] for |wi-wo| <= 1,
    else 0.  SAME zero-padding along W is encoded by truncating the band at the
    edges.  Built with exact 0/1 masks (no reduced-precision contractions).
    """
    ky, kx, cin, cout = w_hwio.shape
    wi = jnp.arange(width)[:, None]          # (W, 1)  input  W position
    wo = jnp.arange(width)[None, :]          # (1, W)  output W position
    per_dy = []
    for dy in range(ky):
        acc = jnp.zeros((width, cin, width, cout), w_hwio.dtype)
        for dx in range(kx):
            mask = (wi == wo + dx - 1).astype(w_hwio.dtype)       # (W, W)
            acc = acc + mask[:, None, :, None] * w_hwio[dy, dx][None, :, None, :]
        per_dy.append(acc.reshape(width * cin, width * cout))
    return jnp.stack(per_dy, axis=0)


@jax.jit
def residual_forward(x_nchw, params):
    """Pallas implementation of Residual.forward (use_1x1conv=False, stride=1)."""
    N, C, H, W = x_nchw.shape
    WC = W * C
    # NCHW -> NHWC -> fold (W, C) into one lane-dense axis, flatten rows.
    x = jnp.transpose(x_nchw, (0, 2, 3, 1)).reshape(N * H, WC)

    bw1 = _band_weights(params["w1"], W).astype(jnp.float32)
    bw2 = _band_weights(params["w2"], W).astype(jnp.float32)
    proj = jnp.tile(jnp.eye(C, dtype=jnp.float32), (W, W))       # (WC, WC)

    # Exact 0/1 vertical-shift matrices: gather the row above/below within the
    # same image, zero at the image border (SAME padding along H).
    r = jnp.arange(N * H)
    sup = ((r[:, None] == r[None, :] + 1) &
           (r[:, None] % H != 0)).astype(jnp.float32)            # (NH, NH)
    sdn = ((r[:, None] == r[None, :] - 1) &
           (r[:, None] % H != H - 1)).astype(jnp.float32)        # (NH, NH)

    tile_c = lambda v: jnp.tile(v.astype(jnp.float32), W).reshape(1, WC)
    g1, be1 = tile_c(params["g1"]), tile_c(params["be1"])
    g2, be2 = tile_c(params["g2"]), tile_c(params["be2"])
    # Conv biases b1/b2 are intentionally NOT passed: training-mode BatchNorm
    # subtracts the per-channel batch mean, which cancels them exactly.

    kernel = functools.partial(_residual_kernel, n=N, h=H, w=W, c=C)
    vmem = lambda: pl.BlockSpec(memory_space=pltpu.MemorySpace.VMEM)

    out2d = pl.pallas_call(
        kernel,
        out_shape=jax.ShapeDtypeStruct((N * H, WC), x_nchw.dtype),
        in_specs=[vmem() for _ in range(10)],
        out_specs=vmem(),
        compiler_params=pltpu.CompilerParams(vmem_limit_bytes=32 * 1024 * 1024),
    )(x, bw1, bw2, sup, sdn, proj, g1, be1, g2, be2)

    out = out2d.reshape(N, H, W, C)                               # unfold lanes
    return jnp.transpose(out, (0, 3, 1, 2))                       # NHWC -> NCHW


# --------------------------- reference (plain JAX) ---------------------------
def _bn_train(x_nhwc, gamma, beta):
    mean = jnp.mean(x_nhwc, axis=(0, 1, 2), keepdims=True)
    var = jnp.mean((x_nhwc - mean) ** 2, axis=(0, 1, 2), keepdims=True)
    return (x_nhwc - mean) * lax.rsqrt(var + EPS) * gamma + beta


def residual_forward_ref(x_nchw, params):
    x = jnp.transpose(x_nchw, (0, 2, 3, 1))
    dn = ("NHWC", "HWIO", "NHWC")
    y = lax.conv_general_dilated(x, params["w1"], (1, 1), "SAME",
                                 dimension_numbers=dn) + params["b1"]
    y = jnp.maximum(_bn_train(y, params["g1"], params["be1"]), 0.0)
    y = lax.conv_general_dilated(y, params["w2"], (1, 1), "SAME",
                                 dimension_numbers=dn) + params["b2"]
    y = _bn_train(y, params["g2"], params["be2"])
    out = jnp.maximum(y + x, 0.0)
    return jnp.transpose(out, (0, 3, 1, 2))


if __name__ == "__main__":
    N, C, H, W = 2, 8, 16, 16          # in_channels == out_channels; W*C = 128
    key = jax.random.PRNGKey(0)
    ks = jax.random.split(key, 9)

    params = {
        "w1": jax.random.normal(ks[0], (3, 3, C, C), jnp.float32) * 0.1,
        "b1": jax.random.normal(ks[1], (C,), jnp.float32) * 0.1,
        "g1": 1.0 + 0.1 * jax.random.normal(ks[2], (C,), jnp.float32),
        "be1": 0.1 * jax.random.normal(ks[3], (C,), jnp.float32),
        "w2": jax.random.normal(ks[4], (3, 3, C, C), jnp.float32) * 0.1,
        "b2": jax.random.normal(ks[5], (C,), jnp.float32) * 0.1,
        "g2": 1.0 + 0.1 * jax.random.normal(ks[6], (C,), jnp.float32),
        "be2": 0.1 * jax.random.normal(ks[7], (C,), jnp.float32),
    }
    x = jax.random.normal(ks[8], (N, C, H, W), jnp.float32)

    out = jax.block_until_ready(residual_forward(x, params))
    ref = jax.block_until_ready(residual_forward_ref(x, params))

    assert out.shape == (N, C, H, W)
    assert jnp.allclose(out, ref, atol=1e-4, rtol=1e-4), \
        f"max abs err = {jnp.max(jnp.abs(out - ref))}"
    print("KERNEL_OK")
</pallas_src>

<mosaic_0001>
module attributes {stable_mosaic.version = 11 : i64} {
  func.func @_residual_kernel(%arg0: memref<32x128xf32, #tpu.memory_space<vmem>>, %arg1: memref<3x128x128xf32, #tpu.memory_space<vmem>>, %arg2: memref<3x128x128xf32, #tpu.memory_space<vmem>>, %arg3: memref<32x32xf32, #tpu.memory_space<vmem>>, %arg4: memref<32x32xf32, #tpu.memory_space<vmem>>, %arg5: memref<128x128xf32, #tpu.memory_space<vmem>>, %arg6: memref<1x128xf32, #tpu.memory_space<vmem>>, %arg7: memref<1x128xf32, #tpu.memory_space<vmem>>, %arg8: memref<1x128xf32, #tpu.memory_space<vmem>>, %arg9: memref<1x128xf32, #tpu.memory_space<vmem>>, %arg10: memref<32x128xf32, #tpu.memory_space<vmem>>) attributes {dimension_semantics = [], scalar_prefetch = 0 : i64, scratch_operands = 0 : i64, tpu.core_type = #tpu.core_type<tc>} {
    %c0 = arith.constant 0 : index
    %c0_0 = arith.constant 0 : index
    %0 = vector.load %arg3[%c0, %c0_0] : memref<32x32xf32, #tpu.memory_space<vmem>>, vector<32x32xf32>
    %c0_1 = arith.constant 0 : index
    %c0_2 = arith.constant 0 : index
    %1 = vector.load %arg4[%c0_1, %c0_2] : memref<32x32xf32, #tpu.memory_space<vmem>>, vector<32x32xf32>
    %c0_3 = arith.constant 0 : index
    %c0_4 = arith.constant 0 : index
    %2 = vector.load %arg5[%c0_3, %c0_4] : memref<128x128xf32, #tpu.memory_space<vmem>>, vector<128x128xf32>
    %c0_5 = arith.constant 0 : index
    %c0_6 = arith.constant 0 : index
    %3 = vector.load %arg0[%c0_5, %c0_6] : memref<32x128xf32, #tpu.memory_space<vmem>>, vector<32x128xf32>
    %cst = arith.constant dense<0.000000e+00> : vector<32x128xf32>
    %4 = tpu.matmul %0, %3, %cst {dimension_numbers = #tpu.dot_dimension_numbers<[1], [0], [0], [1], [0, 0, 1, 1], [], []>} : vector<32x32xf32>, vector<32x128xf32>, vector<32x128xf32> -> vector<32x128xf32>
    %cst_7 = arith.constant dense<0.000000e+00> : vector<32x128xf32>
    %5 = tpu.matmul %1, %3, %cst_7 {dimension_numbers = #tpu.dot_dimension_numbers<[1], [0], [0], [1], [0, 0, 1, 1], [], []>} : vector<32x32xf32>, vector<32x128xf32>, vector<32x128xf32> -> vector<32x128xf32>
    %c0_8 = arith.constant 0 : index
    %c0_9 = arith.constant 0 : index
    %c0_10 = arith.constant 0 : index
    %6 = vector.load %arg1[%c0_8, %c0_9, %c0_10] : memref<3x128x128xf32, #tpu.memory_space<vmem>>, vector<1x128x128xf32>
    %7 = vector.shape_cast %6 : vector<1x128x128xf32> to vector<128x128xf32>
    %cst_11 = arith.constant dense<0.000000e+00> : vector<32x128xf32>
    %8 = tpu.matmul %4, %7, %cst_11 {dimension_numbers = #tpu.dot_dimension_numbers<[1], [0], [0], [1], [0, 0, 1, 1], [], []>} : vector<32x128xf32>, vector<128x128xf32>, vector<32x128xf32> -> vector<32x128xf32>
    %c1 = arith.constant 1 : index
    %c0_12 = arith.constant 0 : index
    %c0_13 = arith.constant 0 : index
    %9 = vector.load %arg1[%c1, %c0_12, %c0_13] : memref<3x128x128xf32, #tpu.memory_space<vmem>>, vector<1x128x128xf32>
    %10 = vector.shape_cast %9 : vector<1x128x128xf32> to vector<128x128xf32>
    %cst_14 = arith.constant dense<0.000000e+00> : vector<32x128xf32>
    %11 = tpu.matmul %3, %10, %cst_14 {dimension_numbers = #tpu.dot_dimension_numbers<[1], [0], [0], [1], [0, 0, 1, 1], [], []>} : vector<32x128xf32>, vector<128x128xf32>, vector<32x128xf32> -> vector<32x128xf32>
    %12 = arith.addf %8, %11 : vector<32x128xf32>
    %c2 = arith.constant 2 : index
    %c0_15 = arith.constant 0 : index
    %c0_16 = arith.constant 0 : index
    %13 = vector.load %arg1[%c2, %c0_15, %c0_16] : memref<3x128x128xf32, #tpu.memory_space<vmem>>, vector<1x128x128xf32>
    %14 = vector.shape_cast %13 : vector<1x128x128xf32> to vector<128x128xf32>
    %cst_17 = arith.constant dense<0.000000e+00> : vector<32x128xf32>
    %15 = tpu.matmul %5, %14, %cst_17 {dimension_numbers = #tpu.dot_dimension_numbers<[1], [0], [0], [1], [0, 0, 1, 1], [], []>} : vector<32x128xf32>, vector<128x128xf32>, vector<32x128xf32> -> vector<32x128xf32>
    %16 = arith.addf %12, %15 : vector<32x128xf32>
    %cst_18 = arith.constant dense<0.000000e+00> : vector<128xf32>
    %17 = vector.multi_reduction <add>, %16, %cst_18 [0] : vector<32x128xf32> to vector<128xf32>
    %18 = vector.shape_cast %17 : vector<128xf32> to vector<1x128xf32>
    %cst_19 = arith.constant dense<0.000000e+00> : vector<1x128xf32>
    %19 = tpu.matmul %18, %2, %cst_19 {dimension_numbers = #tpu.dot_dimension_numbers<[1], [0], [0], [1], [0, 0, 1, 1], [], []>} : vector<1x128xf32>, vector<128x128xf32>, vector<1x128xf32> -> vector<1x128xf32>
    %cst_20 = arith.constant 0.001953125 : f32
    %20 = vector.broadcast %cst_20 : f32 to vector<1x128xf32>
    %21 = arith.mulf %19, %20 : vector<1x128xf32>
    %22 = vector.broadcast %21 : vector<1x128xf32> to vector<32x128xf32>
    %23 = arith.subf %16, %22 : vector<32x128xf32>
    %24 = arith.mulf %23, %23 : vector<32x128xf32>
    %cst_21 = arith.constant dense<0.000000e+00> : vector<128xf32>
    %25 = vector.multi_reduction <add>, %24, %cst_21 [0] : vector<32x128xf32> to vector<128xf32>
    %26 = vector.shape_cast %25 : vector<128xf32> to vector<1x128xf32>
    %cst_22 = arith.constant dense<0.000000e+00> : vector<1x128xf32>
    %27 = tpu.matmul %26, %2, %cst_22 {dimension_numbers = #tpu.dot_dimension_numbers<[1], [0], [0], [1], [0, 0, 1, 1], [], []>} : vector<1x128xf32>, vector<128x128xf32>, vector<1x128xf32> -> vector<1x128xf32>
    %cst_23 = arith.constant 0.001953125 : f32
    %28 = vector.broadcast %cst_23 : f32 to vector<1x128xf32>
    %29 = arith.mulf %27, %28 : vector<1x128xf32>
    %c0_24 = arith.constant 0 : index
    %c0_25 = arith.constant 0 : index
    %30 = vector.load %arg6[%c0_24, %c0_25] : memref<1x128xf32, #tpu.memory_space<vmem>>, vector<1x128xf32>
    %cst_26 = arith.constant 9.99999974E-6 : f32
    %31 = vector.broadcast %cst_26 : f32 to vector<1x128xf32>
    %32 = arith.addf %29, %31 : vector<1x128xf32>
    %33 = math.rsqrt %32 : vector<1x128xf32>
    %34 = arith.mulf %30, %33 : vector<1x128xf32>
    %35 = vector.broadcast %34 : vector<1x128xf32> to vector<32x128xf32>
    %36 = arith.mulf %23, %35 : vector<32x128xf32>
    %c0_27 = arith.constant 0 : index
    %c0_28 = arith.constant 0 : index
    %37 = vector.load %arg7[%c0_27, %c0_28] : memref<1x128xf32, #tpu.memory_space<vmem>>, vector<1x128xf32>
    %38 = vector.broadcast %37 : vector<1x128xf32> to vector<32x128xf32>
    %39 = arith.addf %36, %38 : vector<32x128xf32>
    %cst_29 = arith.constant 0.000000e+00 : f32
    %40 = vector.broadcast %cst_29 : f32 to vector<32x128xf32>
    %41 = arith.maximumf %39, %40 : vector<32x128xf32>
    %cst_30 = arith.constant dense<0.000000e+00> : vector<32x128xf32>
    %42 = tpu.matmul %0, %41, %cst_30 {dimension_numbers = #tpu.dot_dimension_numbers<[1], [0], [0], [1], [0, 0, 1, 1], [], []>} : vector<32x32xf32>, vector<32x128xf32>, vector<32x128xf32> -> vector<32x128xf32>
    %cst_31 = arith.constant dense<0.000000e+00> : vector<32x128xf32>
    %43 = tpu.matmul %1, %41, %cst_31 {dimension_numbers = #tpu.dot_dimension_numbers<[1], [0], [0], [1], [0, 0, 1, 1], [], []>} : vector<32x32xf32>, vector<32x128xf32>, vector<32x128xf32> -> vector<32x128xf32>
    %c0_32 = arith.constant 0 : index
    %c0_33 = arith.constant 0 : index
    %c0_34 = arith.constant 0 : index
    %44 = vector.load %arg2[%c0_32, %c0_33, %c0_34] : memref<3x128x128xf32, #tpu.memory_space<vmem>>, vector<1x128x128xf32>
    %45 = vector.shape_cast %44 : vector<1x128x128xf32> to vector<128x128xf32>
    %cst_35 = arith.constant dense<0.000000e+00> : vector<32x128xf32>
    %46 = tpu.matmul %42, %45, %cst_35 {dimension_numbers = #tpu.dot_dimension_numbers<[1], [0], [0], [1], [0, 0, 1, 1], [], []>} : vector<32x128xf32>, vector<128x128xf32>, vector<32x128xf32> -> vector<32x128xf32>
    %c1_36 = arith.constant 1 : index
    %c0_37 = arith.constant 0 : index
    %c0_38 = arith.constant 0 : index
    %47 = vector.load %arg2[%c1_36, %c0_37, %c0_38] : memref<3x128x128xf32, #tpu.memory_space<vmem>>, vector<1x128x128xf32>
    %48 = vector.shape_cast %47 : vector<1x128x128xf32> to vector<128x128xf32>
    %cst_39 = arith.constant dense<0.000000e+00> : vector<32x128xf32>
    %49 = tpu.matmul %41, %48, %cst_39 {dimension_numbers = #tpu.dot_dimension_numbers<[1], [0], [0], [1], [0, 0, 1, 1], [], []>} : vector<32x128xf32>, vector<128x128xf32>, vector<32x128xf32> -> vector<32x128xf32>
    %50 = arith.addf %46, %49 : vector<32x128xf32>
    %c2_40 = arith.constant 2 : index
    %c0_41 = arith.constant 0 : index
    %c0_42 = arith.constant 0 : index
    %51 = vector.load %arg2[%c2_40, %c0_41, %c0_42] : memref<3x128x128xf32, #tpu.memory_space<vmem>>, vector<1x128x128xf32>
    %52 = vector.shape_cast %51 : vector<1x128x128xf32> to vector<128x128xf32>
    %cst_43 = arith.constant dense<0.000000e+00> : vector<32x128xf32>
    %53 = tpu.matmul %43, %52, %cst_43 {dimension_numbers = #tpu.dot_dimension_numbers<[1], [0], [0], [1], [0, 0, 1, 1], [], []>} : vector<32x128xf32>, vector<128x128xf32>, vector<32x128xf32> -> vector<32x128xf32>
    %54 = arith.addf %50, %53 : vector<32x128xf32>
    %cst_44 = arith.constant dense<0.000000e+00> : vector<128xf32>
    %55 = vector.multi_reduction <add>, %54, %cst_44 [0] : vector<32x128xf32> to vector<128xf32>
    %56 = vector.shape_cast %55 : vector<128xf32> to vector<1x128xf32>
    %cst_45 = arith.constant dense<0.000000e+00> : vector<1x128xf32>
    %57 = tpu.matmul %56, %2, %cst_45 {dimension_numbers = #tpu.dot_dimension_numbers<[1], [0], [0], [1], [0, 0, 1, 1], [], []>} : vector<1x128xf32>, vector<128x128xf32>, vector<1x128xf32> -> vector<1x128xf32>
    %cst_46 = arith.constant 0.001953125 : f32
    %58 = vector.broadcast %cst_46 : f32 to vector<1x128xf32>
    %59 = arith.mulf %57, %58 : vector<1x128xf32>
    %60 = vector.broadcast %59 : vector<1x128xf32> to vector<32x128xf32>
    %61 = arith.subf %54, %60 : vector<32x128xf32>
    %62 = arith.mulf %61, %61 : vector<32x128xf32>
    %cst_47 = arith.constant dense<0.000000e+00> : vector<128xf32>
    %63 = vector.multi_reduction <add>, %62, %cst_47 [0] : vector<32x128xf32> to vector<128xf32>
    %64 = vector.shape_cast %63 : vector<128xf32> to vector<1x128xf32>
    %cst_48 = arith.constant dense<0.000000e+00> : vector<1x128xf32>
    %65 = tpu.matmul %64, %2, %cst_48 {dimension_numbers = #tpu.dot_dimension_numbers<[1], [0], [0], [1], [0, 0, 1, 1], [], []>} : vector<1x128xf32>, vector<128x128xf32>, vector<1x128xf32> -> vector<1x128xf32>
    %cst_49 = arith.constant 0.001953125 : f32
    %66 = vector.broadcast %cst_49 : f32 to vector<1x128xf32>
    %67 = arith.mulf %65, %66 : vector<1x128xf32>
    %c0_50 = arith.constant 0 : index
    %c0_51 = arith.constant 0 : index
    %68 = vector.load %arg8[%c0_50, %c0_51] : memref<1x128xf32, #tpu.memory_space<vmem>>, vector<1x128xf32>
    %cst_52 = arith.constant 9.99999974E-6 : f32
    %69 = vector.broadcast %cst_52 : f32 to vector<1x128xf32>
    %70 = arith.addf %67, %69 : vector<1x128xf32>
    %71 = math.rsqrt %70 : vector<1x128xf32>
    %72 = arith.mulf %68, %71 : vector<1x128xf32>
    %73 = vector.broadcast %72 : vector<1x128xf32> to vector<32x128xf32>
    %74 = arith.mulf %61, %73 : vector<32x128xf32>
    %c0_53 = arith.constant 0 : index
    %c0_54 = arith.constant 0 : index
    %75 = vector.load %arg9[%c0_53, %c0_54] : memref<1x128xf32, #tpu.memory_space<vmem>>, vector<1x128xf32>
    %76 = vector.broadcast %75 : vector<1x128xf32> to vector<32x128xf32>
    %77 = arith.addf %74, %76 : vector<32x128xf32>
    %78 = arith.addf %77, %3 : vector<32x128xf32>
    %cst_55 = arith.constant 0.000000e+00 : f32
    %79 = vector.broadcast %cst_55 : f32 to vector<32x128xf32>
    %80 = arith.maximumf %78, %79 : vector<32x128xf32>
    %c0_56 = arith.constant 0 : index
    %c0_57 = arith.constant 0 : index
    %81 = vector.load %arg10[%c0_56, %c0_57] : memref<32x128xf32, #tpu.memory_space<vmem>>, vector<32x128xf32>
    tpu.vector_store %arg10[%c0_56, %c0_57], %80 {strides = array<i32>} : memref<32x128xf32, #tpu.memory_space<vmem>>, vector<32x128xf32>,
    return
  }
}

</mosaic_0001>

<bundles_post_ra>
// kernel: tile.28
= control target key start
LH: loop header
LB: loop body
LE: loop exit
PB: predicated region body
PF: predicated region fallthrough
CT: control target
= control target key end

     0   :  { %s1866_s0 = inlined_call_operand.vmem [shape: f32[8,8], index: 0, kind: input, shape index: {}]   ;;  %s1867_s1 = inlined_call_operand.vmem [shape: f32[16,8,16,8], index: 1, kind: output, shape index: {}]  }
   0x1   :  { %v805_v0 = vld [vmem:[%s1866_s0] ss:$0 sm:$0xff]  ;;  %v866_v1 = vld [vmem:[%s1866_s0 + $0x1] ss:$0 sm:$0xff]  ;;  %v935_v2 = vld [vmem:[%s1866_s0 + $0x2] ss:$0 sm:$0xff] }
   0x2   :  { %5 = vst [vmem:[%s1867_s1] sm:$0xff] %v805_v0  ;;  %v1004_v3 = vld [vmem:[%s1866_s0 + $0x3] ss:$0 sm:$0xff]  ;;  %v1073_v4 = vld [vmem:[%s1866_s0 + $0x4] ss:$0 sm:$0xff]  ;;  %v1142_v5 = vld [vmem:[%s1866_s0 + $0x5] ss:$0 sm:$0xff] }
   0x3   :  { %530 = vst [vmem:[%s1867_s1 + $0x80] sm:$0xff] %v805_v0  ;;  %v1211_v6 = vld [vmem:[%s1866_s0 + $0x6] ss:$0 sm:$0xff]  ;;  %v1280_v7 = vld [vmem:[%s1866_s0 + $0x7] ss:$0 sm:$0xff] }
   0x4   :  { %531 = vst [vmem:[%s1867_s1 + $0x100] sm:$0xff] %v805_v0 }
   0x5   :  { %532 = vst [vmem:[%s1867_s1 + $0x180] sm:$0xff] %v805_v0 }
   0x6   :  { %533 = vst [vmem:[%s1867_s1 + $0x200] sm:$0xff] %v805_v0 }
   0x7   :  { %534 = vst [vmem:[%s1867_s1 + $0x280] sm:$0xff] %v805_v0 }
   0x8   :  { %535 = vst [vmem:[%s1867_s1 + $0x300] sm:$0xff] %v805_v0 }
   0x9   :  { %536 = vst [vmem:[%s1867_s1 + $0x380] sm:$0xff] %v805_v0 }
   0xa   :  { %537 = vst [vmem:[%s1867_s1 + $0x400] sm:$0xff] %v805_v0 }
   0xb   :  { %538 = vst [vmem:[%s1867_s1 + $0x480] sm:$0xff] %v805_v0 }
   0xc   :  { %539 = vst [vmem:[%s1867_s1 + $0x500] sm:$0xff] %v805_v0 }
   0xd   :  { %540 = vst [vmem:[%s1867_s1 + $0x580] sm:$0xff] %v805_v0 }
   0xe   :  { %541 = vst [vmem:[%s1867_s1 + $0x600] sm:$0xff] %v805_v0 }
   0xf   :  { %542 = vst [vmem:[%s1867_s1 + $0x680] sm:$0xff] %v805_v0 }
  0x10   :  { %543 = vst [vmem:[%s1867_s1 + $0x700] sm:$0xff] %v805_v0 }
  0x11   :  { %544 = vst [vmem:[%s1867_s1 + $0x780] sm:$0xff] %v805_v0 }
  0x12   :  { %546 = vst [vmem:[%s1867_s1 + $0x10] sm:$0xff] %v866_v1 }
  0x13   :  { %547 = vst [vmem:[%s1867_s1 + $0x90] sm:$0xff] %v866_v1 }
  0x14   :  { %548 = vst [vmem:[%s1867_s1 + $0x110] sm:$0xff] %v866_v1 }
  0x15   :  { %549 = vst [vmem:[%s1867_s1 + $0x190] sm:$0xff] %v866_v1 }
  0x16   :  { %550 = vst [vmem:[%s1867_s1 + $0x210] sm:$0xff] %v866_v1 }
  0x17   :  { %551 = vst [vmem:[%s1867_s1 + $0x290] sm:$0xff] %v866_v1 }
  0x18   :  { %552 = vst [vmem:[%s1867_s1 + $0x310] sm:$0xff] %v866_v1 }
  0x19   :  { %553 = vst [vmem:[%s1867_s1 + $0x390] sm:$0xff] %v866_v1 }
  0x1a   :  { %554 = vst [vmem:[%s1867_s1 + $0x410] sm:$0xff] %v866_v1 }
  0x1b   :  { %555 = vst [vmem:[%s1867_s1 + $0x490] sm:$0xff] %v866_v1 }
  0x1c   :  { %556 = vst [vmem:[%s1867_s1 + $0x510] sm:$0xff] %v866_v1 }
  0x1d   :  { %557 = vst [vmem:[%s1867_s1 + $0x590] sm:$0xff] %v866_v1 }
  0x1e   :  { %558 = vst [vmem:[%s1867_s1 + $0x610] sm:$0xff] %v866_v1 }
  0x1f   :  { %559 = vst [vmem:[%s1867_s1 + $0x690] sm:$0xff] %v866_v1 }
  0x20   :  { %560 = vst [vmem:[%s1867_s1 + $0x710] sm:$0xff] %v866_v1 }
  0x21   :  { %561 = vst [vmem:[%s1867_s1 + $0x790] sm:$0xff] %v866_v1 }
  0x22   :  { %563 = vst [vmem:[%s1867_s1 + $0x20] sm:$0xff] %v935_v2 }
  0x23   :  { %564 = vst [vmem:[%s1867_s1 + $0xa0] sm:$0xff] %v935_v2 }
  0x24   :  { %565 = vst [vmem:[%s1867_s1 + $0x120] sm:$0xff] %v935_v2 }
  0x25   :  { %566 = vst [vmem:[%s1867_s1 + $0x1a0] sm:$0xff] %v935_v2 }
  0x26   :  { %567 = vst [vmem:[%s1867_s1 + $0x220] sm:$0xff] %v935_v2 }
  0x27   :  { %568 = vst [vmem:[%s1867_s1 + $0x2a0] sm:$0xff] %v935_v2 }
  0x28   :  { %569 = vst [vmem:[%s1867_s1 + $0x320] sm:$0xff] %v935_v2 }
  0x29   :  { %570 = vst [vmem:[%s1867_s1 + $0x3a0] sm:$0xff] %v935_v2 }
  0x2a   :  { %571 = vst [vmem:[%s1867_s1 + $0x420] sm:$0xff] %v935_v2 }
  0x2b   :  { %572 = vst [vmem:[%s1867_s1 + $0x4a0] sm:$0xff] %v935_v2 }
  0x2c   :  { %573 = vst [vmem:[%s1867_s1 + $0x520] sm:$0xff] %v935_v2 }
  0x2d   :  { %574 = vst [vmem:[%s1867_s1 + $0x5a0] sm:$0xff] %v935_v2 }
  0x2e   :  { %575 = vst [vmem:[%s1867_s1 + $0x620] sm:$0xff] %v935_v2 }
  0x2f   :  { %576 = vst [vmem:[%s1867_s1 + $0x6a0] sm:$0xff] %v935_v2 }
  0x30   :  { %577 = vst [vmem:[%s1867_s1 + $0x720] sm:$0xff] %v935_v2 }
  0x31   :  { %578 = vst [vmem:[%s1867_s1 + $0x7a0] sm:$0xff] %v935_v2 }
  0x32   :  { %580 = vst [vmem:[%s1867_s1 + $0x30] sm:$0xff] %v1004_v3 }
  0x33   :  { %581 = vst [vmem:[%s1867_s1 + $0xb0] sm:$0xff] %v1004_v3 }
  0x34   :  { %582 = vst [vmem:[%s1867_s1 + $0x130] sm:$0xff] %v1004_v3 }
  0x35   :  { %583 = vst [vmem:[%s1867_s1 + $0x1b0] sm:$0xff] %v1004_v3 }
  0x36   :  { %584 = vst [vmem:[%s1867_s1 + $0x230] sm:$0xff] %v1004_v3 }
  0x37   :  { %585 = vst [vmem:[%s1867_s1 + $0x2b0] sm:$0xff] %v1004_v3 }
  0x38   :  { %586 = vst [vmem:[%s1867_s1 + $0x330] sm:$0xff] %v1004_v3 }
  0x39   :  { %587 = vst [vmem:[%s1867_s1 + $0x3b0] sm:$0xff] %v1004_v3 }
  0x3a   :  { %588 = vst [vmem:[%s1867_s1 + $0x430] sm:$0xff] %v1004_v3 }
  0x3b   :  { %589 = vst [vmem:[%s1867_s1 + $0x4b0] sm:$0xff] %v1004_v3 }
  0x3c   :  { %590 = vst [vmem:[%s1867_s1 + $0x530] sm:$0xff] %v1004_v3 }
  0x3d   :  { %591 = vst [vmem:[%s1867_s1 + $0x5b0] sm:$0xff] %v1004_v3 }
  0x3e   :  { %592 = vst [vmem:[%s1867_s1 + $0x630] sm:$0xff] %v1004_v3 }
  0x3f   :  { %593 = vst [vmem:[%s1867_s1 + $0x6b0] sm:$0xff] %v1004_v3 }
  0x40   :  { %594 = vst [vmem:[%s1867_s1 + $0x730] sm:$0xff] %v1004_v3 }
  0x41   :  { %595 = vst [vmem:[%s1867_s1 + $0x7b0] sm:$0xff] %v1004_v3 }
  0x42   :  { %597 = vst [vmem:[%s1867_s1 + $0x40] sm:$0xff] %v1073_v4 }
  0x43   :  { %598 = vst [vmem:[%s1867_s1 + $0xc0] sm:$0xff] %v1073_v4 }
  0x44   :  { %599 = vst [vmem:[%s1867_s1 + $0x140] sm:$0xff] %v1073_v4 }
  0x45   :  { %600 = vst [vmem:[%s1867_s1 + $0x1c0] sm:$0xff] %v1073_v4 }
  0x46   :  { %601 = vst [vmem:[%s1867_s1 + $0x240] sm:$0xff] %v1073_v4 }
  0x47   :  { %602 = vst [vmem:[%s1867_s1 + $0x2c0] sm:$0xff] %v1073_v4 }
  0x48   :  { %603 = vst [vmem:[%s1867_s1 + $0x340] sm:$0xff] %v1073_v4 }
  0x49   :  { %604 = vst [vmem:[%s1867_s1 + $0x3c0] sm:$0xff] %v1073_v4 }
  0x4a   :  { %605 = vst [vmem:[%s1867_s1 + $0x440] sm:$0xff] %v1073_v4 }
  0x4b   :  { %606 = vst [vmem:[%s1867_s1 + $0x4c0] sm:$0xff] %v1073_v4 }
  0x4c   :  { %607 = vst [vmem:[%s1867_s1 + $0x540] sm:$0xff] %v1073_v4 }
  0x4d   :  { %608 = vst [vmem:[%s1867_s1 + $0x5c0] sm:$0xff] %v1073_v4 }
  0x4e   :  { %609 = vst [vmem:[%s1867_s1 + $0x640] sm:$0xff] %v1073_v4 }
  0x4f   :  { %610 = vst [vmem:[%s1867_s1 + $0x6c0] sm:$0xff] %v1073_v4 }
  0x50   :  { %611 = vst [vmem:[%s1867_s1 + $0x740] sm:$0xff] %v1073_v4 }
  0x51   :  { %612 = vst [vmem:[%s1867_s1 + $0x7c0] sm:$0xff] %v1073_v4 }
  0x52   :  { %614 = vst [vmem:[%s1867_s1 + $0x50] sm:$0xff] %v1142_v5 }
  0x53   :  { %615 = vst [vmem:[%s1867_s1 + $0xd0] sm:$0xff] %v1142_v5 }
  0x54   :  { %616 = vst [vmem:[%s1867_s1 + $0x150] sm:$0xff] %v1142_v5 }
  0x55   :  { %617 = vst [vmem:[%s1867_s1 + $0x1d0] sm:$0xff] %v1142_v5 }
  0x56   :  { %618 = vst [vmem:[%s1867_s1 + $0x250] sm:$0xff] %v1142_v5 }
  0x57   :  { %619 = vst [vmem:[%s1867_s1 + $0x2d0] sm:$0xff] %v1142_v5 }
  0x58   :  { %620 = vst [vmem:[%s1867_s1 + $0x350] sm:$0xff] %v1142_v5 }
  0x59   :  { %621 = vst [vmem:[%s1867_s1 + $0x3d0] sm:$0xff] %v1142_v5 }
  0x5a   :  { %622 = vst [vmem:[%s1867_s1 + $0x450] sm:$0xff] %v1142_v5 }
  0x5b   :  { %623 = vst [vmem:[%s1867_s1 + $0x4d0] sm:$0xff] %v1142_v5 }
  0x5c   :  { %624 = vst [vmem:[%s1867_s1 + $0x550] sm:$0xff] %v1142_v5 }
  0x5d   :  { %625 = vst [vmem:[%s1867_s1 + $0x5d0] sm:$0xff] %v1142_v5 }
  0x5e   :  { %626 = vst [vmem:[%s1867_s1 + $0x650] sm:$0xff] %v1142_v5 }
  0x5f   :  { %627 = vst [vmem:[%s1867_s1 + $0x6d0] sm:$0xff] %v1142_v5 }
  0x60   :  { %628 = vst [vmem:[%s1867_s1 + $0x750] sm:$0xff] %v1142_v5 }
  0x61   :  { %629 = vst [vmem:[%s1867_s1 + $0x7d0] sm:$0xff] %v1142_v5 }
  0x62   :  { %631 = vst [vmem:[%s1867_s1 + $0x60] sm:$0xff] %v1211_v6 }
  0x63   :  { %632 = vst [vmem:[%s1867_s1 + $0xe0] sm:$0xff] %v1211_v6 }
  0x64   :  { %633 = vst [vmem:[%s1867_s1 + $0x160] sm:$0xff] %v1211_v6 }
  0x65   :  { %634 = vst [vmem:[%s1867_s1 + $0x1e0] sm:$0xff] %v1211_v6 }
  0x66   :  { %635 = vst [vmem:[%s1867_s1 + $0x260] sm:$0xff] %v1211_v6 }
  0x67   :  { %636 = vst [vmem:[%s1867_s1 + $0x2e0] sm:$0xff] %v1211_v6 }
  0x68   :  { %637 = vst [vmem:[%s1867_s1 + $0x360] sm:$0xff] %v1211_v6 }
  0x69   :  { %638 = vst [vmem:[%s1867_s1 + $0x3e0] sm:$0xff] %v1211_v6 }
  0x6a   :  { %639 = vst [vmem:[%s1867_s1 + $0x460] sm:$0xff] %v1211_v6 }
  0x6b   :  { %640 = vst [vmem:[%s1867_s1 + $0x4e0] sm:$0xff] %v1211_v6 }
  0x6c   :  { %641 = vst [vmem:[%s1867_s1 + $0x560] sm:$0xff] %v1211_v6 }
  0x6d   :  { %642 = vst [vmem:[%s1867_s1 + $0x5e0] sm:$0xff] %v1211_v6 }
  0x6e   :  { %643 = vst [vmem:[%s1867_s1 + $0x660] sm:$0xff] %v1211_v6 }
  0x6f   :  { %644 = vst [vmem:[%s1867_s1 + $0x6e0] sm:$0xff] %v1211_v6 }
  0x70   :  { %645 = vst [vmem:[%s1867_s1 + $0x760] sm:$0xff] %v1211_v6 }
  0x71   :  { %646 = vst [vmem:[%s1867_s1 + $0x7e0] sm:$0xff] %v1211_v6 }
  0x72   :  { %648 = vst [vmem:[%s1867_s1 + $0x70] sm:$0xff] %v1280_v7 }
  0x73   :  { %649 = vst [vmem:[%s1867_s1 + $0xf0] sm:$0xff] %v1280_v7 }
  0x74   :  { %650 = vst [vmem:[%s1867_s1 + $0x170] sm:$0xff] %v1280_v7 }
  0x75   :  { %651 = vst [vmem:[%s1867_s1 + $0x1f0] sm:$0xff] %v1280_v7 }
  0x76   :  { %652 = vst [vmem:[%s1867_s1 + $0x270] sm:$0xff] %v1280_v7 }
  0x77   :  { %653 = vst [vmem:[%s1867_s1 + $0x2f0] sm:$0xff] %v1280_v7 }
  0x78   :  { %654 = vst [vmem:[%s1867_s1 + $0x370] sm:$0xff] %v1280_v7 }
  0x79   :  { %655 = vst [vmem:[%s1867_s1 + $0x3f0] sm:$0xff] %v1280_v7 }
  0x7a   :  { %656 = vst [vmem:[%s1867_s1 + $0x470] sm:$0xff] %v1280_v7 }
  0x7b   :  { %657 = vst [vmem:[%s1867_s1 + $0x4f0] sm:$0xff] %v1280_v7 }
  0x7c   :  { %658 = vst [vmem:[%s1867_s1 + $0x570] sm:$0xff] %v1280_v7 }
  0x7d   :  { %659 = vst [vmem:[%s1867_s1 + $0x5f0] sm:$0xff] %v1280_v7 }
  0x7e   :  { %660 = vst [vmem:[%s1867_s1 + $0x670] sm:$0xff] %v1280_v7 }
  0x7f   :  { %661 = vst [vmem:[%s1867_s1 + $0x6f0] sm:$0xff] %v1280_v7 }
  0x80   :  { %662 = vst [vmem:[%s1867_s1 + $0x770] sm:$0xff] %v1280_v7 }
  0x81   :  { %663 = vst [vmem:[%s1867_s1 + $0x7f0] sm:$0xff] %v1280_v7 }
  0x82   :  { %664 = vst [vmem:[%s1867_s1 + $0x8] sm:$0xff] %v805_v0 }
  0x83   :  { %665 = vst [vmem:[%s1867_s1 + $0x88] sm:$0xff] %v805_v0 }
  0x84   :  { %666 = vst [vmem:[%s1867_s1 + $0x108] sm:$0xff] %v805_v0 }
  0x85   :  { %667 = vst [vmem:[%s1867_s1 + $0x188] sm:$0xff] %v805_v0 }
  0x86   :  { %668 = vst [vmem:[%s1867_s1 + $0x208] sm:$0xff] %v805_v0 }
  0x87   :  { %669 = vst [vmem:[%s1867_s1 + $0x288] sm:$0xff] %v805_v0 }
  0x88   :  { %670 = vst [vmem:[%s1867_s1 + $0x308] sm:$0xff] %v805_v0 }
  0x89   :  { %671 = vst [vmem:[%s1867_s1 + $0x388] sm:$0xff] %v805_v0 }
  0x8a   :  { %672 = vst [vmem:[%s1867_s1 + $0x408] sm:$0xff] %v805_v0 }
  0x8b   :  { %673 = vst [vmem:[%s1867_s1 + $0x488] sm:$0xff] %v805_v0 }
  0x8c   :  { %674 = vst [vmem:[%s1867_s1 + $0x508] sm:$0xff] %v805_v0 }
  0x8d   :  { %675 = vst [vmem:[%s1867_s1 + $0x588] sm:$0xff] %v805_v0 }
  0x8e   :  { %676 = vst [vmem:[%s1867_s1 + $0x608] sm:$0xff] %v805_v0 }
  0x8f   :  { %677 = vst [vmem:[%s1867_s1 + $0x688] sm:$0xff] %v805_v0 }
  0x90   :  { %678 = vst [vmem:[%s1867_s1 + $0x708] sm:$0xff] %v805_v0 }
  0x91   :  { %679 = vst [vmem:[%s1867_s1 + $0x788] sm:$0xff] %v805_v0 }
  0x92   :  { %680 = vst [vmem:[%s1867_s1 + $0x18] sm:$0xff] %v866_v1 }
  0x93   :  { %681 = vst [vmem:[%s1867_s1 + $0x98] sm:$0xff] %v866_v1 }
  0x94   :  { %682 = vst [vmem:[%s1867_s1 + $0x118] sm:$0xff] %v866_v1 }
  0x95   :  { %683 = vst [vmem:[%s1867_s1 + $0x198] sm:$0xff] %v866_v1 }
  0x96   :  { %684 = vst [vmem:[%s1867_s1 + $0x218] sm:$0xff] %v866_v1 }
  0x97   :  { %685 = vst [vmem:[%s1867_s1 + $0x298] sm:$0xff] %v866_v1 }
  0x98   :  { %686 = vst [vmem:[%s1867_s1 + $0x318] sm:$0xff] %v866_v1 }
  0x99   :  { %687 = vst [vmem:[%s1867_s1 + $0x398] sm:$0xff] %v866_v1 }
  0x9a   :  { %688 = vst [vmem:[%s1867_s1 + $0x418] sm:$0xff] %v866_v1 }
  0x9b   :  { %689 = vst [vmem:[%s1867_s1 + $0x498] sm:$0xff] %v866_v1 }
  0x9c   :  { %690 = vst [vmem:[%s1867_s1 + $0x518] sm:$0xff] %v866_v1 }
  0x9d   :  { %691 = vst [vmem:[%s1867_s1 + $0x598] sm:$0xff] %v866_v1 }
  0x9e   :  { %692 = vst [vmem:[%s1867_s1 + $0x618] sm:$0xff] %v866_v1 }
  0x9f   :  { %693 = vst [vmem:[%s1867_s1 + $0x698] sm:$0xff] %v866_v1 }
  0xa0   :  { %694 = vst [vmem:[%s1867_s1 + $0x718] sm:$0xff] %v866_v1 }
  0xa1   :  { %695 = vst [vmem:[%s1867_s1 + $0x798] sm:$0xff] %v866_v1 }
  0xa2   :  { %696 = vst [vmem:[%s1867_s1 + $0x28] sm:$0xff] %v935_v2 }
  0xa3   :  { %697 = vst [vmem:[%s1867_s1 + $0xa8] sm:$0xff] %v935_v2 }
  0xa4   :  { %698 = vst [vmem:[%s1867_s1 + $0x128] sm:$0xff] %v935_v2 }
  0xa5   :  { %699 = vst [vmem:[%s1867_s1 + $0x1a8] sm:$0xff] %v935_v2 }
  0xa6   :  { %700 = vst [vmem:[%s1867_s1 + $0x228] sm:$0xff] %v935_v2 }
  0xa7   :  { %701 = vst [vmem:[%s1867_s1 + $0x2a8] sm:$0xff] %v935_v2 }
  0xa8   :  { %702 = vst [vmem:[%s1867_s1 + $0x328] sm:$0xff] %v935_v2 }
  0xa9   :  { %703 = vst [vmem:[%s1867_s1 + $0x3a8] sm:$0xff] %v935_v2 }
  0xaa   :  { %704 = vst [vmem:[%s1867_s1 + $0x428] sm:$0xff] %v935_v2 }
  0xab   :  { %705 = vst [vmem:[%s1867_s1 + $0x4a8] sm:$0xff] %v935_v2 }
  0xac   :  { %706 = vst [vmem:[%s1867_s1 + $0x528] sm:$0xff] %v935_v2 }
  0xad   :  { %707 = vst [vmem:[%s1867_s1 + $0x5a8] sm:$0xff] %v935_v2 }
  0xae   :  { %708 = vst [vmem:[%s1867_s1 + $0x628] sm:$0xff] %v935_v2 }
  0xaf   :  { %709 = vst [vmem:[%s1867_s1 + $0x6a8] sm:$0xff] %v935_v2 }
  0xb0   :  { %710 = vst [vmem:[%s1867_s1 + $0x728] sm:$0xff] %v935_v2 }
  0xb1   :  { %711 = vst [vmem:[%s1867_s1 + $0x7a8] sm:$0xff] %v935_v2 }
  0xb2   :  { %712 = vst [vmem:[%s1867_s1 + $0x38] sm:$0xff] %v1004_v3 }
  0xb3   :  { %713 = vst [vmem:[%s1867_s1 + $0xb8] sm:$0xff] %v1004_v3 }
  0xb4   :  { %714 = vst [vmem:[%s1867_s1 + $0x138] sm:$0xff] %v1004_v3 }
  0xb5   :  { %715 = vst [vmem:[%s1867_s1 + $0x1b8] sm:$0xff] %v1004_v3 }
  0xb6   :  { %716 = vst [vmem:[%s1867_s1 + $0x238] sm:$0xff] %v1004_v3 }
  0xb7   :  { %717 = vst [vmem:[%s1867_s1 + $0x2b8] sm:$0xff] %v1004_v3 }
  0xb8   :  { %718 = vst [vmem:[%s1867_s1 + $0x338] sm:$0xff] %v1004_v3 }
  0xb9   :  { %719 = vst [vmem:[%s1867_s1 + $0x3b8] sm:$0xff] %v1004_v3 }
  0xba   :  { %720 = vst [vmem:[%s1867_s1 + $0x438] sm:$0xff] %v1004_v3 }
  0xbb   :  { %721 = vst [vmem:[%s1867_s1 + $0x4b8] sm:$0xff] %v1004_v3 }
  0xbc   :  { %722 = vst [vmem:[%s1867_s1 + $0x538] sm:$0xff] %v1004_v3 }
  0xbd   :  { %723 = vst [vmem:[%s1867_s1 + $0x5b8] sm:$0xff] %v1004_v3 }
  0xbe   :  { %724 = vst [vmem:[%s1867_s1 + $0x638] sm:$0xff] %v1004_v3 }
  0xbf   :  { %725 = vst [vmem:[%s1867_s1 + $0x6b8] sm:$0xff] %v1004_v3 }
  0xc0   :  { %726 = vst [vmem:[%s1867_s1 + $0x738] sm:$0xff] %v1004_v3 }
  0xc1   :  { %727 = vst [vmem:[%s1867_s1 + $0x7b8] sm:$0xff] %v1004_v3 }
  0xc2   :  { %728 = vst [vmem:[%s1867_s1 + $0x48] sm:$0xff] %v1073_v4 }
  0xc3   :  { %729 = vst [vmem:[%s1867_s1 + $0xc8] sm:$0xff] %v1073_v4 }
  0xc4   :  { %730 = vst [vmem:[%s1867_s1 + $0x148] sm:$0xff] %v1073_v4 }
  0xc5   :  { %731 = vst [vmem:[%s1867_s1 + $0x1c8] sm:$0xff] %v1073_v4 }
  0xc6   :  { %732 = vst [vmem:[%s1867_s1 + $0x248] sm:$0xff] %v1073_v4 }
  0xc7   :  { %733 = vst [vmem:[%s1867_s1 + $0x2c8] sm:$0xff] %v1073_v4 }
  0xc8   :  { %734 = vst [vmem:[%s1867_s1 + $0x348] sm:$0xff] %v1073_v4 }
  0xc9   :  { %735 = vst [vmem:[%s1867_s1 + $0x3c8] sm:$0xff] %v1073_v4 }
  0xca   :  { %736 = vst [vmem:[%s1867_s1 + $0x448] sm:$0xff] %v1073_v4 }
  0xcb   :  { %737 = vst [vmem:[%s1867_s1 + $0x4c8] sm:$0xff] %v1073_v4 }
  0xcc   :  { %738 = vst [vmem:[%s1867_s1 + $0x548] sm:$0xff] %v1073_v4 }
  0xcd   :  { %739 = vst [vmem:[%s1867_s1 + $0x5c8] sm:$0xff] %v1073_v4 }
  0xce   :  { %740 = vst [vmem:[%s1867_s1 + $0x648] sm:$0xff] %v1073_v4 }
  0xcf   :  { %741 = vst [vmem:[%s1867_s1 + $0x6c8] sm:$0xff] %v1073_v4 }
  0xd0   :  { %742 = vst [vmem:[%s1867_s1 + $0x748] sm:$0xff] %v1073_v4 }
  0xd1   :  { %743 = vst [vmem:[%s1867_s1 + $0x7c8] sm:$0xff] %v1073_v4 }
  0xd2   :  { %744 = vst [vmem:[%s1867_s1 + $0x58] sm:$0xff] %v1142_v5 }
  0xd3   :  { %745 = vst [vmem:[%s1867_s1 + $0xd8] sm:$0xff] %v1142_v5 }
  0xd4   :  { %746 = vst [vmem:[%s1867_s1 + $0x158] sm:$0xff] %v1142_v5 }
  0xd5   :  { %747 = vst [vmem:[%s1867_s1 + $0x1d8] sm:$0xff] %v1142_v5 }
  0xd6   :  { %748 = vst [vmem:[%s1867_s1 + $0x258] sm:$0xff] %v1142_v5 }
  0xd7   :  { %749 = vst [vmem:[%s1867_s1 + $0x2d8] sm:$0xff] %v1142_v5 }
  0xd8   :  { %750 = vst [vmem:[%s1867_s1 + $0x358] sm:$0xff] %v1142_v5 }
  0xd9   :  { %751 = vst [vmem:[%s1867_s1 + $0x3d8] sm:$0xff] %v1142_v5 }
  0xda   :  { %752 = vst [vmem:[%s1867_s1 + $0x458] sm:$0xff] %v1142_v5 }
  0xdb   :  { %753 = vst [vmem:[%s1867_s1 + $0x4d8] sm:$0xff] %v1142_v5 }
  0xdc   :  { %754 = vst [vmem:[%s1867_s1 + $0x558] sm:$0xff] %v1142_v5 }
  0xdd   :  { %755 = vst [vmem:[%s1867_s1 + $0x5d8] sm:$0xff] %v1142_v5 }
  0xde   :  { %756 = vst [vmem:[%s1867_s1 + $0x658] sm:$0xff] %v1142_v5 }
  0xdf   :  { %757 = vst [vmem:[%s1867_s1 + $0x6d8] sm:$0xff] %v1142_v5 }
  0xe0   :  { %758 = vst [vmem:[%s1867_s1 + $0x758] sm:$0xff] %v1142_v5 }
  0xe1   :  { %759 = vst [vmem:[%s1867_s1 + $0x7d8] sm:$0xff] %v1142_v5 }
  0xe2   :  { %760 = vst [vmem:[%s1867_s1 + $0x68] sm:$0xff] %v1211_v6 }
  0xe3   :  { %761 = vst [vmem:[%s1867_s1 + $0xe8] sm:$0xff] %v1211_v6 }
  0xe4   :  { %762 = vst [vmem:[%s1867_s1 + $0x168] sm:$0xff] %v1211_v6 }
  0xe5   :  { %763 = vst [vmem:[%s1867_s1 + $0x1e8] sm:$0xff] %v1211_v6 }
  0xe6   :  { %764 = vst [vmem:[%s1867_s1 + $0x268] sm:$0xff] %v1211_v6 }
  0xe7   :  { %765 = vst [vmem:[%s1867_s1 + $0x2e8] sm:$0xff] %v1211_v6 }
  0xe8   :  { %766 = vst [vmem:[%s1867_s1 + $0x368] sm:$0xff] %v1211_v6 }
  0xe9   :  { %767 = vst [vmem:[%s1867_s1 + $0x3e8] sm:$0xff] %v1211_v6 }
  0xea   :  { %768 = vst [vmem:[%s1867_s1 + $0x468] sm:$0xff] %v1211_v6 }
  0xeb   :  { %769 = vst [vmem:[%s1867_s1 + $0x4e8] sm:$0xff] %v1211_v6 }
  0xec   :  { %770 = vst [vmem:[%s1867_s1 + $0x568] sm:$0xff] %v1211_v6 }
  0xed   :  { %771 = vst [vmem:[%s1867_s1 + $0x5e8] sm:$0xff] %v1211_v6 }
  0xee   :  { %772 = vst [vmem:[%s1867_s1 + $0x668] sm:$0xff] %v1211_v6 }
  0xef   :  { %773 = vst [vmem:[%s1867_s1 + $0x6e8] sm:$0xff] %v1211_v6 }
  0xf0   :  { %774 = vst [vmem:[%s1867_s1 + $0x768] sm:$0xff] %v1211_v6 }
  0xf1   :  { %775 = vst [vmem:[%s1867_s1 + $0x7e8] sm:$0xff] %v1211_v6 }
  0xf2   :  { %776 = vst [vmem:[%s1867_s1 + $0x78] sm:$0xff] %v1280_v7 }
  0xf3   :  { %777 = vst [vmem:[%s1867_s1 + $0xf8] sm:$0xff] %v1280_v7 }
  0xf4   :  { %778 = vst [vmem:[%s1867_s1 + $0x178] sm:$0xff] %v1280_v7 }
  0xf5   :  { %779 = vst [vmem:[%s1867_s1 + $0x1f8] sm:$0xff] %v1280_v7 }
  0xf6   :  { %780 = vst [vmem:[%s1867_s1 + $0x278] sm:$0xff] %v1280_v7 }
  0xf7   :  { %781 = vst [vmem:[%s1867_s1 + $0x2f8] sm:$0xff] %v1280_v7 }
  0xf8   :  { %782 = vst [vmem:[%s1867_s1 + $0x378] sm:$0xff] %v1280_v7 }
  0xf9   :  { %783 = vst [vmem:[%s1867_s1 + $0x3f8] sm:$0xff] %v1280_v7 }
  0xfa   :  { %784 = vst [vmem:[%s1867_s1 + $0x478] sm:$0xff] %v1280_v7 }
  0xfb   :  { %785 = vst [vmem:[%s1867_s1 + $0x4f8] sm:$0xff] %v1280_v7 }
  0xfc   :  { %786 = vst [vmem:[%s1867_s1 + $0x578] sm:$0xff] %v1280_v7 }
  0xfd   :  { %787 = vst [vmem:[%s1867_s1 + $0x5f8] sm:$0xff] %v1280_v7 }
  0xfe   :  { %788 = vst [vmem:[%s1867_s1 + $0x678] sm:$0xff] %v1280_v7 }
  0xff   :  { %789 = vst [vmem:[%s1867_s1 + $0x6f8] sm:$0xff] %v1280_v7 }
 0x100   :  { %790 = vst [vmem:[%s1867_s1 + $0x778] sm:$0xff] %v1280_v7 }
 0x101   :  { %791 = vst [vmem:[%s1867_s1 + $0x7f8] sm:$0xff] %v1280_v7 }

// kernel: tile.29
= control target key start
LH: loop header
LB: loop body
LE: loop exit
PB: predicated region body
PF: predicated region fallthrough
CT: control target
= control target key end

     0   :  { %vm6_vm0 = vcmask 1043458   ;;  %s379_s6 = smov 3  ;;  %vm10_vm1 = vcmask 1045508   ;;  %vm14_vm2 = vcmask 1047558   ;;  %s382_s9 = smov 12  ;;  %vm16_vm3 = vcmask 64512   ;;  %s12377_s0 = inlined_call_operand.vmem [shape: f32[16,8,16,8], index: 0, kind: input, shape index: {}]   ;;  %s12378_s1 = inlined_call_operand.vmem [shape: f32[128,128], index: 1, kind: output, shape index: {}]  }
   0x1   :  { %v5922_v0 = vld [vmem:[%s12377_s0 + $0x40f] ss:$16 sm:%s379_s6]   ;;  %s387_s10 = smov 48  ;;  %s392_s15 = smov 192  ;;  %vm353_vm4 = vcmask 1048512   ;;  %vm720_vm5 = vcmask 982912  }
   0x2   :  { %v5923_v1 = vld [vmem:[%s12377_s0 + $0x40f] ss:$16 sm:%s382_s9]   ;;  %s334_s16 = smov 3  ;;  %s337_s21 = smov 12  ;;  %vm1087_vm6 = vcmask 917312   ;;  %vm1454_vm7 = vcmask 851712  }
   0x3   :  { %v5924_v2 = vld [vmem:[%s12377_s0 + $0x40f] ss:$16 sm:%s387_s10]   ;;  %v385_v3 = vsel %vm6_vm0, %v5923_v1, %v5922_v0  ;;  %s342_s22 = smov 48  ;;  %s347_s27 = smov 192  ;;  %vm1821_vm8 = vcmask 786112   ;;  %vm2188_vm9 = vcmask 720512  }
   0x4   :  { %v5925_v4 = vld [vmem:[%s12377_s0 + $0x40f] ss:$16 sm:%s392_s15]   ;;  %v390_v6 = vsel %vm10_vm1, %v5924_v2, %v385_v3  ;;  %s402_s28 = smov 3  ;;  %s405_s4 = smov 12  ;;  %vm2555_vm10 = vcmask 654912   ;;  %vm2922_vm11 = vcmask 589312  }
   0x5   :  { %v5913_v5 = vld [vmem:[%s12377_s0 + $0xf] ss:$16 sm:%s334_s16]   ;;  %v395_v9 = vsel %vm14_vm2, %v5925_v4, %v390_v6  ;;  %s410_s5 = smov 48  ;;  %s7113_s6 = smov 120   ;;  %vm3289_vm12 = vcmask 523712   ;;  %vm3656_vm13 = vcmask 458112  }
   0x6   :  { %v5914_v7 = vld [vmem:[%s12377_s0 + $0xf] ss:$16 sm:%s337_s21]   ;;  %396 = vrot.lane.b32.xlu1 %v395_v9, %s7113_s6  ;;  %s415_s9 = smov 192  ;;  %s356_s10 = smov 3  ;;  %vm4023_vm14 = vcmask 392512   ;;  %vm4390_vm15 = vcmask 326912  }
   0x7   :  { %v5915_v8 = vld [vmem:[%s12377_s0 + $0xf] ss:$16 sm:%s342_s22]   ;;  %v340_v10 = vsel %vm6_vm0, %v5914_v7, %v5913_v5  ;;  %s359_s15 = smov 12  ;;  %s364_s16 = smov 48 }
   0x8   :  { %v5916_v11 = vld [vmem:[%s12377_s0 + $0xf] ss:$16 sm:%s347_s27]   ;;  %v345_v13 = vsel %vm10_vm1, %v5915_v8, %v340_v10  ;;  %s369_s19 = smov 192  ;;  %s494_s20 = smov 3 }
   0x9   :  { %v5927_v12 = vld [vmem:[%s12377_s0 + $0x60f] ss:$16 sm:%s402_s28]   ;;  %v350_v15 = vsel %vm14_vm2, %v5916_v11, %v345_v13  ;;  %s497_s25 = smov 12  ;;  %s502_s26 = smov 48 }
   0xa   :  { %v5928_v14 = vld [vmem:[%s12377_s0 + $0x60f] ss:$16 sm:%s405_s4]   ;;  %351 = vrot.lane.b32.xlu0 %v350_v15, %s7113_s6  ;;  %s507_s2 = smov 192  ;;  %s471_s3 = smov 3 }
   0xb   :  { %v408_v16 = vsel %vm6_vm0, %v5928_v14, %v5927_v12  ;;  %v5929_v17 = vld [vmem:[%s12377_s0 + $0x60f] ss:$16 sm:%s410_s5]   ;;  %s474_s7 = smov 12  ;;  %s479_s8 = smov 48 }
   0xc   :  { %v5930_v18 = vld [vmem:[%s12377_s0 + $0x60f] ss:$16 sm:%s415_s9]   ;;  %v413_v19 = vsel %vm10_vm1, %v5929_v17, %v408_v16  ;;  %s425_s11 = smov 3  ;;  %s433_s17 = smov 48 }
   0xd   :  { %v5917_v20 = vld [vmem:[%s12377_s0 + $0x20f] ss:$16 sm:%s356_s10]   ;;  %v418_v26 = vsel %vm14_vm2, %v5930_v18, %v413_v19  ;;  %s484_s22 = smov 192  ;;  %s438_s23 = smov 192 }
   0xe   :  { %v5918_v21 = vld [vmem:[%s12377_s0 + $0x20f] ss:$16 sm:%s359_s15]   ;;  %419 = vrot.lane.b32.xlu1 %v418_v26, %s7113_s6  ;;  %s563_s28 = smov 3  ;;  %s566_s29 = smov 12 }
   0xf   :  { %v5919_v22 = vld [vmem:[%s12377_s0 + $0x20f] ss:$16 sm:%s364_s16]   ;;  %v362_v23 = vsel %vm6_vm0, %v5918_v21, %v5917_v20  ;;  %s428_s16 = smov 12  ;;  %s543_s9 = smov 12 }
  0x10   :  { %v5920_v24 = vld [vmem:[%s12377_s0 + $0x20f] ss:$16 sm:%s369_s19]   ;;  %v367_v27 = vsel %vm10_vm1, %v5919_v22, %v362_v23  ;;  %s571_s14 = smov 48  ;;  %s548_s15 = smov 48 }
  0x11   :  { %v5947_v25 = vld [vmem:[%s12377_s0 + $0x68f] ss:$16 sm:%s494_s20]   ;;  %v372_v30 = vsel %vm14_vm2, %v5920_v24, %v367_v27  ;;  %s632_s10 = smov 3  ;;  %s612_s18 = smov 12 }
  0x12   :  { %v5948_v28 = vld [vmem:[%s12377_s0 + $0x68f] ss:$16 sm:%s497_s25]   ;;  %373 = vrot.lane.b32.xlu0 %v372_v30, %s7113_s6  ;;  %s517_s24 = smov 3  ;;  %s520_s27 = smov 12 }
  0x13   :  { %v5942_v29 = vld [vmem:[%s12377_s0 + $0x48f] ss:$16 sm:%s471_s3]   ;;  %v500_v31 = vsel %vm6_vm0, %v5948_v28, %v5947_v25  ;;  %s525_s3 = smov 48  ;;  %s530_s4 = smov 192 }
  0x14   :  { %v5949_v32 = vld [vmem:[%s12377_s0 + $0x68f] ss:$16 sm:%s502_s26]   ;;  %s645_s5 = smov 192  ;;  %s704_s19 = smov 12 }
  0x15   :  { %v5943_v33 = vld [vmem:[%s12377_s0 + $0x48f] ss:$16 sm:%s474_s7]   ;;  %v505_v39 = vsel %vm10_vm1, %v5949_v32, %v500_v31  ;;  %s678_s25 = smov 3  ;;  %s681_s26 = smov 12  ;;  %v5993_v26 = vld [vmem:[%s12377_s0 + $0xe] ss:$16 sm:%s704_s19]  }
  0x16   :  { %v5950_v34 = vld [vmem:[%s12377_s0 + $0x68f] ss:$16 sm:%s507_s2]   ;;  %v477_v36 = vsel %vm6_vm0, %v5943_v33, %v5942_v29  ;;  %s553_s2 = smov 192  ;;  %s594_s7 = smov 48 }
  0x17   :  { %v5944_v35 = vld [vmem:[%s12377_s0 + $0x48f] ss:$16 sm:%s479_s8]   ;;  %s540_s8 = smov 3  ;;  %v510_v49 = vsel %vm14_vm2, %v5950_v34, %v505_v39  ;;  %s686_s12 = smov 48 }
  0x18   :  { %v5932_v37 = vld [vmem:[%s12377_s0 + $0x8f] ss:$16 sm:%s425_s11]   ;;  %v482_v45 = vsel %vm10_vm1, %v5944_v35, %v477_v36  ;;  %511 = vrot.lane.b32.xlu1 %v510_v49, %s7113_s6  ;;  %s635_s11 = smov 12  ;;  %s599_s13 = smov 192 }
  0x19   :  { %v5933_v38 = vld [vmem:[%s12377_s0 + $0x8f] ss:$16 sm:%s428_s16]   ;;  %s576_s16 = smov 192  ;;  %s691_s19 = smov 192 }
  0x1a   :  { %v431_v40 = vsel %vm6_vm0, %v5933_v38, %v5932_v37  ;;  %v5934_v41 = vld [vmem:[%s12377_s0 + $0x8f] ss:$16 sm:%s433_s17]   ;;  %s448_s17 = smov 3  ;;  %s777_s30 = smov 48 }
  0x1b   :  { %v5945_v42 = vld [vmem:[%s12377_s0 + $0x48f] ss:$16 sm:%s484_s22]   ;;  %v436_v43 = vsel %vm10_vm1, %v5934_v41, %v431_v40  ;;  %s451_s22 = smov 12  ;;  %v6008_v49 = vld [vmem:[%s12377_s0 + $0x60e] ss:$16 sm:%s777_s30]   ;;  %s754_s21 = smov 48 }
  0x1c   :  { %v5935_v44 = vld [vmem:[%s12377_s0 + $0x8f] ss:$16 sm:%s438_s23]   ;;  %s456_s23 = smov 48  ;;  %v487_v52 = vsel %vm14_vm2, %v5945_v42, %v482_v45  ;;  %s759_s30 = smov 192 }
  0x1d   :  { %v441_v46 = vsel %vm14_vm2, %v5935_v44, %v436_v43  ;;  %v5962_v47 = vld [vmem:[%s12377_s0 + $0x50f] ss:$16 sm:%s563_s28]   ;;  %s461_s28 = smov 192  ;;  %488 = vrot.lane.b32.xlu0 %v487_v52, %s7113_s6  ;;  %s887_s20 = smov 12 }
  0x1e   :  { %v5963_v48 = vld [vmem:[%s12377_s0 + $0x50f] ss:$16 sm:%s566_s29]   ;;  %442 = vrot.lane.b32.xlu2 %v441_v46, %s7113_s6  ;;  %s7114_s29 = smov 112  }
  0x1f   :  { %v5957_v50 = vld [vmem:[%s12377_s0 + $0x30f] ss:$16 sm:%s540_s8]   ;;  %v569_v53 = vsel %vm6_vm0, %v5963_v48, %v5962_v47  ;;  %s841_s8 = smov 12 }
  0x20   :  { %v5958_v51 = vld [vmem:[%s12377_s0 + $0x30f] ss:$16 sm:%s543_s9]   ;;  %s815_s9 = smov 3 }
  0x21   :  { %v5964_v54 = vld [vmem:[%s12377_s0 + $0x50f] ss:$16 sm:%s571_s14]   ;;  %v546_v58 = vsel %vm6_vm0, %v5958_v51, %v5957_v50  ;;  %s640_s14 = smov 48 }
  0x22   :  { %v5959_v55 = vld [vmem:[%s12377_s0 + $0x30f] ss:$16 sm:%s548_s15]   ;;  %v574_v61 = vsel %vm10_vm1, %v5964_v54, %v569_v53  ;;  %s874_s15 = smov 192 }
  0x23   :  { %v5965_v56 = vld [vmem:[%s12377_s0 + $0x50f] ss:$16 sm:%s576_s16]   ;;  %v551_v2 = vsel %vm10_vm1, %v5959_v55, %v546_v58  ;;  %s1022_s16 = smov 3 }
  0x24   :  { %v5937_v57 = vld [vmem:[%s12377_s0 + $0x28f] ss:$16 sm:%s448_s17]   ;;  %s609_s17 = smov 3  ;;  %v579_v6 = vsel %vm14_vm2, %v5965_v56, %v574_v61 }
  0x25   :  { %v5938_v59 = vld [vmem:[%s12377_s0 + $0x28f] ss:$16 sm:%s451_s22]   ;;  %580 = vrot.lane.b32.xlu1 %v579_v6, %s7113_s6  ;;  %s709_s22 = smov 48 }
  0x26   :  { %v5939_v60 = vld [vmem:[%s12377_s0 + $0x28f] ss:$16 sm:%s456_s23]   ;;  %v454_v62 = vsel %vm6_vm0, %v5938_v59, %v5937_v57  ;;  %s617_s23 = smov 48  ;;  %v5994_v28 = vld [vmem:[%s12377_s0 + $0xe] ss:$16 sm:%s709_s22]   ;;  %s979_s22 = smov 12 }
  0x27   :  { %v5940_v63 = vld [vmem:[%s12377_s0 + $0x28f] ss:$16 sm:%s461_s28]   ;;  %v459_v1 = vsel %vm10_vm1, %v5939_v60, %v454_v62  ;;  %v6003_v60 = vld [vmem:[%s12377_s0 + $0x40e] ss:$16 sm:%s754_s21]   ;;  %s800_s28 = smov 48  ;;  %s976_s21 = smov 3 }
  0x28   :  { %v5960_v0 = vld [vmem:[%s12377_s0 + $0x30f] ss:$16 sm:%s553_s2]   ;;  %v464_v3 = vsel %vm14_vm2, %v5940_v63, %v459_v1  ;;  %s586_s2 = smov 3  ;;  %v6004_v1 = vld [vmem:[%s12377_s0 + $0x40e] ss:$16 sm:%s759_s30]   ;;  %s851_s30 = smov 192 }
  0x29   :  { %v5977_v4 = vld [vmem:[%s12377_s0 + $0x38f] ss:$16 sm:%s632_s10]   ;;  %465 = vrot.lane.b32.xlu2 %v464_v3, %s7113_s6  ;;  %v556_v10 = vsel %vm14_vm2, %v5960_v0, %v551_v2  ;;  %s920_s10 = smov 192 }
  0x2a   :  { %v5978_v5 = vld [vmem:[%s12377_s0 + $0x38f] ss:$16 sm:%s635_s11]   ;;  %s622_s11 = smov 192  ;;  %557 = vrot.lane.b32.xlu0 %v556_v10, %s7113_s6 }
  0x2b   :  { %v5979_v7 = vld [vmem:[%s12377_s0 + $0x38f] ss:$16 sm:%s640_s14]   ;;  %v638_v11 = vsel %vm6_vm0, %v5978_v5, %v5977_v4  ;;  %s714_s14 = smov 192  ;;  %v6022_v4 = vld [vmem:[%s12377_s0 + $0x48e] ss:$16 sm:%s841_s8]   ;;  %s828_s8 = smov 192 }
  0x2c   :  { %v5972_v8 = vld [vmem:[%s12377_s0 + $0x18f] ss:$16 sm:%s609_s17]   ;;  %v643_v19 = vsel %vm10_vm1, %v5979_v7, %v638_v11  ;;  %v5995_v42 = vld [vmem:[%s12377_s0 + $0xe] ss:$16 sm:%s714_s14]   ;;  %s910_s14 = smov 12  ;;  %s1025_s17 = smov 12 }
  0x2d   :  { %v5973_v9 = vld [vmem:[%s12377_s0 + $0x18f] ss:$16 sm:%s612_s18]   ;;  %s701_s18 = smov 3  ;;  %v6016_v5 = vld [vmem:[%s12377_s0 + $0x28e] ss:$16 sm:%s815_s9]   ;;  %s869_s9 = smov 48 }
  0x2e   :  { %v5974_v12 = vld [vmem:[%s12377_s0 + $0x18f] ss:$16 sm:%s617_s23]   ;;  %v615_v15 = vsel %vm6_vm0, %v5973_v9, %v5972_v8  ;;  %v5992_v25 = vld [vmem:[%s12377_s0 + $0xe] ss:$16 sm:%s701_s18]   ;;  %s668_s18 = smov 192  ;;  %s792_s23 = smov 3 }
  0x2f   :  { %v5952_v13 = vld [vmem:[%s12377_s0 + $0x10f] ss:$16 sm:%s517_s24]   ;;  %v620_v24 = vsel %vm10_vm1, %v5974_v12, %v615_v15  ;;  %v707_v32 = vsel %vm6_vm0, %v5993_v26, %v5992_v25  ;;  %s782_s24 = smov 192 }
  0x30   :  { %v5953_v14 = vld [vmem:[%s12377_s0 + $0x10f] ss:$16 sm:%s520_s27]   ;;  %s772_s27 = smov 12  ;;  %v712_v41 = vsel %vm10_vm1, %v5994_v28, %v707_v32  ;;  %v6009_v63 = vld [vmem:[%s12377_s0 + $0x60e] ss:$16 sm:%s782_s24]   ;;  %s731_s24 = smov 48 }
  0x31   :  { %v523_v16 = vsel %vm6_vm0, %v5953_v14, %v5952_v13  ;;  %v5954_v17 = vld [vmem:[%s12377_s0 + $0x10f] ss:$16 sm:%s525_s3]   ;;  %s589_s3 = smov 12  ;;  %v6007_v47 = vld [vmem:[%s12377_s0 + $0x60e] ss:$16 sm:%s772_s27]   ;;  %v717_v48 = vsel %vm14_vm2, %v5995_v42, %v712_v41  ;;  %s795_s27 = smov 12 }
  0x32   :  { %v5955_v18 = vld [vmem:[%s12377_s0 + $0x10f] ss:$16 sm:%s530_s4]   ;;  %v528_v21 = vsel %vm10_vm1, %v5954_v17, %v523_v16  ;;  %s838_s4 = smov 3  ;;  %v5998_v14 = vld [vmem:[%s12377_s0 + $0x20e] ss:$16 sm:%s731_s24]   ;;  %s1090_s24 = smov 3 }
  0x33   :  { %v5980_v20 = vld [vmem:[%s12377_s0 + $0x38f] ss:$16 sm:%s645_s5]   ;;  %v533_v23 = vsel %vm14_vm2, %v5955_v18, %v528_v21  ;;  %s749_s5 = smov 12  ;;  %v6021_v2 = vld [vmem:[%s12377_s0 + $0x48e] ss:$16 sm:%s838_s4]   ;;  %s1012_s4 = smov 192 }
  0x34   :  { %v5975_v22 = vld [vmem:[%s12377_s0 + $0x18f] ss:$16 sm:%s622_s11]   ;;  %v648_v27 = vsel %vm14_vm2, %v5980_v20, %v643_v19  ;;  %534 = vrot.lane.b32.xlu2 %v533_v23, %s7113_s6  ;;  %v844_v12 = vsel %vm6_vm0, %v6022_v4, %v6021_v2  ;;  %s892_s11 = smov 48 }
  0x35   :  { %v5987_v29 = vld [vmem:[%s12377_s0 + $0x78f] ss:$16 sm:%s678_s25]   ;;  %v625_v31 = vsel %vm14_vm2, %v5975_v22, %v620_v24  ;;  %649 = vrot.lane.b32.xlu1 %v648_v27, %s7113_s6  ;;  %s736_s25 = smov 192 }
  0x36   :  { %v5988_v30 = vld [vmem:[%s12377_s0 + $0x78f] ss:$16 sm:%s681_s26]   ;;  %s769_s26 = smov 3  ;;  %626 = vrot.lane.b32.xlu0 %v625_v31, %s7113_s6 }
  0x37   :  { %v5967_v33 = vld [vmem:[%s12377_s0 + $0x70f] ss:$16 sm:%s586_s2]   ;;  %v684_v37 = vsel %vm6_vm0, %v5988_v30, %v5987_v29  ;;  %s746_s2 = smov 3  ;;  %v6006_v46 = vld [vmem:[%s12377_s0 + $0x60e] ss:$16 sm:%s769_s26]   ;;  %s953_s26 = smov 3 }
  0x38   :  { %v5968_v34 = vld [vmem:[%s12377_s0 + $0x70f] ss:$16 sm:%s589_s3]   ;;  %v6001_v50 = vld [vmem:[%s12377_s0 + $0x40e] ss:$16 sm:%s746_s2]   ;;  %v775_v54 = vsel %vm6_vm0, %v6007_v47, %v6006_v46  ;;  %s823_s2 = smov 48  ;;  %s12_s3 = smov 192 }
  0x39   :  { %v592_v35 = vsel %vm6_vm0, %v5968_v34, %v5967_v33  ;;  %v5969_v36 = vld [vmem:[%s12377_s0 + $0x70f] ss:$16 sm:%s594_s7]   ;;  %s655_s7 = smov 3  ;;  %v6002_v51 = vld [vmem:[%s12377_s0 + $0x40e] ss:$16 sm:%s749_s5]   ;;  %v780_v62 = vsel %vm10_vm1, %v6008_v49, %v775_v54  ;;  %s1035_s5 = smov 192 }
  0x3a   :  { %v5989_v38 = vld [vmem:[%s12377_s0 + $0x78f] ss:$16 sm:%s686_s12]   ;;  %v597_v39 = vsel %vm10_vm1, %v5969_v36, %v592_v35  ;;  %s658_s12 = smov 12  ;;  %v752_v59 = vsel %vm6_vm0, %v6002_v51, %v6001_v50  ;;  %v785_v6 = vsel %vm14_vm2, %v6009_v63, %v780_v62  ;;  %v5999_v15 = vld [vmem:[%s12377_s0 + $0x20e] ss:$16 sm:%s736_s25]   ;;  %s1093_s25 = smov 12 }
  0x3b   :  { %v5970_v40 = vld [vmem:[%s12377_s0 + $0x70f] ss:$16 sm:%s599_s13]   ;;  %v689_v45 = vsel %vm10_vm1, %v5989_v38, %v684_v37  ;;  %s663_s13 = smov 48  ;;  %v757_v3 = vsel %vm10_vm1, %v6003_v60, %v752_v59  ;;  %v6024_v17 = vld [vmem:[%s12377_s0 + $0x48e] ss:$16 sm:%s851_s30]   ;;  %s915_s30 = smov 48 }
  0x3c   :  { %v602_v43 = vsel %vm14_vm2, %v5970_v40, %v597_v39  ;;  %v5990_v44 = vld [vmem:[%s12377_s0 + $0x78f] ss:$16 sm:%s691_s19]   ;;  %s726_s19 = smov 12  ;;  %v762_v11 = vsel %vm14_vm2, %v6004_v1, %v757_v3  ;;  %v6018_v19 = vld [vmem:[%s12377_s0 + $0x28e] ss:$16 sm:%s823_s2]   ;;  %s864_s2 = smov 12 }
  0x3d   :  { %603 = vrot.lane.b32.xlu2 %v602_v43, %s7113_s6  ;;  %v5982_v52 = vld [vmem:[%s12377_s0 + $0x58f] ss:$16 sm:%s655_s7]   ;;  %v694_v53 = vsel %vm14_vm2, %v5990_v44, %v689_v45  ;;  %718 = vrot.lane.b32.xlu1 %v717_v48, %s7114_s29  ;;  %s805_s7 = smov 192 }
  0x3e   :  { %v5983_v55 = vld [vmem:[%s12377_s0 + $0x58f] ss:$16 sm:%s658_s12]   ;;  %695 = vrot.lane.b32.xlu0 %v694_v53, %s7113_s6  ;;  %s846_s12 = smov 48 }
  0x3f   :  { %v5984_v56 = vld [vmem:[%s12377_s0 + $0x58f] ss:$16 sm:%s663_s13]   ;;  %v661_v57 = vsel %vm6_vm0, %v5983_v55, %v5982_v52  ;;  %s818_s13 = smov 12  ;;  %v6023_v7 = vld [vmem:[%s12377_s0 + $0x48e] ss:$16 sm:%s846_s12]   ;;  %s22_s12 = smov 12 }
  0x40   :  { %v5985_v58 = vld [vmem:[%s12377_s0 + $0x58f] ss:$16 sm:%s668_s18]   ;;  %v666_v61 = vsel %vm10_vm1, %v5984_v56, %v661_v57  ;;  %s723_s18 = smov 3  ;;  %v6017_v8 = vld [vmem:[%s12377_s0 + $0x28e] ss:$16 sm:%s818_s13]   ;;  %s907_s13 = smov 3  ;;  %v849_v20 = vsel %vm10_vm1, %v6023_v7, %v844_v12 }
  0x41   :  { %v671_v0 = vsel %vm14_vm2, %v5985_v58, %v666_v61  ;;  %v5996_v9 = vld [vmem:[%s12377_s0 + $0x20e] ss:$16 sm:%s723_s18]   ;;  %v821_v18 = vsel %vm6_vm0, %v6017_v8, %v6016_v5  ;;  %v854_v28 = vsel %vm14_vm2, %v6024_v17, %v849_v20  ;;  %s897_s18 = smov 192 }
  0x42   :  { %v5997_v10 = vld [vmem:[%s12377_s0 + $0x20e] ss:$16 sm:%s726_s19]   ;;  %s884_s19 = smov 3  ;;  %v826_v25 = vsel %vm10_vm1, %v6018_v19, %v821_v18 }
  0x43   :  { %v729_v13 = vsel %vm6_vm0, %v5997_v10, %v5996_v9  ;;  %v6019_v21 = vld [vmem:[%s12377_s0 + $0x28e] ss:$16 sm:%s828_s8]   ;;  %s956_s8 = smov 12 }
  0x44   :  { %v734_v16 = vsel %vm10_vm1, %v5998_v14, %v729_v13  ;;  %v6036_v23 = vld [vmem:[%s12377_s0 + $0x30e] ss:$16 sm:%s907_s13]   ;;  %v831_v32 = vsel %vm14_vm2, %v6019_v21, %v826_v25  ;;  %s1081_s13 = smov 192 }
  0x45   :  { %672 = vrot.lane.b32.xlu2 %v671_v0, %s7113_s6  ;;  %786 = vrot.lane.b32.xlu1 %v785_v6, %s7114_s29  ;;  %v739_v22 = vsel %vm14_vm2, %v5999_v15, %v734_v16  ;;  %v6037_v24 = vld [vmem:[%s12377_s0 + $0x30e] ss:$16 sm:%s910_s14]   ;;  %s966_s6 = smov 192  ;;  %s1103_s14 = smov 192 }
  0x46   :  { %763 = vrot.lane.b32.xlu0 %v762_v11, %s7114_s29  ;;  %v6031_v26 = vld [vmem:[%s12377_s0 + $0x10e] ss:$16 sm:%s884_s19]   ;;  %v913_v33 = vsel %vm6_vm0, %v6037_v24, %v6036_v23  ;;  %s1071_s19 = smov 12 }
  0x47   :  { %v6032_v27 = vld [vmem:[%s12377_s0 + $0x10e] ss:$16 sm:%s887_s20]   ;;  %s1251_s20 = smov 3 }
  0x48   :  { %v6011_v29 = vld [vmem:[%s12377_s0 + $0x8e] ss:$16 sm:%s792_s23]   ;;  %v890_v39 = vsel %vm6_vm0, %v6032_v27, %v6031_v26  ;;  %s943_s23 = smov 192 }
  0x49   :  { %v6012_v30 = vld [vmem:[%s12377_s0 + $0x8e] ss:$16 sm:%s795_s27]   ;;  %s861_s27 = smov 3 }
  0x4a   :  { %v6013_v31 = vld [vmem:[%s12377_s0 + $0x8e] ss:$16 sm:%s800_s28]   ;;  %v798_v35 = vsel %vm6_vm0, %v6012_v30, %v6011_v29  ;;  %s1045_s28 = smov 3  ;;  %v6075_v30 = vld [vmem:[%s12377_s0 + $0x20d] ss:$16 sm:%s1090_s24]   ;;  %s1185_s24 = smov 12 }
  0x4b   :  { %v6038_v34 = vld [vmem:[%s12377_s0 + $0x30e] ss:$16 sm:%s915_s30]   ;;  %v803_v37 = vsel %vm10_vm1, %v6013_v31, %v798_v35  ;;  %s1048_s30 = smov 12  ;;  %v6076_v31 = vld [vmem:[%s12377_s0 + $0x20d] ss:$16 sm:%s1093_s25]   ;;  %s1076_s25 = smov 48 }
  0x4c   :  { %v6014_v36 = vld [vmem:[%s12377_s0 + $0x8e] ss:$16 sm:%s805_s7]   ;;  %v918_v41 = vsel %vm10_vm1, %v6038_v34, %v913_v33  ;;  %s930_s7 = smov 3 }
  0x4d   :  { %740 = vrot.lane.b32.xlu2 %v739_v22, %s7114_s29  ;;  %855 = vrot.lane.b32.xlu1 %v854_v28, %s7114_s29  ;;  %v6039_v38 = vld [vmem:[%s12377_s0 + $0x30e] ss:$16 sm:%s920_s10]   ;;  %v808_v43 = vsel %vm14_vm2, %v6014_v36, %v803_v37  ;;  %s984_s10 = smov 48 }
  0x4e   :  { %v6033_v40 = vld [vmem:[%s12377_s0 + $0x10e] ss:$16 sm:%s892_s11]   ;;  %832 = vrot.lane.b32.xlu0 %v831_v32, %s7114_s29  ;;  %v923_v49 = vsel %vm14_vm2, %v6039_v38, %v918_v41  ;;  %s938_s11 = smov 48  ;;  %v1096_v38 = vsel %vm6_vm0, %v6076_v31, %v6075_v30 }
  0x4f   :  { %v6034_v42 = vld [vmem:[%s12377_s0 + $0x10e] ss:$16 sm:%s897_s18]   ;;  %v895_v46 = vsel %vm10_vm1, %v6033_v40, %v890_v39  ;;  %s989_s18 = smov 192  ;;  %v6078_v41 = vld [vmem:[%s12377_s0 + $0x20d] ss:$16 sm:%s1103_s14]   ;;  %s1167_s14 = smov 48 }
  0x50   :  { %v6051_v44 = vld [vmem:[%s12377_s0 + $0x18e] ss:$16 sm:%s976_s21]   ;;  %s961_s21 = smov 48  ;;  %v900_v54 = vsel %vm14_vm2, %v6034_v42, %v895_v46 }
  0x51   :  { %v6052_v45 = vld [vmem:[%s12377_s0 + $0x18e] ss:$16 sm:%s979_s22]   ;;  %s1218_s22 = smov 192 }
  0x52   :  { %v6046_v47 = vld [vmem:[%s12377_s0 + $0x70e] ss:$16 sm:%s953_s26]   ;;  %v982_v55 = vsel %vm6_vm0, %v6052_v45, %v6051_v44  ;;  %v6072_v45 = vld [vmem:[%s12377_s0 + $0xd] ss:$16 sm:%s1071_s19]   ;;  %s1172_s19 = smov 192  ;;  %s7115_s26 = smov 104  }
  0x53   :  { %v6026_v48 = vld [vmem:[%s12377_s0 + $0x68e] ss:$16 sm:%s861_s27]   ;;  %s1121_s27 = smov 48 }
  0x54   :  { %v6027_v50 = vld [vmem:[%s12377_s0 + $0x68e] ss:$16 sm:%s864_s2]   ;;  %s1030_s2 = smov 48  ;;  %v6082_v34 = vld [vmem:[%s12377_s0 + $0x40d] ss:$16 sm:%s1121_s27]   ;;  %s7711_s27 = smov 48 }
  0x55   :  { %809 = vrot.lane.b32.xlu2 %v808_v43, %s7114_s29  ;;  %v6047_v51 = vld [vmem:[%s12377_s0 + $0x70e] ss:$16 sm:%s956_s8]   ;;  %v867_v52 = vsel %vm6_vm0, %v6027_v50, %v6026_v48  ;;  %924 = vrot.lane.b32.xlu1 %v923_v49, %s7114_s29  ;;  %s933_s8 = smov 12 }
  0x56   :  { %v6028_v53 = vld [vmem:[%s12377_s0 + $0x68e] ss:$16 sm:%s869_s9]   ;;  %v959_v60 = vsel %vm6_vm0, %v6047_v51, %v6046_v47  ;;  %901 = vrot.lane.b32.xlu0 %v900_v54, %s7114_s29  ;;  %s1113_s9 = smov 3 }
  0x57   :  { %v6053_v56 = vld [vmem:[%s12377_s0 + $0x18e] ss:$16 sm:%s984_s10]   ;;  %v872_v57 = vsel %vm10_vm1, %v6028_v53, %v867_v52  ;;  %s1116_s10 = smov 12  ;;  %v6080_v22 = vld [vmem:[%s12377_s0 + $0x40d] ss:$16 sm:%s1113_s9]   ;;  %s1397_s9 = smov 48 }
  0x58   :  { %v6029_v58 = vld [vmem:[%s12377_s0 + $0x68e] ss:$16 sm:%s874_s15]   ;;  %v987_v62 = vsel %vm10_vm1, %v6053_v56, %v982_v55  ;;  %v6081_v23 = vld [vmem:[%s12377_s0 + $0x40d] ss:$16 sm:%s1116_s10]   ;;  %s1190_s10 = smov 48  ;;  %s7734_s15 = smov 48 }
  0x59   :  { %v6054_v59 = vld [vmem:[%s12377_s0 + $0x18e] ss:$16 sm:%s989_s18]   ;;  %v877_v0 = vsel %vm14_vm2, %v6029_v58, %v872_v57  ;;  %s1053_s18 = smov 48  ;;  %v1119_v33 = vsel %vm6_vm0, %v6081_v23, %v6080_v22  ;;  %v6096_v47 = vld [vmem:[%s12377_s0 + $0x28d] ss:$16 sm:%s1185_s24]   ;;  %s7749_s24 = smov 3 }
  0x5a   :  { %v6048_v61 = vld [vmem:[%s12377_s0 + $0x70e] ss:$16 sm:%s961_s21]   ;;  %v992_v6 = vsel %vm14_vm2, %v6054_v59, %v987_v62  ;;  %v1124_v40 = vsel %vm10_vm1, %v6082_v34, %v1119_v33  ;;  %v6073_v49 = vld [vmem:[%s12377_s0 + $0xd] ss:$16 sm:%s1076_s25]   ;;  %s1254_s25 = smov 12  ;;  %s169_s21 = smov 12 }
  0x5b   :  { %v6049_v63 = vld [vmem:[%s12377_s0 + $0x70e] ss:$16 sm:%s966_s6]   ;;  %v964_v3 = vsel %vm10_vm1, %v6048_v61, %v959_v60  ;;  %s1058_s6 = smov 192  ;;  %v6097_v55 = vld [vmem:[%s12377_s0 + $0x28d] ss:$16 sm:%s1190_s10]   ;;  %s1228_s10 = smov 3 }
  0x5c   :  { %v6066_v1 = vld [vmem:[%s12377_s0 + $0x78e] ss:$16 sm:%s1045_s28]   ;;  %v969_v11 = vsel %vm14_vm2, %v6049_v63, %v964_v3  ;;  %v6074_v57 = vld [vmem:[%s12377_s0 + $0xd] ss:$16 sm:%s1081_s13]   ;;  %s1139_s28 = smov 12  ;;  %s1205_s13 = smov 3 }
  0x5d   :  { %v6067_v2 = vld [vmem:[%s12377_s0 + $0x78e] ss:$16 sm:%s1048_s30]   ;;  %878 = vrot.lane.b32.xlu2 %v877_v0, %s7114_s29  ;;  %993 = vrot.lane.b32.xlu1 %v992_v6, %s7114_s29  ;;  %s1159_s30 = smov 3 }
  0x5e   :  { %v6041_v4 = vld [vmem:[%s12377_s0 + $0x50e] ss:$16 sm:%s930_s7]   ;;  %v1051_v12 = vsel %vm6_vm0, %v6067_v2, %v6066_v1  ;;  %970 = vrot.lane.b32.xlu0 %v969_v11, %s7114_s29  ;;  %s1144_s7 = smov 48 }
  0x5f   :  { %v6042_v5 = vld [vmem:[%s12377_s0 + $0x50e] ss:$16 sm:%s933_s8]   ;;  %v6090_v51 = vld [vmem:[%s12377_s0 + $0x8d] ss:$16 sm:%s1159_s30]   ;;  %s1389_s30 = smov 3  ;;  %s111_s8 = smov 48 }
  0x60   :  { %v936_v7 = vsel %vm6_vm0, %v6042_v5, %v6041_v4  ;;  %v6043_v8 = vld [vmem:[%s12377_s0 + $0x50e] ss:$16 sm:%s938_s11]   ;;  %s999_s11 = smov 3  ;;  %v6092_v60 = vld [vmem:[%s12377_s0 + $0x8d] ss:$16 sm:%s1167_s14]   ;;  %s32_s14 = smov 192 }
  0x61   :  { %v6061_v9 = vld [vmem:[%s12377_s0 + $0x58e] ss:$16 sm:%s1022_s16]   ;;  %v941_v14 = vsel %vm10_vm1, %v6043_v8, %v936_v7  ;;  %s1002_s16 = smov 12  ;;  %v6093_v62 = vld [vmem:[%s12377_s0 + $0x8d] ss:$16 sm:%s1172_s19]   ;;  %s4_s19 = smov 12 }
  0x62   :  { %v6062_v10 = vld [vmem:[%s12377_s0 + $0x58e] ss:$16 sm:%s1025_s17]   ;;  %s1007_s17 = smov 48  ;;  %v6110_v1 = vld [vmem:[%s12377_s0 + $0x10d] ss:$16 sm:%s1251_s20]   ;;  %s166_s20 = smov 3 }
  0x63   :  { %v6068_v13 = vld [vmem:[%s12377_s0 + $0x78e] ss:$16 sm:%s1053_s18]   ;;  %v1028_v17 = vsel %vm6_vm0, %v6062_v10, %v6061_v9  ;;  %s1068_s18 = smov 3  ;;  %v6086_v2 = vld [vmem:[%s12377_s0 + $0x60d] ss:$16 sm:%s1139_s28]   ;;  %s82_s28 = smov 3 }
  0x64   :  { %v6044_v15 = vld [vmem:[%s12377_s0 + $0x50e] ss:$16 sm:%s943_s23]   ;;  %v1056_v19 = vsel %vm10_vm1, %v6068_v13, %v1051_v12  ;;  %v6071_v44 = vld [vmem:[%s12377_s0 + $0xd] ss:$16 sm:%s1068_s18]   ;;  %s1149_s23 = smov 192  ;;  %s1208_s18 = smov 12 }
  0x65   :  { %v6069_v16 = vld [vmem:[%s12377_s0 + $0x78e] ss:$16 sm:%s1058_s6]   ;;  %v946_v21 = vsel %vm14_vm2, %v6044_v15, %v941_v14  ;;  %v1074_v48 = vsel %vm6_vm0, %v6072_v45, %v6071_v44  ;;  %s1136_s6 = smov 3  ;;  %v6111_v4 = vld [vmem:[%s12377_s0 + $0x10d] ss:$16 sm:%s1254_s25]   ;;  %s1323_s25 = smov 12 }
  0x66   :  { %v6063_v18 = vld [vmem:[%s12377_s0 + $0x58e] ss:$16 sm:%s1030_s2]   ;;  %v1061_v28 = vsel %vm14_vm2, %v6069_v16, %v1056_v19  ;;  %947 = vrot.lane.b32.xlu2 %v946_v21, %s7114_s29  ;;  %s1162_s2 = smov 12  ;;  %v1079_v56 = vsel %vm10_vm1, %v6073_v49, %v1074_v48  ;;  %v1257_v11 = vsel %vm6_vm0, %v6111_v4, %v6110_v1 }
  0x67   :  { %v6064_v20 = vld [vmem:[%s12377_s0 + $0x58e] ss:$16 sm:%s1035_s5]   ;;  %v1033_v25 = vsel %vm10_vm1, %v6063_v18, %v1028_v17  ;;  %s1126_s5 = smov 192  ;;  %1062 = vrot.lane.b32.xlu1 %v1061_v28, %s7114_s29  ;;  %v1084_v63 = vsel %vm14_vm2, %v6074_v57, %v1079_v56 }
  0x68   :  { %v6056_v24 = vld [vmem:[%s12377_s0 + $0x38e] ss:$16 sm:%s999_s11]   ;;  %s1098_s11 = smov 48  ;;  %v1038_v32 = vsel %vm14_vm2, %v6064_v20, %v1033_v25  ;;  %v6083_v37 = vld [vmem:[%s12377_s0 + $0x40d] ss:$16 sm:%s1126_s5]   ;;  %s7720_s5 = smov 192 }
  0x69   :  { %v6057_v26 = vld [vmem:[%s12377_s0 + $0x38e] ss:$16 sm:%s1002_s16]   ;;  %v6077_v39 = vld [vmem:[%s12377_s0 + $0x20d] ss:$16 sm:%s1098_s11]   ;;  %v1129_v50 = vsel %vm14_vm2, %v6083_v37, %v1124_v40  ;;  %s1231_s11 = smov 12  ;;  %s7736_s16 = smov 192 }
  0x6a   :  { %v6058_v27 = vld [vmem:[%s12377_s0 + $0x38e] ss:$16 sm:%s1007_s17]   ;;  %v1005_v29 = vsel %vm6_vm0, %v6057_v26, %v6056_v24  ;;  %s1182_s17 = smov 3  ;;  %1039 = vrot.lane.b32.xlu0 %v1038_v32, %s7114_s29  ;;  %v1101_v46 = vsel %vm10_vm1, %v6077_v39, %v1096_v38 }
  0x6b   :  { %v1010_v35 = vsel %vm10_vm1, %v6058_v27, %v1005_v29  ;;  %v6059_v36 = vld [vmem:[%s12377_s0 + $0x38e] ss:$16 sm:%s1012_s4]   ;;  %v6095_v43 = vld [vmem:[%s12377_s0 + $0x28d] ss:$16 sm:%s1182_s17]   ;;  %v1106_v53 = vsel %vm14_vm2, %v6078_v41, %v1101_v46  ;;  %s7761_s4 = smov 3  ;;  %s1369_s17 = smov 12 }
  0x6c   :  { %v1015_v42 = vsel %vm14_vm2, %v6059_v36, %v1010_v35  ;;  %v6091_v52 = vld [vmem:[%s12377_s0 + $0x8d] ss:$16 sm:%s1162_s2]   ;;  %v1188_v54 = vsel %vm6_vm0, %v6096_v47, %v6095_v43  ;;  %v5839_v24 = vld [vmem:[%s12377_s0 + $0x80] ss:$16 sm:%s22_s12]   ;;  %s179_s12 = smov 192  ;;  %s1392_s2 = smov 12 }
  0x6d   :  { %v1165_v59 = vsel %vm6_vm0, %v6091_v52, %v6090_v51  ;;  %v1193_v61 = vsel %vm10_vm1, %v6097_v55, %v1188_v54  ;;  %v6085_v0 = vld [vmem:[%s12377_s0 + $0x60d] ss:$16 sm:%s1136_s6]   ;;  %s7753_s6 = smov 48  ;;  %v5841_v27 = vld [vmem:[%s12377_s0 + $0x80] ss:$16 sm:%s32_s14]   ;;  %s253_s14 = smov 12 }
  0x6e   :  { %1016 = vrot.lane.b32.xlu2 %v1015_v42, %s7114_s29  ;;  %s1195_s29 = smov 192  ;;  %v1170_v3 = vsel %vm10_vm1, %v6092_v60, %v1165_v59  ;;  %v1142_v5 = vsel %vm6_vm0, %v6086_v2, %v6085_v0  ;;  %v6087_v6 = vld [vmem:[%s12377_s0 + $0x60d] ss:$16 sm:%s1144_s7]   ;;  %s19_s7 = smov 3 }
  0x6f   :  { %1130 = vrot.lane.b32.xlu1 %v1129_v50, %s7115_s26  ;;  %v6098_v58 = vld [vmem:[%s12377_s0 + $0x28d] ss:$16 sm:%s1195_s29]   ;;  %v1175_v10 = vsel %vm14_vm2, %v6093_v62, %v1170_v3  ;;  %v1147_v13 = vsel %vm10_vm1, %v6087_v6, %v1142_v5  ;;  %s1366_s29 = smov 3 }
  0x70   :  { %v1198_v7 = vsel %vm14_vm2, %v6098_v58, %v1193_v61  ;;  %v6105_v8 = vld [vmem:[%s12377_s0 + $0x68d] ss:$16 sm:%s1228_s10]   ;;  %v5838_v18 = vld [vmem:[%s12377_s0 + $0x80] ss:$16 sm:%s19_s7]   ;;  %s174_s7 = smov 48  ;;  %s1465_s10 = smov 48 }
  0x71   :  { %v6106_v9 = vld [vmem:[%s12377_s0 + $0x68d] ss:$16 sm:%s1231_s11]   ;;  %s1300_s11 = smov 12  ;;  %v25_v25 = vsel %vm6_vm0, %v5839_v24, %v5838_v18  ;;  %v5873_v32 = vld [vmem:[%s12377_s0 + $0x400] ss:$16 sm:%s166_s20]   ;;  %s1374_s20 = smov 48 }
  0x72   :  { %1107 = vrot.lane.b32.xlu0 %v1106_v53, %s7115_s26  ;;  %v6112_v12 = vld [vmem:[%s12377_s0 + $0x10d] ss:$16 sm:%s7711_s27]   ;;  %v1234_v16 = vsel %vm6_vm0, %v6106_v9, %v6105_v8  ;;  %s1460_s27 = smov 12 }
  0x73   :  { %v6088_v14 = vld [vmem:[%s12377_s0 + $0x60d] ss:$16 sm:%s1149_s23]   ;;  %v1262_v19 = vsel %vm10_vm1, %v6112_v12, %v1257_v11  ;;  %v5874_v33 = vld [vmem:[%s12377_s0 + $0x400] ss:$16 sm:%s169_s21]   ;;  %s103_s23 = smov 3  ;;  %s263_s21 = smov 192 }
  0x74   :  { %v6113_v15 = vld [vmem:[%s12377_s0 + $0x10d] ss:$16 sm:%s7720_s5]   ;;  %s27_s5 = smov 48  ;;  %v1152_v21 = vsel %vm14_vm2, %v6088_v14, %v1147_v13  ;;  %v172_v37 = vsel %vm6_vm0, %v5874_v33, %v5873_v32  ;;  %v5875_v38 = vld [vmem:[%s12377_s0 + $0x400] ss:$16 sm:%s174_s7]   ;;  %s85_s7 = smov 12 }
  0x75   :  { %v6107_v17 = vld [vmem:[%s12377_s0 + $0x68d] ss:$16 sm:%s7734_s15]   ;;  %v5840_v26 = vld [vmem:[%s12377_s0 + $0x80] ss:$16 sm:%s27_s5]   ;;  %s2_s15 = smov 3  ;;  %v1267_v34 = vsel %vm14_vm2, %v6113_v15, %v1262_v19  ;;  %v177_v39 = vsel %vm10_vm1, %v5875_v38, %v172_v37  ;;  %s1470_s5 = smov 192 }
  0x76   :  { %1085 = vrot.lane.b32.xlu2 %v1084_v63, %s7115_s26  ;;  %v6108_v20 = vld [vmem:[%s12377_s0 + $0x68d] ss:$16 sm:%s7736_s16]   ;;  %v1239_v28 = vsel %vm10_vm1, %v6107_v17, %v1234_v16  ;;  %v30_v31 = vsel %vm10_vm1, %v5840_v26, %v25_v25  ;;  %s8_s16 = smov 48 }
  0x77   :  { %1199 = vrot.lane.b32.xlu1 %v1198_v7, %s7115_s26  ;;  %v6125_v22 = vld [vmem:[%s12377_s0 + $0x70d] ss:$16 sm:%s7749_s24]   ;;  %v35_v36 = vsel %vm14_vm2, %v5841_v27, %v30_v31  ;;  %v1244_v41 = vsel %vm14_vm2, %v6108_v20, %v1239_v28  ;;  %s106_s24 = smov 12 }
  0x78   :  { %v6126_v23 = vld [vmem:[%s12377_s0 + $0x70d] ss:$16 sm:%s1323_s25]   ;;  %s7800_s25 = smov 48  ;;  %5842 = vst.msk [vmem:[%s12378_s1 + $0x8] sm:$0xff] %vm16_vm3, %v35_v36   ;;  %v443_v44 = vpop.permute.xlu2 %442   ;;  %v397_v13 = vpop.permute.xlu1 %396  }
  0x79   :  { %v6120_v29 = vld [vmem:[%s12377_s0 + $0x50d] ss:$16 sm:%s7761_s4]   ;;  %v5876_v40 = vld [vmem:[%s12377_s0 + $0x400] ss:$16 sm:%s179_s12]   ;;  %v1326_v42 = vsel %vm6_vm0, %v6126_v23, %v6125_v22  ;;  %s95_s12 = smov 192  ;;  %s7116_s4 = smov 96  }
  0x7a   :  { %1176 = vrot.lane.b32.xlu0 %v1175_v10, %s7115_s26  ;;  %v6121_v30 = vld [vmem:[%s12377_s0 + $0x50d] ss:$16 sm:%s1300_s11]   ;;  %v182_v45 = vsel %vm14_vm2, %v5876_v40, %v177_v39  ;;  %5936 = vst.msk [vmem:[%s12378_s1 + $0x8] sm:$0xff] %vm353_vm4, %v443_v44   ;;  %s1274_s11 = smov 3 }
  0x7b   :  { %v6127_v35 = vld [vmem:[%s12377_s0 + $0x70d] ss:$16 sm:%s7753_s6]   ;;  %s1333_s6 = smov 192  ;;  %v3_v46 = vld [vmem:[%s12377_s0] ss:$16 sm:%s2_s15]   ;;  %v1303_v51 = vsel %vm6_vm0, %v6121_v30, %v6120_v29  ;;  %s1435_s15 = smov 3 }
  0x7c   :  { %v6122_v43 = vld [vmem:[%s12377_s0 + $0x50d] ss:$16 sm:%s7800_s25]   ;;  %s1310_s25 = smov 192  ;;  %v5_v47 = vld [vmem:[%s12377_s0] ss:$16 sm:%s4_s19]   ;;  %v1331_v54 = vsel %vm10_vm1, %v6127_v35, %v1326_v42  ;;  %s1402_s19 = smov 192  ;;  %v352_v18 = vpop.permute.xlu0 %351  }
  0x7d   :  { %v6128_v48 = vld [vmem:[%s12377_s0 + $0x70d] ss:$16 sm:%s1333_s6]   ;;  %v7_v49 = vsel %vm6_vm0, %v5_v47, %v3_v46  ;;  %v9_v50 = vld [vmem:[%s12377_s0] ss:$16 sm:%s8_s16]   ;;  %s1213_s6 = smov 48  ;;  %v1308_v59 = vsel %vm10_vm1, %v6122_v43, %v1303_v51  ;;  %s1287_s16 = smov 192 }
  0x7e   :  { %1153 = vrot.lane.b32.xlu2 %v1152_v21, %s7115_s26  ;;  %5877 = vst.msk [vmem:[%s12378_s1 + $0x40] sm:$0xff] %vm16_vm3, %v182_v45   ;;  %v11_v52 = vsel %vm10_vm1, %v9_v50, %v7_v49  ;;  %v13_v53 = vld [vmem:[%s12377_s0] ss:$16 sm:%s12_s3]   ;;  %v1336_v63 = vsel %vm14_vm2, %v6128_v48, %v1331_v54  ;;  %s1457_s3 = smov 3 }
  0x7f   :  { %1268 = vrot.lane.b32.xlu1 %v1267_v34, %s7115_s26  ;;  %v6123_v55 = vld [vmem:[%s12377_s0 + $0x50d] ss:$16 sm:%s1310_s25]   ;;  %v15_v56 = vsel %vm14_vm2, %v13_v53, %v11_v52  ;;  %s116_s25 = smov 192  ;;  %5926 = vst.msk [vmem:[%s12378_s1 + $0x40] sm:$0xff] %vm353_vm4, %v397_v13  }
  0x80   :  { %v6100_v57 = vld [vmem:[%s12377_s0 + $0x48d] ss:$16 sm:%s1205_s13]   ;;  %17 = vst.msk [vmem:[%s12378_s1] sm:$0xff] %vm16_vm3, %v15_v56   ;;  %v1313_v5 = vsel %vm14_vm2, %v6123_v55, %v1308_v59  ;;  %s250_s13 = smov 3  ;;  %v420_v38 = vpop.permute.xlu1 %419  }
  0x81   :  { %v6101_v58 = vld [vmem:[%s12377_s0 + $0x48d] ss:$16 sm:%s1208_s18]   ;;  %v5858_v16 = vld [vmem:[%s12377_s0 + $0x280] ss:$16 sm:%s103_s23]   ;;  %s1443_s23 = smov 48  ;;  %s1667_s18 = smov 12 }
  0x82   :  { %1245 = vrot.lane.b32.xlu0 %v1244_v41, %s7115_s26  ;;  %v1211_v60 = vsel %vm6_vm0, %v6101_v58, %v6100_v57  ;;  %v6102_v61 = vld [vmem:[%s12377_s0 + $0x48d] ss:$16 sm:%s1213_s6]   ;;  %354 = vst.msk [vmem:[%s12378_s1] sm:$0xff] %vm353_vm4, %v352_v18   ;;  %s284_s6 = smov 192 }
  0x83   :  { %v6103_v62 = vld [vmem:[%s12377_s0 + $0x48d] ss:$16 sm:%s1218_s22]   ;;  %v1216_v0 = vsel %vm10_vm1, %v6102_v61, %v1211_v60  ;;  %s1379_s22 = smov 192  ;;  %v466_v8 = vpop.permute.xlu2 %465   ;;  %v5859_v17 = vld [vmem:[%s12377_s0 + $0x280] ss:$16 sm:%s106_s24]   ;;  %s221_s24 = smov 192 }
  0x84   :  { %v6140_v1 = vld [vmem:[%s12377_s0 + $0x58d] ss:$16 sm:%s1389_s30]   ;;  %v1221_v3 = vsel %vm14_vm2, %v6103_v62, %v1216_v0  ;;  %v109_v20 = vsel %vm6_vm0, %v5859_v17, %v5858_v16  ;;  %v5860_v21 = vld [vmem:[%s12377_s0 + $0x280] ss:$16 sm:%s111_s8]   ;;  %s90_s8 = smov 48  ;;  %v374_v43 = vpop.permute.xlu0 %373   ;;  %s40_s30 = smov 3 }
  0x85   :  { %v6141_v2 = vld [vmem:[%s12377_s0 + $0x58d] ss:$16 sm:%s1392_s2]   ;;  %v5861_v22 = vld [vmem:[%s12377_s0 + $0x280] ss:$16 sm:%s116_s25]   ;;  %v114_v24 = vsel %vm10_vm1, %v5860_v21, %v109_v20  ;;  %s43_s25 = smov 12  ;;  %s1356_s2 = smov 192 }
  0x86   :  { %v6142_v4 = vld [vmem:[%s12377_s0 + $0x58d] ss:$16 sm:%s1397_s9]   ;;  %1222 = vrot.lane.b32.xlu2 %v1221_v3, %s7115_s26  ;;  %v1395_v6 = vsel %vm6_vm0, %v6141_v2, %v6140_v1  ;;  %v119_v26 = vsel %vm14_vm2, %v5861_v22, %v114_v24  ;;  %s48_s9 = smov 48 }
  0x87   :  { %v6135_v7 = vld [vmem:[%s12377_s0 + $0x38d] ss:$16 sm:%s1366_s29]   ;;  %1337 = vrot.lane.b32.xlu1 %v1336_v63, %s7115_s26  ;;  %v1400_v14 = vsel %vm10_vm1, %v6142_v4, %v1395_v6  ;;  %5862 = vst.msk [vmem:[%s12378_s1 + $0x28] sm:$0xff] %vm16_vm3, %v119_v26   ;;  %s53_s29 = smov 192 }
  0x88   :  { %v6136_v9 = vld [vmem:[%s12377_s0 + $0x38d] ss:$16 sm:%s1369_s17]   ;;  %s258_s17 = smov 48  ;;  %v5893_v25 = vld [vmem:[%s12377_s0 + $0x600] ss:$16 sm:%s250_s13]   ;;  %s200_s13 = smov 192 }
  0x89   :  { %v6143_v10 = vld [vmem:[%s12377_s0 + $0x58d] ss:$16 sm:%s1402_s19]   ;;  %v1372_v11 = vsel %vm6_vm0, %v6136_v9, %v6135_v7  ;;  %v5894_v27 = vld [vmem:[%s12377_s0 + $0x600] ss:$16 sm:%s253_s14]   ;;  %s1277_s19 = smov 12  ;;  %s271_s14 = smov 3 }
  0x8a   :  { %v6137_v12 = vld [vmem:[%s12377_s0 + $0x38d] ss:$16 sm:%s1374_s20]   ;;  %1314 = vrot.lane.b32.xlu0 %v1313_v5, %s7115_s26  ;;  %v1405_v23 = vsel %vm14_vm2, %v6143_v10, %v1400_v14  ;;  %v256_v30 = vsel %vm6_vm0, %v5894_v27, %v5893_v25  ;;  %5941 = vst.msk [vmem:[%s12378_s1 + $0x28] sm:$0xff] %vm353_vm4, %v466_v8   ;;  %s1282_s20 = smov 48  ;;  %v512_v0 = vpop.permute.xlu1 %511  }
  0x8b   :  { %v6138_v15 = vld [vmem:[%s12377_s0 + $0x38d] ss:$16 sm:%s1379_s22]   ;;  %v1377_v19 = vsel %vm10_vm1, %v6137_v12, %v1372_v11  ;;  %v5895_v28 = vld [vmem:[%s12377_s0 + $0x600] ss:$16 sm:%s258_s17]   ;;  %s274_s17 = smov 12  ;;  %s148_s22 = smov 12 }
  0x8c   :  { %v1382_v29 = vsel %vm14_vm2, %v6138_v15, %v1377_v19  ;;  %v5896_v31 = vld [vmem:[%s12377_s0 + $0x600] ss:$16 sm:%s263_s21]   ;;  %v261_v33 = vsel %vm10_vm1, %v5895_v28, %v256_v30  ;;  %v6115_v42 = vld [vmem:[%s12377_s0 + $0x30d] ss:$16 sm:%s1274_s11]   ;;  %s279_s21 = smov 48  ;;  %s137_s11 = smov 192 }
  0x8d   :  { %v5853_v34 = vld [vmem:[%s12377_s0 + $0x200] ss:$16 sm:%s82_s28]   ;;  %v266_v35 = vsel %vm14_vm2, %v5896_v31, %v261_v33  ;;  %v6116_v45 = vld [vmem:[%s12377_s0 + $0x30d] ss:$16 sm:%s1277_s19]   ;;  %s1438_s19 = smov 12  ;;  %s1549_s28 = smov 3 }
  0x8e   :  { %v7981_v32 = vpop.permute.xlu2 %534   ;;  %v5854_v36 = vld [vmem:[%s12377_s0 + $0x200] ss:$16 sm:%s85_s7]   ;;  %5897 = vst.msk [vmem:[%s12378_s1 + $0x60] sm:$0xff] %vm16_vm3, %v266_v35   ;;  %v1280_v47 = vsel %vm6_vm0, %v6116_v45, %v6115_v42  ;;  %s1585_s7 = smov 192 }
  0x8f   :  { %1406 = vrot.lane.b32.xlu1 %v1405_v23, %s7115_s26  ;;  %v5855_v37 = vld [vmem:[%s12377_s0 + $0x200] ss:$16 sm:%s90_s8]   ;;  %v88_v39 = vsel %vm6_vm0, %v5854_v36, %v5853_v34  ;;  %5931 = vst.msk [vmem:[%s12378_s1 + $0x60] sm:$0xff] %vm353_vm4, %v420_v38   ;;  %v489_v6 = vpop.permute.xlu0 %488   ;;  %s1644_s8 = smov 12 }
  0x90   :  { %v5856_v40 = vld [vmem:[%s12377_s0 + $0x200] ss:$16 sm:%s95_s12]   ;;  %v93_v41 = vsel %vm10_vm1, %v5855_v37, %v88_v39  ;;  %v6117_v46 = vld [vmem:[%s12377_s0 + $0x30d] ss:$16 sm:%s1282_s20]   ;;  %s1718_s12 = smov 48  ;;  %s1873_s20 = smov 12 }
  0x91   :  { %v98_v44 = vsel %vm14_vm2, %v5856_v40, %v93_v41  ;;  %v6118_v48 = vld [vmem:[%s12377_s0 + $0x30d] ss:$16 sm:%s1287_s16]   ;;  %v1285_v49 = vsel %vm10_vm1, %v6117_v46, %v1280_v47  ;;  %v6154_v50 = vld [vmem:[%s12377_s0 + $0x20c] ss:$16 sm:%s1457_s3]   ;;  %s1448_s16 = smov 192  ;;  %s190_s3 = smov 12 }
  0x92   :  { %1383 = vrot.lane.b32.xlu0 %v1382_v29, %s7115_s26  ;;  %5857 = vst.msk [vmem:[%s12378_s1 + $0x20] sm:$0xff] %vm16_vm3, %v98_v44   ;;  %v1290_v51 = vsel %vm14_vm2, %v6118_v48, %v1285_v49  ;;  %v6155_v52 = vld [vmem:[%s12377_s0 + $0x20c] ss:$16 sm:%s1460_s27]   ;;  %s195_s27 = smov 48 }
  0x93   :  { %5921 = vst.msk [vmem:[%s12378_s1 + $0x20] sm:$0xff] %vm353_vm4, %v374_v43   ;;  %v6156_v53 = vld [vmem:[%s12377_s0 + $0x20c] ss:$16 sm:%s1465_s10]   ;;  %1291 = vrot.lane.b32.xlu2 %v1290_v51, %s7115_s26  ;;  %v1463_v55 = vsel %vm6_vm0, %v6155_v52, %v6154_v50  ;;  %s132_s10 = smov 48 }
  0x94   :  { %v6157_v56 = vld [vmem:[%s12377_s0 + $0x20c] ss:$16 sm:%s1470_s5]   ;;  %v1468_v57 = vsel %vm10_vm1, %v6156_v53, %v1463_v55  ;;  %v5843_v2 = vld [vmem:[%s12377_s0 + $0x100] ss:$16 sm:%s40_s30]   ;;  %s1534_s5 = smov 48  ;;  %s1516_s30 = smov 192 }
  0x95   :  { %v6150_v58 = vld [vmem:[%s12377_s0 + $0xc] ss:$16 sm:%s1435_s15]   ;;  %v1473_v60 = vsel %vm14_vm2, %v6157_v56, %v1468_v57  ;;  %v5844_v4 = vld [vmem:[%s12377_s0 + $0x100] ss:$16 sm:%s43_s25]   ;;  %s1343_s15 = smov 3  ;;  %s292_s25 = smov 3 }
  0x96   :  { %v6151_v59 = vld [vmem:[%s12377_s0 + $0xc] ss:$16 sm:%s1438_s19]   ;;  %v5845_v5 = vld [vmem:[%s12377_s0 + $0x100] ss:$16 sm:%s48_s9]   ;;  %v46_v7 = vsel %vm6_vm0, %v5844_v4, %v5843_v2  ;;  %s1346_s19 = smov 12  ;;  %s1526_s9 = smov 3 }
  0x97   :  { %v8046_v54 = vpop.permute.xlu2 %603   ;;  %v1441_v61 = vsel %vm6_vm0, %v6151_v59, %v6150_v58  ;;  %v6152_v62 = vld [vmem:[%s12377_s0 + $0xc] ss:$16 sm:%s1443_s23]   ;;  %1474 = vrot.lane.b32.xlu1 %v1473_v60, %s7116_s4  ;;  %v51_v9 = vsel %vm10_vm1, %v5845_v5, %v46_v7  ;;  %s1351_s23 = smov 48  ;;  %v8127_v23 = vpop.permute.xlu1 %580  }
  0x98   :  { %v6153_v63 = vld [vmem:[%s12377_s0 + $0xc] ss:$16 sm:%s1448_s16]   ;;  %v1446_v1 = vsel %vm10_vm1, %v6152_v62, %v1441_v61  ;;  %v5846_v8 = vld [vmem:[%s12377_s0 + $0x100] ss:$16 sm:%s53_s29]   ;;  %s187_s16 = smov 3  ;;  %s300_s29 = smov 48 }
  0x99   :  { %v1451_v3 = vsel %vm14_vm2, %v6153_v63, %v1446_v1  ;;  %v5898_v10 = vld [vmem:[%s12377_s0 + $0x680] ss:$16 sm:%s271_s14]   ;;  %v56_v12 = vsel %vm14_vm2, %v5846_v8, %v51_v9  ;;  %v6130_v27 = vld [vmem:[%s12377_s0 + $0x18d] ss:$16 sm:%s1343_s15]   ;;  %s1539_s15 = smov 192  ;;  %s2169_s14 = smov 3 }
  0x9a   :  { %1452 = vrot.lane.b32.xlu0 %v1451_v3, %s7116_s4  ;;  %v5899_v11 = vld [vmem:[%s12377_s0 + $0x680] ss:$16 sm:%s274_s17]   ;;  %5847 = vst.msk [vmem:[%s12378_s1 + $0x10] sm:$0xff] %vm16_vm3, %v56_v12   ;;  %s208_s17 = smov 3 }
  0x9b   :  { %v277_v13 = vsel %vm6_vm0, %v5899_v11, %v5898_v10  ;;  %v5900_v14 = vld [vmem:[%s12377_s0 + $0x680] ss:$16 sm:%s279_s21]   ;;  %5956 = vst.msk [vmem:[%s12378_s1 + $0x10] sm:$0xff] %vm353_vm4, %v7981_v32   ;;  %s211_s21 = smov 12 }
  0x9c   :  { %v5901_v15 = vld [vmem:[%s12377_s0 + $0x680] ss:$16 sm:%s284_s6]   ;;  %v282_v17 = vsel %vm10_vm1, %v5900_v14, %v277_v13  ;;  %v6131_v28 = vld [vmem:[%s12377_s0 + $0x18d] ss:$16 sm:%s1346_s19]   ;;  %v8144_v29 = vpop.permute.xlu0 %557   ;;  %s1503_s19 = smov 3  ;;  %s216_s6 = smov 48 }
  0x9d   :  { %v5878_v18 = vld [vmem:[%s12377_s0 + $0x480] ss:$16 sm:%s187_s16]   ;;  %v287_v19 = vsel %vm14_vm2, %v5901_v15, %v282_v17  ;;  %v1349_v30 = vsel %vm6_vm0, %v6131_v28, %v6130_v27  ;;  %v6132_v31 = vld [vmem:[%s12377_s0 + $0x18d] ss:$16 sm:%s1351_s23]   ;;  %s1506_s23 = smov 12  ;;  %s1511_s16 = smov 48 }
  0x9e   :  { %v5879_v20 = vld [vmem:[%s12377_s0 + $0x480] ss:$16 sm:%s190_s3]   ;;  %5902 = vst.msk [vmem:[%s12378_s1 + $0x68] sm:$0xff] %vm16_vm3, %v287_v19   ;;  %v1354_v32 = vsel %vm10_vm1, %v6132_v31, %v1349_v30  ;;  %s124_s3 = smov 3 }
  0x9f   :  { %v8100_v16 = vpop.permute.xlu2 %672   ;;  %v193_v21 = vsel %vm6_vm0, %v5879_v20, %v5878_v18  ;;  %v5880_v22 = vld [vmem:[%s12377_s0 + $0x480] ss:$16 sm:%s195_s27]   ;;  %5951 = vst.msk [vmem:[%s12378_s1 + $0x68] sm:$0xff] %vm353_vm4, %v512_v0   ;;  %s1529_s27 = smov 12 }
  0xa0   :  { %v198_v24 = vsel %vm10_vm1, %v5880_v22, %v193_v21  ;;  %v5881_v25 = vld [vmem:[%s12377_s0 + $0x480] ss:$16 sm:%s200_s13]   ;;  %v6133_v33 = vld [vmem:[%s12377_s0 + $0x18d] ss:$16 sm:%s1356_s2]   ;;  %s1483_s2 = smov 12  ;;  %s1493_s13 = smov 192 }
  0xa1   :  { %v203_v26 = vsel %vm14_vm2, %v5881_v25, %v198_v24  ;;  %v1359_v34 = vsel %vm14_vm2, %v6133_v33, %v1354_v32  ;;  %v6169_v35 = vld [vmem:[%s12377_s0 + $0x8c] ss:$16 sm:%s1526_s9]   ;;  %s295_s9 = smov 12  ;;  %v5903_v49 = vld [vmem:[%s12377_s0 + $0x700] ss:$16 sm:%s292_s25]   ;;  %s229_s25 = smov 3 }
  0xa2   :  { %5882 = vst.msk [vmem:[%s12378_s1 + $0x48] sm:$0xff] %vm16_vm3, %v203_v26   ;;  %v6170_v36 = vld [vmem:[%s12377_s0 + $0x8c] ss:$16 sm:%s1529_s27]   ;;  %1360 = vrot.lane.b32.xlu2 %v1359_v34, %s7115_s26  ;;  %s127_s27 = smov 12 }
  0xa3   :  { %5946 = vst.msk [vmem:[%s12378_s1 + $0x48] sm:$0xff] %vm353_vm4, %v489_v6   ;;  %v1532_v37 = vsel %vm6_vm0, %v6170_v36, %v6169_v35  ;;  %v6171_v38 = vld [vmem:[%s12377_s0 + $0x8c] ss:$16 sm:%s1534_s5]   ;;  %s305_s5 = smov 192 }
  0xa4   :  { %v1537_v39 = vsel %vm10_vm1, %v6171_v38, %v1532_v37  ;;  %v6172_v40 = vld [vmem:[%s12377_s0 + $0x8c] ss:$16 sm:%s1539_s15]   ;;  %v5904_v50 = vld [vmem:[%s12377_s0 + $0x700] ss:$16 sm:%s295_s9]   ;;  %s69_s15 = smov 48  ;;  %s1942_s9 = smov 12 }
  0xa5   :  { %v6164_v41 = vld [vmem:[%s12377_s0 + $0x60c] ss:$16 sm:%s1503_s19]   ;;  %v1542_v42 = vsel %vm14_vm2, %v6172_v40, %v1537_v39  ;;  %v298_v53 = vsel %vm6_vm0, %v5904_v50, %v5903_v49  ;;  %v5905_v55 = vld [vmem:[%s12377_s0 + $0x700] ss:$16 sm:%s300_s29]   ;;  %s1412_s19 = smov 3  ;;  %s1860_s29 = smov 192 }
  0xa6   :  { %v6165_v43 = vld [vmem:[%s12377_s0 + $0x60c] ss:$16 sm:%s1506_s23]   ;;  %1543 = vrot.lane.b32.xlu1 %v1542_v42, %s7116_s4  ;;  %v303_v57 = vsel %vm10_vm1, %v5905_v55, %v298_v53  ;;  %s1415_s23 = smov 12 }
  0xa7   :  { %v6166_v44 = vld [vmem:[%s12377_s0 + $0x60c] ss:$16 sm:%s1511_s16]   ;;  %v8188_v45 = vpop.permute.xlu1 %649   ;;  %v1509_v46 = vsel %vm6_vm0, %v6165_v43, %v6164_v41  ;;  %v5906_v56 = vld [vmem:[%s12377_s0 + $0x700] ss:$16 sm:%s305_s5]   ;;  %v741_v62 = vpop.permute.xlu2 %740   ;;  %s1420_s16 = smov 48  ;;  %s1598_s5 = smov 12 }
  0xa8   :  { %v6167_v47 = vld [vmem:[%s12377_s0 + $0x60c] ss:$16 sm:%s1516_s30]   ;;  %v1514_v48 = vsel %vm10_vm1, %v6166_v44, %v1509_v46  ;;  %v8202_v51 = vpop.permute.xlu0 %626   ;;  %v5883_v58 = vld [vmem:[%s12377_s0 + $0x500] ss:$16 sm:%s208_s17]   ;;  %v308_v59 = vsel %vm14_vm2, %v5906_v56, %v303_v57  ;;  %s1480_s30 = smov 3  ;;  %s1664_s17 = smov 3 }
  0xa9   :  { %v1519_v52 = vsel %vm14_vm2, %v6167_v47, %v1514_v48  ;;  %v5884_v60 = vld [vmem:[%s12377_s0 + $0x500] ss:$16 sm:%s211_s21]   ;;  %5907 = vst.msk [vmem:[%s12378_s1 + $0x70] sm:$0xff] %vm16_vm3, %v308_v59   ;;  %s74_s21 = smov 192 }
  0xaa   :  { %1520 = vrot.lane.b32.xlu0 %v1519_v52, %s7116_s4  ;;  %v5885_v61 = vld [vmem:[%s12377_s0 + $0x500] ss:$16 sm:%s216_s6]   ;;  %v214_v63 = vsel %vm6_vm0, %v5884_v60, %v5883_v58  ;;  %5971 = vst.msk [vmem:[%s12378_s1 + $0x70] sm:$0xff] %vm353_vm4, %v8046_v54   ;;  %s145_s6 = smov 3 }
  0xab   :  { %v5886_v0 = vld [vmem:[%s12377_s0 + $0x500] ss:$16 sm:%s221_s24]   ;;  %v219_v54 = vsel %vm10_vm1, %v5885_v61, %v214_v63  ;;  %v6145_v9 = vld [vmem:[%s12377_s0 + $0x78d] ss:$16 sm:%s1412_s19]   ;;  %s1608_s19 = smov 192  ;;  %s1677_s24 = smov 192 }
  0xac   :  { %v5863_v1 = vld [vmem:[%s12377_s0 + $0x300] ss:$16 sm:%s124_s3]   ;;  %v224_v2 = vsel %vm14_vm2, %v5886_v0, %v219_v54  ;;  %s1425_s3 = smov 192  ;;  %v6146_v12 = vld [vmem:[%s12377_s0 + $0x78d] ss:$16 sm:%s1415_s23]   ;;  %s1572_s23 = smov 3 }
  0xad   :  { %v5864_v3 = vld [vmem:[%s12377_s0 + $0x300] ss:$16 sm:%s127_s27]   ;;  %5887 = vst.msk [vmem:[%s12378_s1 + $0x50] sm:$0xff] %vm16_vm3, %v224_v2   ;;  %s1595_s27 = smov 3  ;;  %v1418_v14 = vsel %vm6_vm0, %v6146_v12, %v6145_v9 }
  0xae   :  { %v5865_v4 = vld [vmem:[%s12377_s0 + $0x300] ss:$16 sm:%s132_s10]   ;;  %v130_v6 = vsel %vm6_vm0, %v5864_v3, %v5863_v1  ;;  %5966 = vst.msk [vmem:[%s12378_s1 + $0x50] sm:$0xff] %vm353_vm4, %v8127_v23   ;;  %s1654_s10 = smov 192 }
  0xaf   :  { %v719_v5 = vpop.permute.xlu1 %718   ;;  %v5866_v7 = vld [vmem:[%s12377_s0 + $0x300] ss:$16 sm:%s137_s11]   ;;  %v135_v8 = vsel %vm10_vm1, %v5865_v4, %v130_v6  ;;  %v6147_v13 = vld [vmem:[%s12377_s0 + $0x78d] ss:$16 sm:%s1420_s16]   ;;  %s1603_s11 = smov 48  ;;  %s1575_s16 = smov 12  ;;  %v810_v24 = vpop.permute.xlu2 %809  }
  0xb0   :  { %v8265_v10 = vpop.permute.xlu0 %695   ;;  %v140_v11 = vsel %vm14_vm2, %v5866_v7, %v135_v8  ;;  %v6148_v15 = vld [vmem:[%s12377_s0 + $0x78d] ss:$16 sm:%s1425_s3]   ;;  %v1423_v17 = vsel %vm10_vm1, %v6147_v13, %v1418_v14  ;;  %v6184_v18 = vld [vmem:[%s12377_s0 + $0x68c] ss:$16 sm:%s1595_s27]   ;;  %s1580_s3 = smov 48  ;;  %s1827_s27 = smov 12 }
  0xb1   :  { %5867 = vst.msk [vmem:[%s12378_s1 + $0x30] sm:$0xff] %vm16_vm3, %v140_v11   ;;  %v1428_v19 = vsel %vm14_vm2, %v6148_v15, %v1423_v17  ;;  %v6185_v20 = vld [vmem:[%s12377_s0 + $0x68c] ss:$16 sm:%s1598_s5]   ;;  %s232_s5 = smov 12 }
  0xb2   :  { %5961 = vst.msk [vmem:[%s12378_s1 + $0x30] sm:$0xff] %vm353_vm4, %v8144_v29   ;;  %v6186_v21 = vld [vmem:[%s12377_s0 + $0x68c] ss:$16 sm:%s1603_s11]   ;;  %1429 = vrot.lane.b32.xlu2 %v1428_v19, %s7115_s26  ;;  %v1601_v22 = vsel %vm6_vm0, %v6185_v20, %v6184_v18  ;;  %s237_s11 = smov 48  ;;  %s1710_s26 = smov 3 }
  0xb3   :  { %v6187_v23 = vld [vmem:[%s12377_s0 + $0x68c] ss:$16 sm:%s1608_s19]   ;;  %6000 = vst.msk [vmem:[%s12378_s1 + $0x20] sm:$0xff] %vm720_vm5, %v741_v62   ;;  %v1606_v25 = vsel %vm10_vm1, %v6186_v21, %v1601_v22  ;;  %s242_s19 = smov 192 }
  0xb4   :  { %v6179_v26 = vld [vmem:[%s12377_s0 + $0x48c] ss:$16 sm:%s1572_s23]   ;;  %v1611_v29 = vsel %vm14_vm2, %v6187_v23, %v1606_v25  ;;  %v5888_v34 = vld [vmem:[%s12377_s0 + $0x580] ss:$16 sm:%s229_s25]   ;;  %s61_s25 = smov 3  ;;  %s2204_s23 = smov 192 }
  0xb5   :  { %v6180_v27 = vld [vmem:[%s12377_s0 + $0x48c] ss:$16 sm:%s1575_s16]   ;;  %1612 = vrot.lane.b32.xlu1 %v1611_v29, %s7116_s4  ;;  %721 = vst.msk [vmem:[%s12378_s1] sm:$0xff] %vm720_vm5, %v719_v5   ;;  %s2016_s16 = smov 48 }
  0xb6   :  { %v1578_v30 = vsel %vm6_vm0, %v6180_v27, %v6179_v26  ;;  %v6181_v31 = vld [vmem:[%s12377_s0 + $0x48c] ss:$16 sm:%s1580_s3]   ;;  %v5889_v37 = vld [vmem:[%s12377_s0 + $0x580] ss:$16 sm:%s232_s5]   ;;  %s153_s3 = smov 48  ;;  %s64_s5 = smov 12 }
  0xb7   :  { %v8314_v28 = vpop.permute.xlu1 %786   ;;  %v6182_v32 = vld [vmem:[%s12377_s0 + $0x48c] ss:$16 sm:%s1585_s7]   ;;  %v1583_v33 = vsel %vm10_vm1, %v6181_v31, %v1578_v30  ;;  %v5890_v38 = vld [vmem:[%s12377_s0 + $0x580] ss:$16 sm:%s237_s11]   ;;  %s158_s7 = smov 192  ;;  %v235_v39 = vsel %vm6_vm0, %v5889_v37, %v5888_v34  ;;  %v8374_v52 = vpop.permute.xlu2 %878   ;;  %s1733_s11 = smov 3 }
  0xb8   :  { %v8333_v35 = vpop.permute.xlu0 %763   ;;  %v1588_v36 = vsel %vm14_vm2, %v6182_v32, %v1583_v33  ;;  %v5891_v40 = vld [vmem:[%s12377_s0 + $0x580] ss:$16 sm:%s242_s19]   ;;  %6015 = vst.msk [vmem:[%s12378_s1 + $0x8] sm:$0xff] %vm720_vm5, %v810_v24   ;;  %v240_v41 = vsel %vm10_vm1, %v5890_v38, %v235_v39  ;;  %s1759_s19 = smov 12 }
  0xb9   :  { %1589 = vrot.lane.b32.xlu0 %v1588_v36, %s7116_s4  ;;  %v5868_v42 = vld [vmem:[%s12377_s0 + $0x380] ss:$16 sm:%s145_s6]   ;;  %v245_v44 = vsel %vm14_vm2, %v5891_v40, %v240_v41  ;;  %s1672_s6 = smov 48  ;;  %6010 = vst.msk [vmem:[%s12378_s1 + $0x60] sm:$0xff] %vm720_vm5, %v8314_v28  }
  0xba   :  { %v5869_v43 = vld [vmem:[%s12377_s0 + $0x380] ss:$16 sm:%s148_s22]   ;;  %5892 = vst.msk [vmem:[%s12378_s1 + $0x58] sm:$0xff] %vm16_vm3, %v245_v44   ;;  %s326_s22 = smov 192 }
  0xbb   :  { %v151_v46 = vsel %vm6_vm0, %v5869_v43, %v5868_v42  ;;  %v5870_v47 = vld [vmem:[%s12377_s0 + $0x380] ss:$16 sm:%s153_s3]   ;;  %5986 = vst.msk [vmem:[%s12378_s1 + $0x58] sm:$0xff] %vm353_vm4, %v8100_v16   ;;  %s1802_s3 = smov 3 }
  0xbc   :  { %v5871_v48 = vld [vmem:[%s12377_s0 + $0x380] ss:$16 sm:%s158_s7]   ;;  %v156_v49 = vsel %vm10_vm1, %v5870_v47, %v151_v46  ;;  %v6159_v61 = vld [vmem:[%s12377_s0 + $0x40c] ss:$16 sm:%s1480_s30]   ;;  %s1641_s30 = smov 3  ;;  %s1805_s7 = smov 12 }
  0xbd   :  { %v5848_v50 = vld [vmem:[%s12377_s0 + $0x180] ss:$16 sm:%s61_s25]   ;;  %v161_v16 = vsel %vm14_vm2, %v5871_v48, %v156_v49  ;;  %s1488_s25 = smov 48  ;;  %v6160_v62 = vld [vmem:[%s12377_s0 + $0x40c] ss:$16 sm:%s1483_s2]   ;;  %s1847_s2 = smov 3 }
  0xbe   :  { %v5849_v53 = vld [vmem:[%s12377_s0 + $0x180] ss:$16 sm:%s64_s5]   ;;  %5872 = vst.msk [vmem:[%s12378_s1 + $0x38] sm:$0xff] %vm16_vm3, %v161_v16   ;;  %v1486_v63 = vsel %vm6_vm0, %v6160_v62, %v6159_v61  ;;  %s2090_s5 = smov 192 }
  0xbf   :  { %v8385_v55 = vpop.permute.xlu1 %855   ;;  %v67_v56 = vsel %vm6_vm0, %v5849_v53, %v5848_v50  ;;  %v5850_v57 = vld [vmem:[%s12377_s0 + $0x180] ss:$16 sm:%s69_s15]   ;;  %5981 = vst.msk [vmem:[%s12378_s1 + $0x38] sm:$0xff] %vm353_vm4, %v8188_v45   ;;  %s1756_s15 = smov 3 }
  0xc0   :  { %v72_v45 = vsel %vm10_vm1, %v5850_v57, %v67_v56  ;;  %v5851_v58 = vld [vmem:[%s12377_s0 + $0x180] ss:$16 sm:%s74_s21]   ;;  %v8404_v59 = vpop.permute.xlu0 %832   ;;  %v6161_v0 = vld [vmem:[%s12377_s0 + $0x40c] ss:$16 sm:%s1488_s25]   ;;  %s1649_s25 = smov 48  ;;  %v8447_v6 = vpop.permute.xlu2 %947   ;;  %s1736_s21 = smov 12 }
  0xc1   :  { %v77_v60 = vsel %vm14_vm2, %v5851_v58, %v72_v45  ;;  %v6162_v54 = vld [vmem:[%s12377_s0 + $0x40c] ss:$16 sm:%s1493_s13]   ;;  %6005 = vst.msk [vmem:[%s12378_s1 + $0x40] sm:$0xff] %vm720_vm5, %v8333_v35   ;;  %s1562_s13 = smov 192 }
  0xc2   :  { %5852 = vst.msk [vmem:[%s12378_s1 + $0x18] sm:$0xff] %vm16_vm3, %v77_v60   ;;  %v6199_v2 = vld [vmem:[%s12377_s0 + $0x50c] ss:$16 sm:%s1664_s17]   ;;  %s313_s17 = smov 3 }
  0xc3   :  { %5976 = vst.msk [vmem:[%s12378_s1 + $0x18] sm:$0xff] %vm353_vm4, %v8202_v51   ;;  %v1491_v51 = vsel %vm10_vm1, %v6161_v0, %v1486_v63  ;;  %v6200_v3 = vld [vmem:[%s12377_s0 + $0x50c] ss:$16 sm:%s1667_s18]   ;;  %s316_s18 = smov 12 }
  0xc4   :  { %v1496_v1 = vsel %vm14_vm2, %v6162_v54, %v1491_v51  ;;  %v1670_v4 = vsel %vm6_vm0, %v6200_v3, %v6199_v2  ;;  %v6201_v5 = vld [vmem:[%s12377_s0 + $0x50c] ss:$16 sm:%s1672_s6]   ;;  %s321_s6 = smov 48  ;;  %v5908_v20 = vld [vmem:[%s12377_s0 + $0x780] ss:$16 sm:%s313_s17]   ;;  %s1870_s17 = smov 3 }
  0xc5   :  { %1497 = vrot.lane.b32.xlu2 %v1496_v1, %s7116_s4  ;;  %v1675_v7 = vsel %vm10_vm1, %v6201_v5, %v1670_v4  ;;  %v6202_v8 = vld [vmem:[%s12377_s0 + $0x50c] ss:$16 sm:%s1677_s24]   ;;  %6030 = vst.msk [vmem:[%s12378_s1 + $0x68] sm:$0xff] %vm720_vm5, %v8374_v52   ;;  %s1746_s24 = smov 192 }
  0xc6   :  { %v6194_v9 = vld [vmem:[%s12377_s0 + $0x30c] ss:$16 sm:%s1641_s30]   ;;  %v1680_v12 = vsel %vm14_vm2, %v6202_v8, %v1675_v7  ;;  %v5909_v21 = vld [vmem:[%s12377_s0 + $0x780] ss:$16 sm:%s316_s18]   ;;  %s1687_s30 = smov 3  ;;  %s7117_s18 = smov 88  }
  0xc7   :  { %v8456_v11 = vpop.permute.xlu1 %924   ;;  %v6195_v13 = vld [vmem:[%s12377_s0 + $0x30c] ss:$16 sm:%s1644_s8]   ;;  %1681 = vrot.lane.b32.xlu1 %v1680_v12, %s7116_s4  ;;  %s1552_s8 = smov 12  ;;  %v319_v23 = vsel %vm6_vm0, %v5909_v21, %v5908_v20  ;;  %6025 = vst.msk [vmem:[%s12378_s1 + $0x48] sm:$0xff] %vm720_vm5, %v8385_v55  }
  0xc8   :  { %v6196_v14 = vld [vmem:[%s12377_s0 + $0x30c] ss:$16 sm:%s1649_s25]   ;;  %v1647_v15 = vsel %vm6_vm0, %v6195_v13, %v6194_v9  ;;  %v8475_v18 = vpop.permute.xlu0 %901   ;;  %s1557_s25 = smov 48  ;;  %v5910_v24 = vld [vmem:[%s12377_s0 + $0x780] ss:$16 sm:%s321_s6]   ;;  %s1741_s6 = smov 48  ;;  %v8517_v33 = vpop.permute.xlu2 %1016  }
  0xc9   :  { %v6197_v17 = vld [vmem:[%s12377_s0 + $0x30c] ss:$16 sm:%s1654_s10]   ;;  %v1652_v19 = vsel %vm10_vm1, %v6196_v14, %v1647_v15  ;;  %v5911_v25 = vld [vmem:[%s12377_s0 + $0x780] ss:$16 sm:%s326_s22]   ;;  %v324_v26 = vsel %vm10_vm1, %v5910_v24, %v319_v23  ;;  %s1924_s22 = smov 48  ;;  %s1832_s10 = smov 48 }
  0xca   :  { %v1657_v22 = vsel %vm14_vm2, %v6197_v17, %v1652_v19  ;;  %v6174_v27 = vld [vmem:[%s12377_s0 + $0x28c] ss:$16 sm:%s1549_s28]   ;;  %v329_v28 = vsel %vm14_vm2, %v5911_v25, %v324_v26  ;;  %6020 = vst.msk [vmem:[%s12378_s1 + $0x28] sm:$0xff] %vm720_vm5, %v8404_v59   ;;  %s1906_s28 = smov 192 }
  0xcb   :  { %1658 = vrot.lane.b32.xlu0 %v1657_v22, %s7116_s4  ;;  %v6175_v29 = vld [vmem:[%s12377_s0 + $0x28c] ss:$16 sm:%s1552_s8]   ;;  %5912 = vst.msk [vmem:[%s12378_s1 + $0x78] sm:$0xff] %vm16_vm3, %v329_v28   ;;  %s1713_s8 = smov 12  ;;  %vm4757_vm3 = vcmask 261312  }
  0xcc   :  { %v6176_v30 = vld [vmem:[%s12377_s0 + $0x28c] ss:$16 sm:%s1557_s25]   ;;  %v1555_v31 = vsel %vm6_vm0, %v6175_v29, %v6174_v27  ;;  %5991 = vst.msk [vmem:[%s12378_s1 + $0x78] sm:$0xff] %vm353_vm4, %v8265_v10   ;;  %s2126_s25 = smov 12 }
  0xcd   :  { %v6177_v32 = vld [vmem:[%s12377_s0 + $0x28c] ss:$16 sm:%s1562_s13]   ;;  %v1560_v10 = vsel %vm10_vm1, %v6176_v30, %v1555_v31  ;;  %s1723_s13 = smov 192  ;;  %6045 = vst.msk [vmem:[%s12378_s1 + $0x50] sm:$0xff] %vm720_vm5, %v8447_v6  }
  0xce   :  { %v6214_v34 = vld [vmem:[%s12377_s0 + $0x38c] ss:$16 sm:%s1733_s11]   ;;  %v1565_v36 = vsel %vm14_vm2, %v6177_v32, %v1560_v10  ;;  %s1618_s11 = smov 3  ;;  %v6229_v59 = vld [vmem:[%s12377_s0 + $0xb] ss:$16 sm:%s1802_s3]   ;;  %s1939_s3 = smov 3 }
  0xcf   :  { %v8528_v35 = vpop.permute.xlu1 %993   ;;  %v6215_v37 = vld [vmem:[%s12377_s0 + $0x38c] ss:$16 sm:%s1736_s21]   ;;  %1566 = vrot.lane.b32.xlu2 %v1565_v36, %s7116_s4  ;;  %s1621_s21 = smov 12  ;;  %6040 = vst.msk [vmem:[%s12378_s1 + $0x30] sm:$0xff] %vm720_vm5, %v8456_v11  }
  0xd0   :  { %v6216_v38 = vld [vmem:[%s12377_s0 + $0x38c] ss:$16 sm:%s1741_s6]   ;;  %v1739_v39 = vsel %vm6_vm0, %v6215_v37, %v6214_v34  ;;  %v8547_v41 = vpop.permute.xlu0 %970   ;;  %s1626_s6 = smov 48  ;;  %v8591_v45 = vpop.permute.xlu2 %1085   ;;  %v6230_v60 = vld [vmem:[%s12377_s0 + $0xb] ss:$16 sm:%s1805_s7]   ;;  %s1690_s7 = smov 12 }
  0xd1   :  { %v6217_v40 = vld [vmem:[%s12377_s0 + $0x38c] ss:$16 sm:%s1746_s24]   ;;  %v1744_v42 = vsel %vm10_vm1, %v6216_v38, %v1739_v39  ;;  %s1631_s24 = smov 192  ;;  %v1808_v63 = vsel %vm6_vm0, %v6230_v60, %v6229_v59  ;;  %6035 = vst.msk [vmem:[%s12378_s1 + $0x10] sm:$0xff] %vm720_vm5, %v8475_v18  }
  0xd2   :  { %v6209_v43 = vld [vmem:[%s12377_s0 + $0x18c] ss:$16 sm:%s1710_s26]   ;;  %v1749_v46 = vsel %vm14_vm2, %v6217_v40, %v1744_v42  ;;  %v6243_v18 = vld [vmem:[%s12377_s0 + $0x60b] ss:$16 sm:%s1870_s17]   ;;  %s1850_s26 = smov 12  ;;  %s2054_s17 = smov 3 }
  0xd3   :  { %v6210_v44 = vld [vmem:[%s12377_s0 + $0x18c] ss:$16 sm:%s1713_s8]   ;;  %1750 = vrot.lane.b32.xlu1 %v1749_v46, %s7116_s4  ;;  %6060 = vst.msk [vmem:[%s12378_s1 + $0x38] sm:$0xff] %vm720_vm5, %v8517_v33   ;;  %s2480_s8 = smov 192 }
  0xd4   :  { %v1716_v47 = vsel %vm6_vm0, %v6210_v44, %v6209_v43  ;;  %v6211_v48 = vld [vmem:[%s12377_s0 + $0x18c] ss:$16 sm:%s1718_s12]   ;;  %s1810_s12 = smov 48  ;;  %v6244_v21 = vld [vmem:[%s12377_s0 + $0x60b] ss:$16 sm:%s1873_s20]   ;;  %s1919_s20 = smov 12 }
  0xd5   :  { %v6212_v49 = vld [vmem:[%s12377_s0 + $0x18c] ss:$16 sm:%s1723_s13]   ;;  %v1721_v50 = vsel %vm10_vm1, %v6211_v48, %v1716_v47  ;;  %s1815_s13 = smov 192  ;;  %v6231_v0 = vld [vmem:[%s12377_s0 + $0xb] ss:$16 sm:%s1810_s12]   ;;  %s1695_s12 = smov 48  ;;  %v1876_v24 = vsel %vm6_vm0, %v6244_v21, %v6243_v18 }
  0xd6   :  { %v6189_v52 = vld [vmem:[%s12377_s0 + $0x10c] ss:$16 sm:%s1618_s11]   ;;  %v1726_v16 = vsel %vm14_vm2, %v6212_v49, %v1721_v50  ;;  %s1779_s11 = smov 3  ;;  %v6232_v51 = vld [vmem:[%s12377_s0 + $0xb] ss:$16 sm:%s1815_s13]   ;;  %v1813_v54 = vsel %vm10_vm1, %v6231_v0, %v1808_v63  ;;  %s1700_s13 = smov 192 }
  0xd7   :  { %v6190_v53 = vld [vmem:[%s12377_s0 + $0x10c] ss:$16 sm:%s1621_s21]   ;;  %1727 = vrot.lane.b32.xlu0 %v1726_v16, %s7116_s4  ;;  %s1782_s21 = smov 12  ;;  %v1818_v3 = vsel %vm14_vm2, %v6232_v51, %v1813_v54  ;;  %6055 = vst.msk [vmem:[%s12378_s1 + $0x18] sm:$0xff] %vm720_vm5, %v8528_v35  }
  0xd8   :  { %v6191_v55 = vld [vmem:[%s12377_s0 + $0x10c] ss:$16 sm:%s1626_s6]   ;;  %v1624_v56 = vsel %vm6_vm0, %v6190_v53, %v6189_v52  ;;  %s1787_s6 = smov 48  ;;  %v8664_v19 = vpop.permute.xlu2 %1153   ;;  %v6238_v26 = vld [vmem:[%s12377_s0 + $0x40b] ss:$16 sm:%s1847_s2]   ;;  %s1769_s2 = smov 192 }
  0xd9   :  { %v6192_v57 = vld [vmem:[%s12377_s0 + $0x10c] ss:$16 sm:%s1631_s24]   ;;  %v1629_v58 = vsel %vm10_vm1, %v6191_v55, %v1624_v56  ;;  %v8600_v61 = vpop.permute.xlu1 %1062   ;;  %s1792_s24 = smov 192  ;;  %v6239_v28 = vld [vmem:[%s12377_s0 + $0x40b] ss:$16 sm:%s1850_s26]   ;;  %s2217_s26 = smov 12 }
  0xda   :  { %v1634_v62 = vsel %vm14_vm2, %v6192_v57, %v1629_v58  ;;  %v6224_v1 = vld [vmem:[%s12377_s0 + $0x78c] ss:$16 sm:%s1779_s11]   ;;  %v1853_v31 = vsel %vm6_vm0, %v6239_v28, %v6238_v26  ;;  %v6241_v33 = vld [vmem:[%s12377_s0 + $0x40b] ss:$16 sm:%s1860_s29]   ;;  %s2146_s11 = smov 3  ;;  %s2273_s29 = smov 192 }
  0xdb   :  { %1635 = vrot.lane.b32.xlu2 %v1634_v62, %s7116_s4  ;;  %v6225_v4 = vld [vmem:[%s12377_s0 + $0x78c] ss:$16 sm:%s1782_s21]   ;;  %1819 = vrot.lane.b32.xlu1 %v1818_v3, %s7117_s18  ;;  %s1878_s21 = smov 48 }
  0xdc   :  { %v8620_v2 = vpop.permute.xlu0 %1039   ;;  %v6226_v5 = vld [vmem:[%s12377_s0 + $0x78c] ss:$16 sm:%s1787_s6]   ;;  %v1785_v6 = vsel %vm6_vm0, %v6225_v4, %v6224_v1  ;;  %v6245_v22 = vld [vmem:[%s12377_s0 + $0x60b] ss:$16 sm:%s1878_s21]   ;;  %s1764_s6 = smov 48  ;;  %s2291_s21 = smov 48 }
  0xdd   :  { %v6227_v7 = vld [vmem:[%s12377_s0 + $0x78c] ss:$16 sm:%s1792_s24]   ;;  %v1790_v9 = vsel %vm10_vm1, %v6226_v5, %v1785_v6  ;;  %v1881_v27 = vsel %vm10_vm1, %v6245_v22, %v1876_v24  ;;  %6050 = vst.msk [vmem:[%s12378_s1 + $0x70] sm:$0xff] %vm720_vm5, %v8547_v41   ;;  %s2571_s24 = smov 192 }
  0xde   :  { %v6204_v8 = vld [vmem:[%s12377_s0 + $0x70c] ss:$16 sm:%s1687_s30]   ;;  %v1795_v12 = vsel %vm14_vm2, %v6227_v7, %v1790_v9  ;;  %s1883_s30 = smov 192  ;;  %v6258_v41 = vld [vmem:[%s12377_s0 + $0x48b] ss:$16 sm:%s1939_s3]   ;;  %s1929_s3 = smov 192 }
  0xdf   :  { %v6205_v11 = vld [vmem:[%s12377_s0 + $0x70c] ss:$16 sm:%s1690_s7]   ;;  %1796 = vrot.lane.b32.xlu0 %v1795_v12, %s7116_s4  ;;  %1088 = vst.msk [vmem:[%s12378_s1] sm:$0xff] %vm1087_vm6, %v8591_v45   ;;  %s1824_s7 = smov 3 }
  0xe0   :  { %v1693_v13 = vsel %vm6_vm0, %v6205_v11, %v6204_v8  ;;  %v6206_v14 = vld [vmem:[%s12377_s0 + $0x70c] ss:$16 sm:%s1695_s12]   ;;  %v6246_v25 = vld [vmem:[%s12377_s0 + $0x60b] ss:$16 sm:%s1883_s30]   ;;  %s1947_s12 = smov 48  ;;  %v8737_v44 = vpop.permute.xlu2 %1222   ;;  %s2021_s30 = smov 192 }
  0xe1   :  { %v6207_v15 = vld [vmem:[%s12377_s0 + $0x70c] ss:$16 sm:%s1700_s13]   ;;  %v1698_v17 = vsel %vm10_vm1, %v6206_v14, %v1693_v13  ;;  %s1855_s13 = smov 48  ;;  %v8673_v23 = vpop.permute.xlu1 %1130   ;;  %v1886_v30 = vsel %vm14_vm2, %v6246_v25, %v1881_v27  ;;  %v6259_v43 = vld [vmem:[%s12377_s0 + $0x48b] ss:$16 sm:%s1942_s9]   ;;  %s2131_s9 = smov 48 }
  0xe2   :  { %v1703_v20 = vsel %vm14_vm2, %v6207_v15, %v1698_v17  ;;  %v6240_v32 = vld [vmem:[%s12377_s0 + $0x40b] ss:$16 sm:%s1855_s13]   ;;  %v6219_v34 = vld [vmem:[%s12377_s0 + $0x58c] ss:$16 sm:%s1756_s15]   ;;  %s1952_s13 = smov 192  ;;  %v1945_v46 = vsel %vm6_vm0, %v6259_v43, %v6258_v41  ;;  %s2057_s15 = smov 12 }
  0xe3   :  { %1704 = vrot.lane.b32.xlu2 %v1703_v20, %s7116_s4  ;;  %v1858_v10 = vsel %vm10_vm1, %v6240_v32, %v1853_v31  ;;  %v6220_v35 = vld [vmem:[%s12377_s0 + $0x58c] ss:$16 sm:%s1759_s19]   ;;  %1887 = vrot.lane.b32.xlu1 %v1886_v30, %s7117_s18  ;;  %s1916_s19 = smov 3 }
  0xe4   :  { %v8692_v29 = vpop.permute.xlu0 %1107   ;;  %v1863_v36 = vsel %vm14_vm2, %v6241_v33, %v1858_v10  ;;  %v1762_v37 = vsel %vm6_vm0, %v6220_v35, %v6219_v34  ;;  %v6221_v38 = vld [vmem:[%s12377_s0 + $0x58c] ss:$16 sm:%s1764_s6]   ;;  %v6260_v47 = vld [vmem:[%s12377_s0 + $0x48b] ss:$16 sm:%s1947_s12]   ;;  %s2177_s6 = smov 48  ;;  %s2360_s12 = smov 48 }
  0xe5   :  { %v1767_v39 = vsel %vm10_vm1, %v6221_v38, %v1762_v37  ;;  %v6222_v40 = vld [vmem:[%s12377_s0 + $0x58c] ss:$16 sm:%s1769_s2]   ;;  %v6261_v48 = vld [vmem:[%s12377_s0 + $0x48b] ss:$16 sm:%s1952_s13]   ;;  %v1950_v50 = vsel %vm10_vm1, %v6260_v47, %v1945_v46  ;;  %s1837_s13 = smov 192  ;;  %s1985_s2 = smov 3 }
  0xe6   :  { %v1772_v42 = vsel %vm14_vm2, %v6222_v40, %v1767_v39  ;;  %v6253_v52 = vld [vmem:[%s12377_s0 + $0x28b] ss:$16 sm:%s1916_s19]   ;;  %v1955_v53 = vsel %vm14_vm2, %v6261_v48, %v1950_v50  ;;  %6070 = vst.msk [vmem:[%s12378_s1 + $0x78] sm:$0xff] %vm720_vm5, %v8600_v61   ;;  %s2008_s19 = smov 3 }
  0xe7   :  { %1864 = vrot.lane.b32.xlu0 %v1863_v36, %s7117_s18  ;;  %v6254_v16 = vld [vmem:[%s12377_s0 + $0x28b] ss:$16 sm:%s1919_s20]   ;;  %s2011_s20 = smov 12  ;;  %6065 = vst.msk [vmem:[%s12378_s1 + $0x58] sm:$0xff] %vm720_vm5, %v8620_v2  }
  0xe8   :  { %v1922_v55 = vsel %vm6_vm0, %v6254_v16, %v6253_v52  ;;  %v6255_v56 = vld [vmem:[%s12377_s0 + $0x28b] ss:$16 sm:%s1924_s22]   ;;  %6089 = vst.msk [vmem:[%s12378_s1 + $0x60] sm:$0xff] %vm1087_vm6, %v8664_v19   ;;  %s2199_s22 = smov 48 }
  0xe9   :  { %v8746_v49 = vpop.permute.xlu1 %1199   ;;  %v1927_v45 = vsel %vm10_vm1, %v6255_v56, %v1922_v55  ;;  %v6256_v58 = vld [vmem:[%s12377_s0 + $0x28b] ss:$16 sm:%s1929_s3]   ;;  %6084 = vst.msk [vmem:[%s12378_s1 + $0x40] sm:$0xff] %vm1087_vm6, %v8673_v23   ;;  %s2240_s3 = smov 12 }
  0xea   :  { %v6233_v59 = vld [vmem:[%s12377_s0 + $0x20b] ss:$16 sm:%s1824_s7]   ;;  %v1932_v60 = vsel %vm14_vm2, %v6256_v58, %v1927_v45  ;;  %6079 = vst.msk [vmem:[%s12378_s1 + $0x20] sm:$0xff] %vm1087_vm6, %v8692_v29   ;;  %s2123_s7 = smov 3 }
  0xeb   :  { %1773 = vrot.lane.b32.xlu2 %v1772_v42, %s7116_s4  ;;  %v6234_v61 = vld [vmem:[%s12377_s0 + $0x20b] ss:$16 sm:%s1827_s27]   ;;  %1956 = vrot.lane.b32.xlu1 %v1955_v53, %s7117_s18  ;;  %s1988_s27 = smov 12  ;;  %s7118_s4 = smov 80  }
  0xec   :  { %v8766_v57 = vpop.permute.xlu0 %1176   ;;  %v6235_v62 = vld [vmem:[%s12377_s0 + $0x20b] ss:$16 sm:%s1832_s10]   ;;  %v1830_v63 = vsel %vm6_vm0, %v6234_v61, %v6233_v59  ;;  %s1993_s10 = smov 48  ;;  %6104 = vst.msk [vmem:[%s12378_s1 + $0x48] sm:$0xff] %vm1087_vm6, %v8737_v44  }
  0xed   :  { %v6236_v0 = vld [vmem:[%s12377_s0 + $0x20b] ss:$16 sm:%s1837_s13]   ;;  %v1835_v51 = vsel %vm10_vm1, %v6235_v62, %v1830_v63  ;;  %s1998_s13 = smov 192  ;;  %v8817_v8 = vpop.permute.xlu2 %1291   ;;  %6099 = vst.msk [vmem:[%s12378_s1 + $0x28] sm:$0xff] %vm1087_vm6, %v8746_v49  }
  0xee   :  { %v6273_v54 = vld [vmem:[%s12377_s0 + $0x30b] ss:$16 sm:%s2008_s19]   ;;  %v1840_v2 = vsel %vm14_vm2, %v6236_v0, %v1835_v51  ;;  %s1893_s19 = smov 3  ;;  %6094 = vst.msk [vmem:[%s12378_s1 + $0x8] sm:$0xff] %vm1087_vm6, %v8766_v57  }
  0xef   :  { %v6274_v1 = vld [vmem:[%s12377_s0 + $0x30b] ss:$16 sm:%s2011_s20]   ;;  %1933 = vrot.lane.b32.xlu0 %v1932_v60, %s7117_s18  ;;  %s1896_s20 = smov 12  ;;  %6119 = vst.msk [vmem:[%s12378_s1 + $0x30] sm:$0xff] %vm1087_vm6, %v8817_v8  }
  0xf0   :  { %v2014_v3 = vsel %vm6_vm0, %v6274_v1, %v6273_v54  ;;  %v6275_v4 = vld [vmem:[%s12377_s0 + $0x30b] ss:$16 sm:%s2016_s16]   ;;  %s1901_s16 = smov 48  ;;  %v6318_v8 = vld [vmem:[%s12377_s0 + $0x40a] ss:$16 sm:%s2217_s26]   ;;  %s2103_s26 = smov 12 }
  0xf1   :  { %v2019_v5 = vsel %vm10_vm1, %v6275_v4, %v2014_v3  ;;  %v6276_v6 = vld [vmem:[%s12377_s0 + $0x30b] ss:$16 sm:%s2021_s30]   ;;  %v8819_v9 = vpop.permute.xlu1 %1268   ;;  %s2401_s30 = smov 12 }
  0xf2   :  { %v6268_v7 = vld [vmem:[%s12377_s0 + $0x10b] ss:$16 sm:%s1985_s2]   ;;  %v2024_v13 = vsel %vm14_vm2, %v6276_v6, %v2019_v5  ;;  %s2077_s2 = smov 3  ;;  %6114 = vst.msk [vmem:[%s12378_s1 + $0x10] sm:$0xff] %vm1087_vm6, %v8819_v9  }
  0xf3   :  { %v6269_v11 = vld [vmem:[%s12377_s0 + $0x10b] ss:$16 sm:%s1988_s27]   ;;  %1841 = vrot.lane.b32.xlu2 %v1840_v2, %s7117_s18  ;;  %s2080_s27 = smov 12  ;;  %2025 = vrot.lane.b32.xlu1 %v2024_v13, %s7117_s18 }
  0xf4   :  { %v6270_v12 = vld [vmem:[%s12377_s0 + $0x10b] ss:$16 sm:%s1993_s10]   ;;  %v1991_v14 = vsel %vm6_vm0, %v6269_v11, %v6268_v7  ;;  %v8838_v17 = vpop.permute.xlu0 %1245   ;;  %s2085_s10 = smov 48 }
  0xf5   :  { %v6271_v15 = vld [vmem:[%s12377_s0 + $0x10b] ss:$16 sm:%s1998_s13]   ;;  %v1996_v18 = vsel %vm10_vm1, %v6270_v12, %v1991_v14  ;;  %6109 = vst.msk [vmem:[%s12378_s1 + $0x68] sm:$0xff] %vm1087_vm6, %v8838_v17   ;;  %s2561_s13 = smov 12 }
  0xf6   :  { %v6248_v19 = vld [vmem:[%s12377_s0 + $0x8b] ss:$16 sm:%s1893_s19]   ;;  %v2001_v21 = vsel %vm14_vm2, %v6271_v15, %v1996_v18  ;;  %s2337_s19 = smov 48 }
  0xf7   :  { %v6249_v20 = vld [vmem:[%s12377_s0 + $0x8b] ss:$16 sm:%s1896_s20]   ;;  %2002 = vrot.lane.b32.xlu0 %v2001_v21, %s7117_s18  ;;  %s2194_s20 = smov 12 }
  0xf8   :  { %v1899_v22 = vsel %vm6_vm0, %v6249_v20, %v6248_v19  ;;  %v6250_v23 = vld [vmem:[%s12377_s0 + $0x8b] ss:$16 sm:%s1901_s16]   ;;  %s2062_s16 = smov 48  ;;  %v6313_v17 = vld [vmem:[%s12377_s0 + $0x20a] ss:$16 sm:%s2194_s20]   ;;  %s2286_s20 = smov 12 }
  0xf9   :  { %v6251_v24 = vld [vmem:[%s12377_s0 + $0x8b] ss:$16 sm:%s1906_s28]   ;;  %v1904_v25 = vsel %vm10_vm1, %v6250_v23, %v1899_v22  ;;  %s2067_s28 = smov 192  ;;  %v8889_v34 = vpop.permute.xlu1 %1337   ;;  %v6314_v19 = vld [vmem:[%s12377_s0 + $0x20a] ss:$16 sm:%s2199_s22]   ;;  %s2627_s22 = smov 3 }
  0xfa   :  { %v6288_v26 = vld [vmem:[%s12377_s0 + $0x18b] ss:$16 sm:%s2077_s2]   ;;  %v1909_v29 = vsel %vm14_vm2, %v6251_v24, %v1904_v25  ;;  %s1962_s2 = smov 3  ;;  %v6315_v20 = vld [vmem:[%s12377_s0 + $0x20a] ss:$16 sm:%s2204_s23]   ;;  %s2296_s23 = smov 192 }
  0xfb   :  { %v6289_v27 = vld [vmem:[%s12377_s0 + $0x18b] ss:$16 sm:%s2080_s27]   ;;  %s1965_s27 = smov 12  ;;  %1910 = vrot.lane.b32.xlu2 %v1909_v29, %s7117_s18  ;;  %6129 = vst.msk [vmem:[%s12378_s1 + $0x70] sm:$0xff] %vm1087_vm6, %v8889_v34  }
  0xfc   :  { %v6290_v28 = vld [vmem:[%s12377_s0 + $0x18b] ss:$16 sm:%s2085_s10]   ;;  %v2083_v30 = vsel %vm6_vm0, %v6289_v27, %v6288_v26  ;;  %s1970_s10 = smov 48  ;;  %v8909_v41 = vpop.permute.xlu0 %1314   ;;  %v1361_v59 = vpop.permute.xlu2 %1360   ;;  %v6335_v34 = vld [vmem:[%s12377_s0 + $0x28a] ss:$16 sm:%s2296_s23]   ;;  %s2365_s23 = smov 192 }
  0xfd   :  { %v6291_v31 = vld [vmem:[%s12377_s0 + $0x18b] ss:$16 sm:%s2090_s5]   ;;  %v2088_v32 = vsel %vm10_vm1, %v6290_v28, %v2083_v30  ;;  %s1975_s5 = smov 192  ;;  %6134 = vst.msk [vmem:[%s12378_s1 + $0x18] sm:$0xff] %vm1087_vm6, %v1361_v59  }
  0xfe   :  { %v6283_v33 = vld [vmem:[%s12377_s0 + $0x70b] ss:$16 sm:%s2054_s17]   ;;  %v2093_v38 = vsel %vm14_vm2, %v6291_v31, %v2088_v32  ;;  %v6333_v32 = vld [vmem:[%s12377_s0 + $0x28a] ss:$16 sm:%s2286_s20]   ;;  %s2309_s17 = smov 12  ;;  %s2536_s20 = smov 3 }
  0xff   :  { %v6284_v10 = vld [vmem:[%s12377_s0 + $0x70b] ss:$16 sm:%s2057_s15]   ;;  %s2149_s15 = smov 12  ;;  %2094 = vrot.lane.b32.xlu1 %v2093_v38, %s7117_s18  ;;  %6124 = vst.msk [vmem:[%s12378_s1 + $0x50] sm:$0xff] %vm1087_vm6, %v8909_v41  }
 0x100   :  { %v2060_v35 = vsel %vm6_vm0, %v6284_v10, %v6283_v33  ;;  %v6285_v36 = vld [vmem:[%s12377_s0 + $0x70b] ss:$16 sm:%s2062_s16]   ;;  %s2154_s16 = smov 48  ;;  %v6334_v33 = vld [vmem:[%s12377_s0 + $0x28a] ss:$16 sm:%s2291_s21]   ;;  %s2172_s21 = smov 12 }
 0x101   :  { %v6286_v37 = vld [vmem:[%s12377_s0 + $0x70b] ss:$16 sm:%s2067_s28]   ;;  %v2065_v39 = vsel %vm10_vm1, %v6285_v36, %v2060_v35  ;;  %s2159_s28 = smov 192  ;;  %v8959_v60 = vpop.permute.xlu1 %1406  }
 0x102   :  { %v6263_v40 = vld [vmem:[%s12377_s0 + $0x68b] ss:$16 sm:%s1962_s2]   ;;  %v2070_v44 = vsel %vm14_vm2, %v6286_v37, %v2065_v39  ;;  %6144 = vst.msk [vmem:[%s12378_s1 + $0x58] sm:$0xff] %vm1087_vm6, %v8959_v60   ;;  %s2237_s2 = smov 3 }
 0x103   :  { %v6264_v42 = vld [vmem:[%s12377_s0 + $0x68b] ss:$16 sm:%s1965_s27]   ;;  %2071 = vrot.lane.b32.xlu0 %v2070_v44, %s7117_s18  ;;  %s2245_s27 = smov 48 }
 0x104   :  { %v6265_v43 = vld [vmem:[%s12377_s0 + $0x68b] ss:$16 sm:%s1970_s10]   ;;  %v1968_v46 = vsel %vm6_vm0, %v6264_v42, %v6263_v40  ;;  %v8979_v1 = vpop.permute.xlu0 %1383   ;;  %s2268_s10 = smov 48  ;;  %v6330_v42 = vld [vmem:[%s12377_s0 + $0x8a] ss:$16 sm:%s2273_s29]   ;;  %s2306_s29 = smov 3 }
 0x105   :  { %v6266_v47 = vld [vmem:[%s12377_s0 + $0x68b] ss:$16 sm:%s1975_s5]   ;;  %v1973_v49 = vsel %vm10_vm1, %v6265_v43, %v1968_v46  ;;  %s2136_s5 = smov 192  ;;  %v6329_v41 = vld [vmem:[%s12377_s0 + $0x8a] ss:$16 sm:%s2268_s10]   ;;  %s2182_s10 = smov 192 }
 0x106   :  { %v6303_v48 = vld [vmem:[%s12377_s0 + $0x78b] ss:$16 sm:%s2146_s11]   ;;  %s2031_s11 = smov 3  ;;  %v1978_v55 = vsel %vm14_vm2, %v6266_v47, %v1973_v49  ;;  %v6308_v43 = vld [vmem:[%s12377_s0 + $0xa] ss:$16 sm:%s2169_s14]   ;;  %s2411_s14 = smov 192 }
 0x107   :  { %v6304_v50 = vld [vmem:[%s12377_s0 + $0x78b] ss:$16 sm:%s2149_s15]   ;;  %s2034_s15 = smov 12  ;;  %1979 = vrot.lane.b32.xlu2 %v1978_v55, %s7117_s18  ;;  %6139 = vst.msk [vmem:[%s12378_s1 + $0x38] sm:$0xff] %vm1087_vm6, %v8979_v1  }
 0x108   :  { %v2152_v52 = vsel %vm6_vm0, %v6304_v50, %v6303_v48  ;;  %v6305_v16 = vld [vmem:[%s12377_s0 + $0x78b] ss:$16 sm:%s2154_s16]   ;;  %s2039_s16 = smov 48  ;;  %v6309_v46 = vld [vmem:[%s12377_s0 + $0xa] ss:$16 sm:%s2172_s21]   ;;  %s2842_s21 = smov 48 }
 0x109   :  { %v6306_v53 = vld [vmem:[%s12377_s0 + $0x78b] ss:$16 sm:%s2159_s28]   ;;  %v2157_v56 = vsel %vm10_vm1, %v6305_v16, %v2152_v52  ;;  %s2044_s28 = smov 192  ;;  %v9053_v29 = vpop.permute.xlu1 %1474   ;;  %v6310_v47 = vld [vmem:[%s12377_s0 + $0xa] ss:$16 sm:%s2177_s6]   ;;  %v2175_v50 = vsel %vm6_vm0, %v6309_v46, %v6308_v43  ;;  %s2640_s6 = smov 192 }
 0x10a   :  { %v6298_v57 = vld [vmem:[%s12377_s0 + $0x58b] ss:$16 sm:%s2123_s7]   ;;  %s2214_s7 = smov 3  ;;  %v2162_v0 = vsel %vm14_vm2, %v6306_v53, %v2157_v56  ;;  %v2180_v55 = vsel %vm10_vm1, %v6310_v47, %v2175_v50  ;;  %v6311_v56 = vld [vmem:[%s12377_s0 + $0xa] ss:$16 sm:%s2182_s10]   ;;  %s2699_s10 = smov 12 }
 0x10b   :  { %v6299_v45 = vld [vmem:[%s12377_s0 + $0x58b] ss:$16 sm:%s2126_s25]   ;;  %v6317_v7 = vld [vmem:[%s12377_s0 + $0x40a] ss:$16 sm:%s2214_s7]   ;;  %s2100_s7 = smov 3  ;;  %s2383_s25 = smov 48 }
 0x10c   :  { %v6300_v58 = vld [vmem:[%s12377_s0 + $0x58b] ss:$16 sm:%s2131_s9]   ;;  %v2129_v61 = vsel %vm6_vm0, %v6299_v45, %v6298_v57  ;;  %s2222_s9 = smov 48  ;;  %2163 = vrot.lane.b32.xlu1 %v2162_v0, %s7117_s18  ;;  %v2220_v9 = vsel %vm6_vm0, %v6318_v8, %v6317_v7  ;;  %v9073_v35 = vpop.permute.xlu0 %1452   ;;  %v1430_v48 = vpop.permute.xlu2 %1429   ;;  %6158 = vst.msk [vmem:[%s12378_s1 + $0x20] sm:$0xff] %vm1454_vm7, %v9053_v29  }
 0x10d   :  { %v6301_v62 = vld [vmem:[%s12377_s0 + $0x58b] ss:$16 sm:%s2136_s5]   ;;  %v2134_v51 = vsel %vm10_vm1, %v6300_v58, %v2129_v61  ;;  %s2227_s5 = smov 192  ;;  %v6319_v11 = vld [vmem:[%s12377_s0 + $0x40a] ss:$16 sm:%s2222_s9]   ;;  %s2108_s9 = smov 48  ;;  %v2185_v61 = vsel %vm14_vm2, %v6311_v56, %v2180_v55 }
 0x10e   :  { %v6278_v63 = vld [vmem:[%s12377_s0 + $0x50b] ss:$16 sm:%s2031_s11]   ;;  %s2191_s11 = smov 3  ;;  %v2139_v5 = vsel %vm14_vm2, %v6301_v62, %v2134_v51  ;;  %v6320_v12 = vld [vmem:[%s12377_s0 + $0x40a] ss:$16 sm:%s2227_s5]   ;;  %v2225_v15 = vsel %vm10_vm1, %v6319_v11, %v2220_v9  ;;  %s2113_s5 = smov 192 }
 0x10f   :  { %v6279_v54 = vld [vmem:[%s12377_s0 + $0x50b] ss:$16 sm:%s2034_s15]   ;;  %v6312_v13 = vld [vmem:[%s12377_s0 + $0x20a] ss:$16 sm:%s2191_s11]   ;;  %s2283_s11 = smov 3  ;;  %v2230_v24 = vsel %vm14_vm2, %v6320_v12, %v2225_v15  ;;  %s2332_s15 = smov 12 }
 0x110   :  { %v2037_v2 = vsel %vm6_vm0, %v6279_v54, %v6278_v63  ;;  %v6280_v3 = vld [vmem:[%s12377_s0 + $0x50b] ss:$16 sm:%s2039_s16]   ;;  %2140 = vrot.lane.b32.xlu0 %v2139_v5, %s7117_s18  ;;  %v2197_v18 = vsel %vm6_vm0, %v6313_v17, %v6312_v13  ;;  %6149 = vst.msk [vmem:[%s12378_s1 + $0x78] sm:$0xff] %vm1087_vm6, %v1430_v48   ;;  %s2398_s16 = smov 3 }
 0x111   :  { %v6281_v4 = vld [vmem:[%s12377_s0 + $0x50b] ss:$16 sm:%s2044_s28]   ;;  %v2042_v6 = vsel %vm10_vm1, %v6280_v3, %v2037_v2  ;;  %v2202_v21 = vsel %vm10_vm1, %v6314_v19, %v2197_v18  ;;  %v6332_v28 = vld [vmem:[%s12377_s0 + $0x28a] ss:$16 sm:%s2283_s11]   ;;  %s2539_s28 = smov 12  ;;  %s2663_s11 = smov 192 }
 0x112   :  { %v2047_v14 = vsel %vm14_vm2, %v6281_v4, %v2042_v6  ;;  %v6293_v22 = vld [vmem:[%s12377_s0 + $0x38b] ss:$16 sm:%s2100_s7]   ;;  %s2260_s7 = smov 3  ;;  %v2207_v30 = vsel %vm14_vm2, %v6315_v20, %v2202_v21  ;;  %v2289_v10 = vsel %vm6_vm0, %v6333_v32, %v6332_v28  ;;  %v6349_v45 = vld [vmem:[%s12377_s0 + $0x10a] ss:$16 sm:%s2360_s12]   ;;  %s2447_s12 = smov 12 }
 0x113   :  { %v6294_v23 = vld [vmem:[%s12377_s0 + $0x38b] ss:$16 sm:%s2103_s26]   ;;  %2048 = vrot.lane.b32.xlu2 %v2047_v14, %s7117_s18  ;;  %s2263_s26 = smov 12  ;;  %v2294_v39 = vsel %vm10_vm1, %v6334_v33, %v2289_v10  ;;  %1455 = vst.msk [vmem:[%s12378_s1] sm:$0xff] %vm1454_vm7, %v9073_v35  }
 0x114   :  { %v2106_v25 = vsel %vm6_vm0, %v6294_v23, %v6293_v22  ;;  %v6295_v26 = vld [vmem:[%s12377_s0 + $0x38b] ss:$16 sm:%s2108_s9]   ;;  %2231 = vrot.lane.b32.xlu1 %v2230_v24, %s7118_s4  ;;  %v2299_v49 = vsel %vm14_vm2, %v6335_v34, %v2294_v39  ;;  %s2342_s9 = smov 192 }
 0x115   :  { %v6296_v27 = vld [vmem:[%s12377_s0 + $0x38b] ss:$16 sm:%s2113_s5]   ;;  %v2111_v31 = vsel %vm10_vm1, %v6295_v26, %v2106_v25  ;;  %v6327_v36 = vld [vmem:[%s12377_s0 + $0x8a] ss:$16 sm:%s2260_s7]   ;;  %s2352_s7 = smov 3  ;;  %s2470_s5 = smov 12 }
 0x116   :  { %v6328_v37 = vld [vmem:[%s12377_s0 + $0x8a] ss:$16 sm:%s2263_s26]   ;;  %v2116_v38 = vsel %vm14_vm2, %v6296_v27, %v2111_v31  ;;  %s2355_s26 = smov 12 }
 0x117   :  { %v2266_v40 = vsel %vm6_vm0, %v6328_v37, %v6327_v36  ;;  %v6347_v52 = vld [vmem:[%s12377_s0 + $0x10a] ss:$16 sm:%s2352_s7]   ;;  %s2521_s7 = smov 48 }
 0x118   :  { %2208 = vrot.lane.b32.xlu0 %v2207_v30, %s7118_s4  ;;  %v2271_v44 = vsel %vm10_vm1, %v6329_v41, %v2266_v40  ;;  %v6348_v16 = vld [vmem:[%s12377_s0 + $0x10a] ss:$16 sm:%s2355_s26]   ;;  %v1544_v9 = vpop.permute.xlu1 %1543   ;;  %s2594_s26 = smov 192 }
 0x119   :  { %v2276_v53 = vsel %vm14_vm2, %v6330_v42, %v2271_v44  ;;  %v2358_v57 = vsel %vm6_vm0, %v6348_v16, %v6347_v52  ;;  %v6343_v59 = vld [vmem:[%s12377_s0 + $0x68a] ss:$16 sm:%s2332_s15]   ;;  %s2250_s15 = smov 192  ;;  %6173 = vst.msk [vmem:[%s12378_s1 + $0x8] sm:$0xff] %vm1454_vm7, %v1544_v9  }
 0x11a   :  { %v6344_v60 = vld [vmem:[%s12377_s0 + $0x68a] ss:$16 sm:%s2337_s19]   ;;  %v2363_v62 = vsel %vm10_vm1, %v6349_v45, %v2358_v57  ;;  %s2424_s19 = smov 12  ;;  %v6387_v57 = vld [vmem:[%s12377_s0 + $0x9] ss:$16 sm:%s2536_s20]   ;;  %s2928_s20 = smov 12 }
 0x11b   :  { %2117 = vrot.lane.b32.xlu2 %v2116_v38, %s7117_s18  ;;  %s2329_s18 = smov 3  ;;  %v6350_v63 = vld [vmem:[%s12377_s0 + $0x10a] ss:$16 sm:%s2365_s23]   ;;  %s2429_s23 = smov 48 }
 0x11c   :  { %2300 = vrot.lane.b32.xlu1 %v2299_v49, %s7118_s4  ;;  %v6342_v58 = vld [vmem:[%s12377_s0 + $0x68a] ss:$16 sm:%s2329_s18]   ;;  %s2421_s18 = smov 3  ;;  %v2368_v5 = vsel %vm14_vm2, %v6350_v63, %v2363_v62  ;;  %v1521_v21 = vpop.permute.xlu0 %1520  }
 0x11d   :  { %v2335_v0 = vsel %vm6_vm0, %v6343_v59, %v6342_v58  ;;  %v6322_v51 = vld [vmem:[%s12377_s0 + $0x60a] ss:$16 sm:%s2237_s2]   ;;  %6168 = vst.msk [vmem:[%s12378_s1 + $0x60] sm:$0xff] %vm1454_vm7, %v1521_v21   ;;  %s2581_s2 = smov 3 }
 0x11e   :  { %v6323_v54 = vld [vmem:[%s12377_s0 + $0x60a] ss:$16 sm:%s2240_s3]   ;;  %v2340_v1 = vsel %vm10_vm1, %v6344_v60, %v2335_v0  ;;  %s2378_s3 = smov 12  ;;  %v6388_v62 = vld [vmem:[%s12377_s0 + $0x9] ss:$16 sm:%s2539_s28]   ;;  %s2847_s28 = smov 192 }
 0x11f   :  { %v6345_v2 = vld [vmem:[%s12377_s0 + $0x68a] ss:$16 sm:%s2342_s9]   ;;  %v2243_v3 = vsel %vm6_vm0, %v6323_v54, %v6322_v51  ;;  %s2434_s9 = smov 192  ;;  %v1498_v28 = vpop.permute.xlu2 %1497   ;;  %v6394_v0 = vld [vmem:[%s12377_s0 + $0x209] ss:$16 sm:%s2571_s24]   ;;  %v2542_v54 = vsel %vm6_vm0, %v6388_v62, %v6387_v57  ;;  %s2819_s24 = smov 48 }
 0x120   :  { %2277 = vrot.lane.b32.xlu0 %v2276_v53, %s7118_s4  ;;  %v6324_v4 = vld [vmem:[%s12377_s0 + $0x60a] ss:$16 sm:%s2245_s27]   ;;  %s2406_s27 = smov 48  ;;  %v2345_v11 = vsel %vm14_vm2, %v6345_v2, %v2340_v1  ;;  %6163 = vst.msk [vmem:[%s12378_s1 + $0x40] sm:$0xff] %vm1454_vm7, %v1498_v28  }
 0x121   :  { %v6362_v6 = vld [vmem:[%s12377_s0 + $0x70a] ss:$16 sm:%s2421_s18]   ;;  %v2248_v12 = vsel %vm10_vm1, %v6324_v4, %v2243_v3  ;;  %s2558_s18 = smov 3  ;;  %v6392_v53 = vld [vmem:[%s12377_s0 + $0x209] ss:$16 sm:%s2561_s13]   ;;  %s2607_s13 = smov 12 }
 0x122   :  { %v6325_v7 = vld [vmem:[%s12377_s0 + $0x60a] ss:$16 sm:%s2250_s15]   ;;  %v6391_v16 = vld [vmem:[%s12377_s0 + $0x209] ss:$16 sm:%s2558_s18]   ;;  %s2452_s15 = smov 48  ;;  %s2635_s18 = smov 48 }
 0x123   :  { %2186 = vrot.lane.b32.xlu2 %v2185_v61, %s7118_s4  ;;  %v6363_v8 = vld [vmem:[%s12377_s0 + $0x70a] ss:$16 sm:%s2424_s19]   ;;  %v2253_v22 = vsel %vm14_vm2, %v6325_v7, %v2248_v12  ;;  %s2503_s19 = smov 192  ;;  %v2564_v60 = vsel %vm6_vm0, %v6392_v53, %v6391_v16 }
 0x124   :  { %v2427_v13 = vsel %vm6_vm0, %v6363_v8, %v6362_v6  ;;  %v6364_v14 = vld [vmem:[%s12377_s0 + $0x70a] ss:$16 sm:%s2429_s23]   ;;  %2369 = vrot.lane.b32.xlu1 %v2368_v5, %s7118_s4  ;;  %s2314_s23 = smov 48 }
 0x125   :  { %v6357_v15 = vld [vmem:[%s12377_s0 + $0x50a] ss:$16 sm:%s2398_s16]   ;;  %s2490_s16 = smov 3  ;;  %v2432_v23 = vsel %vm10_vm1, %v6364_v14, %v2427_v13  ;;  %v6408_v21 = vld [vmem:[%s12377_s0 + $0x89] ss:$16 sm:%s2635_s18]   ;;  %s2686_s18 = smov 192 }
 0x126   :  { %v6358_v17 = vld [vmem:[%s12377_s0 + $0x50a] ss:$16 sm:%s2401_s30]   ;;  %s2493_s30 = smov 12 }
 0x127   :  { %v6365_v18 = vld [vmem:[%s12377_s0 + $0x70a] ss:$16 sm:%s2434_s9]   ;;  %v2404_v19 = vsel %vm6_vm0, %v6358_v17, %v6357_v15  ;;  %s2319_s9 = smov 192  ;;  %v1613_v63 = vpop.permute.xlu1 %1612  }
 0x128   :  { %v6359_v20 = vld [vmem:[%s12377_s0 + $0x50a] ss:$16 sm:%s2406_s27]   ;;  %2346 = vrot.lane.b32.xlu0 %v2345_v11, %s7118_s4  ;;  %s2498_s27 = smov 48  ;;  %v2437_v32 = vsel %vm14_vm2, %v6365_v18, %v2432_v23  ;;  %6188 = vst.msk [vmem:[%s12378_s1 + $0x68] sm:$0xff] %vm1454_vm7, %v1613_v63  }
 0x129   :  { %v6337_v24 = vld [vmem:[%s12377_s0 + $0x48a] ss:$16 sm:%s2306_s29]   ;;  %v2409_v27 = vsel %vm10_vm1, %v6359_v20, %v2404_v19  ;;  %s2467_s29 = smov 3  ;;  %v1567_v58 = vpop.permute.xlu2 %1566   ;;  %v6406_v11 = vld [vmem:[%s12377_s0 + $0x89] ss:$16 sm:%s2627_s22]   ;;  %s2704_s22 = smov 48 }
 0x12a   :  { %v6360_v25 = vld [vmem:[%s12377_s0 + $0x50a] ss:$16 sm:%s2411_s14]   ;;  %6178 = vst.msk [vmem:[%s12378_s1 + $0x28] sm:$0xff] %vm1454_vm7, %v1567_v58   ;;  %s2811_s14 = smov 3 }
 0x12b   :  { %v6338_v26 = vld [vmem:[%s12377_s0 + $0x48a] ss:$16 sm:%s2309_s17]   ;;  %2254 = vrot.lane.b32.xlu2 %v2253_v22, %s7118_s4  ;;  %v2414_v35 = vsel %vm14_vm2, %v6360_v25, %v2409_v27  ;;  %s2549_s17 = smov 192  ;;  %v1590_v1 = vpop.permute.xlu0 %1589  }
 0x12c   :  { %v2312_v29 = vsel %vm6_vm0, %v6338_v26, %v6337_v24  ;;  %v6339_v30 = vld [vmem:[%s12377_s0 + $0x48a] ss:$16 sm:%s2314_s23]   ;;  %s2475_s23 = smov 48  ;;  %2438 = vrot.lane.b32.xlu1 %v2437_v32, %s7118_s4  ;;  %6183 = vst.msk [vmem:[%s12378_s1 + $0x48] sm:$0xff] %vm1454_vm7, %v1590_v1  }
 0x12d   :  { %v6377_v31 = vld [vmem:[%s12377_s0 + $0x58a] ss:$16 sm:%s2490_s16]   ;;  %s2375_s16 = smov 3  ;;  %v2317_v36 = vsel %vm10_vm1, %v6339_v30, %v2312_v29  ;;  %v6390_v6 = vld [vmem:[%s12377_s0 + $0x9] ss:$16 sm:%s2549_s17]   ;;  %s2673_s17 = smov 3 }
 0x12e   :  { %v6378_v33 = vld [vmem:[%s12377_s0 + $0x58a] ss:$16 sm:%s2493_s30]   ;;  %s2544_s30 = smov 48  ;;  %v6402_v22 = vld [vmem:[%s12377_s0 + $0x609] ss:$16 sm:%s2607_s13]   ;;  %s2526_s13 = smov 192 }
 0x12f   :  { %v6340_v10 = vld [vmem:[%s12377_s0 + $0x48a] ss:$16 sm:%s2319_s9]   ;;  %v2496_v37 = vsel %vm6_vm0, %v6378_v33, %v6377_v31  ;;  %v6389_v51 = vld [vmem:[%s12377_s0 + $0x9] ss:$16 sm:%s2544_s30]   ;;  %s2709_s30 = smov 192  ;;  %s2997_s9 = smov 12 }
 0x130   :  { %v6379_v34 = vld [vmem:[%s12377_s0 + $0x58a] ss:$16 sm:%s2498_s27]   ;;  %2415 = vrot.lane.b32.xlu0 %v2414_v35, %s7118_s4  ;;  %v2322_v44 = vsel %vm14_vm2, %v6340_v10, %v2317_v36  ;;  %v2547_v8 = vsel %vm10_vm1, %v6389_v51, %v2542_v54  ;;  %s2696_s27 = smov 3 }
 0x131   :  { %v6372_v38 = vld [vmem:[%s12377_s0 + $0x38a] ss:$16 sm:%s2467_s29]   ;;  %v2501_v46 = vsel %vm10_vm1, %v6379_v34, %v2496_v37  ;;  %s2612_s29 = smov 48  ;;  %v2552_v17 = vsel %vm14_vm2, %v6390_v6, %v2547_v8  ;;  %v6409_v29 = vld [vmem:[%s12377_s0 + $0x89] ss:$16 sm:%s2640_s6]   ;;  %s2814_s6 = smov 12 }
 0x132   :  { %v6373_v39 = vld [vmem:[%s12377_s0 + $0x38a] ss:$16 sm:%s2470_s5]   ;;  %v6403_v23 = vld [vmem:[%s12377_s0 + $0x609] ss:$16 sm:%s2612_s29]   ;;  %s3053_s29 = smov 192  ;;  %s3025_s5 = smov 48 }
 0x133   :  { %v6380_v40 = vld [vmem:[%s12377_s0 + $0x58a] ss:$16 sm:%s2503_s19]   ;;  %v2473_v41 = vsel %vm6_vm0, %v6373_v39, %v6372_v38  ;;  %s2388_s19 = smov 192  ;;  %2323 = vrot.lane.b32.xlu2 %v2322_v44, %s7118_s4 }
 0x134   :  { %v6374_v42 = vld [vmem:[%s12377_s0 + $0x38a] ss:$16 sm:%s2475_s23]   ;;  %v2506_v55 = vsel %vm14_vm2, %v6380_v40, %v2501_v46  ;;  %s2630_s23 = smov 12  ;;  %v6421_v10 = vld [vmem:[%s12377_s0 + $0x689] ss:$16 sm:%s2696_s27]   ;;  %s2834_s27 = smov 3 }
 0x135   :  { %v6352_v43 = vld [vmem:[%s12377_s0 + $0x30a] ss:$16 sm:%s2375_s16]   ;;  %v2478_v50 = vsel %vm10_vm1, %v6374_v42, %v2473_v41  ;;  %s2566_s16 = smov 48  ;;  %2507 = vrot.lane.b32.xlu1 %v2506_v55, %s7118_s4  ;;  %v1636_v18 = vpop.permute.xlu2 %1635  }
 0x136   :  { %v6353_v47 = vld [vmem:[%s12377_s0 + $0x30a] ss:$16 sm:%s2378_s3]   ;;  %v6393_v61 = vld [vmem:[%s12377_s0 + $0x209] ss:$16 sm:%s2566_s16]   ;;  %s7119_s16 = smov 72   ;;  %s2617_s3 = smov 192 }
 0x137   :  { %v6375_v48 = vld [vmem:[%s12377_s0 + $0x38a] ss:$16 sm:%s2480_s8]   ;;  %v2381_v52 = vsel %vm6_vm0, %v6353_v47, %v6352_v43  ;;  %s2444_s8 = smov 3  ;;  %v2569_v4 = vsel %vm10_vm1, %v6393_v61, %v2564_v60  ;;  %v6407_v12 = vld [vmem:[%s12377_s0 + $0x89] ss:$16 sm:%s2630_s23]   ;;  %s2681_s23 = smov 48 }
 0x138   :  { %v6354_v49 = vld [vmem:[%s12377_s0 + $0x30a] ss:$16 sm:%s2383_s25]   ;;  %v2483_v45 = vsel %vm14_vm2, %v6375_v48, %v2478_v50  ;;  %s2604_s25 = smov 3  ;;  %v2574_v13 = vsel %vm14_vm2, %v6394_v0, %v2569_v4  ;;  %v2633_v20 = vsel %vm6_vm0, %v6407_v12, %v6406_v11  ;;  %6193 = vst.msk [vmem:[%s12378_s1 + $0x10] sm:$0xff] %vm1454_vm7, %v1636_v18  }
 0x139   :  { %v6355_v56 = vld [vmem:[%s12377_s0 + $0x30a] ss:$16 sm:%s2388_s19]   ;;  %v2386_v59 = vsel %vm10_vm1, %v6354_v49, %v2381_v52  ;;  %2484 = vrot.lane.b32.xlu0 %v2483_v45, %s7118_s4  ;;  %s2516_s19 = smov 12  ;;  %v2638_v28 = vsel %vm10_vm1, %v6408_v21, %v2633_v20  ;;  %v1682_v41 = vpop.permute.xlu1 %1681  }
 0x13a   :  { %v6367_v2 = vld [vmem:[%s12377_s0 + $0x18a] ss:$16 sm:%s2444_s8]   ;;  %v2391_v3 = vsel %vm14_vm2, %v6355_v56, %v2386_v59  ;;  %s2457_s8 = smov 192  ;;  %v6401_v15 = vld [vmem:[%s12377_s0 + $0x609] ss:$16 sm:%s2604_s25]   ;;  %v2643_v35 = vsel %vm14_vm2, %v6409_v29, %v2638_v28  ;;  %s2584_s25 = smov 12 }
 0x13b   :  { %v6368_v5 = vld [vmem:[%s12377_s0 + $0x18a] ss:$16 sm:%s2447_s12]   ;;  %2392 = vrot.lane.b32.xlu2 %v2391_v3, %s7118_s4  ;;  %v2610_v24 = vsel %vm6_vm0, %v6402_v22, %v6401_v15  ;;  %6203 = vst.msk [vmem:[%s12378_s1 + $0x50] sm:$0xff] %vm1454_vm7, %v1682_v41   ;;  %s2773_s12 = smov 48 }
 0x13c   :  { %v6369_v7 = vld [vmem:[%s12377_s0 + $0x18a] ss:$16 sm:%s2452_s15]   ;;  %v2450_v9 = vsel %vm6_vm0, %v6368_v5, %v6367_v2  ;;  %s2513_s15 = smov 3  ;;  %v6404_v30 = vld [vmem:[%s12377_s0 + $0x609] ss:$16 sm:%s2617_s3]   ;;  %v2615_v32 = vsel %vm10_vm1, %v6403_v23, %v2610_v24  ;;  %s2732_s3 = smov 192 }
 0x13d   :  { %v6370_v14 = vld [vmem:[%s12377_s0 + $0x18a] ss:$16 sm:%s2457_s8]   ;;  %v2455_v19 = vsel %vm10_vm1, %v6369_v7, %v2450_v9  ;;  %2575 = vrot.lane.b32.xlu1 %v2574_v13, %s7119_s16  ;;  %v2620_v39 = vsel %vm14_vm2, %v6404_v30, %v2615_v32  ;;  %v1705_v40 = vpop.permute.xlu2 %1704   ;;  %v1659_v52 = vpop.permute.xlu0 %1658   ;;  %s2742_s8 = smov 3 }
 0x13e   :  { %v6382_v25 = vld [vmem:[%s12377_s0 + $0x78a] ss:$16 sm:%s2513_s15]   ;;  %v2460_v27 = vsel %vm14_vm2, %v6370_v14, %v2455_v19  ;;  %s2676_s15 = smov 12  ;;  %v6422_v34 = vld [vmem:[%s12377_s0 + $0x689] ss:$16 sm:%s2699_s10]   ;;  %s2837_s10 = smov 12 }
 0x13f   :  { %v6383_v26 = vld [vmem:[%s12377_s0 + $0x78a] ss:$16 sm:%s2516_s19]   ;;  %v6416_v37 = vld [vmem:[%s12377_s0 + $0x489] ss:$16 sm:%s2673_s17]   ;;  %v2702_v43 = vsel %vm6_vm0, %v6422_v34, %v6421_v10  ;;  %s2650_s17 = smov 3  ;;  %s2925_s19 = smov 3 }
 0x140   :  { %v6384_v31 = vld [vmem:[%s12377_s0 + $0x78a] ss:$16 sm:%s2521_s7]   ;;  %v2519_v33 = vsel %vm6_vm0, %v6383_v26, %v6382_v25  ;;  %v6417_v38 = vld [vmem:[%s12377_s0 + $0x489] ss:$16 sm:%s2676_s15]   ;;  %s2589_s15 = smov 48  ;;  %s2658_s7 = smov 48 }
 0x141   :  { %2553 = vrot.lane.b32.xlu0 %v2552_v17, %s7119_s16  ;;  %v6385_v36 = vld [vmem:[%s12377_s0 + $0x78a] ss:$16 sm:%s2526_s13]   ;;  %v2524_v42 = vsel %vm10_vm1, %v6384_v31, %v2519_v33  ;;  %6208 = vst.msk [vmem:[%s12378_s1 + $0x70] sm:$0xff] %vm1454_vm7, %v1705_v40   ;;  %v2679_v49 = vsel %vm6_vm0, %v6417_v38, %v6416_v37  ;;  %s2750_s13 = smov 48 }
 0x142   :  { %v6423_v44 = vld [vmem:[%s12377_s0 + $0x689] ss:$16 sm:%s2704_s22]   ;;  %s2765_s22 = smov 3  ;;  %v2529_v16 = vsel %vm14_vm2, %v6385_v36, %v2524_v42  ;;  %6198 = vst.msk [vmem:[%s12378_s1 + $0x30] sm:$0xff] %vm1454_vm7, %v1659_v52  }
 0x143   :  { %2461 = vrot.lane.b32.xlu2 %v2460_v27, %s7118_s4  ;;  %v6418_v46 = vld [vmem:[%s12377_s0 + $0x489] ss:$16 sm:%s2681_s23]   ;;  %s2768_s23 = smov 12  ;;  %v2707_v53 = vsel %vm10_vm1, %v6423_v44, %v2702_v43 }
 0x144   :  { %v6424_v47 = vld [vmem:[%s12377_s0 + $0x689] ss:$16 sm:%s2709_s30]   ;;  %v2684_v57 = vsel %vm10_vm1, %v6418_v46, %v2679_v49  ;;  %s3443_s30 = smov 192 }
 0x145   :  { %2644 = vrot.lane.b32.xlu1 %v2643_v35, %s7119_s16  ;;  %v6396_v48 = vld [vmem:[%s12377_s0 + $0x409] ss:$16 sm:%s2581_s2]   ;;  %v2712_v60 = vsel %vm14_vm2, %v6424_v47, %v2707_v53  ;;  %v1774_v0 = vpop.permute.xlu2 %1773   ;;  %v1751_v8 = vpop.permute.xlu1 %1750   ;;  %s3094_s2 = smov 48 }
 0x146   :  { %v6397_v50 = vld [vmem:[%s12377_s0 + $0x409] ss:$16 sm:%s2584_s25]   ;;  %6223 = vst.msk [vmem:[%s12378_s1 + $0x58] sm:$0xff] %vm1454_vm7, %v1774_v0   ;;  %s2994_s25 = smov 3 }
 0x147   :  { %v6419_v55 = vld [vmem:[%s12377_s0 + $0x489] ss:$16 sm:%s2686_s18]   ;;  %v2587_v45 = vsel %vm6_vm0, %v6397_v50, %v6396_v48  ;;  %s2745_s18 = smov 12  ;;  %6218 = vst.msk [vmem:[%s12378_s1 + $0x38] sm:$0xff] %vm1454_vm7, %v1751_v8  }
 0x148   :  { %v6398_v56 = vld [vmem:[%s12377_s0 + $0x409] ss:$16 sm:%s2589_s15]   ;;  %s2653_s15 = smov 12  ;;  %v2689_v63 = vsel %vm14_vm2, %v6419_v55, %v2684_v57 }
 0x149   :  { %2621 = vrot.lane.b32.xlu0 %v2620_v39, %s7119_s16  ;;  %v6436_v58 = vld [vmem:[%s12377_s0 + $0x509] ss:$16 sm:%s2765_s22]   ;;  %v2592_v51 = vsel %vm10_vm1, %v6398_v56, %v2587_v45  ;;  %s2755_s22 = smov 192  ;;  %v1728_v14 = vpop.permute.xlu0 %1727  }
 0x14a   :  { %v6437_v59 = vld [vmem:[%s12377_s0 + $0x509] ss:$16 sm:%s2768_s23]   ;;  %6213 = vst.msk [vmem:[%s12378_s1 + $0x18] sm:$0xff] %vm1454_vm7, %v1728_v14   ;;  %s3117_s23 = smov 48 }
 0x14b   :  { %2530 = vrot.lane.b32.xlu2 %v2529_v16, %s7118_s4  ;;  %s2778_s4 = smov 192  ;;  %v6399_v61 = vld [vmem:[%s12377_s0 + $0x409] ss:$16 sm:%s2594_s26]   ;;  %v2771_v54 = vsel %vm6_vm0, %v6437_v59, %v6436_v58  ;;  %s2719_s26 = smov 3 }
 0x14c   :  { %v6431_v62 = vld [vmem:[%s12377_s0 + $0x309] ss:$16 sm:%s2742_s8]   ;;  %v2597_v9 = vsel %vm14_vm2, %v6399_v61, %v2592_v51  ;;  %s2722_s8 = smov 12 }
 0x14d   :  { %v6438_v1 = vld [vmem:[%s12377_s0 + $0x509] ss:$16 sm:%s2773_s12]   ;;  %2713 = vrot.lane.b32.xlu1 %v2712_v60, %s7119_s16  ;;  %v1842_v24 = vpop.permute.xlu2 %1841   ;;  %s2824_s12 = smov 192  ;;  %v1820_v10 = vpop.permute.xlu1 %1819  }
 0x14e   :  { %v6432_v2 = vld [vmem:[%s12377_s0 + $0x309] ss:$16 sm:%s2745_s18]   ;;  %v2776_v11 = vsel %vm10_vm1, %v6438_v1, %v2771_v54  ;;  %6237 = vst.msk [vmem:[%s12378_s1 + $0x20] sm:$0xff] %vm1821_vm8, %v1842_v24   ;;  %s7120_s18 = smov 64  }
 0x14f   :  { %v6439_v3 = vld [vmem:[%s12377_s0 + $0x509] ss:$16 sm:%s2778_s4]   ;;  %v2748_v5 = vsel %vm6_vm0, %v6432_v2, %v6431_v62  ;;  %1822 = vst.msk [vmem:[%s12378_s1] sm:$0xff] %vm1821_vm8, %v1820_v10   ;;  %s2916_s4 = smov 192 }
 0x150   :  { %v6433_v4 = vld [vmem:[%s12377_s0 + $0x309] ss:$16 sm:%s2750_s13]   ;;  %v2781_v20 = vsel %vm14_vm2, %v6439_v3, %v2776_v11  ;;  %s2888_s13 = smov 48  ;;  %v6469_v53 = vld [vmem:[%s12377_s0 + $0x8] ss:$16 sm:%s2916_s4]   ;;  %s3112_s4 = smov 12 }
 0x151   :  { %v6411_v6 = vld [vmem:[%s12377_s0 + $0x289] ss:$16 sm:%s2650_s17]   ;;  %2690 = vrot.lane.b32.xlu0 %v2689_v63, %s7119_s16  ;;  %v2753_v15 = vsel %vm10_vm1, %v6433_v4, %v2748_v5  ;;  %v1797_v38 = vpop.permute.xlu0 %1796   ;;  %s2788_s17 = smov 3 }
 0x152   :  { %v6412_v7 = vld [vmem:[%s12377_s0 + $0x289] ss:$16 sm:%s2653_s15]   ;;  %6228 = vst.msk [vmem:[%s12378_s1 + $0x78] sm:$0xff] %vm1454_vm7, %v1797_v38   ;;  %s2791_s15 = smov 12 }
 0x153   :  { %v6434_v12 = vld [vmem:[%s12377_s0 + $0x309] ss:$16 sm:%s2755_s22]   ;;  %v2656_v17 = vsel %vm6_vm0, %v6412_v7, %v6411_v6  ;;  %2598 = vrot.lane.b32.xlu2 %v2597_v9, %s7119_s16  ;;  %s2893_s22 = smov 192 }
 0x154   :  { %v6413_v13 = vld [vmem:[%s12377_s0 + $0x289] ss:$16 sm:%s2658_s7]   ;;  %v2758_v23 = vsel %vm14_vm2, %v6434_v12, %v2753_v15  ;;  %s2880_s7 = smov 3 }
 0x155   :  { %v6451_v18 = vld [vmem:[%s12377_s0 + $0x389] ss:$16 sm:%s2834_s27]   ;;  %v2661_v25 = vsel %vm10_vm1, %v6413_v13, %v2656_v17  ;;  %2782 = vrot.lane.b32.xlu1 %v2781_v20, %s7119_s16  ;;  %s2911_s27 = smov 48  ;;  %v1911_v48 = vpop.permute.xlu2 %1910   ;;  %v1888_v58 = vpop.permute.xlu1 %1887  }
 0x156   :  { %v6452_v19 = vld [vmem:[%s12377_s0 + $0x389] ss:$16 sm:%s2837_s10]   ;;  %s2883_s10 = smov 12  ;;  %v6468_v52 = vld [vmem:[%s12377_s0 + $0x8] ss:$16 sm:%s2911_s27]   ;;  %s2971_s27 = smov 3 }
 0x157   :  { %v6414_v21 = vld [vmem:[%s12377_s0 + $0x289] ss:$16 sm:%s2663_s11]   ;;  %v2840_v26 = vsel %vm6_vm0, %v6452_v19, %v6451_v18  ;;  %6252 = vst.msk [vmem:[%s12378_s1 + $0x8] sm:$0xff] %vm1821_vm8, %v1911_v48   ;;  %s2801_s11 = smov 192 }
 0x158   :  { %v6446_v22 = vld [vmem:[%s12377_s0 + $0x189] ss:$16 sm:%s2811_s14]   ;;  %s2727_s14 = smov 48  ;;  %v2666_v34 = vsel %vm14_vm2, %v6414_v21, %v2661_v25  ;;  %6247 = vst.msk [vmem:[%s12378_s1 + $0x60] sm:$0xff] %vm1821_vm8, %v1888_v58  }
 0x159   :  { %v6453_v27 = vld [vmem:[%s12377_s0 + $0x389] ss:$16 sm:%s2842_s21]   ;;  %s2903_s21 = smov 3  ;;  %2759 = vrot.lane.b32.xlu0 %v2758_v23, %s7119_s16  ;;  %v1865_v63 = vpop.permute.xlu0 %1864  }
 0x15a   :  { %v6447_v28 = vld [vmem:[%s12377_s0 + $0x189] ss:$16 sm:%s2814_s6]   ;;  %s2906_s6 = smov 12  ;;  %v2845_v35 = vsel %vm10_vm1, %v6453_v27, %v2840_v26  ;;  %v6466_v41 = vld [vmem:[%s12377_s0 + $0x8] ss:$16 sm:%s2903_s21]   ;;  %s2979_s21 = smov 48 }
 0x15b   :  { %v6454_v29 = vld [vmem:[%s12377_s0 + $0x389] ss:$16 sm:%s2847_s28]   ;;  %v2817_v31 = vsel %vm6_vm0, %v6447_v28, %v6446_v22  ;;  %v6467_v42 = vld [vmem:[%s12377_s0 + $0x8] ss:$16 sm:%s2906_s6]   ;;  %s2951_s6 = smov 12  ;;  %s2984_s28 = smov 192 }
 0x15c   :  { %v6448_v30 = vld [vmem:[%s12377_s0 + $0x189] ss:$16 sm:%s2819_s24]   ;;  %2667 = vrot.lane.b32.xlu2 %v2666_v34, %s7119_s16  ;;  %v2850_v43 = vsel %vm14_vm2, %v6454_v29, %v2845_v35  ;;  %v2909_v50 = vsel %vm6_vm0, %v6467_v42, %v6466_v41  ;;  %6242 = vst.msk [vmem:[%s12378_s1 + $0x40] sm:$0xff] %vm1821_vm8, %v1865_v63   ;;  %s2956_s24 = smov 48 }
 0x15d   :  { %v6426_v32 = vld [vmem:[%s12377_s0 + $0x109] ss:$16 sm:%s2719_s26]   ;;  %v2822_v39 = vsel %vm10_vm1, %v6448_v30, %v2817_v31  ;;  %2851 = vrot.lane.b32.xlu1 %v2850_v43, %s7119_s16  ;;  %v2914_v60 = vsel %vm10_vm1, %v6468_v52, %v2909_v50  ;;  %s2857_s26 = smov 3  ;;  %v1957_v18 = vpop.permute.xlu1 %1956  }
 0x15e   :  { %v6427_v33 = vld [vmem:[%s12377_s0 + $0x109] ss:$16 sm:%s2722_s8]   ;;  %v6480_v54 = vld [vmem:[%s12377_s0 + $0x608] ss:$16 sm:%s2971_s27]   ;;  %v2919_v2 = vsel %vm14_vm2, %v6469_v53, %v2914_v60  ;;  %s2860_s8 = smov 12  ;;  %s3410_s27 = smov 12 }
 0x15f   :  { %v6449_v36 = vld [vmem:[%s12377_s0 + $0x189] ss:$16 sm:%s2824_s12]   ;;  %v2725_v40 = vsel %vm6_vm0, %v6427_v33, %v6426_v32  ;;  %v6482_v9 = vld [vmem:[%s12377_s0 + $0x608] ss:$16 sm:%s2979_s21]   ;;  %s2961_s12 = smov 192  ;;  %s3066_s21 = smov 12 }
 0x160   :  { %v6428_v37 = vld [vmem:[%s12377_s0 + $0x109] ss:$16 sm:%s2727_s14]   ;;  %v2827_v47 = vsel %vm14_vm2, %v6449_v36, %v2822_v39  ;;  %s2948_s14 = smov 3  ;;  %v6476_v11 = vld [vmem:[%s12377_s0 + $0x408] ss:$16 sm:%s2951_s6]   ;;  %s3040_s6 = smov 3 }
 0x161   :  { %v6429_v44 = vld [vmem:[%s12377_s0 + $0x109] ss:$16 sm:%s2732_s3]   ;;  %v2730_v49 = vsel %vm10_vm1, %v6428_v37, %v2725_v40  ;;  %2828 = vrot.lane.b32.xlu0 %v2827_v47, %s7119_s16  ;;  %v1980_v6 = vpop.permute.xlu2 %1979   ;;  %6262 = vst.msk [vmem:[%s12378_s1 + $0x48] sm:$0xff] %vm1821_vm8, %v1957_v18   ;;  %v1934_v23 = vpop.permute.xlu0 %1933   ;;  %s3507_s3 = smov 48 }
 0x162   :  { %v6461_v46 = vld [vmem:[%s12377_s0 + $0x789] ss:$16 sm:%s2880_s7]   ;;  %s2796_s7 = smov 48  ;;  %v2735_v59 = vsel %vm14_vm2, %v6429_v44, %v2730_v49  ;;  %v6475_v4 = vld [vmem:[%s12377_s0 + $0x408] ss:$16 sm:%s2948_s14]   ;;  %s3438_s14 = smov 48 }
 0x163   :  { %v6462_v16 = vld [vmem:[%s12377_s0 + $0x789] ss:$16 sm:%s2883_s10]   ;;  %s2974_s10 = smov 12  ;;  %6267 = vst.msk [vmem:[%s12378_s1 + $0x68] sm:$0xff] %vm1821_vm8, %v1980_v6   ;;  %v2954_v14 = vsel %vm6_vm0, %v6476_v11, %v6475_v4 }
 0x164   :  { %v6463_v55 = vld [vmem:[%s12377_s0 + $0x789] ss:$16 sm:%s2888_s13]   ;;  %v2886_v56 = vsel %vm6_vm0, %v6462_v16, %v6461_v46  ;;  %v6481_v1 = vld [vmem:[%s12377_s0 + $0x608] ss:$16 sm:%s2974_s10]   ;;  %s3048_s10 = smov 48  ;;  %s3099_s13 = smov 192 }
 0x165   :  { %v6441_v57 = vld [vmem:[%s12377_s0 + $0x709] ss:$16 sm:%s2788_s17]   ;;  %v2891_v0 = vsel %vm10_vm1, %v6463_v55, %v2886_v56  ;;  %2736 = vrot.lane.b32.xlu2 %v2735_v59, %s7119_s16  ;;  %v2977_v8 = vsel %vm6_vm0, %v6481_v1, %v6480_v54  ;;  %2920 = vrot.lane.b32.xlu1 %v2919_v2, %s7120_s18  ;;  %s2865_s17 = smov 48  ;;  %v2026_v41 = vpop.permute.xlu1 %2025  }
 0x166   :  { %v6442_v45 = vld [vmem:[%s12377_s0 + $0x709] ss:$16 sm:%s2791_s15]   ;;  %v6483_v12 = vld [vmem:[%s12377_s0 + $0x608] ss:$16 sm:%s2984_s28]   ;;  %v2982_v20 = vsel %vm10_vm1, %v6482_v9, %v2977_v8  ;;  %s3030_s28 = smov 192  ;;  %s2938_s15 = smov 192 }
 0x167   :  { %v6464_v61 = vld [vmem:[%s12377_s0 + $0x789] ss:$16 sm:%s2893_s22]   ;;  %v2794_v51 = vsel %vm6_vm0, %v6442_v45, %v6441_v57  ;;  %v6477_v13 = vld [vmem:[%s12377_s0 + $0x408] ss:$16 sm:%s2956_s24]   ;;  %s3043_s22 = smov 12  ;;  %v2987_v28 = vsel %vm14_vm2, %v6483_v12, %v2982_v20  ;;  %s3168_s24 = smov 192 }
 0x168   :  { %v6443_v62 = vld [vmem:[%s12377_s0 + $0x709] ss:$16 sm:%s2796_s7]   ;;  %v2896_v5 = vsel %vm14_vm2, %v6464_v61, %v2891_v0  ;;  %v6478_v21 = vld [vmem:[%s12377_s0 + $0x408] ss:$16 sm:%s2961_s12]   ;;  %s2870_s7 = smov 192  ;;  %v2959_v24 = vsel %vm10_vm1, %v6477_v13, %v2954_v14  ;;  %s3020_s12 = smov 12 }
 0x169   :  { %v6444_v3 = vld [vmem:[%s12377_s0 + $0x709] ss:$16 sm:%s2801_s11]   ;;  %v2799_v7 = vsel %vm10_vm1, %v6443_v62, %v2794_v51  ;;  %2897 = vrot.lane.b32.xlu0 %v2896_v5, %s7119_s16  ;;  %6257 = vst.msk [vmem:[%s12378_s1 + $0x28] sm:$0xff] %vm1821_vm8, %v1934_v23   ;;  %v2964_v31 = vsel %vm14_vm2, %v6478_v21, %v2959_v24  ;;  %v2003_v47 = vpop.permute.xlu0 %2002   ;;  %s3163_s11 = smov 48 }
 0x16a   :  { %v6456_v15 = vld [vmem:[%s12377_s0 + $0x589] ss:$16 sm:%s2857_s26]   ;;  %v2804_v19 = vsel %vm14_vm2, %v6444_v3, %v2799_v7  ;;  %s3017_s26 = smov 3  ;;  %v6495_v26 = vld [vmem:[%s12377_s0 + $0x488] ss:$16 sm:%s3040_s6]   ;;  %s3341_s6 = smov 12 }
 0x16b   :  { %v6457_v17 = vld [vmem:[%s12377_s0 + $0x589] ss:$16 sm:%s2860_s8]   ;;  %v6496_v27 = vld [vmem:[%s12377_s0 + $0x488] ss:$16 sm:%s3043_s22]   ;;  %s2933_s8 = smov 48  ;;  %s3751_s22 = smov 3 }
 0x16c   :  { %v6458_v22 = vld [vmem:[%s12377_s0 + $0x589] ss:$16 sm:%s2865_s17]   ;;  %v2863_v25 = vsel %vm6_vm0, %v6457_v17, %v6456_v15  ;;  %v6490_v30 = vld [vmem:[%s12377_s0 + $0x288] ss:$16 sm:%s3017_s26]   ;;  %v3046_v10 = vsel %vm6_vm0, %v6496_v27, %v6495_v26  ;;  %s3007_s26 = smov 192  ;;  %s7123_s17 = smov 40  }
 0x16d   :  { %2805 = vrot.lane.b32.xlu2 %v2804_v19, %s7119_s16  ;;  %v6459_v29 = vld [vmem:[%s12377_s0 + $0x589] ss:$16 sm:%s2870_s7]   ;;  %v2049_v32 = vpop.permute.xlu2 %2048   ;;  %v2868_v33 = vsel %vm10_vm1, %v6458_v22, %v2863_v25  ;;  %2988 = vrot.lane.b32.xlu1 %v2987_v28, %s7120_s18  ;;  %s3810_s7 = smov 192 }
 0x16e   :  { %v6497_v34 = vld [vmem:[%s12377_s0 + $0x488] ss:$16 sm:%s3048_s10]   ;;  %6282 = vst.msk [vmem:[%s12378_s1 + $0x50] sm:$0xff] %vm1821_vm8, %v2049_v32   ;;  %v2873_v42 = vsel %vm14_vm2, %v6459_v29, %v2868_v33  ;;  %s3682_s10 = smov 3 }
 0x16f   :  { %v6491_v35 = vld [vmem:[%s12377_s0 + $0x288] ss:$16 sm:%s3020_s12]   ;;  %s3109_s12 = smov 3  ;;  %v3051_v43 = vsel %vm10_vm1, %v6497_v34, %v3046_v10  ;;  %6277 = vst.msk [vmem:[%s12378_s1 + $0x30] sm:$0xff] %vm1821_vm8, %v2026_v41  }
 0x170   :  { %v6498_v36 = vld [vmem:[%s12377_s0 + $0x488] ss:$16 sm:%s3053_s29]   ;;  %v3023_v38 = vsel %vm6_vm0, %v6491_v35, %v6490_v30  ;;  %6272 = vst.msk [vmem:[%s12378_s1 + $0x10] sm:$0xff] %vm1821_vm8, %v2003_v47   ;;  %s7121_s29 = smov 56  }
 0x171   :  { %v6492_v37 = vld [vmem:[%s12377_s0 + $0x288] ss:$16 sm:%s3025_s5]   ;;  %2965 = vrot.lane.b32.xlu0 %v2964_v31, %s7120_s18  ;;  %v3056_v16 = vsel %vm14_vm2, %v6498_v36, %v3051_v43  ;;  %v2095_v54 = vpop.permute.xlu1 %2094   ;;  %s3191_s5 = smov 192 }
 0x172   :  { %v6470_v39 = vld [vmem:[%s12377_s0 + $0x208] ss:$16 sm:%s2925_s19]   ;;  %s3086_s19 = smov 3  ;;  %v3028_v48 = vsel %vm10_vm1, %v6492_v37, %v3023_v38  ;;  %6292 = vst.msk [vmem:[%s12378_s1 + $0x18] sm:$0xff] %vm1821_vm8, %v2095_v54  }
 0x173   :  { %v6471_v40 = vld [vmem:[%s12377_s0 + $0x208] ss:$16 sm:%s2928_s20]   ;;  %s3063_s20 = smov 3 }
 0x174   :  { %v6493_v44 = vld [vmem:[%s12377_s0 + $0x288] ss:$16 sm:%s3030_s28]   ;;  %v2931_v49 = vsel %vm6_vm0, %v6471_v40, %v6470_v39  ;;  %s3089_s28 = smov 12 }
 0x175   :  { %v6472_v46 = vld [vmem:[%s12377_s0 + $0x208] ss:$16 sm:%s2933_s8]   ;;  %2874 = vrot.lane.b32.xlu2 %v2873_v42, %s7119_s16  ;;  %s3122_s16 = smov 192  ;;  %v3033_v56 = vsel %vm14_vm2, %v6493_v44, %v3028_v48  ;;  %v2118_v57 = vpop.permute.xlu2 %2117   ;;  %3057 = vrot.lane.b32.xlu1 %v3056_v16, %s7120_s18  ;;  %s3155_s8 = smov 3  ;;  %v2072_v5 = vpop.permute.xlu0 %2071  }
 0x176   :  { %v6510_v50 = vld [vmem:[%s12377_s0 + $0x308] ss:$16 sm:%s3109_s12]   ;;  %v2936_v45 = vsel %vm10_vm1, %v6472_v46, %v2931_v49  ;;  %6297 = vst.msk [vmem:[%s12378_s1 + $0x38] sm:$0xff] %vm1821_vm8, %v2118_v57   ;;  %s3186_s12 = smov 48 }
 0x177   :  { %v6511_v52 = vld [vmem:[%s12377_s0 + $0x308] ss:$16 sm:%s3112_s4]   ;;  %s3158_s4 = smov 12  ;;  %6287 = vst.msk [vmem:[%s12378_s1 + $0x70] sm:$0xff] %vm1821_vm8, %v2072_v5  }
 0x178   :  { %v6473_v53 = vld [vmem:[%s12377_s0 + $0x208] ss:$16 sm:%s2938_s15]   ;;  %v3115_v58 = vsel %vm6_vm0, %v6511_v52, %v6510_v50  ;;  %s3076_s15 = smov 192 }
 0x179   :  { %v6505_v55 = vld [vmem:[%s12377_s0 + $0x108] ss:$16 sm:%s3086_s19]   ;;  %s3002_s19 = smov 48  ;;  %3034 = vrot.lane.b32.xlu0 %v3033_v56, %s7120_s18  ;;  %v2941_v1 = vsel %vm14_vm2, %v6473_v53, %v2936_v45 }
 0x17a   :  { %v6512_v59 = vld [vmem:[%s12377_s0 + $0x308] ss:$16 sm:%s3117_s23]   ;;  %s3178_s23 = smov 3 }
 0x17b   :  { %v6506_v60 = vld [vmem:[%s12377_s0 + $0x108] ss:$16 sm:%s3089_s28]   ;;  %s3181_s28 = smov 12  ;;  %v3120_v2 = vsel %vm10_vm1, %v6512_v59, %v3115_v58 }
 0x17c   :  { %v6513_v61 = vld [vmem:[%s12377_s0 + $0x308] ss:$16 sm:%s3122_s16]   ;;  %v3092_v63 = vsel %vm6_vm0, %v6506_v60, %v6505_v55  ;;  %s3260_s16 = smov 192 }
 0x17d   :  { %v6507_v62 = vld [vmem:[%s12377_s0 + $0x108] ss:$16 sm:%s3094_s2]   ;;  %2942 = vrot.lane.b32.xlu2 %v2941_v1, %s7120_s18  ;;  %v3125_v11 = vsel %vm14_vm2, %v6513_v61, %v3120_v2  ;;  %v2187_v15 = vpop.permute.xlu2 %2186   ;;  %s3232_s2 = smov 48 }
 0x17e   :  { %v6485_v0 = vld [vmem:[%s12377_s0 + $0x88] ss:$16 sm:%s2994_s25]   ;;  %v3097_v6 = vsel %vm10_vm1, %v6507_v62, %v3092_v63  ;;  %3126 = vrot.lane.b32.xlu1 %v3125_v11, %s7120_s18  ;;  %2189 = vst.msk [vmem:[%s12378_s1] sm:$0xff] %vm2188_vm9, %v2187_v15   ;;  %v2164_v26 = vpop.permute.xlu1 %2163   ;;  %s3132_s25 = smov 3 }
 0x17f   :  { %v6486_v51 = vld [vmem:[%s12377_s0 + $0x88] ss:$16 sm:%s2997_s9]   ;;  %6307 = vst.msk [vmem:[%s12378_s1 + $0x78] sm:$0xff] %vm1821_vm8, %v2164_v26   ;;  %s3135_s9 = smov 12 }
 0x180   :  { %v6508_v3 = vld [vmem:[%s12377_s0 + $0x108] ss:$16 sm:%s3099_s13]   ;;  %v3000_v7 = vsel %vm6_vm0, %v6486_v51, %v6485_v0  ;;  %s3237_s13 = smov 192 }
 0x181   :  { %v6487_v4 = vld [vmem:[%s12377_s0 + $0x88] ss:$16 sm:%s3002_s19]   ;;  %v3102_v14 = vsel %vm14_vm2, %v6508_v3, %v3097_v6  ;;  %s3224_s19 = smov 3 }
 0x182   :  { %v6525_v8 = vld [vmem:[%s12377_s0 + $0x188] ss:$16 sm:%s3178_s23]   ;;  %v3005_v17 = vsel %vm10_vm1, %v6487_v4, %v3000_v7  ;;  %3103 = vrot.lane.b32.xlu0 %v3102_v14, %s7120_s18  ;;  %v2141_v31 = vpop.permute.xlu0 %2140   ;;  %s3255_s23 = smov 48 }
 0x183   :  { %v6526_v9 = vld [vmem:[%s12377_s0 + $0x188] ss:$16 sm:%s3181_s28]   ;;  %s3227_s28 = smov 12  ;;  %6302 = vst.msk [vmem:[%s12378_s1 + $0x58] sm:$0xff] %vm1821_vm8, %v2141_v31  }
 0x184   :  { %v6488_v12 = vld [vmem:[%s12377_s0 + $0x88] ss:$16 sm:%s3007_s26]   ;;  %v3184_v18 = vsel %vm6_vm0, %v6526_v9, %v6525_v8  ;;  %s3145_s26 = smov 192 }
 0x185   :  { %v6520_v13 = vld [vmem:[%s12377_s0 + $0x708] ss:$16 sm:%s3155_s8]   ;;  %s3071_s8 = smov 48  ;;  %v3010_v27 = vsel %vm14_vm2, %v6488_v12, %v3005_v17  ;;  %v2255_v39 = vpop.permute.xlu2 %2254  }
 0x186   :  { %v6527_v19 = vld [vmem:[%s12377_s0 + $0x188] ss:$16 sm:%s3186_s12]   ;;  %s3247_s12 = smov 3  ;;  %3011 = vrot.lane.b32.xlu2 %v3010_v27, %s7120_s18  ;;  %6326 = vst.msk [vmem:[%s12378_s1 + $0x60] sm:$0xff] %vm2188_vm9, %v2255_v39   ;;  %v2232_v50 = vpop.permute.xlu1 %2231  }
 0x187   :  { %v6521_v20 = vld [vmem:[%s12377_s0 + $0x708] ss:$16 sm:%s3158_s4]   ;;  %s3250_s4 = smov 12  ;;  %v3189_v28 = vsel %vm10_vm1, %v6527_v19, %v3184_v18  ;;  %6321 = vst.msk [vmem:[%s12378_s1 + $0x40] sm:$0xff] %vm2188_vm9, %v2232_v50  }
 0x188   :  { %v6528_v21 = vld [vmem:[%s12377_s0 + $0x188] ss:$16 sm:%s3191_s5]   ;;  %v3161_v23 = vsel %vm6_vm0, %v6521_v20, %v6520_v13  ;;  %s3328_s5 = smov 192 }
 0x189   :  { %v6522_v22 = vld [vmem:[%s12377_s0 + $0x708] ss:$16 sm:%s3163_s11]   ;;  %v3194_v35 = vsel %vm14_vm2, %v6528_v21, %v3189_v28  ;;  %s3300_s11 = smov 48  ;;  %v6557_v3 = vld [vmem:[%s12377_s0 + $0x407] ss:$16 sm:%s3328_s5]   ;;  %s3512_s5 = smov 192 }
 0x18a   :  { %v6500_v24 = vld [vmem:[%s12377_s0 + $0x688] ss:$16 sm:%s3063_s20]   ;;  %v3166_v32 = vsel %vm10_vm1, %v6522_v22, %v3161_v23  ;;  %3195 = vrot.lane.b32.xlu1 %v3194_v35, %s7120_s18  ;;  %v2209_v56 = vpop.permute.xlu0 %2208   ;;  %s3201_s20 = smov 3 }
 0x18b   :  { %v6501_v25 = vld [vmem:[%s12377_s0 + $0x688] ss:$16 sm:%s3066_s21]   ;;  %6316 = vst.msk [vmem:[%s12378_s1 + $0x20] sm:$0xff] %vm2188_vm9, %v2209_v56   ;;  %s3204_s21 = smov 12 }
 0x18c   :  { %v6523_v29 = vld [vmem:[%s12377_s0 + $0x708] ss:$16 sm:%s3168_s24]   ;;  %v3069_v33 = vsel %vm6_vm0, %v6501_v25, %v6500_v24  ;;  %s3305_s24 = smov 192  ;;  %v6551_v4 = vld [vmem:[%s12377_s0 + $0x207] ss:$16 sm:%s3300_s11]   ;;  %s3874_s11 = smov 48 }
 0x18d   :  { %v6502_v30 = vld [vmem:[%s12377_s0 + $0x688] ss:$16 sm:%s3071_s8]   ;;  %v3171_v38 = vsel %vm14_vm2, %v6523_v29, %v3166_v32  ;;  %s3292_s8 = smov 3  ;;  %v2324_v0 = vpop.permute.xlu2 %2323   ;;  %v6552_v12 = vld [vmem:[%s12377_s0 + $0x207] ss:$16 sm:%s3305_s24]   ;;  %s3456_s24 = smov 12 }
 0x18e   :  { %v6540_v10 = vld [vmem:[%s12377_s0 + $0x788] ss:$16 sm:%s3247_s12]   ;;  %v3074_v40 = vsel %vm10_vm1, %v6502_v30, %v3069_v33  ;;  %3172 = vrot.lane.b32.xlu0 %v3171_v38, %s7120_s18  ;;  %s3323_s12 = smov 48  ;;  %6341 = vst.msk [vmem:[%s12378_s1 + $0x48] sm:$0xff] %vm2188_vm9, %v2324_v0   ;;  %v2301_v8 = vpop.permute.xlu1 %2300  }
 0x18f   :  { %v6541_v34 = vld [vmem:[%s12377_s0 + $0x788] ss:$16 sm:%s3250_s4]   ;;  %s3295_s4 = smov 12  ;;  %v6549_v62 = vld [vmem:[%s12377_s0 + $0x207] ss:$16 sm:%s3292_s8]   ;;  %s3209_s8 = smov 48 }
 0x190   :  { %v6503_v36 = vld [vmem:[%s12377_s0 + $0x688] ss:$16 sm:%s3076_s15]   ;;  %v3253_v41 = vsel %vm6_vm0, %v6541_v34, %v6540_v10  ;;  %v6556_v1 = vld [vmem:[%s12377_s0 + $0x407] ss:$16 sm:%s3323_s12]   ;;  %s3384_s12 = smov 3  ;;  %s3214_s15 = smov 192 }
 0x191   :  { %v6535_v37 = vld [vmem:[%s12377_s0 + $0x588] ss:$16 sm:%s3224_s19]   ;;  %s3140_s19 = smov 48  ;;  %v3079_v52 = vsel %vm14_vm2, %v6503_v36, %v3074_v40  ;;  %v6550_v2 = vld [vmem:[%s12377_s0 + $0x207] ss:$16 sm:%s3295_s4]   ;;  %s3387_s4 = smov 12 }
 0x192   :  { %v6542_v42 = vld [vmem:[%s12377_s0 + $0x788] ss:$16 sm:%s3255_s23]   ;;  %s3315_s23 = smov 3  ;;  %3080 = vrot.lane.b32.xlu2 %v3079_v52, %s7120_s18  ;;  %v3298_v5 = vsel %vm6_vm0, %v6550_v2, %v6549_v62  ;;  %6336 = vst.msk [vmem:[%s12378_s1 + $0x28] sm:$0xff] %vm2188_vm9, %v2301_v8   ;;  %v2278_v14 = vpop.permute.xlu0 %2277  }
 0x193   :  { %v6536_v43 = vld [vmem:[%s12377_s0 + $0x588] ss:$16 sm:%s3227_s28]   ;;  %s3318_s28 = smov 12  ;;  %v3258_v16 = vsel %vm10_vm1, %v6542_v42, %v3253_v41  ;;  %v6554_v58 = vld [vmem:[%s12377_s0 + $0x407] ss:$16 sm:%s3315_s23]   ;;  %v3303_v15 = vsel %vm10_vm1, %v6551_v4, %v3298_v5  ;;  %s3392_s23 = smov 48 }
 0x194   :  { %v6543_v44 = vld [vmem:[%s12377_s0 + $0x788] ss:$16 sm:%s3260_s16]   ;;  %v3230_v47 = vsel %vm6_vm0, %v6536_v43, %v6535_v37  ;;  %v6555_v59 = vld [vmem:[%s12377_s0 + $0x407] ss:$16 sm:%s3318_s28]   ;;  %s3364_s28 = smov 12  ;;  %s3397_s16 = smov 192  ;;  %v3308_v23 = vsel %vm14_vm2, %v6552_v12, %v3303_v15 }
 0x195   :  { %v6537_v46 = vld [vmem:[%s12377_s0 + $0x588] ss:$16 sm:%s3232_s2]   ;;  %v3263_v60 = vsel %vm14_vm2, %v6543_v44, %v3258_v16  ;;  %v3321_v54 = vsel %vm6_vm0, %v6555_v59, %v6554_v58  ;;  %v6569_v18 = vld [vmem:[%s12377_s0 + $0x287] ss:$16 sm:%s3384_s12]   ;;  %s3369_s2 = smov 48  ;;  %v2393_v24 = vpop.permute.xlu2 %2392   ;;  %s3685_s12 = smov 12 }
 0x196   :  { %v6515_v48 = vld [vmem:[%s12377_s0 + $0x508] ss:$16 sm:%s3132_s25]   ;;  %v3235_v57 = vsel %vm10_vm1, %v6537_v46, %v3230_v47  ;;  %3264 = vrot.lane.b32.xlu1 %v3263_v60, %s7120_s18  ;;  %v3326_v11 = vsel %vm10_vm1, %v6556_v1, %v3321_v54  ;;  %6331 = vst.msk [vmem:[%s12378_s1 + $0x8] sm:$0xff] %vm2188_vm9, %v2278_v14   ;;  %s3270_s25 = smov 3  ;;  %v2370_v10 = vpop.permute.xlu1 %2369  }
 0x197   :  { %v6516_v49 = vld [vmem:[%s12377_s0 + $0x508] ss:$16 sm:%s3135_s9]   ;;  %v6570_v19 = vld [vmem:[%s12377_s0 + $0x287] ss:$16 sm:%s3387_s4]   ;;  %v3331_v20 = vsel %vm14_vm2, %v6557_v3, %v3326_v11  ;;  %s3273_s9 = smov 12  ;;  %s3461_s4 = smov 48 }
 0x198   :  { %v6538_v53 = vld [vmem:[%s12377_s0 + $0x588] ss:$16 sm:%s3237_s13]   ;;  %v3138_v45 = vsel %vm6_vm0, %v6516_v49, %v6515_v48  ;;  %v3390_v26 = vsel %vm6_vm0, %v6570_v19, %v6569_v18  ;;  %v6571_v27 = vld [vmem:[%s12377_s0 + $0x287] ss:$16 sm:%s3392_s23]   ;;  %s3374_s13 = smov 192  ;;  %s3754_s23 = smov 12 }
 0x199   :  { %v6517_v55 = vld [vmem:[%s12377_s0 + $0x508] ss:$16 sm:%s3140_s19]   ;;  %v3240_v63 = vsel %vm14_vm2, %v6538_v53, %v3235_v57  ;;  %s3361_s19 = smov 3  ;;  %v6565_v28 = vld [vmem:[%s12377_s0 + $0x87] ss:$16 sm:%s3364_s28]   ;;  %s3453_s28 = smov 3  ;;  %v3395_v35 = vsel %vm10_vm1, %v6571_v27, %v3390_v26 }
 0x19a   :  { %v6518_v61 = vld [vmem:[%s12377_s0 + $0x508] ss:$16 sm:%s3145_s26]   ;;  %v3143_v51 = vsel %vm10_vm1, %v6517_v55, %v3138_v45  ;;  %3241 = vrot.lane.b32.xlu0 %v3240_v63, %s7120_s18  ;;  %6356 = vst.msk [vmem:[%s12378_s1 + $0x30] sm:$0xff] %vm2188_vm9, %v2393_v24   ;;  %v2347_v38 = vpop.permute.xlu0 %2346   ;;  %s3782_s26 = smov 48 }
 0x19b   :  { %v6530_v6 = vld [vmem:[%s12377_s0 + $0x388] ss:$16 sm:%s3201_s20]   ;;  %v3148_v9 = vsel %vm14_vm2, %v6518_v61, %v3143_v51  ;;  %v6564_v22 = vld [vmem:[%s12377_s0 + $0x87] ss:$16 sm:%s3361_s19]   ;;  %s3278_s20 = smov 48  ;;  %s3351_s19 = smov 192 }
 0x19c   :  { %v6531_v7 = vld [vmem:[%s12377_s0 + $0x388] ss:$16 sm:%s3204_s21]   ;;  %3149 = vrot.lane.b32.xlu2 %v3148_v9, %s7120_s18  ;;  %v3367_v31 = vsel %vm6_vm0, %v6565_v28, %v6564_v22  ;;  %6351 = vst.msk [vmem:[%s12378_s1 + $0x10] sm:$0xff] %vm2188_vm9, %v2370_v10   ;;  %s3338_s21 = smov 3 }
 0x19d   :  { %v6532_v13 = vld [vmem:[%s12377_s0 + $0x388] ss:$16 sm:%s3209_s8]   ;;  %v3207_v17 = vsel %vm6_vm0, %v6531_v7, %v6530_v6  ;;  %v6572_v29 = vld [vmem:[%s12377_s0 + $0x287] ss:$16 sm:%s3397_s16]   ;;  %s3283_s8 = smov 192  ;;  %v2462_v48 = vpop.permute.xlu2 %2461   ;;  %s7122_s16 = smov 48  }
 0x19e   :  { %v6533_v21 = vld [vmem:[%s12377_s0 + $0x388] ss:$16 sm:%s3214_s15]   ;;  %v3212_v25 = vsel %vm10_vm1, %v6532_v13, %v3207_v17  ;;  %3332 = vrot.lane.b32.xlu1 %v3331_v20, %s7121_s29  ;;  %6346 = vst.msk [vmem:[%s12378_s1 + $0x68] sm:$0xff] %vm2188_vm9, %v2347_v38   ;;  %v3400_v43 = vsel %vm14_vm2, %v6572_v29, %v3395_v35  ;;  %v2439_v58 = vpop.permute.xlu1 %2438   ;;  %s3851_s15 = smov 48 }
 0x19f   :  { %v6566_v30 = vld [vmem:[%s12377_s0 + $0x87] ss:$16 sm:%s3369_s2]   ;;  %v3217_v34 = vsel %vm14_vm2, %v6533_v21, %v3212_v25  ;;  %6371 = vst.msk [vmem:[%s12378_s1 + $0x18] sm:$0xff] %vm2188_vm9, %v2462_v48   ;;  %s3535_s2 = smov 192 }
 0x1a0   :  { %v6545_v32 = vld [vmem:[%s12377_s0 + $0x7] ss:$16 sm:%s3270_s25]   ;;  %s3430_s25 = smov 3  ;;  %v3372_v39 = vsel %vm10_vm1, %v6566_v30, %v3367_v31  ;;  %6366 = vst.msk [vmem:[%s12378_s1 + $0x70] sm:$0xff] %vm2188_vm9, %v2439_v58  }
 0x1a1   :  { %v6546_v33 = vld [vmem:[%s12377_s0 + $0x7] ss:$16 sm:%s3273_s9]   ;;  %s3407_s9 = smov 3 }
 0x1a2   :  { %3309 = vrot.lane.b32.xlu0 %v3308_v23, %s7121_s29  ;;  %v6567_v36 = vld [vmem:[%s12377_s0 + $0x87] ss:$16 sm:%s3374_s13]   ;;  %v3276_v40 = vsel %vm6_vm0, %v6546_v33, %v6545_v32  ;;  %s3433_s13 = smov 12  ;;  %v2416_v63 = vpop.permute.xlu0 %2415  }
 0x1a3   :  { %v6547_v37 = vld [vmem:[%s12377_s0 + $0x7] ss:$16 sm:%s3278_s20]   ;;  %v3377_v47 = vsel %vm14_vm2, %v6567_v36, %v3372_v39  ;;  %s3499_s20 = smov 3  ;;  %6361 = vst.msk [vmem:[%s12378_s1 + $0x50] sm:$0xff] %vm2188_vm9, %v2416_v63  }
 0x1a4   :  { %v6584_v41 = vld [vmem:[%s12377_s0 + $0x107] ss:$16 sm:%s3453_s28]   ;;  %3218 = vrot.lane.b32.xlu2 %v3217_v34, %s7120_s18  ;;  %s3466_s18 = smov 192  ;;  %v3281_v49 = vsel %vm10_vm1, %v6547_v37, %v3276_v40  ;;  %s3530_s28 = smov 48 }
 0x1a5   :  { %v6585_v42 = vld [vmem:[%s12377_s0 + $0x107] ss:$16 sm:%s3456_s24]   ;;  %s3502_s24 = smov 12  ;;  %v2531_v6 = vpop.permute.xlu2 %2530  }
 0x1a6   :  { %v6548_v44 = vld [vmem:[%s12377_s0 + $0x7] ss:$16 sm:%s3283_s8]   ;;  %v3459_v50 = vsel %vm6_vm0, %v6585_v42, %v6584_v41  ;;  %3401 = vrot.lane.b32.xlu1 %v3400_v43, %s7121_s29  ;;  %6386 = vst.msk [vmem:[%s12378_s1 + $0x78] sm:$0xff] %vm2188_vm9, %v2531_v6   ;;  %s3420_s8 = smov 192 }
 0x1a7   :  { %v6579_v46 = vld [vmem:[%s12377_s0 + $0x687] ss:$16 sm:%s3430_s25]   ;;  %s3346_s25 = smov 48  ;;  %v3286_v59 = vsel %vm14_vm2, %v6548_v44, %v3281_v49  ;;  %v2508_v18 = vpop.permute.xlu1 %2507  }
 0x1a8   :  { %v6586_v52 = vld [vmem:[%s12377_s0 + $0x107] ss:$16 sm:%s3461_s4]   ;;  %s3522_s4 = smov 3  ;;  %6381 = vst.msk [vmem:[%s12378_s1 + $0x58] sm:$0xff] %vm2188_vm9, %v2508_v18  }
 0x1a9   :  { %v6580_v16 = vld [vmem:[%s12377_s0 + $0x687] ss:$16 sm:%s3433_s13]   ;;  %s3525_s13 = smov 12  ;;  %v3464_v60 = vsel %vm10_vm1, %v6586_v52, %v3459_v50 }
 0x1aa   :  { %v6587_v53 = vld [vmem:[%s12377_s0 + $0x107] ss:$16 sm:%s3466_s18]   ;;  %v3436_v56 = vsel %vm6_vm0, %v6580_v16, %v6579_v46  ;;  %3378 = vrot.lane.b32.xlu0 %v3377_v47, %s7121_s29  ;;  %s3604_s18 = smov 192 }
 0x1ab   :  { %v6581_v55 = vld [vmem:[%s12377_s0 + $0x687] ss:$16 sm:%s3438_s14]   ;;  %v3469_v2 = vsel %vm14_vm2, %v6587_v53, %v3464_v60  ;;  %v2485_v23 = vpop.permute.xlu0 %2484   ;;  %s3576_s14 = smov 48 }
 0x1ac   :  { %v6559_v57 = vld [vmem:[%s12377_s0 + $0x607] ss:$16 sm:%s3338_s21]   ;;  %v3441_v0 = vsel %vm10_vm1, %v6581_v55, %v3436_v56  ;;  %3287 = vrot.lane.b32.xlu2 %v3286_v59, %s7121_s29  ;;  %6376 = vst.msk [vmem:[%s12378_s1 + $0x38] sm:$0xff] %vm2188_vm9, %v2485_v23   ;;  %s3476_s21 = smov 3 }
 0x1ad   :  { %v6560_v45 = vld [vmem:[%s12377_s0 + $0x607] ss:$16 sm:%s3341_s6]   ;;  %s3479_s6 = smov 12  ;;  %v2599_v32 = vpop.permute.xlu2 %2598  }
 0x1ae   :  { %v6582_v61 = vld [vmem:[%s12377_s0 + $0x687] ss:$16 sm:%s3443_s30]   ;;  %v3344_v51 = vsel %vm6_vm0, %v6560_v45, %v6559_v57  ;;  %3470 = vrot.lane.b32.xlu1 %v3469_v2, %s7121_s29  ;;  %s3581_s30 = smov 192  ;;  %6400 = vst.msk [vmem:[%s12378_s1 + $0x40] sm:$0xff] %vm2555_vm10, %v2599_v32  }
 0x1af   :  { %v6561_v62 = vld [vmem:[%s12377_s0 + $0x607] ss:$16 sm:%s3346_s25]   ;;  %v3446_v5 = vsel %vm14_vm2, %v6582_v61, %v3441_v0  ;;  %s3568_s25 = smov 3  ;;  %v2576_v41 = vpop.permute.xlu1 %2575  }
 0x1b0   :  { %v6599_v54 = vld [vmem:[%s12377_s0 + $0x707] ss:$16 sm:%s3522_s4]   ;;  %v3349_v7 = vsel %vm10_vm1, %v6561_v62, %v3344_v51  ;;  %s3599_s4 = smov 48  ;;  %6395 = vst.msk [vmem:[%s12378_s1 + $0x20] sm:$0xff] %vm2555_vm10, %v2576_v41  }
 0x1b1   :  { %v6600_v1 = vld [vmem:[%s12377_s0 + $0x707] ss:$16 sm:%s3525_s13]   ;;  %s3571_s13 = smov 12 }
 0x1b2   :  { %v6562_v3 = vld [vmem:[%s12377_s0 + $0x607] ss:$16 sm:%s3351_s19]   ;;  %v3528_v8 = vsel %vm6_vm0, %v6600_v1, %v6599_v54  ;;  %3447 = vrot.lane.b32.xlu0 %v3446_v5, %s7121_s29  ;;  %s3489_s19 = smov 192 }
 0x1b3   :  { %v6594_v4 = vld [vmem:[%s12377_s0 + $0x507] ss:$16 sm:%s3499_s20]   ;;  %s3415_s20 = smov 48  ;;  %v3354_v19 = vsel %vm14_vm2, %v6562_v3, %v3349_v7  ;;  %v2554_v47 = vpop.permute.xlu0 %2553  }
 0x1b4   :  { %v6601_v9 = vld [vmem:[%s12377_s0 + $0x707] ss:$16 sm:%s3530_s28]   ;;  %s3591_s28 = smov 3  ;;  %3355 = vrot.lane.b32.xlu2 %v3354_v19, %s7121_s29  ;;  %2556 = vst.msk [vmem:[%s12378_s1] sm:$0xff] %vm2555_vm10, %v2554_v47  }
 0x1b5   :  { %v6595_v11 = vld [vmem:[%s12377_s0 + $0x507] ss:$16 sm:%s3502_s24]   ;;  %s3594_s24 = smov 12  ;;  %v3533_v20 = vsel %vm10_vm1, %v6601_v9, %v3528_v8 }
 0x1b6   :  { %v6602_v12 = vld [vmem:[%s12377_s0 + $0x707] ss:$16 sm:%s3535_s2]   ;;  %v3505_v14 = vsel %vm6_vm0, %v6595_v11, %v6594_v4  ;;  %s3672_s2 = smov 192  ;;  %v2668_v57 = vpop.permute.xlu2 %2667  }
 0x1b7   :  { %v6596_v13 = vld [vmem:[%s12377_s0 + $0x507] ss:$16 sm:%s3507_s3]   ;;  %v3538_v28 = vsel %vm14_vm2, %v6602_v12, %v3533_v20  ;;  %s3645_s3 = smov 48  ;;  %6415 = vst.msk [vmem:[%s12378_s1 + $0x28] sm:$0xff] %vm2555_vm10, %v2668_v57   ;;  %v2645_v54 = vpop.permute.xlu1 %2644  }
 0x1b8   :  { %v6574_v15 = vld [vmem:[%s12377_s0 + $0x487] ss:$16 sm:%s3407_s9]   ;;  %v3510_v24 = vsel %vm10_vm1, %v6596_v13, %v3505_v14  ;;  %3539 = vrot.lane.b32.xlu1 %v3538_v28, %s7121_s29  ;;  %s3545_s9 = smov 3  ;;  %6410 = vst.msk [vmem:[%s12378_s1 + $0x8] sm:$0xff] %vm2555_vm10, %v2645_v54  }
 0x1b9   :  { %v6575_v17 = vld [vmem:[%s12377_s0 + $0x487] ss:$16 sm:%s3410_s27]   ;;  %s3548_s27 = smov 12  ;;  %v6631_v61 = vld [vmem:[%s12377_s0 + $0x206] ss:$16 sm:%s3672_s2]   ;;  %s3869_s2 = smov 12 }
 0x1ba   :  { %v6597_v21 = vld [vmem:[%s12377_s0 + $0x507] ss:$16 sm:%s3512_s5]   ;;  %v3413_v25 = vsel %vm6_vm0, %v6575_v17, %v6574_v15  ;;  %s3650_s5 = smov 192  ;;  %v6626_v62 = vld [vmem:[%s12377_s0 + $0x6] ss:$16 sm:%s3645_s3]   ;;  %s3856_s3 = smov 192 }
 0x1bb   :  { %v6576_v22 = vld [vmem:[%s12377_s0 + $0x487] ss:$16 sm:%s3415_s20]   ;;  %v3515_v31 = vsel %vm14_vm2, %v6597_v21, %v3510_v24  ;;  %s3637_s20 = smov 3  ;;  %v6627_v3 = vld [vmem:[%s12377_s0 + $0x6] ss:$16 sm:%s3650_s5]   ;;  %v2622_v5 = vpop.permute.xlu0 %2621   ;;  %s3800_s5 = smov 12 }
 0x1bc   :  { %v6614_v26 = vld [vmem:[%s12377_s0 + $0x587] ss:$16 sm:%s3591_s28]   ;;  %v3418_v33 = vsel %vm10_vm1, %v6576_v22, %v3413_v25  ;;  %3516 = vrot.lane.b32.xlu0 %v3515_v31, %s7121_s29  ;;  %s3667_s28 = smov 48  ;;  %6405 = vst.msk [vmem:[%s12378_s1 + $0x60] sm:$0xff] %vm2555_vm10, %v2622_v5  }
 0x1bd   :  { %v6615_v27 = vld [vmem:[%s12377_s0 + $0x587] ss:$16 sm:%s3594_s24]   ;;  %s3640_s24 = smov 12  ;;  %v6624_v55 = vld [vmem:[%s12377_s0 + $0x6] ss:$16 sm:%s3637_s20]   ;;  %s3553_s20 = smov 48 }
 0x1be   :  { %v6577_v29 = vld [vmem:[%s12377_s0 + $0x487] ss:$16 sm:%s3420_s8]   ;;  %v3597_v10 = vsel %vm6_vm0, %v6615_v27, %v6614_v26  ;;  %v6630_v59 = vld [vmem:[%s12377_s0 + $0x206] ss:$16 sm:%s3667_s28]   ;;  %s3728_s28 = smov 3  ;;  %s3558_s8 = smov 192 }
 0x1bf   :  { %v6609_v30 = vld [vmem:[%s12377_s0 + $0x387] ss:$16 sm:%s3568_s25]   ;;  %s3484_s25 = smov 48  ;;  %v3423_v42 = vsel %vm14_vm2, %v6577_v29, %v3418_v33  ;;  %v6625_v60 = vld [vmem:[%s12377_s0 + $0x6] ss:$16 sm:%s3640_s24]   ;;  %s3731_s24 = smov 12  ;;  %v2737_v15 = vpop.permute.xlu2 %2736   ;;  %v2714_v26 = vpop.permute.xlu1 %2713  }
 0x1c0   :  { %v6616_v34 = vld [vmem:[%s12377_s0 + $0x587] ss:$16 sm:%s3599_s4]   ;;  %s3659_s4 = smov 3  ;;  %3424 = vrot.lane.b32.xlu2 %v3423_v42, %s7121_s29  ;;  %v3643_v63 = vsel %vm6_vm0, %v6625_v60, %v6624_v55  ;;  %6430 = vst.msk [vmem:[%s12378_s1 + $0x10] sm:$0xff] %vm2555_vm10, %v2737_v15  }
 0x1c1   :  { %v6610_v35 = vld [vmem:[%s12377_s0 + $0x387] ss:$16 sm:%s3571_s13]   ;;  %s3662_s13 = smov 12  ;;  %v3602_v43 = vsel %vm10_vm1, %v6616_v34, %v3597_v10  ;;  %v6628_v50 = vld [vmem:[%s12377_s0 + $0x206] ss:$16 sm:%s3659_s4]   ;;  %v3648_v6 = vsel %vm10_vm1, %v6626_v62, %v3643_v63  ;;  %s3736_s4 = smov 48 }
 0x1c2   :  { %v6617_v36 = vld [vmem:[%s12377_s0 + $0x587] ss:$16 sm:%s3604_s18]   ;;  %v3574_v38 = vsel %vm6_vm0, %v6610_v35, %v6609_v30  ;;  %v6629_v52 = vld [vmem:[%s12377_s0 + $0x206] ss:$16 sm:%s3662_s13]   ;;  %s3708_s13 = smov 12  ;;  %s3741_s18 = smov 192  ;;  %v3653_v14 = vsel %vm14_vm2, %v6627_v3, %v3648_v6 }
 0x1c3   :  { %v6611_v37 = vld [vmem:[%s12377_s0 + $0x387] ss:$16 sm:%s3576_s14]   ;;  %v3607_v16 = vsel %vm14_vm2, %v6617_v36, %v3602_v43  ;;  %v3665_v58 = vsel %vm6_vm0, %v6629_v52, %v6628_v50  ;;  %v6643_v8 = vld [vmem:[%s12377_s0 + $0x86] ss:$16 sm:%s3728_s28]   ;;  %s3713_s14 = smov 48  ;;  %v2691_v31 = vpop.permute.xlu0 %2690   ;;  %s4026_s28 = smov 3 }
 0x1c4   :  { %v6589_v39 = vld [vmem:[%s12377_s0 + $0x307] ss:$16 sm:%s3476_s21]   ;;  %v3579_v48 = vsel %vm10_vm1, %v6611_v37, %v3574_v38  ;;  %3608 = vrot.lane.b32.xlu1 %v3607_v16, %s7121_s29  ;;  %v3670_v2 = vsel %vm10_vm1, %v6630_v59, %v3665_v58  ;;  %s3614_s21 = smov 3  ;;  %6425 = vst.msk [vmem:[%s12378_s1 + $0x68] sm:$0xff] %vm2555_vm10, %v2714_v26  }
 0x1c5   :  { %v6590_v40 = vld [vmem:[%s12377_s0 + $0x307] ss:$16 sm:%s3479_s6]   ;;  %v6644_v9 = vld [vmem:[%s12377_s0 + $0x86] ss:$16 sm:%s3731_s24]   ;;  %v3675_v11 = vsel %vm14_vm2, %v6631_v61, %v3670_v2  ;;  %s3617_s6 = smov 12  ;;  %s3805_s24 = smov 48 }
 0x1c6   :  { %v6612_v44 = vld [vmem:[%s12377_s0 + $0x387] ss:$16 sm:%s3581_s30]   ;;  %v3482_v49 = vsel %vm6_vm0, %v6590_v40, %v6589_v39  ;;  %v3734_v18 = vsel %vm6_vm0, %v6644_v9, %v6643_v8  ;;  %v6645_v19 = vld [vmem:[%s12377_s0 + $0x86] ss:$16 sm:%s3736_s4]   ;;  %s3718_s30 = smov 192  ;;  %s3823_s4 = smov 12 }
 0x1c7   :  { %v6591_v46 = vld [vmem:[%s12377_s0 + $0x307] ss:$16 sm:%s3484_s25]   ;;  %v3584_v56 = vsel %vm14_vm2, %v6612_v44, %v3579_v48  ;;  %s3705_s25 = smov 3  ;;  %v6639_v20 = vld [vmem:[%s12377_s0 + $0x606] ss:$16 sm:%s3708_s13]   ;;  %s3797_s13 = smov 3  ;;  %v3739_v28 = vsel %vm10_vm1, %v6645_v19, %v3734_v18  ;;  %v2806_v39 = vpop.permute.xlu2 %2805   ;;  %v2783_v50 = vpop.permute.xlu1 %2782  }
 0x1c8   :  { %v6592_v53 = vld [vmem:[%s12377_s0 + $0x307] ss:$16 sm:%s3489_s19]   ;;  %v3487_v45 = vsel %vm10_vm1, %v6591_v46, %v3482_v49  ;;  %3585 = vrot.lane.b32.xlu0 %v3584_v56, %s7121_s29  ;;  %6420 = vst.msk [vmem:[%s12378_s1 + $0x48] sm:$0xff] %vm2555_vm10, %v2691_v31   ;;  %s4154_s19 = smov 192 }
 0x1c9   :  { %v6604_v0 = vld [vmem:[%s12377_s0 + $0x187] ss:$16 sm:%s3545_s9]   ;;  %v3492_v1 = vsel %vm14_vm2, %v6592_v53, %v3487_v45  ;;  %v6638_v13 = vld [vmem:[%s12377_s0 + $0x606] ss:$16 sm:%s3705_s25]   ;;  %s3622_s9 = smov 48  ;;  %s4544_s25 = smov 192 }
 0x1ca   :  { %v6605_v51 = vld [vmem:[%s12377_s0 + $0x187] ss:$16 sm:%s3548_s27]   ;;  %3493 = vrot.lane.b32.xlu2 %v3492_v1, %s7121_s29  ;;  %v3711_v23 = vsel %vm6_vm0, %v6639_v20, %v6638_v13  ;;  %6445 = vst.msk [vmem:[%s12378_s1 + $0x70] sm:$0xff] %vm2555_vm10, %v2806_v39   ;;  %s3695_s27 = smov 192 }
 0x1cb   :  { %v6606_v4 = vld [vmem:[%s12377_s0 + $0x187] ss:$16 sm:%s3553_s20]   ;;  %v3551_v7 = vsel %vm6_vm0, %v6605_v51, %v6604_v0  ;;  %v6646_v21 = vld [vmem:[%s12377_s0 + $0x86] ss:$16 sm:%s3741_s18]   ;;  %s3627_s20 = smov 192  ;;  %s3787_s18 = smov 192  ;;  %v2760_v56 = vpop.permute.xlu0 %2759  }
 0x1cc   :  { %v6607_v12 = vld [vmem:[%s12377_s0 + $0x187] ss:$16 sm:%s3558_s8]   ;;  %v3556_v17 = vsel %vm10_vm1, %v6606_v4, %v3551_v7  ;;  %3676 = vrot.lane.b32.xlu1 %v3675_v11, %s7122_s16  ;;  %v3744_v35 = vsel %vm14_vm2, %v6646_v21, %v3739_v28  ;;  %6440 = vst.msk [vmem:[%s12378_s1 + $0x50] sm:$0xff] %vm2555_vm10, %v2783_v50   ;;  %s3920_s8 = smov 48 }
 0x1cd   :  { %v6640_v22 = vld [vmem:[%s12377_s0 + $0x606] ss:$16 sm:%s3713_s14]   ;;  %v6619_v24 = vld [vmem:[%s12377_s0 + $0x787] ss:$16 sm:%s3614_s21]   ;;  %v3561_v27 = vsel %vm14_vm2, %v6607_v12, %v3556_v17  ;;  %s3774_s21 = smov 3  ;;  %s3925_s14 = smov 192 }
 0x1ce   :  { %v6620_v25 = vld [vmem:[%s12377_s0 + $0x787] ss:$16 sm:%s3617_s6]   ;;  %v6641_v29 = vld [vmem:[%s12377_s0 + $0x606] ss:$16 sm:%s3718_s30]   ;;  %v3716_v32 = vsel %vm10_vm1, %v6640_v22, %v3711_v23  ;;  %s3777_s30 = smov 12  ;;  %s3690_s6 = smov 48 }
 0x1cf   :  { %v6621_v30 = vld [vmem:[%s12377_s0 + $0x787] ss:$16 sm:%s3622_s9]   ;;  %v3620_v33 = vsel %vm6_vm0, %v6620_v25, %v6619_v24  ;;  %v6658_v10 = vld [vmem:[%s12377_s0 + $0x686] ss:$16 sm:%s3797_s13]   ;;  %v3721_v38 = vsel %vm14_vm2, %v6641_v29, %v3716_v32  ;;  %v2875_v0 = vpop.permute.xlu2 %2874   ;;  %v2852_v8 = vpop.permute.xlu1 %2851   ;;  %s4195_s9 = smov 48  ;;  %s4095_s13 = smov 3 }
 0x1d0   :  { %3654 = vrot.lane.b32.xlu0 %v3653_v14, %s7122_s16  ;;  %v6659_v34 = vld [vmem:[%s12377_s0 + $0x686] ss:$16 sm:%s3800_s5]   ;;  %v3625_v40 = vsel %vm10_vm1, %v6621_v30, %v3620_v33  ;;  %6435 = vst.msk [vmem:[%s12378_s1 + $0x30] sm:$0xff] %vm2555_vm10, %v2760_v56   ;;  %s4098_s5 = smov 12 }
 0x1d1   :  { %v6622_v36 = vld [vmem:[%s12377_s0 + $0x787] ss:$16 sm:%s3627_s20]   ;;  %v6653_v37 = vld [vmem:[%s12377_s0 + $0x486] ss:$16 sm:%s3774_s21]   ;;  %v3803_v41 = vsel %vm6_vm0, %v6659_v34, %v6658_v10  ;;  %s3764_s21 = smov 192  ;;  %s4126_s20 = smov 48 }
 0x1d2   :  { %3562 = vrot.lane.b32.xlu2 %v3561_v27, %s7121_s29  ;;  %v6660_v42 = vld [vmem:[%s12377_s0 + $0x686] ss:$16 sm:%s3805_s24]   ;;  %v3630_v52 = vsel %vm14_vm2, %v6622_v36, %v3625_v40  ;;  %6460 = vst.msk [vmem:[%s12378_s1 + $0x58] sm:$0xff] %vm2555_vm10, %v2875_v0   ;;  %s4029_s24 = smov 12 }
 0x1d3   :  { %v6654_v43 = vld [vmem:[%s12377_s0 + $0x486] ss:$16 sm:%s3777_s30]   ;;  %s3866_s30 = smov 3  ;;  %v3808_v16 = vsel %vm10_vm1, %v6660_v42, %v3803_v41  ;;  %6455 = vst.msk [vmem:[%s12378_s1 + $0x38] sm:$0xff] %vm2555_vm10, %v2852_v8   ;;  %v2829_v14 = vpop.permute.xlu0 %2828  }
 0x1d4   :  { %3745 = vrot.lane.b32.xlu1 %v3744_v35, %s7122_s16  ;;  %v6661_v44 = vld [vmem:[%s12377_s0 + $0x686] ss:$16 sm:%s3810_s7]   ;;  %v3780_v47 = vsel %vm6_vm0, %v6654_v43, %v6653_v37  ;;  %6450 = vst.msk [vmem:[%s12378_s1 + $0x18] sm:$0xff] %vm2555_vm10, %v2829_v14   ;;  %s4218_s7 = smov 48 }
 0x1d5   :  { %v6655_v46 = vld [vmem:[%s12377_s0 + $0x486] ss:$16 sm:%s3782_s26]   ;;  %v3813_v60 = vsel %vm14_vm2, %v6661_v44, %v3808_v16  ;;  %s3948_s26 = smov 192 }
 0x1d6   :  { %v6633_v48 = vld [vmem:[%s12377_s0 + $0x406] ss:$16 sm:%s3682_s10]   ;;  %s3843_s10 = smov 3  ;;  %v3785_v57 = vsel %vm10_vm1, %v6655_v46, %v3780_v47 }
 0x1d7   :  { %v6634_v49 = vld [vmem:[%s12377_s0 + $0x406] ss:$16 sm:%s3685_s12]   ;;  %s3820_s12 = smov 3  ;;  %v2943_v24 = vpop.permute.xlu2 %2942   ;;  %v2921_v10 = vpop.permute.xlu1 %2920  }
 0x1d8   :  { %3722 = vrot.lane.b32.xlu0 %v3721_v38, %s7122_s16  ;;  %v6656_v53 = vld [vmem:[%s12377_s0 + $0x486] ss:$16 sm:%s3787_s18]   ;;  %v3688_v45 = vsel %vm6_vm0, %v6634_v49, %v6633_v48  ;;  %s3846_s18 = smov 12  ;;  %6474 = vst.msk [vmem:[%s12378_s1 + $0x20] sm:$0xff] %vm2922_vm11, %v2943_v24  }
 0x1d9   :  { %v6635_v55 = vld [vmem:[%s12377_s0 + $0x406] ss:$16 sm:%s3690_s6]   ;;  %v3790_v63 = vsel %vm14_vm2, %v6656_v53, %v3785_v57  ;;  %s3912_s6 = smov 3  ;;  %2923 = vst.msk [vmem:[%s12378_s1] sm:$0xff] %vm2922_vm11, %v2921_v10  }
 0x1da   :  { %v6673_v58 = vld [vmem:[%s12377_s0 + $0x506] ss:$16 sm:%s3866_s30]   ;;  %3631 = vrot.lane.b32.xlu2 %v3630_v52, %s7121_s29  ;;  %s3879_s29 = smov 192  ;;  %v3693_v51 = vsel %vm10_vm1, %v6635_v55, %v3688_v45  ;;  %s3943_s30 = smov 48 }
 0x1db   :  { %v6674_v59 = vld [vmem:[%s12377_s0 + $0x506] ss:$16 sm:%s3869_s2]   ;;  %s3915_s2 = smov 12  ;;  %v2898_v38 = vpop.permute.xlu0 %2897  }
 0x1dc   :  { %v6636_v61 = vld [vmem:[%s12377_s0 + $0x406] ss:$16 sm:%s3695_s27]   ;;  %v3872_v54 = vsel %vm6_vm0, %v6674_v59, %v6673_v58  ;;  %3814 = vrot.lane.b32.xlu1 %v3813_v60, %s7122_s16  ;;  %s3833_s27 = smov 192  ;;  %6465 = vst.msk [vmem:[%s12378_s1 + $0x78] sm:$0xff] %vm2555_vm10, %v2898_v38  }
 0x1dd   :  { %v6668_v62 = vld [vmem:[%s12377_s0 + $0x306] ss:$16 sm:%s3843_s10]   ;;  %s3759_s10 = smov 48  ;;  %v3698_v9 = vsel %vm14_vm2, %v6636_v61, %v3693_v51 }
 0x1de   :  { %v6675_v1 = vld [vmem:[%s12377_s0 + $0x506] ss:$16 sm:%s3874_s11]   ;;  %s3935_s11 = smov 3 }
 0x1df   :  { %v6669_v2 = vld [vmem:[%s12377_s0 + $0x306] ss:$16 sm:%s3846_s18]   ;;  %s3938_s18 = smov 12  ;;  %v3877_v11 = vsel %vm10_vm1, %v6675_v1, %v3872_v54  ;;  %v2989_v58 = vpop.permute.xlu1 %2988  }
 0x1e0   :  { %v6676_v3 = vld [vmem:[%s12377_s0 + $0x506] ss:$16 sm:%s3879_s29]   ;;  %v3849_v5 = vsel %vm6_vm0, %v6669_v2, %v6668_v62  ;;  %3791 = vrot.lane.b32.xlu0 %v3790_v63, %s7122_s16  ;;  %s4017_s29 = smov 192  ;;  %v3012_v48 = vpop.permute.xlu2 %3011   ;;  %6484 = vst.msk [vmem:[%s12378_s1 + $0x60] sm:$0xff] %vm2922_vm11, %v2989_v58  }
 0x1e1   :  { %v6670_v4 = vld [vmem:[%s12377_s0 + $0x306] ss:$16 sm:%s3851_s15]   ;;  %v3882_v20 = vsel %vm14_vm2, %v6676_v3, %v3877_v11  ;;  %s3989_s15 = smov 48  ;;  %6489 = vst.msk [vmem:[%s12378_s1 + $0x8] sm:$0xff] %vm2922_vm11, %v3012_v48  }
 0x1e2   :  { %v6648_v6 = vld [vmem:[%s12377_s0 + $0x286] ss:$16 sm:%s3751_s22]   ;;  %v3854_v15 = vsel %vm10_vm1, %v6670_v4, %v3849_v5  ;;  %3699 = vrot.lane.b32.xlu2 %v3698_v9, %s7122_s16  ;;  %s3889_s22 = smov 3 }
 0x1e3   :  { %v6649_v7 = vld [vmem:[%s12377_s0 + $0x286] ss:$16 sm:%s3754_s23]   ;;  %s3892_s23 = smov 12  ;;  %v6706_v53 = vld [vmem:[%s12377_s0 + $0x5] ss:$16 sm:%s4017_s29]   ;;  %v2966_v63 = vpop.permute.xlu0 %2965   ;;  %s4213_s29 = smov 12 }
 0x1e4   :  { %v6671_v12 = vld [vmem:[%s12377_s0 + $0x306] ss:$16 sm:%s3856_s3]   ;;  %v3757_v17 = vsel %vm6_vm0, %v6649_v7, %v6648_v6  ;;  %3883 = vrot.lane.b32.xlu1 %v3882_v20, %s7122_s16  ;;  %s3994_s3 = smov 192  ;;  %6479 = vst.msk [vmem:[%s12378_s1 + $0x40] sm:$0xff] %vm2922_vm11, %v2966_v63  }
 0x1e5   :  { %v6650_v13 = vld [vmem:[%s12377_s0 + $0x286] ss:$16 sm:%s3759_s10]   ;;  %v3859_v23 = vsel %vm14_vm2, %v6671_v12, %v3854_v15  ;;  %s3981_s10 = smov 3 }
 0x1e6   :  { %v6688_v18 = vld [vmem:[%s12377_s0 + $0x386] ss:$16 sm:%s3935_s11]   ;;  %v3762_v25 = vsel %vm10_vm1, %v6650_v13, %v3757_v17  ;;  %s4012_s11 = smov 48 }
 0x1e7   :  { %v6689_v19 = vld [vmem:[%s12377_s0 + $0x386] ss:$16 sm:%s3938_s18]   ;;  %s3984_s18 = smov 12  ;;  %v6705_v52 = vld [vmem:[%s12377_s0 + $0x5] ss:$16 sm:%s4012_s11]   ;;  %s4072_s11 = smov 3 }
 0x1e8   :  { %v6651_v21 = vld [vmem:[%s12377_s0 + $0x286] ss:$16 sm:%s3764_s21]   ;;  %v3941_v26 = vsel %vm6_vm0, %v6689_v19, %v6688_v18  ;;  %3860 = vrot.lane.b32.xlu0 %v3859_v23, %s7122_s16  ;;  %s3902_s21 = smov 192  ;;  %v3058_v18 = vpop.permute.xlu1 %3057  }
 0x1e9   :  { %v6683_v22 = vld [vmem:[%s12377_s0 + $0x186] ss:$16 sm:%s3912_s6]   ;;  %s3828_s6 = smov 48  ;;  %v3767_v34 = vsel %vm14_vm2, %v6651_v21, %v3762_v25  ;;  %v6717_v54 = vld [vmem:[%s12377_s0 + $0x605] ss:$16 sm:%s4072_s11]   ;;  %s4511_s11 = smov 12 }
 0x1ea   :  { %v6690_v27 = vld [vmem:[%s12377_s0 + $0x386] ss:$16 sm:%s3943_s30]   ;;  %s4004_s30 = smov 3  ;;  %3768 = vrot.lane.b32.xlu2 %v3767_v34, %s7122_s16  ;;  %6499 = vst.msk [vmem:[%s12378_s1 + $0x48] sm:$0xff] %vm2922_vm11, %v3058_v18  }
 0x1eb   :  { %v6684_v28 = vld [vmem:[%s12377_s0 + $0x186] ss:$16 sm:%s3915_s2]   ;;  %s4007_s2 = smov 12  ;;  %v3946_v35 = vsel %vm10_vm1, %v6690_v27, %v3941_v26  ;;  %v6703_v41 = vld [vmem:[%s12377_s0 + $0x5] ss:$16 sm:%s4004_s30]   ;;  %s4080_s30 = smov 48  ;;  %v3035_v23 = vpop.permute.xlu0 %3034  }
 0x1ec   :  { %v6691_v29 = vld [vmem:[%s12377_s0 + $0x386] ss:$16 sm:%s3948_s26]   ;;  %v3918_v31 = vsel %vm6_vm0, %v6684_v28, %v6683_v22  ;;  %v6704_v42 = vld [vmem:[%s12377_s0 + $0x5] ss:$16 sm:%s4007_s2]   ;;  %s4052_s2 = smov 12  ;;  %s4085_s26 = smov 192  ;;  %v3081_v6 = vpop.permute.xlu2 %3080  }
 0x1ed   :  { %v6685_v30 = vld [vmem:[%s12377_s0 + $0x186] ss:$16 sm:%s3920_s8]   ;;  %v3951_v43 = vsel %vm14_vm2, %v6691_v29, %v3946_v35  ;;  %v4010_v50 = vsel %vm6_vm0, %v6704_v42, %v6703_v41  ;;  %s4057_s8 = smov 48  ;;  %v6719_v9 = vld [vmem:[%s12377_s0 + $0x605] ss:$16 sm:%s4080_s30]   ;;  %s4167_s30 = smov 12 }
 0x1ee   :  { %v6663_v32 = vld [vmem:[%s12377_s0 + $0x106] ss:$16 sm:%s3820_s12]   ;;  %v3923_v39 = vsel %vm10_vm1, %v6685_v30, %v3918_v31  ;;  %3952 = vrot.lane.b32.xlu1 %v3951_v43, %s7122_s16  ;;  %v4015_v60 = vsel %vm10_vm1, %v6705_v52, %v4010_v50  ;;  %s3958_s12 = smov 3  ;;  %6504 = vst.msk [vmem:[%s12378_s1 + $0x68] sm:$0xff] %vm2922_vm11, %v3081_v6  }
 0x1ef   :  { %v6664_v33 = vld [vmem:[%s12377_s0 + $0x106] ss:$16 sm:%s3823_s4]   ;;  %v4020_v2 = vsel %vm14_vm2, %v6706_v53, %v4015_v60  ;;  %s3961_s4 = smov 12  ;;  %v6713_v11 = vld [vmem:[%s12377_s0 + $0x405] ss:$16 sm:%s4052_s2]   ;;  %s4141_s2 = smov 3 }
 0x1f0   :  { %v6686_v36 = vld [vmem:[%s12377_s0 + $0x186] ss:$16 sm:%s3925_s14]   ;;  %v3826_v40 = vsel %vm6_vm0, %v6664_v33, %v6663_v32  ;;  %s4062_s14 = smov 192  ;;  %v6720_v12 = vld [vmem:[%s12377_s0 + $0x605] ss:$16 sm:%s4085_s26]   ;;  %s4131_s26 = smov 192  ;;  %v3127_v41 = vpop.permute.xlu1 %3126  }
 0x1f1   :  { %v6665_v37 = vld [vmem:[%s12377_s0 + $0x106] ss:$16 sm:%s3828_s6]   ;;  %v3928_v47 = vsel %vm14_vm2, %v6686_v36, %v3923_v39  ;;  %s4049_s6 = smov 3  ;;  %v6714_v13 = vld [vmem:[%s12377_s0 + $0x405] ss:$16 sm:%s4057_s8]   ;;  %s4269_s8 = smov 192 }
 0x1f2   :  { %v6666_v44 = vld [vmem:[%s12377_s0 + $0x106] ss:$16 sm:%s3833_s27]   ;;  %v3831_v49 = vsel %vm10_vm1, %v6665_v37, %v3826_v40  ;;  %3929 = vrot.lane.b32.xlu0 %v3928_v47, %s7122_s16  ;;  %6494 = vst.msk [vmem:[%s12378_s1 + $0x28] sm:$0xff] %vm2922_vm11, %v3035_v23   ;;  %s4608_s27 = smov 48 }
 0x1f3   :  { %v6698_v46 = vld [vmem:[%s12377_s0 + $0x786] ss:$16 sm:%s3981_s10]   ;;  %s3897_s10 = smov 48  ;;  %v3836_v59 = vsel %vm14_vm2, %v6666_v44, %v3831_v49  ;;  %v6712_v4 = vld [vmem:[%s12377_s0 + $0x405] ss:$16 sm:%s4049_s6]   ;;  %s4539_s6 = smov 48 }
 0x1f4   :  { %v6699_v16 = vld [vmem:[%s12377_s0 + $0x786] ss:$16 sm:%s3984_s18]   ;;  %s4075_s18 = smov 12  ;;  %3837 = vrot.lane.b32.xlu2 %v3836_v59, %s7122_s16  ;;  %v4055_v14 = vsel %vm6_vm0, %v6713_v11, %v6712_v4  ;;  %6514 = vst.msk [vmem:[%s12378_s1 + $0x30] sm:$0xff] %vm2922_vm11, %v3127_v41   ;;  %v3104_v47 = vpop.permute.xlu0 %3103  }
 0x1f5   :  { %v6700_v55 = vld [vmem:[%s12377_s0 + $0x786] ss:$16 sm:%s3989_s15]   ;;  %v3987_v56 = vsel %vm6_vm0, %v6699_v16, %v6698_v46  ;;  %v6718_v1 = vld [vmem:[%s12377_s0 + $0x605] ss:$16 sm:%s4075_s18]   ;;  %v4060_v24 = vsel %vm10_vm1, %v6714_v13, %v4055_v14  ;;  %s4149_s18 = smov 48  ;;  %s4200_s15 = smov 192 }
 0x1f6   :  { %v6678_v57 = vld [vmem:[%s12377_s0 + $0x706] ss:$16 sm:%s3889_s22]   ;;  %v3992_v0 = vsel %vm10_vm1, %v6700_v55, %v3987_v56  ;;  %v4078_v8 = vsel %vm6_vm0, %v6718_v1, %v6717_v54  ;;  %4021 = vrot.lane.b32.xlu1 %v4020_v2, %s7123_s17  ;;  %s3966_s22 = smov 48  ;;  %v3150_v32 = vpop.permute.xlu2 %3149   ;;  %6509 = vst.msk [vmem:[%s12378_s1 + $0x10] sm:$0xff] %vm2922_vm11, %v3104_v47  }
 0x1f7   :  { %v6679_v45 = vld [vmem:[%s12377_s0 + $0x706] ss:$16 sm:%s3892_s23]   ;;  %v4083_v20 = vsel %vm10_vm1, %v6719_v9, %v4078_v8  ;;  %v6715_v21 = vld [vmem:[%s12377_s0 + $0x405] ss:$16 sm:%s4062_s14]   ;;  %s4121_s14 = smov 12  ;;  %s4039_s23 = smov 192 }
 0x1f8   :  { %v6701_v61 = vld [vmem:[%s12377_s0 + $0x786] ss:$16 sm:%s3994_s3]   ;;  %v3895_v51 = vsel %vm6_vm0, %v6679_v45, %v6678_v57  ;;  %s4144_s3 = smov 12  ;;  %v6732_v26 = vld [vmem:[%s12377_s0 + $0x485] ss:$16 sm:%s4141_s2]   ;;  %v4088_v28 = vsel %vm14_vm2, %v6720_v12, %v4083_v20  ;;  %v4065_v31 = vsel %vm14_vm2, %v6715_v21, %v4060_v24  ;;  %s4442_s2 = smov 12 }
 0x1f9   :  { %v6680_v62 = vld [vmem:[%s12377_s0 + $0x706] ss:$16 sm:%s3897_s10]   ;;  %v3997_v5 = vsel %vm14_vm2, %v6701_v61, %v3992_v0  ;;  %s3971_s10 = smov 192  ;;  %v6733_v27 = vld [vmem:[%s12377_s0 + $0x485] ss:$16 sm:%s4144_s3]   ;;  %s4852_s3 = smov 3 }
 0x1fa   :  { %v6681_v3 = vld [vmem:[%s12377_s0 + $0x706] ss:$16 sm:%s3902_s21]   ;;  %v3900_v7 = vsel %vm10_vm1, %v6680_v62, %v3895_v51  ;;  %3998 = vrot.lane.b32.xlu0 %v3997_v5, %s7122_s16  ;;  %v4147_v10 = vsel %vm6_vm0, %v6733_v27, %v6732_v26  ;;  %6519 = vst.msk [vmem:[%s12378_s1 + $0x50] sm:$0xff] %vm2922_vm11, %v3150_v32   ;;  %s4264_s21 = smov 48 }
 0x1fb   :  { %v6693_v15 = vld [vmem:[%s12377_s0 + $0x586] ss:$16 sm:%s3958_s12]   ;;  %v3905_v19 = vsel %vm14_vm2, %v6681_v3, %v3900_v7  ;;  %s4118_s12 = smov 3  ;;  %v6734_v34 = vld [vmem:[%s12377_s0 + $0x485] ss:$16 sm:%s4149_s18]   ;;  %s4783_s18 = smov 3 }
 0x1fc   :  { %v6694_v17 = vld [vmem:[%s12377_s0 + $0x586] ss:$16 sm:%s3961_s4]   ;;  %3906 = vrot.lane.b32.xlu2 %v3905_v19, %s7122_s16  ;;  %s4034_s4 = smov 48  ;;  %v4152_v43 = vsel %vm10_vm1, %v6734_v34, %v4147_v10  ;;  %v3196_v54 = vpop.permute.xlu1 %3195  }
 0x1fd   :  { %v6695_v22 = vld [vmem:[%s12377_s0 + $0x586] ss:$16 sm:%s3966_s22]   ;;  %v3964_v25 = vsel %vm6_vm0, %v6694_v17, %v6693_v15  ;;  %v6727_v30 = vld [vmem:[%s12377_s0 + $0x285] ss:$16 sm:%s4118_s12]   ;;  %s4108_s12 = smov 192  ;;  %s7126_s22 = smov 16  }
 0x1fe   :  { %v6696_v29 = vld [vmem:[%s12377_s0 + $0x586] ss:$16 sm:%s3971_s10]   ;;  %v3969_v33 = vsel %vm10_vm1, %v6695_v22, %v3964_v25  ;;  %v6728_v35 = vld [vmem:[%s12377_s0 + $0x285] ss:$16 sm:%s4121_s14]   ;;  %s4210_s14 = smov 3  ;;  %v3219_v57 = vpop.permute.xlu2 %3218   ;;  %s4911_s10 = smov 192 }
 0x1ff   :  { %4089 = vrot.lane.b32.xlu1 %v4088_v28, %s7123_s17  ;;  %v6735_v36 = vld [vmem:[%s12377_s0 + $0x485] ss:$16 sm:%s4154_s19]   ;;  %v4124_v38 = vsel %vm6_vm0, %v6728_v35, %v6727_v30  ;;  %v3974_v42 = vsel %vm14_vm2, %v6696_v29, %v3969_v33  ;;  %6534 = vst.msk [vmem:[%s12378_s1 + $0x38] sm:$0xff] %vm2922_vm11, %v3219_v57   ;;  %s7124_s19 = smov 32  }
 0x200   :  { %v6729_v37 = vld [vmem:[%s12377_s0 + $0x285] ss:$16 sm:%s4126_s20]   ;;  %v4157_v16 = vsel %vm14_vm2, %v6735_v36, %v4152_v43  ;;  %6529 = vst.msk [vmem:[%s12378_s1 + $0x18] sm:$0xff] %vm2922_vm11, %v3196_v54   ;;  %v3173_v5 = vpop.permute.xlu0 %3172   ;;  %s4292_s20 = smov 192 }
 0x201   :  { %v6707_v39 = vld [vmem:[%s12377_s0 + $0x205] ss:$16 sm:%s4026_s28]   ;;  %s4187_s28 = smov 3  ;;  %v4129_v48 = vsel %vm10_vm1, %v6729_v37, %v4124_v38  ;;  %6524 = vst.msk [vmem:[%s12378_s1 + $0x70] sm:$0xff] %vm2922_vm11, %v3173_v5  }
 0x202   :  { %v6708_v40 = vld [vmem:[%s12377_s0 + $0x205] ss:$16 sm:%s4029_s24]   ;;  %4066 = vrot.lane.b32.xlu0 %v4065_v31, %s7123_s17  ;;  %s4164_s24 = smov 3 }
 0x203   :  { %v6730_v44 = vld [vmem:[%s12377_s0 + $0x285] ss:$16 sm:%s4131_s26]   ;;  %v4032_v49 = vsel %vm6_vm0, %v6708_v40, %v6707_v39  ;;  %s4190_s26 = smov 12 }
 0x204   :  { %v6709_v46 = vld [vmem:[%s12377_s0 + $0x205] ss:$16 sm:%s4034_s4]   ;;  %3975 = vrot.lane.b32.xlu2 %v3974_v42, %s7122_s16  ;;  %s4223_s16 = smov 192  ;;  %v4134_v56 = vsel %vm14_vm2, %v6730_v44, %v4129_v48  ;;  %s4256_s4 = smov 3 }
 0x205   :  { %v6747_v50 = vld [vmem:[%s12377_s0 + $0x305] ss:$16 sm:%s4210_s14]   ;;  %v4037_v45 = vsel %vm10_vm1, %v6709_v46, %v4032_v49  ;;  %s4287_s14 = smov 48 }
 0x206   :  { %v6748_v52 = vld [vmem:[%s12377_s0 + $0x305] ss:$16 sm:%s4213_s29]   ;;  %s4259_s29 = smov 12  ;;  %v3288_v15 = vpop.permute.xlu2 %3287  }
 0x207   :  { %v6710_v53 = vld [vmem:[%s12377_s0 + $0x205] ss:$16 sm:%s4039_s23]   ;;  %v4216_v58 = vsel %vm6_vm0, %v6748_v52, %v6747_v50  ;;  %4158 = vrot.lane.b32.xlu1 %v4157_v16, %s7123_s17  ;;  %3290 = vst.msk [vmem:[%s12378_s1] sm:$0xff] %vm3289_vm12, %v3288_v15   ;;  %s4177_s23 = smov 192 }
 0x208   :  { %v6742_v55 = vld [vmem:[%s12377_s0 + $0x105] ss:$16 sm:%s4187_s28]   ;;  %s4103_s28 = smov 48  ;;  %v4042_v1 = vsel %vm14_vm2, %v6710_v53, %v4037_v45  ;;  %v3265_v26 = vpop.permute.xlu1 %3264  }
 0x209   :  { %v6749_v59 = vld [vmem:[%s12377_s0 + $0x305] ss:$16 sm:%s4218_s7]   ;;  %s4279_s7 = smov 3  ;;  %6544 = vst.msk [vmem:[%s12378_s1 + $0x78] sm:$0xff] %vm2922_vm11, %v3265_v26  }
 0x20a   :  { %v6743_v60 = vld [vmem:[%s12377_s0 + $0x105] ss:$16 sm:%s4190_s26]   ;;  %s4282_s26 = smov 12  ;;  %4135 = vrot.lane.b32.xlu0 %v4134_v56, %s7123_s17  ;;  %v4221_v2 = vsel %vm10_vm1, %v6749_v59, %v4216_v58 }
 0x20b   :  { %v6750_v61 = vld [vmem:[%s12377_s0 + $0x305] ss:$16 sm:%s4223_s16]   ;;  %v4193_v63 = vsel %vm6_vm0, %v6743_v60, %v6742_v55  ;;  %s4361_s16 = smov 192 }
 0x20c   :  { %v6744_v62 = vld [vmem:[%s12377_s0 + $0x105] ss:$16 sm:%s4195_s9]   ;;  %4043 = vrot.lane.b32.xlu2 %v4042_v1, %s7123_s17  ;;  %v4226_v11 = vsel %vm14_vm2, %v6750_v61, %v4221_v2  ;;  %v3242_v31 = vpop.permute.xlu0 %3241   ;;  %s4333_s9 = smov 48 }
 0x20d   :  { %v6722_v0 = vld [vmem:[%s12377_s0 + $0x85] ss:$16 sm:%s4095_s13]   ;;  %v4198_v6 = vsel %vm10_vm1, %v6744_v62, %v4193_v63  ;;  %6539 = vst.msk [vmem:[%s12378_s1 + $0x58] sm:$0xff] %vm2922_vm11, %v3242_v31   ;;  %s4233_s13 = smov 3 }
 0x20e   :  { %v6723_v51 = vld [vmem:[%s12377_s0 + $0x85] ss:$16 sm:%s4098_s5]   ;;  %s4236_s5 = smov 12  ;;  %v3356_v39 = vpop.permute.xlu2 %3355  }
 0x20f   :  { %v6745_v3 = vld [vmem:[%s12377_s0 + $0x105] ss:$16 sm:%s4200_s15]   ;;  %v4101_v7 = vsel %vm6_vm0, %v6723_v51, %v6722_v0  ;;  %4227 = vrot.lane.b32.xlu1 %v4226_v11, %s7123_s17  ;;  %s4338_s15 = smov 192  ;;  %6563 = vst.msk [vmem:[%s12378_s1 + $0x60] sm:$0xff] %vm3289_vm12, %v3356_v39  }
 0x210   :  { %v6724_v4 = vld [vmem:[%s12377_s0 + $0x85] ss:$16 sm:%s4103_s28]   ;;  %v4203_v14 = vsel %vm14_vm2, %v6745_v3, %v4198_v6  ;;  %s4325_s28 = smov 3  ;;  %v3333_v50 = vpop.permute.xlu1 %3332  }
 0x211   :  { %v6762_v8 = vld [vmem:[%s12377_s0 + $0x185] ss:$16 sm:%s4279_s7]   ;;  %v4106_v17 = vsel %vm10_vm1, %v6724_v4, %v4101_v7  ;;  %s4356_s7 = smov 48  ;;  %6558 = vst.msk [vmem:[%s12378_s1 + $0x40] sm:$0xff] %vm3289_vm12, %v3333_v50  }
 0x212   :  { %v6763_v9 = vld [vmem:[%s12377_s0 + $0x185] ss:$16 sm:%s4282_s26]   ;;  %4204 = vrot.lane.b32.xlu0 %v4203_v14, %s7123_s17  ;;  %s4328_s26 = smov 12 }
 0x213   :  { %v6725_v12 = vld [vmem:[%s12377_s0 + $0x85] ss:$16 sm:%s4108_s12]   ;;  %v4285_v18 = vsel %vm6_vm0, %v6763_v9, %v6762_v8  ;;  %s4246_s12 = smov 192 }
 0x214   :  { %v6757_v13 = vld [vmem:[%s12377_s0 + $0x705] ss:$16 sm:%s4256_s4]   ;;  %s4172_s4 = smov 48  ;;  %v4111_v27 = vsel %vm14_vm2, %v6725_v12, %v4106_v17  ;;  %v3310_v56 = vpop.permute.xlu0 %3309  }
 0x215   :  { %v6764_v19 = vld [vmem:[%s12377_s0 + $0x185] ss:$16 sm:%s4287_s14]   ;;  %s4348_s14 = smov 3  ;;  %4112 = vrot.lane.b32.xlu2 %v4111_v27, %s7123_s17  ;;  %6553 = vst.msk [vmem:[%s12378_s1 + $0x20] sm:$0xff] %vm3289_vm12, %v3310_v56  }
 0x216   :  { %v6758_v20 = vld [vmem:[%s12377_s0 + $0x705] ss:$16 sm:%s4259_s29]   ;;  %s4351_s29 = smov 12  ;;  %v4290_v28 = vsel %vm10_vm1, %v6764_v19, %v4285_v18 }
 0x217   :  { %v6765_v21 = vld [vmem:[%s12377_s0 + $0x185] ss:$16 sm:%s4292_s20]   ;;  %v4262_v23 = vsel %vm6_vm0, %v6758_v20, %v6757_v13  ;;  %s4429_s20 = smov 192 }
 0x218   :  { %v6759_v22 = vld [vmem:[%s12377_s0 + $0x705] ss:$16 sm:%s4264_s21]   ;;  %v4295_v35 = vsel %vm14_vm2, %v6765_v21, %v4290_v28  ;;  %s4401_s21 = smov 48  ;;  %v6794_v3 = vld [vmem:[%s12377_s0 + $0x404] ss:$16 sm:%s4429_s20]   ;;  %v3402_v8 = vpop.permute.xlu1 %3401   ;;  %s4613_s20 = smov 192 }
 0x219   :  { %v6737_v24 = vld [vmem:[%s12377_s0 + $0x685] ss:$16 sm:%s4164_s24]   ;;  %v4267_v32 = vsel %vm10_vm1, %v6759_v22, %v4262_v23  ;;  %4296 = vrot.lane.b32.xlu1 %v4295_v35, %s7123_s17  ;;  %s4302_s24 = smov 3  ;;  %6573 = vst.msk [vmem:[%s12378_s1 + $0x28] sm:$0xff] %vm3289_vm12, %v3402_v8  }
 0x21a   :  { %v6738_v25 = vld [vmem:[%s12377_s0 + $0x685] ss:$16 sm:%s4167_s30]   ;;  %s4305_s30 = smov 12  ;;  %v3425_v0 = vpop.permute.xlu2 %3424   ;;  %v6788_v4 = vld [vmem:[%s12377_s0 + $0x204] ss:$16 sm:%s4401_s21]   ;;  %s4975_s21 = smov 48 }
 0x21b   :  { %v6760_v29 = vld [vmem:[%s12377_s0 + $0x705] ss:$16 sm:%s4269_s8]   ;;  %v4170_v33 = vsel %vm6_vm0, %v6738_v25, %v6737_v24  ;;  %s4406_s8 = smov 192  ;;  %6578 = vst.msk [vmem:[%s12378_s1 + $0x48] sm:$0xff] %vm3289_vm12, %v3425_v0  }
 0x21c   :  { %v6739_v30 = vld [vmem:[%s12377_s0 + $0x685] ss:$16 sm:%s4172_s4]   ;;  %v4272_v38 = vsel %vm14_vm2, %v6760_v29, %v4267_v32  ;;  %s4393_s4 = smov 3  ;;  %v6789_v12 = vld [vmem:[%s12377_s0 + $0x204] ss:$16 sm:%s4406_s8]   ;;  %v3379_v14 = vpop.permute.xlu0 %3378   ;;  %s4557_s8 = smov 12 }
 0x21d   :  { %v6777_v10 = vld [vmem:[%s12377_s0 + $0x785] ss:$16 sm:%s4348_s14]   ;;  %v4175_v40 = vsel %vm10_vm1, %v6739_v30, %v4170_v33  ;;  %4273 = vrot.lane.b32.xlu0 %v4272_v38, %s7123_s17  ;;  %s4424_s14 = smov 48  ;;  %6568 = vst.msk [vmem:[%s12378_s1 + $0x8] sm:$0xff] %vm3289_vm12, %v3379_v14  }
 0x21e   :  { %v6778_v34 = vld [vmem:[%s12377_s0 + $0x785] ss:$16 sm:%s4351_s29]   ;;  %s4396_s29 = smov 12  ;;  %v6786_v62 = vld [vmem:[%s12377_s0 + $0x204] ss:$16 sm:%s4393_s4]   ;;  %s4310_s4 = smov 48 }
 0x21f   :  { %v6740_v36 = vld [vmem:[%s12377_s0 + $0x685] ss:$16 sm:%s4177_s23]   ;;  %v4354_v41 = vsel %vm6_vm0, %v6778_v34, %v6777_v10  ;;  %v6793_v1 = vld [vmem:[%s12377_s0 + $0x404] ss:$16 sm:%s4424_s14]   ;;  %s4485_s14 = smov 3  ;;  %s4315_s23 = smov 192 }
 0x220   :  { %v6772_v37 = vld [vmem:[%s12377_s0 + $0x585] ss:$16 sm:%s4325_s28]   ;;  %s4241_s28 = smov 48  ;;  %v4180_v52 = vsel %vm14_vm2, %v6740_v36, %v4175_v40  ;;  %v6787_v2 = vld [vmem:[%s12377_s0 + $0x204] ss:$16 sm:%s4396_s29]   ;;  %s4488_s29 = smov 12  ;;  %v3471_v10 = vpop.permute.xlu1 %3470  }
 0x221   :  { %v6779_v42 = vld [vmem:[%s12377_s0 + $0x785] ss:$16 sm:%s4356_s7]   ;;  %s4416_s7 = smov 3  ;;  %4181 = vrot.lane.b32.xlu2 %v4180_v52, %s7123_s17  ;;  %v4399_v5 = vsel %vm6_vm0, %v6787_v2, %v6786_v62  ;;  %6588 = vst.msk [vmem:[%s12378_s1 + $0x10] sm:$0xff] %vm3289_vm12, %v3471_v10  }
 0x222   :  { %v6773_v43 = vld [vmem:[%s12377_s0 + $0x585] ss:$16 sm:%s4328_s26]   ;;  %s4419_s26 = smov 12  ;;  %v4359_v16 = vsel %vm10_vm1, %v6779_v42, %v4354_v41  ;;  %v6791_v58 = vld [vmem:[%s12377_s0 + $0x404] ss:$16 sm:%s4416_s7]   ;;  %v4404_v15 = vsel %vm10_vm1, %v6788_v4, %v4399_v5  ;;  %s4493_s7 = smov 48 }
 0x223   :  { %v6780_v44 = vld [vmem:[%s12377_s0 + $0x785] ss:$16 sm:%s4361_s16]   ;;  %v4331_v47 = vsel %vm6_vm0, %v6773_v43, %v6772_v37  ;;  %v6792_v59 = vld [vmem:[%s12377_s0 + $0x404] ss:$16 sm:%s4419_s26]   ;;  %s4465_s26 = smov 12  ;;  %s4498_s16 = smov 192  ;;  %v4409_v23 = vsel %vm14_vm2, %v6789_v12, %v4404_v15 }
 0x224   :  { %v6774_v46 = vld [vmem:[%s12377_s0 + $0x585] ss:$16 sm:%s4333_s9]   ;;  %v4364_v60 = vsel %vm14_vm2, %v6780_v44, %v4359_v16  ;;  %v4422_v54 = vsel %vm6_vm0, %v6792_v59, %v6791_v58  ;;  %v6806_v18 = vld [vmem:[%s12377_s0 + $0x284] ss:$16 sm:%s4485_s14]   ;;  %s4470_s9 = smov 48  ;;  %v3494_v24 = vpop.permute.xlu2 %3493   ;;  %v3448_v38 = vpop.permute.xlu0 %3447   ;;  %s4786_s14 = smov 12 }
 0x225   :  { %v6752_v48 = vld [vmem:[%s12377_s0 + $0x505] ss:$16 sm:%s4233_s13]   ;;  %v4336_v57 = vsel %vm10_vm1, %v6774_v46, %v4331_v47  ;;  %4365 = vrot.lane.b32.xlu1 %v4364_v60, %s7123_s17  ;;  %v4427_v11 = vsel %vm10_vm1, %v6793_v1, %v4422_v54  ;;  %s4371_s13 = smov 3  ;;  %6593 = vst.msk [vmem:[%s12378_s1 + $0x30] sm:$0xff] %vm3289_vm12, %v3494_v24  }
 0x226   :  { %v6753_v49 = vld [vmem:[%s12377_s0 + $0x505] ss:$16 sm:%s4236_s5]   ;;  %v6807_v19 = vld [vmem:[%s12377_s0 + $0x284] ss:$16 sm:%s4488_s29]   ;;  %v4432_v20 = vsel %vm14_vm2, %v6794_v3, %v4427_v11  ;;  %s4374_s5 = smov 12  ;;  %s4562_s29 = smov 48 }
 0x227   :  { %v6775_v53 = vld [vmem:[%s12377_s0 + $0x585] ss:$16 sm:%s4338_s15]   ;;  %v4239_v45 = vsel %vm6_vm0, %v6753_v49, %v6752_v48  ;;  %v4491_v26 = vsel %vm6_vm0, %v6807_v19, %v6806_v18  ;;  %v6808_v27 = vld [vmem:[%s12377_s0 + $0x284] ss:$16 sm:%s4493_s7]   ;;  %s4475_s15 = smov 192  ;;  %s4855_s7 = smov 12 }
 0x228   :  { %v6754_v55 = vld [vmem:[%s12377_s0 + $0x505] ss:$16 sm:%s4241_s28]   ;;  %v4341_v63 = vsel %vm14_vm2, %v6775_v53, %v4336_v57  ;;  %s4462_s28 = smov 3  ;;  %v6802_v28 = vld [vmem:[%s12377_s0 + $0x84] ss:$16 sm:%s4465_s26]   ;;  %s4554_s26 = smov 3  ;;  %v4496_v35 = vsel %vm10_vm1, %v6808_v27, %v4491_v26 }
 0x229   :  { %v6755_v61 = vld [vmem:[%s12377_s0 + $0x505] ss:$16 sm:%s4246_s12]   ;;  %v4244_v51 = vsel %vm10_vm1, %v6754_v55, %v4239_v45  ;;  %4342 = vrot.lane.b32.xlu0 %v4341_v63, %s7123_s17  ;;  %6583 = vst.msk [vmem:[%s12378_s1 + $0x68] sm:$0xff] %vm3289_vm12, %v3448_v38   ;;  %s4883_s12 = smov 48 }
 0x22a   :  { %v6767_v6 = vld [vmem:[%s12377_s0 + $0x385] ss:$16 sm:%s4302_s24]   ;;  %v4249_v9 = vsel %vm14_vm2, %v6755_v61, %v4244_v51  ;;  %v6801_v22 = vld [vmem:[%s12377_s0 + $0x84] ss:$16 sm:%s4462_s28]   ;;  %s4379_s24 = smov 48  ;;  %v3540_v58 = vpop.permute.xlu1 %3539   ;;  %s4452_s28 = smov 192 }
 0x22b   :  { %v6768_v7 = vld [vmem:[%s12377_s0 + $0x385] ss:$16 sm:%s4305_s30]   ;;  %4250 = vrot.lane.b32.xlu2 %v4249_v9, %s7123_s17  ;;  %v4468_v31 = vsel %vm6_vm0, %v6802_v28, %v6801_v22  ;;  %s4439_s30 = smov 3  ;;  %6603 = vst.msk [vmem:[%s12378_s1 + $0x70] sm:$0xff] %vm3289_vm12, %v3540_v58  }
 0x22c   :  { %v6769_v13 = vld [vmem:[%s12377_s0 + $0x385] ss:$16 sm:%s4310_s4]   ;;  %v4308_v17 = vsel %vm6_vm0, %v6768_v7, %v6767_v6  ;;  %v6809_v29 = vld [vmem:[%s12377_s0 + $0x284] ss:$16 sm:%s4498_s16]   ;;  %s4384_s4 = smov 192  ;;  %v3563_v48 = vpop.permute.xlu2 %3562   ;;  %s7125_s16 = smov 24  }
 0x22d   :  { %v6770_v21 = vld [vmem:[%s12377_s0 + $0x385] ss:$16 sm:%s4315_s23]   ;;  %v4313_v25 = vsel %vm10_vm1, %v6769_v13, %v4308_v17  ;;  %4433 = vrot.lane.b32.xlu1 %v4432_v20, %s7124_s19  ;;  %v4501_v43 = vsel %vm14_vm2, %v6809_v29, %v4496_v35  ;;  %6608 = vst.msk [vmem:[%s12378_s1 + $0x18] sm:$0xff] %vm3289_vm12, %v3563_v48   ;;  %s4952_s23 = smov 48 }
 0x22e   :  { %v6803_v30 = vld [vmem:[%s12377_s0 + $0x84] ss:$16 sm:%s4470_s9]   ;;  %v4318_v34 = vsel %vm14_vm2, %v6770_v21, %v4313_v25  ;;  %v3517_v63 = vpop.permute.xlu0 %3516   ;;  %s4636_s9 = smov 192 }
 0x22f   :  { %v6782_v32 = vld [vmem:[%s12377_s0 + $0x4] ss:$16 sm:%s4371_s13]   ;;  %s4531_s13 = smov 3  ;;  %v4473_v39 = vsel %vm10_vm1, %v6803_v30, %v4468_v31  ;;  %6598 = vst.msk [vmem:[%s12378_s1 + $0x50] sm:$0xff] %vm3289_vm12, %v3517_v63  }
 0x230   :  { %v6783_v33 = vld [vmem:[%s12377_s0 + $0x4] ss:$16 sm:%s4374_s5]   ;;  %s4508_s5 = smov 3 }
 0x231   :  { %4410 = vrot.lane.b32.xlu0 %v4409_v23, %s7124_s19  ;;  %v6804_v36 = vld [vmem:[%s12377_s0 + $0x84] ss:$16 sm:%s4475_s15]   ;;  %v4377_v40 = vsel %vm6_vm0, %v6783_v33, %v6782_v32  ;;  %s4534_s15 = smov 12 }
 0x232   :  { %v6784_v37 = vld [vmem:[%s12377_s0 + $0x4] ss:$16 sm:%s4379_s24]   ;;  %v4478_v47 = vsel %vm14_vm2, %v6804_v36, %v4473_v39  ;;  %s4600_s24 = smov 3 }
 0x233   :  { %v6821_v41 = vld [vmem:[%s12377_s0 + $0x104] ss:$16 sm:%s4554_s26]   ;;  %4319 = vrot.lane.b32.xlu2 %v4318_v34, %s7123_s17  ;;  %s4567_s17 = smov 192  ;;  %v4382_v49 = vsel %vm10_vm1, %v6784_v37, %v4377_v40  ;;  %s4631_s26 = smov 48 }
 0x234   :  { %v6822_v42 = vld [vmem:[%s12377_s0 + $0x104] ss:$16 sm:%s4557_s8]   ;;  %s4603_s8 = smov 12  ;;  %v3632_v6 = vpop.permute.xlu2 %3631  }
 0x235   :  { %v6785_v44 = vld [vmem:[%s12377_s0 + $0x4] ss:$16 sm:%s4384_s4]   ;;  %v4560_v50 = vsel %vm6_vm0, %v6822_v42, %v6821_v41  ;;  %4502 = vrot.lane.b32.xlu1 %v4501_v43, %s7124_s19  ;;  %6623 = vst.msk [vmem:[%s12378_s1 + $0x78] sm:$0xff] %vm3289_vm12, %v3632_v6   ;;  %s4521_s4 = smov 192 }
 0x236   :  { %v6816_v46 = vld [vmem:[%s12377_s0 + $0x684] ss:$16 sm:%s4531_s13]   ;;  %s4447_s13 = smov 48  ;;  %v4387_v59 = vsel %vm14_vm2, %v6785_v44, %v4382_v49  ;;  %v3609_v18 = vpop.permute.xlu1 %3608  }
 0x237   :  { %v6823_v52 = vld [vmem:[%s12377_s0 + $0x104] ss:$16 sm:%s4562_s29]   ;;  %s4623_s29 = smov 3  ;;  %6618 = vst.msk [vmem:[%s12378_s1 + $0x58] sm:$0xff] %vm3289_vm12, %v3609_v18  }
 0x238   :  { %v6817_v16 = vld [vmem:[%s12377_s0 + $0x684] ss:$16 sm:%s4534_s15]   ;;  %s4626_s15 = smov 12  ;;  %v4565_v60 = vsel %vm10_vm1, %v6823_v52, %v4560_v50 }
 0x239   :  { %v6824_v53 = vld [vmem:[%s12377_s0 + $0x104] ss:$16 sm:%s4567_s17]   ;;  %v4537_v56 = vsel %vm6_vm0, %v6817_v16, %v6816_v46  ;;  %4479 = vrot.lane.b32.xlu0 %v4478_v47, %s7124_s19  ;;  %s4705_s17 = smov 192 }
 0x23a   :  { %v6818_v55 = vld [vmem:[%s12377_s0 + $0x684] ss:$16 sm:%s4539_s6]   ;;  %v4570_v2 = vsel %vm14_vm2, %v6824_v53, %v4565_v60  ;;  %v3586_v23 = vpop.permute.xlu0 %3585   ;;  %s4677_s6 = smov 48 }
 0x23b   :  { %v6796_v57 = vld [vmem:[%s12377_s0 + $0x604] ss:$16 sm:%s4439_s30]   ;;  %v4542_v0 = vsel %vm10_vm1, %v6818_v55, %v4537_v56  ;;  %4388 = vrot.lane.b32.xlu2 %v4387_v59, %s7124_s19  ;;  %6613 = vst.msk [vmem:[%s12378_s1 + $0x38] sm:$0xff] %vm3289_vm12, %v3586_v23   ;;  %s4577_s30 = smov 3 }
 0x23c   :  { %v6797_v45 = vld [vmem:[%s12377_s0 + $0x604] ss:$16 sm:%s4442_s2]   ;;  %s4580_s2 = smov 12  ;;  %v3700_v32 = vpop.permute.xlu2 %3699  }
 0x23d   :  { %v6819_v61 = vld [vmem:[%s12377_s0 + $0x684] ss:$16 sm:%s4544_s25]   ;;  %v4445_v51 = vsel %vm6_vm0, %v6797_v45, %v6796_v57  ;;  %4571 = vrot.lane.b32.xlu1 %v4570_v2, %s7124_s19  ;;  %s4682_s25 = smov 192  ;;  %6637 = vst.msk [vmem:[%s12378_s1 + $0x40] sm:$0xff] %vm3656_vm13, %v3700_v32  }
 0x23e   :  { %v6798_v62 = vld [vmem:[%s12377_s0 + $0x604] ss:$16 sm:%s4447_s13]   ;;  %v4547_v5 = vsel %vm14_vm2, %v6819_v61, %v4542_v0  ;;  %s4669_s13 = smov 3  ;;  %v3677_v41 = vpop.permute.xlu1 %3676  }
 0x23f   :  { %v6836_v54 = vld [vmem:[%s12377_s0 + $0x704] ss:$16 sm:%s4623_s29]   ;;  %v4450_v7 = vsel %vm10_vm1, %v6798_v62, %v4445_v51  ;;  %s4700_s29 = smov 48  ;;  %6632 = vst.msk [vmem:[%s12378_s1 + $0x20] sm:$0xff] %vm3656_vm13, %v3677_v41  }
 0x240   :  { %v6837_v1 = vld [vmem:[%s12377_s0 + $0x704] ss:$16 sm:%s4626_s15]   ;;  %s4672_s15 = smov 12 }
 0x241   :  { %v6799_v3 = vld [vmem:[%s12377_s0 + $0x604] ss:$16 sm:%s4452_s28]   ;;  %v4629_v8 = vsel %vm6_vm0, %v6837_v1, %v6836_v54  ;;  %4548 = vrot.lane.b32.xlu0 %v4547_v5, %s7124_s19  ;;  %s4590_s28 = smov 192 }
 0x242   :  { %v6831_v4 = vld [vmem:[%s12377_s0 + $0x504] ss:$16 sm:%s4600_s24]   ;;  %s4516_s24 = smov 48  ;;  %v4455_v19 = vsel %vm14_vm2, %v6799_v3, %v4450_v7  ;;  %v3655_v47 = vpop.permute.xlu0 %3654  }
 0x243   :  { %v6838_v9 = vld [vmem:[%s12377_s0 + $0x704] ss:$16 sm:%s4631_s26]   ;;  %s4692_s26 = smov 3  ;;  %4456 = vrot.lane.b32.xlu2 %v4455_v19, %s7124_s19  ;;  %3657 = vst.msk [vmem:[%s12378_s1] sm:$0xff] %vm3656_vm13, %v3655_v47  }
 0x244   :  { %v6832_v11 = vld [vmem:[%s12377_s0 + $0x504] ss:$16 sm:%s4603_s8]   ;;  %s4695_s8 = smov 12  ;;  %v4634_v20 = vsel %vm10_vm1, %v6838_v9, %v4629_v8  ;;  %v3769_v57 = vpop.permute.xlu2 %3768  }
 0x245   :  { %v6839_v12 = vld [vmem:[%s12377_s0 + $0x704] ss:$16 sm:%s4636_s9]   ;;  %v4606_v14 = vsel %vm6_vm0, %v6832_v11, %v6831_v4  ;;  %s4773_s9 = smov 192  ;;  %6652 = vst.msk [vmem:[%s12378_s1 + $0x28] sm:$0xff] %vm3656_vm13, %v3769_v57  }
 0x246   :  { %v6833_v13 = vld [vmem:[%s12377_s0 + $0x504] ss:$16 sm:%s4608_s27]   ;;  %v4639_v28 = vsel %vm14_vm2, %v6839_v12, %v4634_v20  ;;  %s4746_s27 = smov 48  ;;  %v6868_v61 = vld [vmem:[%s12377_s0 + $0x203] ss:$16 sm:%s4773_s9]   ;;  %v3746_v54 = vpop.permute.xlu1 %3745   ;;  %s4970_s9 = smov 12 }
 0x247   :  { %v6811_v15 = vld [vmem:[%s12377_s0 + $0x484] ss:$16 sm:%s4508_s5]   ;;  %v4611_v24 = vsel %vm10_vm1, %v6833_v13, %v4606_v14  ;;  %4640 = vrot.lane.b32.xlu1 %v4639_v28, %s7124_s19  ;;  %s4646_s5 = smov 3  ;;  %6647 = vst.msk [vmem:[%s12378_s1 + $0x8] sm:$0xff] %vm3656_vm13, %v3746_v54  }
 0x248   :  { %v6812_v17 = vld [vmem:[%s12377_s0 + $0x484] ss:$16 sm:%s4511_s11]   ;;  %s4649_s11 = smov 12  ;;  %v6863_v62 = vld [vmem:[%s12377_s0 + $0x3] ss:$16 sm:%s4746_s27]   ;;  %s4957_s27 = smov 192 }
 0x249   :  { %v6834_v21 = vld [vmem:[%s12377_s0 + $0x504] ss:$16 sm:%s4613_s20]   ;;  %v4514_v25 = vsel %vm6_vm0, %v6812_v17, %v6811_v15  ;;  %s4751_s20 = smov 192 }
 0x24a   :  { %v6813_v22 = vld [vmem:[%s12377_s0 + $0x484] ss:$16 sm:%s4516_s24]   ;;  %v4616_v31 = vsel %vm14_vm2, %v6834_v21, %v4611_v24  ;;  %s4738_s24 = smov 3  ;;  %v6864_v3 = vld [vmem:[%s12377_s0 + $0x3] ss:$16 sm:%s4751_s20]   ;;  %v3723_v5 = vpop.permute.xlu0 %3722   ;;  %s4901_s20 = smov 12 }
 0x24b   :  { %v6851_v26 = vld [vmem:[%s12377_s0 + $0x584] ss:$16 sm:%s4692_s26]   ;;  %v4519_v33 = vsel %vm10_vm1, %v6813_v22, %v4514_v25  ;;  %4617 = vrot.lane.b32.xlu0 %v4616_v31, %s7124_s19  ;;  %s4768_s26 = smov 48  ;;  %6642 = vst.msk [vmem:[%s12378_s1 + $0x60] sm:$0xff] %vm3656_vm13, %v3723_v5  }
 0x24c   :  { %v6852_v27 = vld [vmem:[%s12377_s0 + $0x584] ss:$16 sm:%s4695_s8]   ;;  %s4741_s8 = smov 12  ;;  %v6861_v55 = vld [vmem:[%s12377_s0 + $0x3] ss:$16 sm:%s4738_s24]   ;;  %s4654_s24 = smov 48 }
 0x24d   :  { %v6814_v29 = vld [vmem:[%s12377_s0 + $0x484] ss:$16 sm:%s4521_s4]   ;;  %v4698_v10 = vsel %vm6_vm0, %v6852_v27, %v6851_v26  ;;  %v6867_v59 = vld [vmem:[%s12377_s0 + $0x203] ss:$16 sm:%s4768_s26]   ;;  %s4829_s26 = smov 3  ;;  %s4659_s4 = smov 192 }
 0x24e   :  { %v6846_v30 = vld [vmem:[%s12377_s0 + $0x384] ss:$16 sm:%s4669_s13]   ;;  %s4585_s13 = smov 48  ;;  %v4524_v42 = vsel %vm14_vm2, %v6814_v29, %v4519_v33  ;;  %v6862_v60 = vld [vmem:[%s12377_s0 + $0x3] ss:$16 sm:%s4741_s8]   ;;  %s4832_s8 = smov 12  ;;  %v3838_v15 = vpop.permute.xlu2 %3837   ;;  %v3815_v26 = vpop.permute.xlu1 %3814  }
 0x24f   :  { %v6853_v34 = vld [vmem:[%s12377_s0 + $0x584] ss:$16 sm:%s4700_s29]   ;;  %s4760_s29 = smov 3  ;;  %4525 = vrot.lane.b32.xlu2 %v4524_v42, %s7124_s19  ;;  %v4744_v63 = vsel %vm6_vm0, %v6862_v60, %v6861_v55  ;;  %6667 = vst.msk [vmem:[%s12378_s1 + $0x10] sm:$0xff] %vm3656_vm13, %v3838_v15  }
 0x250   :  { %v6847_v35 = vld [vmem:[%s12377_s0 + $0x384] ss:$16 sm:%s4672_s15]   ;;  %s4763_s15 = smov 12  ;;  %v4703_v43 = vsel %vm10_vm1, %v6853_v34, %v4698_v10  ;;  %v6865_v50 = vld [vmem:[%s12377_s0 + $0x203] ss:$16 sm:%s4760_s29]   ;;  %v4749_v6 = vsel %vm10_vm1, %v6863_v62, %v4744_v63  ;;  %s4837_s29 = smov 48 }
 0x251   :  { %v6854_v36 = vld [vmem:[%s12377_s0 + $0x584] ss:$16 sm:%s4705_s17]   ;;  %v4675_v38 = vsel %vm6_vm0, %v6847_v35, %v6846_v30  ;;  %v6866_v52 = vld [vmem:[%s12377_s0 + $0x203] ss:$16 sm:%s4763_s15]   ;;  %s4809_s15 = smov 12  ;;  %s4842_s17 = smov 192  ;;  %v4754_v14 = vsel %vm14_vm2, %v6864_v3, %v4749_v6 }
 0x252   :  { %v6848_v37 = vld [vmem:[%s12377_s0 + $0x384] ss:$16 sm:%s4677_s6]   ;;  %v4708_v16 = vsel %vm14_vm2, %v6854_v36, %v4703_v43  ;;  %v4766_v58 = vsel %vm6_vm0, %v6866_v52, %v6865_v50  ;;  %v6880_v8 = vld [vmem:[%s12377_s0 + $0x83] ss:$16 sm:%s4829_s26]   ;;  %s4814_s6 = smov 48  ;;  %v3792_v31 = vpop.permute.xlu0 %3791   ;;  %s5127_s26 = smov 3 }
 0x253   :  { %v6826_v39 = vld [vmem:[%s12377_s0 + $0x304] ss:$16 sm:%s4577_s30]   ;;  %v4680_v48 = vsel %vm10_vm1, %v6848_v37, %v4675_v38  ;;  %4709 = vrot.lane.b32.xlu1 %v4708_v16, %s7124_s19  ;;  %v4771_v2 = vsel %vm10_vm1, %v6867_v59, %v4766_v58  ;;  %s4715_s30 = smov 3  ;;  %6662 = vst.msk [vmem:[%s12378_s1 + $0x68] sm:$0xff] %vm3656_vm13, %v3815_v26  }
 0x254   :  { %v6827_v40 = vld [vmem:[%s12377_s0 + $0x304] ss:$16 sm:%s4580_s2]   ;;  %v6881_v9 = vld [vmem:[%s12377_s0 + $0x83] ss:$16 sm:%s4832_s8]   ;;  %v4776_v11 = vsel %vm14_vm2, %v6868_v61, %v4771_v2  ;;  %s4718_s2 = smov 12  ;;  %s4906_s8 = smov 48 }
 0x255   :  { %v6849_v44 = vld [vmem:[%s12377_s0 + $0x384] ss:$16 sm:%s4682_s25]   ;;  %v4583_v49 = vsel %vm6_vm0, %v6827_v40, %v6826_v39  ;;  %v4835_v18 = vsel %vm6_vm0, %v6881_v9, %v6880_v8  ;;  %v6882_v19 = vld [vmem:[%s12377_s0 + $0x83] ss:$16 sm:%s4837_s29]   ;;  %s4819_s25 = smov 192  ;;  %s4924_s29 = smov 12 }
 0x256   :  { %v6828_v46 = vld [vmem:[%s12377_s0 + $0x304] ss:$16 sm:%s4585_s13]   ;;  %v4685_v56 = vsel %vm14_vm2, %v6849_v44, %v4680_v48  ;;  %s4806_s13 = smov 3  ;;  %v6876_v20 = vld [vmem:[%s12377_s0 + $0x603] ss:$16 sm:%s4809_s15]   ;;  %s4898_s15 = smov 3  ;;  %v4840_v28 = vsel %vm10_vm1, %v6882_v19, %v4835_v18  ;;  %v3907_v39 = vpop.permute.xlu2 %3906   ;;  %v3884_v50 = vpop.permute.xlu1 %3883  }
 0x257   :  { %v6829_v53 = vld [vmem:[%s12377_s0 + $0x304] ss:$16 sm:%s4590_s28]   ;;  %v4588_v45 = vsel %vm10_vm1, %v6828_v46, %v4583_v49  ;;  %4686 = vrot.lane.b32.xlu0 %v4685_v56, %s7124_s19  ;;  %6657 = vst.msk [vmem:[%s12378_s1 + $0x48] sm:$0xff] %vm3656_vm13, %v3792_v31   ;;  %s5255_s28 = smov 192 }
 0x258   :  { %v6841_v0 = vld [vmem:[%s12377_s0 + $0x184] ss:$16 sm:%s4646_s5]   ;;  %v4593_v1 = vsel %vm14_vm2, %v6829_v53, %v4588_v45  ;;  %v6875_v13 = vld [vmem:[%s12377_s0 + $0x603] ss:$16 sm:%s4806_s13]   ;;  %s4723_s5 = smov 48  ;;  %s5645_s13 = smov 192 }
 0x259   :  { %v6842_v51 = vld [vmem:[%s12377_s0 + $0x184] ss:$16 sm:%s4649_s11]   ;;  %4594 = vrot.lane.b32.xlu2 %v4593_v1, %s7124_s19  ;;  %v4812_v23 = vsel %vm6_vm0, %v6876_v20, %v6875_v13  ;;  %6682 = vst.msk [vmem:[%s12378_s1 + $0x70] sm:$0xff] %vm3656_vm13, %v3907_v39   ;;  %s4796_s11 = smov 192 }
 0x25a   :  { %v6843_v4 = vld [vmem:[%s12377_s0 + $0x184] ss:$16 sm:%s4654_s24]   ;;  %v4652_v7 = vsel %vm6_vm0, %v6842_v51, %v6841_v0  ;;  %v6883_v21 = vld [vmem:[%s12377_s0 + $0x83] ss:$16 sm:%s4842_s17]   ;;  %s4728_s24 = smov 192  ;;  %s4888_s17 = smov 192  ;;  %v3861_v56 = vpop.permute.xlu0 %3860  }
 0x25b   :  { %v6844_v12 = vld [vmem:[%s12377_s0 + $0x184] ss:$16 sm:%s4659_s4]   ;;  %v4657_v17 = vsel %vm10_vm1, %v6843_v4, %v4652_v7  ;;  %4777 = vrot.lane.b32.xlu1 %v4776_v11, %s7125_s16  ;;  %v4845_v35 = vsel %vm14_vm2, %v6883_v21, %v4840_v28  ;;  %6677 = vst.msk [vmem:[%s12378_s1 + $0x50] sm:$0xff] %vm3656_vm13, %v3884_v50   ;;  %s5021_s4 = smov 48 }
 0x25c   :  { %v6877_v22 = vld [vmem:[%s12377_s0 + $0x603] ss:$16 sm:%s4814_s6]   ;;  %v6856_v24 = vld [vmem:[%s12377_s0 + $0x784] ss:$16 sm:%s4715_s30]   ;;  %v4662_v27 = vsel %vm14_vm2, %v6844_v12, %v4657_v17  ;;  %s4875_s30 = smov 3  ;;  %s5026_s6 = smov 192 }
 0x25d   :  { %v6857_v25 = vld [vmem:[%s12377_s0 + $0x784] ss:$16 sm:%s4718_s2]   ;;  %v6878_v29 = vld [vmem:[%s12377_s0 + $0x603] ss:$16 sm:%s4819_s25]   ;;  %v4817_v32 = vsel %vm10_vm1, %v6877_v22, %v4812_v23  ;;  %s4878_s25 = smov 12  ;;  %s4791_s2 = smov 48 }
 0x25e   :  { %v6858_v30 = vld [vmem:[%s12377_s0 + $0x784] ss:$16 sm:%s4723_s5]   ;;  %v4721_v33 = vsel %vm6_vm0, %v6857_v25, %v6856_v24  ;;  %v6895_v10 = vld [vmem:[%s12377_s0 + $0x683] ss:$16 sm:%s4898_s15]   ;;  %v4822_v38 = vsel %vm14_vm2, %v6878_v29, %v4817_v32  ;;  %v3976_v0 = vpop.permute.xlu2 %3975   ;;  %s5296_s5 = smov 48  ;;  %s5196_s15 = smov 3 }
 0x25f   :  { %4755 = vrot.lane.b32.xlu0 %v4754_v14, %s7125_s16  ;;  %v6896_v34 = vld [vmem:[%s12377_s0 + $0x683] ss:$16 sm:%s4901_s20]   ;;  %v4726_v40 = vsel %vm10_vm1, %v6858_v30, %v4721_v33  ;;  %6672 = vst.msk [vmem:[%s12378_s1 + $0x30] sm:$0xff] %vm3656_vm13, %v3861_v56   ;;  %s5199_s20 = smov 12 }
 0x260   :  { %v6859_v36 = vld [vmem:[%s12377_s0 + $0x784] ss:$16 sm:%s4728_s24]   ;;  %v6890_v37 = vld [vmem:[%s12377_s0 + $0x483] ss:$16 sm:%s4875_s30]   ;;  %v4904_v41 = vsel %vm6_vm0, %v6896_v34, %v6895_v10  ;;  %v3953_v8 = vpop.permute.xlu1 %3952   ;;  %s4865_s30 = smov 192  ;;  %s5227_s24 = smov 48 }
 0x261   :  { %4663 = vrot.lane.b32.xlu2 %v4662_v27, %s7124_s19  ;;  %v6897_v42 = vld [vmem:[%s12377_s0 + $0x683] ss:$16 sm:%s4906_s8]   ;;  %v4731_v52 = vsel %vm14_vm2, %v6859_v36, %v4726_v40  ;;  %6697 = vst.msk [vmem:[%s12378_s1 + $0x58] sm:$0xff] %vm3656_vm13, %v3976_v0   ;;  %s5130_s8 = smov 12 }
 0x262   :  { %v6891_v43 = vld [vmem:[%s12377_s0 + $0x483] ss:$16 sm:%s4878_s25]   ;;  %s4967_s25 = smov 3  ;;  %v4909_v16 = vsel %vm10_vm1, %v6897_v42, %v4904_v41  ;;  %6692 = vst.msk [vmem:[%s12378_s1 + $0x38] sm:$0xff] %vm3656_vm13, %v3953_v8  }
 0x263   :  { %4846 = vrot.lane.b32.xlu1 %v4845_v35, %s7125_s16  ;;  %v6898_v44 = vld [vmem:[%s12377_s0 + $0x683] ss:$16 sm:%s4911_s10]   ;;  %v4881_v47 = vsel %vm6_vm0, %v6891_v43, %v6890_v37  ;;  %s5319_s10 = smov 48 }
 0x264   :  { %v6892_v46 = vld [vmem:[%s12377_s0 + $0x483] ss:$16 sm:%s4883_s12]   ;;  %v4914_v60 = vsel %vm14_vm2, %v6898_v44, %v4909_v16  ;;  %v3930_v14 = vpop.permute.xlu0 %3929   ;;  %s5049_s12 = smov 192 }
 0x265   :  { %v6870_v48 = vld [vmem:[%s12377_s0 + $0x403] ss:$16 sm:%s4783_s18]   ;;  %s4944_s18 = smov 3  ;;  %v4886_v57 = vsel %vm10_vm1, %v6892_v46, %v4881_v47  ;;  %6687 = vst.msk [vmem:[%s12378_s1 + $0x18] sm:$0xff] %vm3656_vm13, %v3930_v14  }
 0x266   :  { %v6871_v49 = vld [vmem:[%s12377_s0 + $0x403] ss:$16 sm:%s4786_s14]   ;;  %s4921_s14 = smov 3  ;;  %v4044_v24 = vpop.permute.xlu2 %4043  }
 0x267   :  { %4823 = vrot.lane.b32.xlu0 %v4822_v38, %s7125_s16  ;;  %v6893_v53 = vld [vmem:[%s12377_s0 + $0x483] ss:$16 sm:%s4888_s17]   ;;  %v4789_v45 = vsel %vm6_vm0, %v6871_v49, %v6870_v48  ;;  %s4947_s17 = smov 12  ;;  %6711 = vst.msk [vmem:[%s12378_s1 + $0x20] sm:$0xff] %vm4023_vm14, %v4044_v24  }
 0x268   :  { %v6872_v55 = vld [vmem:[%s12377_s0 + $0x403] ss:$16 sm:%s4791_s2]   ;;  %v4891_v63 = vsel %vm14_vm2, %v6893_v53, %v4886_v57  ;;  %s5013_s2 = smov 3  ;;  %v4022_v10 = vpop.permute.xlu1 %4021  }
 0x269   :  { %v6910_v58 = vld [vmem:[%s12377_s0 + $0x503] ss:$16 sm:%s4967_s25]   ;;  %4732 = vrot.lane.b32.xlu2 %v4731_v52, %s7124_s19  ;;  %s4980_s19 = smov 192  ;;  %v4794_v51 = vsel %vm10_vm1, %v6872_v55, %v4789_v45  ;;  %s5044_s25 = smov 48  ;;  %4024 = vst.msk [vmem:[%s12378_s1] sm:$0xff] %vm4023_vm14, %v4022_v10  }
 0x26a   :  { %v6911_v59 = vld [vmem:[%s12377_s0 + $0x503] ss:$16 sm:%s4970_s9]   ;;  %s5016_s9 = smov 12 }
 0x26b   :  { %v6873_v61 = vld [vmem:[%s12377_s0 + $0x403] ss:$16 sm:%s4796_s11]   ;;  %v4973_v54 = vsel %vm6_vm0, %v6911_v59, %v6910_v58  ;;  %4915 = vrot.lane.b32.xlu1 %v4914_v60, %s7125_s16  ;;  %s4934_s11 = smov 192 }
 0x26c   :  { %v6905_v62 = vld [vmem:[%s12377_s0 + $0x303] ss:$16 sm:%s4944_s18]   ;;  %s4860_s18 = smov 48  ;;  %v4799_v9 = vsel %vm14_vm2, %v6873_v61, %v4794_v51  ;;  %v3999_v38 = vpop.permute.xlu0 %3998  }
 0x26d   :  { %v6912_v1 = vld [vmem:[%s12377_s0 + $0x503] ss:$16 sm:%s4975_s21]   ;;  %s5036_s21 = smov 3  ;;  %6702 = vst.msk [vmem:[%s12378_s1 + $0x78] sm:$0xff] %vm3656_vm13, %v3999_v38  }
 0x26e   :  { %v6906_v2 = vld [vmem:[%s12377_s0 + $0x303] ss:$16 sm:%s4947_s17]   ;;  %s5039_s17 = smov 12  ;;  %v4978_v11 = vsel %vm10_vm1, %v6912_v1, %v4973_v54 }
 0x26f   :  { %v6913_v3 = vld [vmem:[%s12377_s0 + $0x503] ss:$16 sm:%s4980_s19]   ;;  %v4950_v5 = vsel %vm6_vm0, %v6906_v2, %v6905_v62  ;;  %4892 = vrot.lane.b32.xlu0 %v4891_v63, %s7125_s16  ;;  %s5118_s19 = smov 192  ;;  %v4113_v48 = vpop.permute.xlu2 %4112  }
 0x270   :  { %v6907_v4 = vld [vmem:[%s12377_s0 + $0x303] ss:$16 sm:%s4952_s23]   ;;  %v4983_v20 = vsel %vm14_vm2, %v6913_v3, %v4978_v11  ;;  %s5090_s23 = smov 48  ;;  %6726 = vst.msk [vmem:[%s12378_s1 + $0x8] sm:$0xff] %vm4023_vm14, %v4113_v48  }
 0x271   :  { %v6885_v6 = vld [vmem:[%s12377_s0 + $0x283] ss:$16 sm:%s4852_s3]   ;;  %v4955_v15 = vsel %vm10_vm1, %v6907_v4, %v4950_v5  ;;  %4800 = vrot.lane.b32.xlu2 %v4799_v9, %s7125_s16  ;;  %s4990_s3 = smov 3  ;;  %v4090_v58 = vpop.permute.xlu1 %4089  }
 0x272   :  { %v6886_v7 = vld [vmem:[%s12377_s0 + $0x283] ss:$16 sm:%s4855_s7]   ;;  %s4993_s7 = smov 12  ;;  %v6943_v53 = vld [vmem:[%s12377_s0 + $0x2] ss:$16 sm:%s5118_s19]   ;;  %s5314_s19 = smov 12 }
 0x273   :  { %v6908_v12 = vld [vmem:[%s12377_s0 + $0x303] ss:$16 sm:%s4957_s27]   ;;  %v4858_v17 = vsel %vm6_vm0, %v6886_v7, %v6885_v6  ;;  %4984 = vrot.lane.b32.xlu1 %v4983_v20, %s7125_s16  ;;  %s5095_s27 = smov 192  ;;  %6721 = vst.msk [vmem:[%s12378_s1 + $0x60] sm:$0xff] %vm4023_vm14, %v4090_v58  }
 0x274   :  { %v6887_v13 = vld [vmem:[%s12377_s0 + $0x283] ss:$16 sm:%s4860_s18]   ;;  %v4960_v23 = vsel %vm14_vm2, %v6908_v12, %v4955_v15  ;;  %s5082_s18 = smov 3  ;;  %v4067_v63 = vpop.permute.xlu0 %4066  }
 0x275   :  { %v6925_v18 = vld [vmem:[%s12377_s0 + $0x383] ss:$16 sm:%s5036_s21]   ;;  %v4863_v25 = vsel %vm10_vm1, %v6887_v13, %v4858_v17  ;;  %s5113_s21 = smov 48  ;;  %6716 = vst.msk [vmem:[%s12378_s1 + $0x40] sm:$0xff] %vm4023_vm14, %v4067_v63  }
 0x276   :  { %v6926_v19 = vld [vmem:[%s12377_s0 + $0x383] ss:$16 sm:%s5039_s17]   ;;  %s5085_s17 = smov 12  ;;  %v6942_v52 = vld [vmem:[%s12377_s0 + $0x2] ss:$16 sm:%s5113_s21]   ;;  %s5173_s21 = smov 3 }
 0x277   :  { %v6888_v21 = vld [vmem:[%s12377_s0 + $0x283] ss:$16 sm:%s4865_s30]   ;;  %v5042_v26 = vsel %vm6_vm0, %v6926_v19, %v6925_v18  ;;  %4961 = vrot.lane.b32.xlu0 %v4960_v23, %s7125_s16  ;;  %s5003_s30 = smov 192 }
 0x278   :  { %v6920_v22 = vld [vmem:[%s12377_s0 + $0x183] ss:$16 sm:%s5013_s2]   ;;  %s4929_s2 = smov 48  ;;  %v4868_v34 = vsel %vm14_vm2, %v6888_v21, %v4863_v25  ;;  %v6954_v54 = vld [vmem:[%s12377_s0 + $0x602] ss:$16 sm:%s5173_s21]   ;;  %s5612_s21 = smov 12 }
 0x279   :  { %v6927_v27 = vld [vmem:[%s12377_s0 + $0x383] ss:$16 sm:%s5044_s25]   ;;  %s5105_s25 = smov 3  ;;  %4869 = vrot.lane.b32.xlu2 %v4868_v34, %s7125_s16  ;;  %v4159_v18 = vpop.permute.xlu1 %4158  }
 0x27a   :  { %v6921_v28 = vld [vmem:[%s12377_s0 + $0x183] ss:$16 sm:%s5016_s9]   ;;  %s5108_s9 = smov 12  ;;  %v5047_v35 = vsel %vm10_vm1, %v6927_v27, %v5042_v26  ;;  %v6940_v41 = vld [vmem:[%s12377_s0 + $0x2] ss:$16 sm:%s5105_s25]   ;;  %s5181_s25 = smov 48 }
 0x27b   :  { %v6928_v29 = vld [vmem:[%s12377_s0 + $0x383] ss:$16 sm:%s5049_s12]   ;;  %v5019_v31 = vsel %vm6_vm0, %v6921_v28, %v6920_v22  ;;  %v6941_v42 = vld [vmem:[%s12377_s0 + $0x2] ss:$16 sm:%s5108_s9]   ;;  %s5153_s9 = smov 12  ;;  %s5186_s12 = smov 192  ;;  %v4182_v6 = vpop.permute.xlu2 %4181  }
 0x27c   :  { %v6922_v30 = vld [vmem:[%s12377_s0 + $0x183] ss:$16 sm:%s5021_s4]   ;;  %v5052_v43 = vsel %vm14_vm2, %v6928_v29, %v5047_v35  ;;  %v5111_v50 = vsel %vm6_vm0, %v6941_v42, %v6940_v41  ;;  %s5158_s4 = smov 48  ;;  %v6956_v9 = vld [vmem:[%s12377_s0 + $0x602] ss:$16 sm:%s5181_s25]   ;;  %v4136_v23 = vpop.permute.xlu0 %4135   ;;  %s5268_s25 = smov 12 }
 0x27d   :  { %v6900_v32 = vld [vmem:[%s12377_s0 + $0x103] ss:$16 sm:%s4921_s14]   ;;  %v5024_v39 = vsel %vm10_vm1, %v6922_v30, %v5019_v31  ;;  %5053 = vrot.lane.b32.xlu1 %v5052_v43, %s7125_s16  ;;  %v5116_v60 = vsel %vm10_vm1, %v6942_v52, %v5111_v50  ;;  %s5059_s14 = smov 3  ;;  %6741 = vst.msk [vmem:[%s12378_s1 + $0x68] sm:$0xff] %vm4023_vm14, %v4182_v6  }
 0x27e   :  { %v6901_v33 = vld [vmem:[%s12377_s0 + $0x103] ss:$16 sm:%s4924_s29]   ;;  %v5121_v2 = vsel %vm14_vm2, %v6943_v53, %v5116_v60  ;;  %s5062_s29 = smov 12  ;;  %v6950_v11 = vld [vmem:[%s12377_s0 + $0x402] ss:$16 sm:%s5153_s9]   ;;  %s5242_s9 = smov 3 }
 0x27f   :  { %v6923_v36 = vld [vmem:[%s12377_s0 + $0x183] ss:$16 sm:%s5026_s6]   ;;  %v4927_v40 = vsel %vm6_vm0, %v6901_v33, %v6900_v32  ;;  %s5163_s6 = smov 192  ;;  %v6957_v12 = vld [vmem:[%s12377_s0 + $0x602] ss:$16 sm:%s5186_s12]   ;;  %s5232_s12 = smov 192 }
 0x280   :  { %v6902_v37 = vld [vmem:[%s12377_s0 + $0x103] ss:$16 sm:%s4929_s2]   ;;  %v5029_v47 = vsel %vm14_vm2, %v6923_v36, %v5024_v39  ;;  %s5150_s2 = smov 3  ;;  %v6951_v13 = vld [vmem:[%s12377_s0 + $0x402] ss:$16 sm:%s5158_s4]   ;;  %s5370_s4 = smov 192 }
 0x281   :  { %v6903_v44 = vld [vmem:[%s12377_s0 + $0x103] ss:$16 sm:%s4934_s11]   ;;  %v4932_v49 = vsel %vm10_vm1, %v6902_v37, %v4927_v40  ;;  %5030 = vrot.lane.b32.xlu0 %v5029_v47, %s7125_s16  ;;  %6736 = vst.msk [vmem:[%s12378_s1 + $0x48] sm:$0xff] %vm4023_vm14, %v4159_v18   ;;  %v4228_v41 = vpop.permute.xlu1 %4227   ;;  %s5709_s11 = smov 48 }
 0x282   :  { %v6935_v46 = vld [vmem:[%s12377_s0 + $0x783] ss:$16 sm:%s5082_s18]   ;;  %s4998_s18 = smov 48  ;;  %v4937_v59 = vsel %vm14_vm2, %v6903_v44, %v4932_v49  ;;  %v6949_v4 = vld [vmem:[%s12377_s0 + $0x402] ss:$16 sm:%s5150_s2]   ;;  %s5640_s2 = smov 48 }
 0x283   :  { %v6936_v16 = vld [vmem:[%s12377_s0 + $0x783] ss:$16 sm:%s5085_s17]   ;;  %s5176_s17 = smov 12  ;;  %4938 = vrot.lane.b32.xlu2 %v4937_v59, %s7125_s16  ;;  %v5156_v14 = vsel %vm6_vm0, %v6950_v11, %v6949_v4  ;;  %6731 = vst.msk [vmem:[%s12378_s1 + $0x28] sm:$0xff] %vm4023_vm14, %v4136_v23  }
 0x284   :  { %v6937_v55 = vld [vmem:[%s12377_s0 + $0x783] ss:$16 sm:%s5090_s23]   ;;  %v5088_v56 = vsel %vm6_vm0, %v6936_v16, %v6935_v46  ;;  %v6955_v1 = vld [vmem:[%s12377_s0 + $0x602] ss:$16 sm:%s5176_s17]   ;;  %v5161_v24 = vsel %vm10_vm1, %v6951_v13, %v5156_v14  ;;  %s5250_s17 = smov 48  ;;  %v4205_v47 = vpop.permute.xlu0 %4204   ;;  %s5301_s23 = smov 192 }
 0x285   :  { %v6915_v57 = vld [vmem:[%s12377_s0 + $0x703] ss:$16 sm:%s4990_s3]   ;;  %v5093_v0 = vsel %vm10_vm1, %v6937_v55, %v5088_v56  ;;  %v5179_v8 = vsel %vm6_vm0, %v6955_v1, %v6954_v54  ;;  %5122 = vrot.lane.b32.xlu1 %v5121_v2, %s7126_s22  ;;  %s5067_s3 = smov 48  ;;  %v4251_v32 = vpop.permute.xlu2 %4250   ;;  %6751 = vst.msk [vmem:[%s12378_s1 + $0x30] sm:$0xff] %vm4023_vm14, %v4228_v41  }
 0x286   :  { %v6916_v45 = vld [vmem:[%s12377_s0 + $0x703] ss:$16 sm:%s4993_s7]   ;;  %v5184_v20 = vsel %vm10_vm1, %v6956_v9, %v5179_v8  ;;  %v6952_v21 = vld [vmem:[%s12377_s0 + $0x402] ss:$16 sm:%s5163_s6]   ;;  %s5222_s6 = smov 12  ;;  %s5140_s7 = smov 192 }
 0x287   :  { %v6938_v61 = vld [vmem:[%s12377_s0 + $0x783] ss:$16 sm:%s5095_s27]   ;;  %v4996_v51 = vsel %vm6_vm0, %v6916_v45, %v6915_v57  ;;  %s5245_s27 = smov 12  ;;  %v6969_v26 = vld [vmem:[%s12377_s0 + $0x482] ss:$16 sm:%s5242_s9]   ;;  %v5189_v28 = vsel %vm14_vm2, %v6957_v12, %v5184_v20  ;;  %v5166_v31 = vsel %vm14_vm2, %v6952_v21, %v5161_v24  ;;  %s5543_s9 = smov 12 }
 0x288   :  { %v6917_v62 = vld [vmem:[%s12377_s0 + $0x703] ss:$16 sm:%s4998_s18]   ;;  %v5098_v5 = vsel %vm14_vm2, %v6938_v61, %v5093_v0  ;;  %s5072_s18 = smov 192  ;;  %v6970_v27 = vld [vmem:[%s12377_s0 + $0x482] ss:$16 sm:%s5245_s27]  }
 0x289   :  { %v6918_v3 = vld [vmem:[%s12377_s0 + $0x703] ss:$16 sm:%s5003_s30]   ;;  %v5001_v7 = vsel %vm10_vm1, %v6917_v62, %v4996_v51  ;;  %5099 = vrot.lane.b32.xlu0 %v5098_v5, %s7125_s16  ;;  %v5248_v10 = vsel %vm6_vm0, %v6970_v27, %v6969_v26  ;;  %6756 = vst.msk [vmem:[%s12378_s1 + $0x50] sm:$0xff] %vm4023_vm14, %v4251_v32   ;;  %s5365_s30 = smov 48 }
 0x28a   :  { %v6930_v15 = vld [vmem:[%s12377_s0 + $0x583] ss:$16 sm:%s5059_s14]   ;;  %v5006_v19 = vsel %vm14_vm2, %v6918_v3, %v5001_v7  ;;  %s5219_s14 = smov 3  ;;  %v6971_v34 = vld [vmem:[%s12377_s0 + $0x482] ss:$16 sm:%s5250_s17]  }
 0x28b   :  { %v6931_v17 = vld [vmem:[%s12377_s0 + $0x583] ss:$16 sm:%s5062_s29]   ;;  %5007 = vrot.lane.b32.xlu2 %v5006_v19, %s7125_s16  ;;  %s5135_s29 = smov 48  ;;  %v5253_v43 = vsel %vm10_vm1, %v6971_v34, %v5248_v10  ;;  %6746 = vst.msk [vmem:[%s12378_s1 + $0x10] sm:$0xff] %vm4023_vm14, %v4205_v47   ;;  %v4297_v54 = vpop.permute.xlu1 %4296  }
 0x28c   :  { %v6932_v22 = vld [vmem:[%s12377_s0 + $0x583] ss:$16 sm:%s5067_s3]   ;;  %v5065_v25 = vsel %vm6_vm0, %v6931_v17, %v6930_v15  ;;  %v6964_v30 = vld [vmem:[%s12377_s0 + $0x282] ss:$16 sm:%s5219_s14]   ;;  %s5209_s14 = smov 192  ;;  %s5691_s3 = smov 192 }
 0x28d   :  { %v6933_v29 = vld [vmem:[%s12377_s0 + $0x583] ss:$16 sm:%s5072_s18]   ;;  %v5070_v33 = vsel %vm10_vm1, %v6932_v22, %v5065_v25  ;;  %v6965_v35 = vld [vmem:[%s12377_s0 + $0x282] ss:$16 sm:%s5222_s6]   ;;  %s5311_s6 = smov 3  ;;  %v4320_v57 = vpop.permute.xlu2 %4319   ;;  %s5783_s18 = smov 192 }
 0x28e   :  { %5190 = vrot.lane.b32.xlu1 %v5189_v28, %s7126_s22  ;;  %v6972_v36 = vld [vmem:[%s12377_s0 + $0x482] ss:$16 sm:%s5255_s28]   ;;  %v5225_v38 = vsel %vm6_vm0, %v6965_v35, %v6964_v30  ;;  %v5075_v42 = vsel %vm14_vm2, %v6933_v29, %v5070_v33  ;;  %6771 = vst.msk [vmem:[%s12378_s1 + $0x38] sm:$0xff] %vm4023_vm14, %v4320_v57   ;;  %s7127_s28 = smov 8  }
 0x28f   :  { %v6966_v37 = vld [vmem:[%s12377_s0 + $0x282] ss:$16 sm:%s5227_s24]   ;;  %v5258_v16 = vsel %vm14_vm2, %v6972_v36, %v5253_v43  ;;  %6766 = vst.msk [vmem:[%s12378_s1 + $0x18] sm:$0xff] %vm4023_vm14, %v4297_v54   ;;  %v4274_v5 = vpop.permute.xlu0 %4273   ;;  %s5393_s24 = smov 192 }
 0x290   :  { %v6944_v39 = vld [vmem:[%s12377_s0 + $0x202] ss:$16 sm:%s5127_s26]   ;;  %s5288_s26 = smov 3  ;;  %v5230_v48 = vsel %vm10_vm1, %v6966_v37, %v5225_v38  ;;  %6761 = vst.msk [vmem:[%s12378_s1 + $0x70] sm:$0xff] %vm4023_vm14, %v4274_v5  }
 0x291   :  { %v6945_v40 = vld [vmem:[%s12377_s0 + $0x202] ss:$16 sm:%s5130_s8]   ;;  %5167 = vrot.lane.b32.xlu0 %v5166_v31, %s7126_s22  ;;  %s5265_s8 = smov 3 }
 0x292   :  { %v6967_v44 = vld [vmem:[%s12377_s0 + $0x282] ss:$16 sm:%s5232_s12]   ;;  %v5133_v49 = vsel %vm6_vm0, %v6945_v40, %v6944_v39  ;;  %s5291_s12 = smov 12 }
 0x293   :  { %v6946_v46 = vld [vmem:[%s12377_s0 + $0x202] ss:$16 sm:%s5135_s29]   ;;  %5076 = vrot.lane.b32.xlu2 %v5075_v42, %s7125_s16  ;;  %s5324_s16 = smov 192  ;;  %v5235_v56 = vsel %vm14_vm2, %v6967_v44, %v5230_v48  ;;  %s5357_s29 = smov 3 }
 0x294   :  { %v6984_v50 = vld [vmem:[%s12377_s0 + $0x302] ss:$16 sm:%s5311_s6]   ;;  %v5138_v45 = vsel %vm10_vm1, %v6946_v46, %v5133_v49  ;;  %s5388_s6 = smov 48 }
 0x295   :  { %v6985_v52 = vld [vmem:[%s12377_s0 + $0x302] ss:$16 sm:%s5314_s19]   ;;  %s5360_s19 = smov 12  ;;  %v4389_v15 = vpop.permute.xlu2 %4388  }
 0x296   :  { %v6947_v53 = vld [vmem:[%s12377_s0 + $0x202] ss:$16 sm:%s5140_s7]   ;;  %v5317_v58 = vsel %vm6_vm0, %v6985_v52, %v6984_v50  ;;  %5259 = vrot.lane.b32.xlu1 %v5258_v16, %s7126_s22  ;;  %4391 = vst.msk [vmem:[%s12378_s1] sm:$0xff] %vm4390_vm15, %v4389_v15   ;;  %s5278_s7 = smov 192 }
 0x297   :  { %v6979_v55 = vld [vmem:[%s12377_s0 + $0x102] ss:$16 sm:%s5288_s26]   ;;  %s5204_s26 = smov 48  ;;  %v5143_v1 = vsel %vm14_vm2, %v6947_v53, %v5138_v45  ;;  %v4366_v26 = vpop.permute.xlu1 %4365  }
 0x298   :  { %v6986_v59 = vld [vmem:[%s12377_s0 + $0x302] ss:$16 sm:%s5319_s10]   ;;  %s5380_s10 = smov 3  ;;  %6781 = vst.msk [vmem:[%s12378_s1 + $0x78] sm:$0xff] %vm4023_vm14, %v4366_v26  }
 0x299   :  { %v6980_v60 = vld [vmem:[%s12377_s0 + $0x102] ss:$16 sm:%s5291_s12]   ;;  %s5383_s12 = smov 12  ;;  %5236 = vrot.lane.b32.xlu0 %v5235_v56, %s7126_s22  ;;  %v5322_v2 = vsel %vm10_vm1, %v6986_v59, %v5317_v58 }
 0x29a   :  { %v6987_v61 = vld [vmem:[%s12377_s0 + $0x302] ss:$16 sm:%s5324_s16]   ;;  %v5294_v63 = vsel %vm6_vm0, %v6980_v60, %v6979_v55  ;;  %s5462_s16 = smov 192 }
 0x29b   :  { %v6981_v62 = vld [vmem:[%s12377_s0 + $0x102] ss:$16 sm:%s5296_s5]   ;;  %5144 = vrot.lane.b32.xlu2 %v5143_v1, %s7126_s22  ;;  %v5327_v11 = vsel %vm14_vm2, %v6987_v61, %v5322_v2  ;;  %v4343_v31 = vpop.permute.xlu0 %4342   ;;  %s5434_s5 = smov 48 }
 0x29c   :  { %v6959_v0 = vld [vmem:[%s12377_s0 + $0x82] ss:$16 sm:%s5196_s15]   ;;  %v5299_v6 = vsel %vm10_vm1, %v6981_v62, %v5294_v63  ;;  %6776 = vst.msk [vmem:[%s12378_s1 + $0x58] sm:$0xff] %vm4023_vm14, %v4343_v31   ;;  %s5334_s15 = smov 3 }
 0x29d   :  { %v6960_v51 = vld [vmem:[%s12377_s0 + $0x82] ss:$16 sm:%s5199_s20]   ;;  %s5337_s20 = smov 12  ;;  %v4457_v39 = vpop.permute.xlu2 %4456  }
 0x29e   :  { %v6982_v3 = vld [vmem:[%s12377_s0 + $0x102] ss:$16 sm:%s5301_s23]   ;;  %v5202_v7 = vsel %vm6_vm0, %v6960_v51, %v6959_v0  ;;  %5328 = vrot.lane.b32.xlu1 %v5327_v11, %s7126_s22  ;;  %s5439_s23 = smov 192  ;;  %6800 = vst.msk [vmem:[%s12378_s1 + $0x60] sm:$0xff] %vm4390_vm15, %v4457_v39  }
 0x29f   :  { %v6961_v4 = vld [vmem:[%s12377_s0 + $0x82] ss:$16 sm:%s5204_s26]   ;;  %v5304_v14 = vsel %vm14_vm2, %v6982_v3, %v5299_v6  ;;  %s5426_s26 = smov 3  ;;  %v4434_v50 = vpop.permute.xlu1 %4433  }
 0x2a0   :  { %v6999_v8 = vld [vmem:[%s12377_s0 + $0x182] ss:$16 sm:%s5380_s10]   ;;  %v5207_v17 = vsel %vm10_vm1, %v6961_v4, %v5202_v7  ;;  %s5457_s10 = smov 48  ;;  %6795 = vst.msk [vmem:[%s12378_s1 + $0x40] sm:$0xff] %vm4390_vm15, %v4434_v50  }
 0x2a1   :  { %v7000_v9 = vld [vmem:[%s12377_s0 + $0x182] ss:$16 sm:%s5383_s12]   ;;  %5305 = vrot.lane.b32.xlu0 %v5304_v14, %s7126_s22  ;;  %s5429_s12 = smov 12 }
 0x2a2   :  { %v6962_v12 = vld [vmem:[%s12377_s0 + $0x82] ss:$16 sm:%s5209_s14]   ;;  %v5386_v18 = vsel %vm6_vm0, %v7000_v9, %v6999_v8  ;;  %s5347_s14 = smov 192 }
 0x2a3   :  { %v6994_v13 = vld [vmem:[%s12377_s0 + $0x702] ss:$16 sm:%s5357_s29]   ;;  %s5273_s29 = smov 48  ;;  %v5212_v27 = vsel %vm14_vm2, %v6962_v12, %v5207_v17  ;;  %v4411_v56 = vpop.permute.xlu0 %4410  }
 0x2a4   :  { %v7001_v19 = vld [vmem:[%s12377_s0 + $0x182] ss:$16 sm:%s5388_s6]   ;;  %s5449_s6 = smov 3  ;;  %5213 = vrot.lane.b32.xlu2 %v5212_v27, %s7126_s22  ;;  %6790 = vst.msk [vmem:[%s12378_s1 + $0x20] sm:$0xff] %vm4390_vm15, %v4411_v56  }
 0x2a5   :  { %v6995_v20 = vld [vmem:[%s12377_s0 + $0x702] ss:$16 sm:%s5360_s19]   ;;  %s5452_s19 = smov 12  ;;  %v5391_v28 = vsel %vm10_vm1, %v7001_v19, %v5386_v18 }
 0x2a6   :  { %v7002_v21 = vld [vmem:[%s12377_s0 + $0x182] ss:$16 sm:%s5393_s24]   ;;  %v5363_v23 = vsel %vm6_vm0, %v6995_v20, %v6994_v13  ;;  %s5530_s24 = smov 192 }
 0x2a7   :  { %v6996_v22 = vld [vmem:[%s12377_s0 + $0x702] ss:$16 sm:%s5365_s30]   ;;  %v5396_v35 = vsel %vm14_vm2, %v7002_v21, %v5391_v28  ;;  %s5502_s30 = smov 48  ;;  %v7031_v3 = vld [vmem:[%s12377_s0 + $0x401] ss:$16 sm:%s5530_s24]   ;;  %v4503_v8 = vpop.permute.xlu1 %4502   ;;  %s5714_s24 = smov 192 }
 0x2a8   :  { %v6974_v24 = vld [vmem:[%s12377_s0 + $0x682] ss:$16 sm:%s5265_s8]   ;;  %v5368_v32 = vsel %vm10_vm1, %v6996_v22, %v5363_v23  ;;  %5397 = vrot.lane.b32.xlu1 %v5396_v35, %s7126_s22  ;;  %s5403_s8 = smov 3  ;;  %6810 = vst.msk [vmem:[%s12378_s1 + $0x28] sm:$0xff] %vm4390_vm15, %v4503_v8  }
 0x2a9   :  { %v6975_v25 = vld [vmem:[%s12377_s0 + $0x682] ss:$16 sm:%s5268_s25]   ;;  %s5406_s25 = smov 12  ;;  %v4526_v0 = vpop.permute.xlu2 %4525   ;;  %v7025_v4 = vld [vmem:[%s12377_s0 + $0x201] ss:$16 sm:%s5502_s30]  }
 0x2aa   :  { %v6997_v29 = vld [vmem:[%s12377_s0 + $0x702] ss:$16 sm:%s5370_s4]   ;;  %v5271_v33 = vsel %vm6_vm0, %v6975_v25, %v6974_v24  ;;  %s5507_s4 = smov 192  ;;  %6815 = vst.msk [vmem:[%s12378_s1 + $0x48] sm:$0xff] %vm4390_vm15, %v4526_v0  }
 0x2ab   :  { %v6976_v30 = vld [vmem:[%s12377_s0 + $0x682] ss:$16 sm:%s5273_s29]   ;;  %v5373_v38 = vsel %vm14_vm2, %v6997_v29, %v5368_v32  ;;  %s5494_s29 = smov 3  ;;  %v7026_v12 = vld [vmem:[%s12377_s0 + $0x201] ss:$16 sm:%s5507_s4]   ;;  %v4480_v14 = vpop.permute.xlu0 %4479   ;;  %s5658_s4 = smov 12 }
 0x2ac   :  { %v7014_v10 = vld [vmem:[%s12377_s0 + $0x782] ss:$16 sm:%s5449_s6]   ;;  %v5276_v40 = vsel %vm10_vm1, %v6976_v30, %v5271_v33  ;;  %5374 = vrot.lane.b32.xlu0 %v5373_v38, %s7126_s22  ;;  %s5525_s6 = smov 48  ;;  %6805 = vst.msk [vmem:[%s12378_s1 + $0x8] sm:$0xff] %vm4390_vm15, %v4480_v14  }
 0x2ad   :  { %v7015_v34 = vld [vmem:[%s12377_s0 + $0x782] ss:$16 sm:%s5452_s19]   ;;  %s5497_s19 = smov 12  ;;  %v7023_v62 = vld [vmem:[%s12377_s0 + $0x201] ss:$16 sm:%s5494_s29]   ;;  %s5411_s29 = smov 48 }
 0x2ae   :  { %v6977_v36 = vld [vmem:[%s12377_s0 + $0x682] ss:$16 sm:%s5278_s7]   ;;  %v5455_v41 = vsel %vm6_vm0, %v7015_v34, %v7014_v10  ;;  %v7030_v1 = vld [vmem:[%s12377_s0 + $0x401] ss:$16 sm:%s5525_s6]   ;;  %s5586_s6 = smov 3  ;;  %s5416_s7 = smov 192 }
 0x2af   :  { %v7009_v37 = vld [vmem:[%s12377_s0 + $0x582] ss:$16 sm:%s5426_s26]   ;;  %s5342_s26 = smov 48  ;;  %v5281_v52 = vsel %vm14_vm2, %v6977_v36, %v5276_v40  ;;  %v7024_v2 = vld [vmem:[%s12377_s0 + $0x201] ss:$16 sm:%s5497_s19]   ;;  %s5589_s19 = smov 12  ;;  %v4572_v10 = vpop.permute.xlu1 %4571  }
 0x2b0   :  { %v7016_v42 = vld [vmem:[%s12377_s0 + $0x782] ss:$16 sm:%s5457_s10]   ;;  %s5517_s10 = smov 3  ;;  %5282 = vrot.lane.b32.xlu2 %v5281_v52, %s7126_s22  ;;  %v5500_v5 = vsel %vm6_vm0, %v7024_v2, %v7023_v62  ;;  %6825 = vst.msk [vmem:[%s12378_s1 + $0x10] sm:$0xff] %vm4390_vm15, %v4572_v10  }
 0x2b1   :  { %v7010_v43 = vld [vmem:[%s12377_s0 + $0x582] ss:$16 sm:%s5429_s12]   ;;  %s5520_s12 = smov 12  ;;  %v5460_v16 = vsel %vm10_vm1, %v7016_v42, %v5455_v41  ;;  %v7028_v58 = vld [vmem:[%s12377_s0 + $0x401] ss:$16 sm:%s5517_s10]   ;;  %v5505_v15 = vsel %vm10_vm1, %v7025_v4, %v5500_v5  ;;  %s5594_s10 = smov 48 }
 0x2b2   :  { %v7017_v44 = vld [vmem:[%s12377_s0 + $0x782] ss:$16 sm:%s5462_s16]   ;;  %v5432_v47 = vsel %vm6_vm0, %v7010_v43, %v7009_v37  ;;  %v7029_v59 = vld [vmem:[%s12377_s0 + $0x401] ss:$16 sm:%s5520_s12]   ;;  %s5566_s12 = smov 12  ;;  %s5599_s16 = smov 192  ;;  %v5510_v23 = vsel %vm14_vm2, %v7026_v12, %v5505_v15 }
 0x2b3   :  { %v7011_v46 = vld [vmem:[%s12377_s0 + $0x582] ss:$16 sm:%s5434_s5]   ;;  %v5465_v60 = vsel %vm14_vm2, %v7017_v44, %v5460_v16  ;;  %v5523_v54 = vsel %vm6_vm0, %v7029_v59, %v7028_v58  ;;  %v7043_v18 = vld [vmem:[%s12377_s0 + $0x281] ss:$16 sm:%s5586_s6]   ;;  %s5571_s5 = smov 48  ;;  %v4595_v24 = vpop.permute.xlu2 %4594   ;;  %v4549_v38 = vpop.permute.xlu0 %4548   ;;  %s5816_s6 = smov 3 }
 0x2b4   :  { %v6989_v48 = vld [vmem:[%s12377_s0 + $0x502] ss:$16 sm:%s5334_s15]   ;;  %v5437_v57 = vsel %vm10_vm1, %v7011_v46, %v5432_v47  ;;  %5466 = vrot.lane.b32.xlu1 %v5465_v60, %s7126_s22  ;;  %v5528_v11 = vsel %vm10_vm1, %v7030_v1, %v5523_v54  ;;  %s5472_s15 = smov 3  ;;  %6830 = vst.msk [vmem:[%s12378_s1 + $0x30] sm:$0xff] %vm4390_vm15, %v4595_v24  }
 0x2b5   :  { %v6990_v49 = vld [vmem:[%s12377_s0 + $0x502] ss:$16 sm:%s5337_s20]   ;;  %v7044_v19 = vld [vmem:[%s12377_s0 + $0x281] ss:$16 sm:%s5589_s19]   ;;  %v5533_v20 = vsel %vm14_vm2, %v7031_v3, %v5528_v11  ;;  %s5475_s20 = smov 12  ;;  %s5663_s19 = smov 48 }
 0x2b6   :  { %v7012_v53 = vld [vmem:[%s12377_s0 + $0x582] ss:$16 sm:%s5439_s23]   ;;  %v5340_v45 = vsel %vm6_vm0, %v6990_v49, %v6989_v48  ;;  %v5592_v26 = vsel %vm6_vm0, %v7044_v19, %v7043_v18  ;;  %v7045_v27 = vld [vmem:[%s12377_s0 + $0x281] ss:$16 sm:%s5594_s10]   ;;  %s5576_s23 = smov 192  ;;  %s5806_s10 = smov 192 }
 0x2b7   :  { %v6991_v55 = vld [vmem:[%s12377_s0 + $0x502] ss:$16 sm:%s5342_s26]   ;;  %v5442_v63 = vsel %vm14_vm2, %v7012_v53, %v5437_v57  ;;  %s5563_s26 = smov 3  ;;  %v7039_v28 = vld [vmem:[%s12377_s0 + $0x81] ss:$16 sm:%s5566_s12]   ;;  %s5655_s12 = smov 3  ;;  %v5597_v35 = vsel %vm10_vm1, %v7045_v27, %v5592_v26 }
 0x2b8   :  { %v6992_v61 = vld [vmem:[%s12377_s0 + $0x502] ss:$16 sm:%s5347_s14]   ;;  %v5345_v51 = vsel %vm10_vm1, %v6991_v55, %v5340_v45  ;;  %5443 = vrot.lane.b32.xlu0 %v5442_v63, %s7126_s22  ;;  %6820 = vst.msk [vmem:[%s12378_s1 + $0x68] sm:$0xff] %vm4390_vm15, %v4549_v38  }
 0x2b9   :  { %v7004_v6 = vld [vmem:[%s12377_s0 + $0x382] ss:$16 sm:%s5403_s8]   ;;  %v5350_v9 = vsel %vm14_vm2, %v6992_v61, %v5345_v51  ;;  %v7038_v22 = vld [vmem:[%s12377_s0 + $0x81] ss:$16 sm:%s5563_s26]   ;;  %s5480_s8 = smov 48  ;;  %v4641_v58 = vpop.permute.xlu1 %4640   ;;  %s5553_s26 = smov 192 }
 0x2ba   :  { %v7005_v7 = vld [vmem:[%s12377_s0 + $0x382] ss:$16 sm:%s5406_s25]   ;;  %5351 = vrot.lane.b32.xlu2 %v5350_v9, %s7126_s22  ;;  %v5569_v31 = vsel %vm6_vm0, %v7039_v28, %v7038_v22  ;;  %s5540_s25 = smov 3  ;;  %6840 = vst.msk [vmem:[%s12378_s1 + $0x70] sm:$0xff] %vm4390_vm15, %v4641_v58  }
 0x2bb   :  { %v7006_v13 = vld [vmem:[%s12377_s0 + $0x382] ss:$16 sm:%s5411_s29]   ;;  %v5409_v17 = vsel %vm6_vm0, %v7005_v7, %v7004_v6  ;;  %v7046_v29 = vld [vmem:[%s12377_s0 + $0x281] ss:$16 sm:%s5599_s16]   ;;  %s5485_s29 = smov 192  ;;  %v4664_v48 = vpop.permute.xlu2 %4663  }
 0x2bc   :  { %v7007_v21 = vld [vmem:[%s12377_s0 + $0x382] ss:$16 sm:%s5416_s7]   ;;  %v5414_v25 = vsel %vm10_vm1, %v7006_v13, %v5409_v17  ;;  %5534 = vrot.lane.b32.xlu1 %v5533_v20, %s7127_s28  ;;  %v5602_v43 = vsel %vm14_vm2, %v7046_v29, %v5597_v35  ;;  %6845 = vst.msk [vmem:[%s12378_s1 + $0x18] sm:$0xff] %vm4390_vm15, %v4664_v48  }
 0x2bd   :  { %v7040_v30 = vld [vmem:[%s12377_s0 + $0x81] ss:$16 sm:%s5571_s5]   ;;  %v5419_v34 = vsel %vm14_vm2, %v7007_v21, %v5414_v25  ;;  %v4618_v63 = vpop.permute.xlu0 %4617   ;;  %s5737_s5 = smov 192 }
 0x2be   :  { %v7019_v32 = vld [vmem:[%s12377_s0 + $0x1] ss:$16 sm:%s5472_s15]   ;;  %s5632_s15 = smov 3  ;;  %v5574_v39 = vsel %vm10_vm1, %v7040_v30, %v5569_v31  ;;  %6835 = vst.msk [vmem:[%s12378_s1 + $0x50] sm:$0xff] %vm4390_vm15, %v4618_v63  }
 0x2bf   :  { %v7020_v33 = vld [vmem:[%s12377_s0 + $0x1] ss:$16 sm:%s5475_s20]   ;;  %s5609_s20 = smov 3 }
 0x2c0   :  { %5511 = vrot.lane.b32.xlu0 %v5510_v23, %s7127_s28  ;;  %v7041_v36 = vld [vmem:[%s12377_s0 + $0x81] ss:$16 sm:%s5576_s23]   ;;  %v5478_v40 = vsel %vm6_vm0, %v7020_v33, %v7019_v32  ;;  %s5635_s23 = smov 12 }
 0x2c1   :  { %v7021_v37 = vld [vmem:[%s12377_s0 + $0x1] ss:$16 sm:%s5480_s8]   ;;  %v5579_v47 = vsel %vm14_vm2, %v7041_v36, %v5574_v39  ;;  %s5701_s8 = smov 3 }
 0x2c2   :  { %v7058_v41 = vld [vmem:[%s12377_s0 + $0x101] ss:$16 sm:%s5655_s12]   ;;  %5420 = vrot.lane.b32.xlu2 %v5419_v34, %s7126_s22  ;;  %s5668_s22 = smov 192  ;;  %v5483_v49 = vsel %vm10_vm1, %v7021_v37, %v5478_v40  ;;  %s5732_s12 = smov 48 }
 0x2c3   :  { %v7059_v42 = vld [vmem:[%s12377_s0 + $0x101] ss:$16 sm:%s5658_s4]   ;;  %s5704_s4 = smov 12  ;;  %v4733_v6 = vpop.permute.xlu2 %4732  }
 0x2c4   :  { %v7022_v44 = vld [vmem:[%s12377_s0 + $0x1] ss:$16 sm:%s5485_s29]   ;;  %v5661_v50 = vsel %vm6_vm0, %v7059_v42, %v7058_v41  ;;  %5603 = vrot.lane.b32.xlu1 %v5602_v43, %s7127_s28  ;;  %6860 = vst.msk [vmem:[%s12378_s1 + $0x78] sm:$0xff] %vm4390_vm15, %v4733_v6   ;;  %s5622_s29 = smov 192 }
 0x2c5   :  { %v7053_v46 = vld [vmem:[%s12377_s0 + $0x681] ss:$16 sm:%s5632_s15]   ;;  %s5548_s15 = smov 48  ;;  %v5488_v59 = vsel %vm14_vm2, %v7022_v44, %v5483_v49  ;;  %v4710_v18 = vpop.permute.xlu1 %4709  }
 0x2c6   :  { %v7060_v52 = vld [vmem:[%s12377_s0 + $0x101] ss:$16 sm:%s5663_s19]   ;;  %s5724_s19 = smov 3  ;;  %6855 = vst.msk [vmem:[%s12378_s1 + $0x58] sm:$0xff] %vm4390_vm15, %v4710_v18  }
 0x2c7   :  { %v7054_v16 = vld [vmem:[%s12377_s0 + $0x681] ss:$16 sm:%s5635_s23]   ;;  %s5727_s23 = smov 12  ;;  %v5666_v60 = vsel %vm10_vm1, %v7060_v52, %v5661_v50 }
 0x2c8   :  { %v7061_v53 = vld [vmem:[%s12377_s0 + $0x101] ss:$16 sm:%s5668_s22]   ;;  %v5638_v56 = vsel %vm6_vm0, %v7054_v16, %v7053_v46  ;;  %5580 = vrot.lane.b32.xlu0 %v5579_v47, %s7127_s28  ;;  %s5778_s22 = smov 48 }
 0x2c9   :  { %v7055_v55 = vld [vmem:[%s12377_s0 + $0x681] ss:$16 sm:%s5640_s2]   ;;  %v5671_v2 = vsel %vm14_vm2, %v7061_v53, %v5666_v60  ;;  %v4687_v23 = vpop.permute.xlu0 %4686  }
 0x2ca   :  { %v7033_v57 = vld [vmem:[%s12377_s0 + $0x601] ss:$16 sm:%s5540_s25]   ;;  %v5643_v0 = vsel %vm10_vm1, %v7055_v55, %v5638_v56  ;;  %5489 = vrot.lane.b32.xlu2 %v5488_v59, %s7127_s28  ;;  %6850 = vst.msk [vmem:[%s12378_s1 + $0x38] sm:$0xff] %vm4390_vm15, %v4687_v23   ;;  %s5681_s25 = smov 12 }
 0x2cb   :  { %v7034_v45 = vld [vmem:[%s12377_s0 + $0x601] ss:$16 sm:%s5543_s9]   ;;  %v4801_v32 = vpop.permute.xlu2 %4800  }
 0x2cc   :  { %v7056_v61 = vld [vmem:[%s12377_s0 + $0x681] ss:$16 sm:%s5645_s13]   ;;  %v5546_v51 = vsel %vm6_vm0, %v7034_v45, %v7033_v57  ;;  %5672 = vrot.lane.b32.xlu1 %v5671_v2, %s7127_s28  ;;  %6874 = vst.msk [vmem:[%s12378_s1 + $0x40] sm:$0xff] %vm4757_vm3, %v4801_v32  }
 0x2cd   :  { %v7035_v62 = vld [vmem:[%s12377_s0 + $0x601] ss:$16 sm:%s5548_s15]   ;;  %v5648_v5 = vsel %vm14_vm2, %v7056_v61, %v5643_v0  ;;  %s5770_s15 = smov 3  ;;  %v4778_v40 = vpop.permute.xlu1 %4777  }
 0x2ce   :  { %v7073_v54 = vld [vmem:[%s12377_s0 + $0x701] ss:$16 sm:%s5724_s19]   ;;  %v5551_v7 = vsel %vm10_vm1, %v7035_v62, %v5546_v51  ;;  %s5801_s19 = smov 48  ;;  %6869 = vst.msk [vmem:[%s12378_s1 + $0x20] sm:$0xff] %vm4757_vm3, %v4778_v40  }
 0x2cf   :  { %v7074_v1 = vld [vmem:[%s12377_s0 + $0x701] ss:$16 sm:%s5727_s23]   ;;  %s5773_s23 = smov 12 }
 0x2d0   :  { %v7036_v3 = vld [vmem:[%s12377_s0 + $0x601] ss:$16 sm:%s5553_s26]   ;;  %v5730_v8 = vsel %vm6_vm0, %v7074_v1, %v7073_v54  ;;  %5649 = vrot.lane.b32.xlu0 %v5648_v5, %s7127_s28 }
 0x2d1   :  { %v7068_v4 = vld [vmem:[%s12377_s0 + $0x501] ss:$16 sm:%s5701_s8]   ;;  %s5617_s8 = smov 48  ;;  %v5556_v19 = vsel %vm14_vm2, %v7036_v3, %v5551_v7  ;;  %v4756_v44 = vpop.permute.xlu0 %4755  }
 0x2d2   :  { %v7075_v9 = vld [vmem:[%s12377_s0 + $0x701] ss:$16 sm:%s5732_s12]   ;;  %s5793_s12 = smov 3  ;;  %5557 = vrot.lane.b32.xlu2 %v5556_v19, %s7127_s28  ;;  %4758 = vst.msk [vmem:[%s12378_s1] sm:$0xff] %vm4757_vm3, %v4756_v44  }
 0x2d3   :  { %v7069_v11 = vld [vmem:[%s12377_s0 + $0x501] ss:$16 sm:%s5704_s4]   ;;  %s5796_s4 = smov 12  ;;  %v5735_v20 = vsel %vm10_vm1, %v7075_v9, %v5730_v8  ;;  %v4870_v16 = vpop.permute.xlu2 %4869  }
 0x2d4   :  { %v7076_v12 = vld [vmem:[%s12377_s0 + $0x701] ss:$16 sm:%s5737_s5]   ;;  %v5707_v14 = vsel %vm6_vm0, %v7069_v11, %v7068_v4  ;;  %6889 = vst.msk [vmem:[%s12378_s1 + $0x28] sm:$0xff] %vm4757_vm3, %v4870_v16  }
 0x2d5   :  { %v7070_v13 = vld [vmem:[%s12377_s0 + $0x501] ss:$16 sm:%s5709_s11]   ;;  %v5740_v28 = vsel %vm14_vm2, %v7076_v12, %v5735_v20  ;;  %s5755_s11 = smov 48  ;;  %v4847_v45 = vpop.permute.xlu1 %4846  }
 0x2d6   :  { %v7048_v15 = vld [vmem:[%s12377_s0 + $0x481] ss:$16 sm:%s5609_s20]   ;;  %v5712_v24 = vsel %vm10_vm1, %v7070_v13, %v5707_v14  ;;  %5741 = vrot.lane.b32.xlu1 %v5740_v28, %s7127_s28  ;;  %6884 = vst.msk [vmem:[%s12378_s1 + $0x8] sm:$0xff] %vm4757_vm3, %v4847_v45   ;;  %s5760_s20 = smov 192 }
 0x2d7   :  { %v7049_v17 = vld [vmem:[%s12377_s0 + $0x481] ss:$16 sm:%s5612_s21]   ;;  %s5686_s21 = smov 48 }
 0x2d8   :  { %v7071_v21 = vld [vmem:[%s12377_s0 + $0x501] ss:$16 sm:%s5714_s24]   ;;  %v5615_v25 = vsel %vm6_vm0, %v7049_v17, %v7048_v15 }
 0x2d9   :  { %v7050_v22 = vld [vmem:[%s12377_s0 + $0x481] ss:$16 sm:%s5617_s8]   ;;  %s5678_s8 = smov 3  ;;  %v5717_v31 = vsel %vm14_vm2, %v7071_v21, %v5712_v24  ;;  %v4824_v59 = vpop.permute.xlu0 %4823  }
 0x2da   :  { %v7088_v26 = vld [vmem:[%s12377_s0 + $0x581] ss:$16 sm:%s5793_s12]   ;;  %v5620_v33 = vsel %vm10_vm1, %v7050_v22, %v5615_v25  ;;  %5718 = vrot.lane.b32.xlu0 %v5717_v31, %s7127_s28  ;;  %6879 = vst.msk [vmem:[%s12378_s1 + $0x60] sm:$0xff] %vm4757_vm3, %v4824_v59   ;;  %s5829_s12 = smov 192 }
 0x2db   :  { %v7089_v27 = vld [vmem:[%s12377_s0 + $0x581] ss:$16 sm:%s5796_s4]  }
 0x2dc   :  { %v7051_v29 = vld [vmem:[%s12377_s0 + $0x481] ss:$16 sm:%s5622_s29]   ;;  %v5799_v10 = vsel %vm6_vm0, %v7089_v27, %v7088_v26 }
 0x2dd   :  { %v7083_v30 = vld [vmem:[%s12377_s0 + $0x381] ss:$16 sm:%s5770_s15]   ;;  %v5625_v41 = vsel %vm14_vm2, %v7051_v29, %v5620_v33  ;;  %v4939_v62 = vpop.permute.xlu2 %4938   ;;  %v4916_v1 = vpop.permute.xlu1 %4915  }
 0x2de   :  { %v7090_v34 = vld [vmem:[%s12377_s0 + $0x581] ss:$16 sm:%s5801_s19]   ;;  %5626 = vrot.lane.b32.xlu2 %v5625_v41, %s7127_s28  ;;  %s5819_s19 = smov 12  ;;  %6904 = vst.msk [vmem:[%s12378_s1 + $0x10] sm:$0xff] %vm4757_vm3, %v4939_v62  }
 0x2df   :  { %v7084_v35 = vld [vmem:[%s12377_s0 + $0x381] ss:$16 sm:%s5773_s23]   ;;  %v5804_v42 = vsel %vm10_vm1, %v7090_v34, %v5799_v10  ;;  %6899 = vst.msk [vmem:[%s12378_s1 + $0x68] sm:$0xff] %vm4757_vm3, %v4916_v1  }
 0x2e0   :  { %v7085_v36 = vld [vmem:[%s12377_s0 + $0x381] ss:$16 sm:%s5778_s22]   ;;  %v5776_v37 = vsel %vm6_vm0, %v7084_v35, %v7083_v30 }
 0x2e1   :  { %v7063_v38 = vld [vmem:[%s12377_s0 + $0x301] ss:$16 sm:%s5678_s8]   ;;  %v5781_v46 = vsel %vm10_vm1, %v7085_v36, %v5776_v37  ;;  %s5747_s8 = smov 3  ;;  %v4893_v3 = vpop.permute.xlu0 %4892  }
 0x2e2   :  { %v7064_v39 = vld [vmem:[%s12377_s0 + $0x301] ss:$16 sm:%s5681_s25]   ;;  %s5750_s25 = smov 12  ;;  %6894 = vst.msk [vmem:[%s12378_s1 + $0x48] sm:$0xff] %vm4757_vm3, %v4893_v3  }
 0x2e3   :  { %v7091_v43 = vld [vmem:[%s12377_s0 + $0x581] ss:$16 sm:%s5806_s10]   ;;  %v5684_v48 = vsel %vm6_vm0, %v7064_v39, %v7063_v38 }
 0x2e4   :  { %v7086_v47 = vld [vmem:[%s12377_s0 + $0x381] ss:$16 sm:%s5783_s18]   ;;  %v5809_v50 = vsel %vm14_vm2, %v7091_v43, %v5804_v42 }
 0x2e5   :  { %v7065_v49 = vld [vmem:[%s12377_s0 + $0x301] ss:$16 sm:%s5686_s21]   ;;  %v5786_v52 = vsel %vm14_vm2, %v7086_v47, %v5781_v46  ;;  %5810 = vrot.lane.b32.xlu1 %v5809_v50, %s7127_s28  ;;  %v5008_v6 = vpop.permute.xlu2 %5007   ;;  %v4985_v9 = vpop.permute.xlu1 %4984  }
 0x2e6   :  { %v5689_v53 = vsel %vm10_vm1, %v7065_v49, %v5684_v48  ;;  %v7066_v55 = vld [vmem:[%s12377_s0 + $0x301] ss:$16 sm:%s5691_s3]   ;;  %5787 = vrot.lane.b32.xlu0 %v5786_v52, %s7127_s28  ;;  %6919 = vst.msk [vmem:[%s12378_s1 + $0x70] sm:$0xff] %vm4757_vm3, %v5008_v6  }
 0x2e7   :  { %v7078_v56 = vld [vmem:[%s12377_s0 + $0x181] ss:$16 sm:%s5747_s8]   ;;  %v5694_v58 = vsel %vm14_vm2, %v7066_v55, %v5689_v53  ;;  %s5824_s8 = smov 48  ;;  %6914 = vst.msk [vmem:[%s12378_s1 + $0x50] sm:$0xff] %vm4757_vm3, %v4985_v9  }
 0x2e8   :  { %v7079_v57 = vld [vmem:[%s12377_s0 + $0x181] ss:$16 sm:%s5750_s25]   ;;  %5695 = vrot.lane.b32.xlu2 %v5694_v58, %s7127_s28 }
 0x2e9   :  { %v5753_v60 = vsel %vm6_vm0, %v7079_v57, %v7078_v56  ;;  %v7080_v61 = vld [vmem:[%s12377_s0 + $0x181] ss:$16 sm:%s5755_s11]   ;;  %v4962_v12 = vpop.permute.xlu0 %4961  }
 0x2ea   :  { %v5758_v63 = vsel %vm10_vm1, %v7080_v61, %v5753_v60  ;;  %v7081_v0 = vld [vmem:[%s12377_s0 + $0x181] ss:$16 sm:%s5760_s20]   ;;  %6909 = vst.msk [vmem:[%s12378_s1 + $0x30] sm:$0xff] %vm4757_vm3, %v4962_v12  }
 0x2eb   :  { %v7093_v51 = vld [vmem:[%s12377_s0 + $0x781] ss:$16 sm:%s5816_s6]   ;;  %v5763_v2 = vsel %vm14_vm2, %v7081_v0, %v5758_v63 }
 0x2ec   :  { %v7094_v54 = vld [vmem:[%s12377_s0 + $0x781] ss:$16 sm:%s5819_s19]  }
 0x2ed   :  { %v5822_v4 = vsel %vm6_vm0, %v7094_v54, %v7093_v51  ;;  %v7095_v5 = vld [vmem:[%s12377_s0 + $0x781] ss:$16 sm:%s5824_s8]   ;;  %v5077_v13 = vpop.permute.xlu2 %5076   ;;  %vm5124_vm0 = vcmask 195712  }
 0x2ee   :  { %v5827_v7 = vsel %vm10_vm1, %v7095_v5, %v5822_v4  ;;  %v7096_v8 = vld [vmem:[%s12377_s0 + $0x781] ss:$16 sm:%s5829_s12]   ;;  %6934 = vst.msk [vmem:[%s12378_s1 + $0x58] sm:$0xff] %vm4757_vm3, %v5077_v13   ;;  %vm5491_vm1 = vcmask 130112  }
 0x2ef   :  { %v5832_v11 = vsel %vm14_vm2, %v7096_v8, %v5827_v7  ;;  %v5054_v14 = vpop.permute.xlu1 %5053  }
 0x2f0   :  { %5764 = vrot.lane.b32.xlu2 %v5763_v2, %s7127_s28  ;;  %6929 = vst.msk [vmem:[%s12378_s1 + $0x38] sm:$0xff] %vm4757_vm3, %v5054_v14  }
 0x2f3   :  { %v5031_v15 = vpop.permute.xlu0 %5030  }
 0x2f4   :  { %6924 = vst.msk [vmem:[%s12378_s1 + $0x18] sm:$0xff] %vm4757_vm3, %v5031_v15  }
 0x2f5   :  { %v5145_v17 = vpop.permute.xlu2 %5144  }
 0x2f6   :  { %6948 = vst.msk [vmem:[%s12378_s1 + $0x20] sm:$0xff] %vm5124_vm0, %v5145_v17  }
 0x2f7   :  { %v5123_v18 = vpop.permute.xlu1 %5122  }
 0x2f8   :  { %5833 = vrot.lane.b32.xlu2 %v5832_v11, %s7127_s28  ;;  %5125 = vst.msk [vmem:[%s12378_s1] sm:$0xff] %vm5124_vm0, %v5123_v18  }
 0x2fb   :  { %v5100_v19 = vpop.permute.xlu0 %5099  }
 0x2fc   :  { %6939 = vst.msk [vmem:[%s12378_s1 + $0x78] sm:$0xff] %vm4757_vm3, %v5100_v19  }
 0x2fe   :  { %v5214_v20 = vpop.permute.xlu2 %5213  }
 0x2ff   :  { %6963 = vst.msk [vmem:[%s12378_s1 + $0x8] sm:$0xff] %vm5124_vm0, %v5214_v20  }
 0x300   :  { %v5191_v21 = vpop.permute.xlu1 %5190  }
 0x301   :  { %6958 = vst.msk [vmem:[%s12378_s1 + $0x60] sm:$0xff] %vm5124_vm0, %v5191_v21  }
 0x303   :  { %v5168_v22 = vpop.permute.xlu0 %5167  }
 0x304   :  { %6953 = vst.msk [vmem:[%s12378_s1 + $0x40] sm:$0xff] %vm5124_vm0, %v5168_v22  }
 0x308   :  { %v5260_v24 = vpop.permute.xlu1 %5259  }
 0x309   :  { %6973 = vst.msk [vmem:[%s12378_s1 + $0x48] sm:$0xff] %vm5124_vm0, %v5260_v24  }
 0x30a   :  { %v5283_v23 = vpop.permute.xlu2 %5282  }
 0x30b   :  { %6978 = vst.msk [vmem:[%s12378_s1 + $0x68] sm:$0xff] %vm5124_vm0, %v5283_v23   ;;  %v5237_v25 = vpop.permute.xlu0 %5236  }
 0x30c   :  { %6968 = vst.msk [vmem:[%s12378_s1 + $0x28] sm:$0xff] %vm5124_vm0, %v5237_v25  }
 0x310   :  { %v5329_v27 = vpop.permute.xlu1 %5328  }
 0x311   :  { %6988 = vst.msk [vmem:[%s12378_s1 + $0x30] sm:$0xff] %vm5124_vm0, %v5329_v27  }
 0x313   :  { %v5306_v28 = vpop.permute.xlu0 %5305  }
 0x314   :  { %v5352_v26 = vpop.permute.xlu2 %5351   ;;  %6983 = vst.msk [vmem:[%s12378_s1 + $0x10] sm:$0xff] %vm5124_vm0, %v5306_v28  }
 0x315   :  { %6993 = vst.msk [vmem:[%s12378_s1 + $0x50] sm:$0xff] %vm5124_vm0, %v5352_v26  }
 0x31a   :  { %v5398_v30 = vpop.permute.xlu1 %5397  }
 0x31b   :  { %7003 = vst.msk [vmem:[%s12378_s1 + $0x18] sm:$0xff] %vm5124_vm0, %v5398_v30  }
 0x31c   :  { %v5421_v29 = vpop.permute.xlu2 %5420  }
 0x31d   :  { %7008 = vst.msk [vmem:[%s12378_s1 + $0x38] sm:$0xff] %vm5124_vm0, %v5421_v29  }
 0x31e   :  { %v5375_v31 = vpop.permute.xlu0 %5374  }
 0x31f   :  { %6998 = vst.msk [vmem:[%s12378_s1 + $0x70] sm:$0xff] %vm5124_vm0, %v5375_v31  }
 0x324   :  { %v5490_v32 = vpop.permute.xlu2 %5489  }
 0x325   :  { %5492 = vst.msk [vmem:[%s12378_s1] sm:$0xff] %vm5491_vm1, %v5490_v32  }
 0x326   :  { %v5467_v33 = vpop.permute.xlu1 %5466  }
 0x327   :  { %7018 = vst.msk [vmem:[%s12378_s1 + $0x78] sm:$0xff] %vm5124_vm0, %v5467_v33  }
 0x32a   :  { %v5444_v10 = vpop.permute.xlu0 %5443  }
 0x32b   :  { %7013 = vst.msk [vmem:[%s12378_s1 + $0x58] sm:$0xff] %vm5124_vm0, %v5444_v10  }
 0x32c   :  { %v5558_v34 = vpop.permute.xlu2 %5557  }
 0x32d   :  { %7037 = vst.msk [vmem:[%s12378_s1 + $0x60] sm:$0xff] %vm5491_vm1, %v5558_v34  }
 0x32e   :  { %v5535_v35 = vpop.permute.xlu1 %5534  }
 0x32f   :  { %7032 = vst.msk [vmem:[%s12378_s1 + $0x40] sm:$0xff] %vm5491_vm1, %v5535_v35  }
 0x332   :  { %v5512_v36 = vpop.permute.xlu0 %5511  }
 0x333   :  { %7027 = vst.msk [vmem:[%s12378_s1 + $0x20] sm:$0xff] %vm5491_vm1, %v5512_v36  }
 0x336   :  { %v5604_v38 = vpop.permute.xlu1 %5603  }
 0x337   :  { %7047 = vst.msk [vmem:[%s12378_s1 + $0x28] sm:$0xff] %vm5491_vm1, %v5604_v38  }
 0x338   :  { %v5627_v37 = vpop.permute.xlu2 %5626  }
 0x339   :  { %7052 = vst.msk [vmem:[%s12378_s1 + $0x48] sm:$0xff] %vm5491_vm1, %v5627_v37  }
 0x33a   :  { %v5581_v39 = vpop.permute.xlu0 %5580  }
 0x33b   :  { %7042 = vst.msk [vmem:[%s12378_s1 + $0x8] sm:$0xff] %vm5491_vm1, %v5581_v39  }
 0x33e   :  { %v5673_v41 = vpop.permute.xlu1 %5672  }
 0x33f   :  { %7062 = vst.msk [vmem:[%s12378_s1 + $0x10] sm:$0xff] %vm5491_vm1, %v5673_v41  }
 0x342   :  { %v5696_v40 = vpop.permute.xlu2 %5695   ;;  %v5650_v42 = vpop.permute.xlu0 %5649  }
 0x343   :  { %7067 = vst.msk [vmem:[%s12378_s1 + $0x30] sm:$0xff] %vm5491_vm1, %v5696_v40  }
 0x344   :  { %7057 = vst.msk [vmem:[%s12378_s1 + $0x68] sm:$0xff] %vm5491_vm1, %v5650_v42  }
 0x348   :  { %v5742_v44 = vpop.permute.xlu1 %5741  }
 0x349   :  { %7077 = vst.msk [vmem:[%s12378_s1 + $0x70] sm:$0xff] %vm5491_vm1, %v5742_v44  }
 0x34a   :  { %v5765_v43 = vpop.permute.xlu2 %5764  }
 0x34b   :  { %7082 = vst.msk [vmem:[%s12378_s1 + $0x18] sm:$0xff] %vm5491_vm1, %v5765_v43  }
 0x34c   :  { %v5719_v46 = vpop.permute.xlu0 %5718  }
 0x34d   :  { %7072 = vst.msk [vmem:[%s12378_s1 + $0x50] sm:$0xff] %vm5491_vm1, %v5719_v46  }
 0x352   :  { %v5834_v47 = vpop.permute.xlu2 %5833  }
 0x353   :  { %7097 = vst.msk [vmem:[%s12378_s1 + $0x78] sm:$0xff] %vm5491_vm1, %v5834_v47  }
 0x357   :  { %v5811_v48 = vpop.permute.xlu1 %5810  }
 0x358   :  { %7092 = vst.msk [vmem:[%s12378_s1 + $0x58] sm:$0xff] %vm5491_vm1, %v5811_v48   ;;  %v5788_v49 = vpop.permute.xlu0 %5787  }
 0x359   :  { %7087 = vst.msk [vmem:[%s12378_s1 + $0x38] sm:$0xff] %vm5491_vm1, %v5788_v49  }

// kernel: tile.33
= control target key start
LH: loop header
LB: loop body
LE: loop exit
PB: predicated region body
PF: predicated region fallthrough
CT: control target
= control target key end

     0   :  { %s28_s0 = inlined_call_operand.vmem [shape: f32[8], index: 0, kind: input, shape index: {}]   ;;  %s29_s1 = inlined_call_operand.vmem [shape: f32[16,8], index: 1, kind: output, shape index: {}]  }
   0x1   :  { %v4_v0 = vld [vmem:[%s28_s0] ss:$0 sm:$0xff] }
   0x2   :  { %5 = vst [vmem:[%s29_s1] sm:$0xff] %v4_v0 }
   0x3   :  { %8 = vst [vmem:[%s29_s1 + $0x8] sm:$0xff] %v4_v0 }

// kernel: tile.34
= control target key start
LH: loop header
LB: loop body
LE: loop exit
PB: predicated region body
PF: predicated region fallthrough
CT: control target
= control target key end

     0   :  { %s131_s10 = smov 120   ;;  %s132_s11 = smov 104   ;;  %vm3_vm0 = vcmask 64512   ;;  %vm9_vm1 = vcmask 1048512   ;;  %vm15_vm2 = vcmask 982912   ;;  %vm21_vm3 = vcmask 917312   ;;  %s207_s0 = inlined_call_operand.vmem [shape: f32[16,8], index: 0, kind: input, shape index: {}]   ;;  %s208_s1 = inlined_call_operand.vmem [shape: f32[1,128], index: 1, kind: output, shape index: {}]  }
   0x1   :  { %v101_v0 = vld [vmem:[%s207_s0 + $0xf] sm:$0x1]   ;;  %v103_v1 = vld [vmem:[%s207_s0 + $0xd] sm:$0x1]   ;;  %v105_v2 = vld [vmem:[%s207_s0 + $0xb] sm:$0x1]  }
   0x2   :  { %7 = vrot.lane.b32.xlu0 %v101_v0, %s131_s10  ;;  %19 = vrot.lane.b32.xlu1 %v103_v1, %s132_s11  ;;  %s133_s14 = smov 88   ;;  %v102_v3 = vld [vmem:[%s207_s0 + $0xe] sm:$0x1]   ;;  %v104_v4 = vld [vmem:[%s207_s0 + $0xc] sm:$0x1]   ;;  %s134_s19 = smov 112  }
   0x3   :  { %31 = vrot.lane.b32.xlu2 %v105_v2, %s133_s14  ;;  %s135_s20 = smov 96   ;;  %v106_v5 = vld [vmem:[%s207_s0 + $0xa] sm:$0x1]   ;;  %s136_s23 = smov 80   ;;  %v107_v6 = vld [vmem:[%s207_s0 + $0x9] sm:$0x1]  }
   0x4   :  { %v108_v7 = vld [vmem:[%s207_s0 + $0x8] sm:$0x1]   ;;  %s137_s28 = smov 72   ;;  %s138_s29 = smov 64   ;;  %v109_v8 = vld [vmem:[%s207_s0 + $0x7] sm:$0x1]  }
   0x5   :  { %s139_s3 = smov 56   ;;  %v110_v9 = vld [vmem:[%s207_s0 + $0x6] sm:$0x1]   ;;  %v111_v10 = vld [vmem:[%s207_s0 + $0x5] sm:$0x1]   ;;  %s140_s8 = smov 48  }
   0x6   :  { %s141_s9 = smov 40   ;;  %v112_v11 = vld [vmem:[%s207_s0 + $0x4] sm:$0x1]   ;;  %s142_s12 = smov 32   ;;  %v113_v12 = vld [vmem:[%s207_s0 + $0x3] sm:$0x1]  }
   0x7   :  { %v114_v13 = vld [vmem:[%s207_s0 + $0x2] sm:$0x1]   ;;  %s143_s17 = smov 24   ;;  %s144_s18 = smov 16   ;;  %v115_v14 = vld [vmem:[%s207_s0 + $0x1] sm:$0x1]  }
   0x8   :  { %s145_s21 = smov 8   ;;  %v2_v15 = vld [vmem:[%s207_s0] sm:$0x1]   ;;  %vm27_vm4 = vcmask 851712   ;;  %vm33_vm5 = vcmask 786112   ;;  %vm39_vm6 = vcmask 720512  }
   0x9   :  { %4 = vst.msk [vmem:[#allocation0] sm:$0x1] %vm3_vm0, %v2_v15   ;;  %vm45_vm7 = vcmask 654912   ;;  %vm51_vm8 = vcmask 589312   ;;  %vm57_vm9 = vcmask 523712   ;;  %vm63_vm10 = vcmask 458112  }
   0xa   :  { %13 = vrot.lane.b32.xlu0 %v102_v3, %s134_s19  ;;  %25 = vrot.lane.b32.xlu1 %v104_v4, %s135_s20  ;;  %vm69_vm11 = vcmask 392512   ;;  %vm75_vm12 = vcmask 326912   ;;  %vm81_vm13 = vcmask 261312   ;;  %vm87_vm14 = vcmask 195712  }
   0xb   :  { %37 = vrot.lane.b32.xlu2 %v106_v5, %s136_s23  ;;  %vm93_vm15 = vcmask 130112  }
  0x12   :  { %43 = vrot.lane.b32.xlu0 %v107_v6, %s137_s28  ;;  %49 = vrot.lane.b32.xlu1 %v108_v7, %s138_s29 }
  0x13   :  { %55 = vrot.lane.b32.xlu2 %v109_v8, %s139_s3 }
  0x1a   :  { %61 = vrot.lane.b32.xlu0 %v110_v9, %s140_s8  ;;  %67 = vrot.lane.b32.xlu1 %v111_v10, %s141_s9 }
  0x1b   :  { %73 = vrot.lane.b32.xlu2 %v112_v11, %s142_s12 }
  0x22   :  { %79 = vrot.lane.b32.xlu0 %v113_v12, %s143_s17  ;;  %85 = vrot.lane.b32.xlu1 %v114_v13, %s144_s18 }
  0x23   :  { %91 = vrot.lane.b32.xlu2 %v115_v14, %s145_s21 }
  0x5d   :  { %v32_v16 = vpop.permute.xlu2 %31  }
  0x65   :  { %v38_v17 = vpop.permute.xlu2 %37  }
  0x6d   :  { %v56_v18 = vpop.permute.xlu2 %55  }
  0x74   :  { %v8_v19 = vpop.permute.xlu0 %7   ;;  %v20_v20 = vpop.permute.xlu1 %19  }
  0x75   :  { %10 = vst.msk [vmem:[#allocation0] sm:$0x1] %vm9_vm1, %v8_v19   ;;  %v74_v21 = vpop.permute.xlu2 %73  }
  0x7c   :  { %v14_v22 = vpop.permute.xlu0 %13   ;;  %v26_v23 = vpop.permute.xlu1 %25  }
  0x7d   :  { %16 = vst.msk [vmem:[#allocation0] sm:$0x1] %vm15_vm2, %v14_v22   ;;  %v92_v24 = vpop.permute.xlu2 %91  }
  0x7e   :  { %22 = vst.msk [vmem:[#allocation0] sm:$0x1] %vm21_vm3, %v20_v20  }
  0x7f   :  { %28 = vst.msk [vmem:[#allocation0] sm:$0x1] %vm27_vm4, %v26_v23  }
  0x80   :  { %34 = vst.msk [vmem:[#allocation0] sm:$0x1] %vm33_vm5, %v32_v16  }
  0x81   :  { %40 = vst.msk [vmem:[#allocation0] sm:$0x1] %vm39_vm6, %v38_v17  }
  0x84   :  { %v44_v25 = vpop.permute.xlu0 %43   ;;  %v50_v26 = vpop.permute.xlu1 %49  }
  0x85   :  { %46 = vst.msk [vmem:[#allocation0] sm:$0x1] %vm45_vm7, %v44_v25  }
  0x86   :  { %52 = vst.msk [vmem:[#allocation0] sm:$0x1] %vm51_vm8, %v50_v26  }
  0x87   :  { %58 = vst.msk [vmem:[#allocation0] sm:$0x1] %vm57_vm9, %v56_v18  }
  0x8c   :  { %v62_v27 = vpop.permute.xlu0 %61   ;;  %v68_v28 = vpop.permute.xlu1 %67  }
  0x8d   :  { %64 = vst.msk [vmem:[#allocation0] sm:$0x1] %vm63_vm10, %v62_v27  }
  0x8e   :  { %70 = vst.msk [vmem:[#allocation0] sm:$0x1] %vm69_vm11, %v68_v28  }
  0x8f   :  { %76 = vst.msk [vmem:[#allocation0] sm:$0x1] %vm75_vm12, %v74_v21  }
  0x94   :  { %v80_v29 = vpop.permute.xlu0 %79   ;;  %v86_v30 = vpop.permute.xlu1 %85  }
  0x95   :  { %82 = vst.msk [vmem:[#allocation0] sm:$0x1] %vm81_vm13, %v80_v29  }
  0x96   :  { %88 = vst.msk [vmem:[#allocation0] sm:$0x1] %vm87_vm14, %v86_v30  }
  0x97   :  { %94 = vst.msk [vmem:[#allocation0] sm:$0x1] %vm93_vm15, %v92_v24  }
  0x9e   :  { %v97_v31 = vld [vmem:[#allocation0] sm:$0x1] }
  0x9f   :  { %100 = vst [vmem:[%s208_s1] sm:$0x1] %v97_v31 }

// kernel: residual_forward.1
= control target key start
LH: loop header
LB: loop body
LE: loop exit
PB: predicated region body
PF: predicated region fallthrough
CT: control target
= control target key end

     0   :  { %vm63_vm0 = vcmask 261120   ;;  %s1442_s0 = inlined_call_operand.vmem [shape: f32[32,128], index: 0, kind: input, shape index: {}]   ;;  %s1443_s1 = inlined_call_operand.vmem [shape: f32[3,128,128], index: 1, kind: input, shape index: {}]   ;;  %s1444_s3 = inlined_call_operand.vmem [shape: f32[32,32], index: 3, kind: input, shape index: {}]   ;;  %s1445_s4 = inlined_call_operand.vmem [shape: f32[32,32], index: 4, kind: input, shape index: {}]   ;;  %s1446_s5 = inlined_call_operand.vmem [shape: f32[128,128], index: 5, kind: input, shape index: {}]   ;;  %s1447_s7 = inlined_call_operand.vmem [shape: f32[1,128], index: 7, kind: input, shape index: {}]   ;;  %s1448_s2 = inlined_call_operand.vmem [shape: f32[3,128,128], index: 2, kind: input, shape index: {}]   ;;  %s1449_s6 = inlined_call_operand.vmem [shape: f32[1,128], index: 6, kind: input, shape index: {}]   ;;  %s1450_s9 = inlined_call_operand.vmem [shape: f32[1,128], index: 9, kind: input, shape index: {}]   ;;  %s1451_s8 = inlined_call_operand.vmem [shape: f32[1,128], index: 8, kind: input, shape index: {}]   ;;  %s1452_s10 = inlined_call_operand.vmem [shape: f32[32,128], index: 10, kind: output, shape index: {}]  }
   0x1   :  { %v848_v0 = vld [vmem:[%s1442_s0 + $0x18] sm:$0xff]  ;;  %v853_v1 = vld [vmem:[%s1442_s0 + $0x10] sm:$0xff]  ;;  %v860_v2 = vld [vmem:[%s1442_s0 + $0x8] sm:$0xff] }
   0x2   :  { %88 = vmatpush.msra.mxu2 %v848_v0  ;;  %129 = vmatpush.msra.mxu1 %v848_v0  ;;  %v867_v3 = vld [vmem:[%s1442_s0] sm:$0xff]  ;;  %v161_v4 = vld [vmem:[%s1443_s1 + $0x78] sm:$0xff]  ;;  %v160_v8 = vld [vmem:[%s1443_s1 + $0x70] sm:$0xff] }
   0x3   :  { %v876_v5 = vld [vmem:[%s1444_s3] sm:$0xff]  ;;  %v723_v7 = vld [vmem:[%s1443_s1 + $0xf8] sm:$0xff]  ;;  %208 = vmatpush.msra.mxu3 %v161_v4  ;;  %v722_v10 = vld [vmem:[%s1443_s1 + $0xf0] sm:$0xff] }
   0x4   :  { %89 = vmatpush.msra.mxu2 %v853_v1  ;;  %130 = vmatpush.msra.mxu1 %v853_v1  ;;  %v882_v6 = vld [vmem:[%s1445_s4] sm:$0xff]  ;;  %v739_v9 = vld [vmem:[%s1443_s1 + $0x178] sm:$0xff]  ;;  %v159_v11 = vld [vmem:[%s1443_s1 + $0x68] sm:$0xff] }
   0x5   :  { %209 = vmatpush.msra.mxu3 %v160_v8  ;;  %v738_v12 = vld [vmem:[%s1443_s1 + $0x170] sm:$0xff]  ;;  %v721_v13 = vld [vmem:[%s1443_s1 + $0xe8] sm:$0xff]  ;;  %v158_v14 = vld [vmem:[%s1443_s1 + $0x60] sm:$0xff]  ;;  %254 = vmatpush.msra.mxu0 %v739_v9 }
   0x6   :  { %90 = vmatpush.msra.mxu2 %v860_v2  ;;  %131 = vmatpush.msra.mxu1 %v860_v2  ;;  %v737_v15 = vld [vmem:[%s1443_s1 + $0x168] sm:$0xff]  ;;  %v720_v16 = vld [vmem:[%s1443_s1 + $0xe0] sm:$0xff]  ;;  %v157_v17 = vld [vmem:[%s1443_s1 + $0x58] sm:$0xff] }
   0x7   :  { %210 = vmatpush.msra.mxu3 %v159_v11  ;;  %255 = vmatpush.msra.mxu0 %v738_v12  ;;  %v926_v18 = vld [vmem:[%s1444_s3 + $0x8] sm:$0xff]  ;;  %v719_v20 = vld [vmem:[%s1443_s1 + $0xd8] sm:$0xff]  ;;  %v156_v21 = vld [vmem:[%s1443_s1 + $0x50] sm:$0xff] }
   0x8   :  { %91 = vmatpush.msra.mxu2 %v867_v3  ;;  %132 = vmatpush.msra.mxu1 %v867_v3  ;;  %v931_v19 = vld [vmem:[%s1445_s4 + $0x8] sm:$0xff]  ;;  %v736_v22 = vld [vmem:[%s1443_s1 + $0x160] sm:$0xff]  ;;  %v718_v23 = vld [vmem:[%s1443_s1 + $0xd0] sm:$0xff] }
   0x9   :  { %700 = vmatmul.msk.f32.vlgmr.msra.gmra.mxu2 %vm63_vm0, %v876_v5  ;;  %704 = vmatmul.msk.f32.vlgmr.msra.gmra.mxu1 %vm63_vm0, %v882_v6  ;;  %v155_v24 = vld [vmem:[%s1443_s1 + $0x48] sm:$0xff]  ;;  %v735_v25 = vld [vmem:[%s1443_s1 + $0x158] sm:$0xff]  ;;  %v154_v27 = vld [vmem:[%s1443_s1 + $0x40] sm:$0xff] }
   0xa   :  { %179 = vmatpush.msrb.mxu2 %v723_v7  ;;  %211 = vmatpush.msra.mxu3 %v158_v14  ;;  %v717_v26 = vld [vmem:[%s1443_s1 + $0xc8] sm:$0xff]  ;;  %v734_v28 = vld [vmem:[%s1443_s1 + $0x150] sm:$0xff]  ;;  %v716_v29 = vld [vmem:[%s1443_s1 + $0xc0] sm:$0xff] }
   0xb   :  { %256 = vmatpush.msra.mxu0 %v737_v15  ;;  %v153_v30 = vld [vmem:[%s1443_s1 + $0x38] sm:$0xff]  ;;  %v973_v31 = vld [vmem:[%s1444_s3 + $0x10] sm:$0xff]  ;;  %v733_v35 = vld [vmem:[%s1443_s1 + $0x148] sm:$0xff] }
   0xc   :  { %180 = vmatpush.msrb.mxu2 %v722_v10  ;;  %212 = vmatpush.msra.mxu3 %v157_v17  ;;  %v978_v32 = vld [vmem:[%s1445_s4 + $0x10] sm:$0xff]  ;;  %v715_v33 = vld [vmem:[%s1443_s1 + $0xb8] sm:$0xff]  ;;  %v151_v37 = vld [vmem:[%s1443_s1 + $0x28] sm:$0xff] }
   0xd   :  { %257 = vmatpush.msra.mxu0 %v736_v22  ;;  %v152_v34 = vld [vmem:[%s1443_s1 + $0x30] sm:$0xff]  ;;  %v732_v38 = vld [vmem:[%s1443_s1 + $0x140] sm:$0xff]  ;;  %v713_v39 = vld [vmem:[%s1443_s1 + $0xa8] sm:$0xff] }
   0xe   :  { %181 = vmatpush.msrb.mxu2 %v721_v13  ;;  %213 = vmatpush.msra.mxu3 %v156_v21  ;;  %v714_v36 = vld [vmem:[%s1443_s1 + $0xb0] sm:$0xff]  ;;  %v150_v40 = vld [vmem:[%s1443_s1 + $0x20] sm:$0xff]  ;;  %v731_v41 = vld [vmem:[%s1443_s1 + $0x138] sm:$0xff] }
   0xf   :  { %258 = vmatpush.msra.mxu0 %v735_v25  ;;  %v712_v42 = vld [vmem:[%s1443_s1 + $0xa0] sm:$0xff]  ;;  %v149_v43 = vld [vmem:[%s1443_s1 + $0x18] sm:$0xff]  ;;  %v148_v47 = vld [vmem:[%s1443_s1 + $0x10] sm:$0xff] }
  0x10   :  { %182 = vmatpush.msrb.mxu2 %v720_v16  ;;  %214 = vmatpush.msra.mxu3 %v155_v24  ;;  %v1020_v44 = vld [vmem:[%s1444_s3 + $0x18] sm:$0xff]  ;;  %v730_v48 = vld [vmem:[%s1443_s1 + $0x130] sm:$0xff]  ;;  %v147_v50 = vld [vmem:[%s1443_s1 + $0x8] sm:$0xff] }
  0x11   :  { %701 = vmatmul.msk.f32.gmra.mxu2 %vm63_vm0, %v926_v18  ;;  %705 = vmatmul.msk.f32.gmra.mxu1 %vm63_vm0, %v931_v19  ;;  %v1025_v45 = vld [vmem:[%s1445_s4 + $0x18] sm:$0xff]  ;;  %v710_v49 = vld [vmem:[%s1443_s1 + $0x90] sm:$0xff]  ;;  %v729_v51 = vld [vmem:[%s1443_s1 + $0x128] sm:$0xff] }
  0x12   :  { %183 = vmatpush.msrb.mxu2 %v719_v20  ;;  %215 = vmatpush.msra.mxu3 %v154_v27  ;;  %v711_v46 = vld [vmem:[%s1443_s1 + $0x98] sm:$0xff]  ;;  %v709_v52 = vld [vmem:[%s1443_s1 + $0x88] sm:$0xff]  ;;  %v708_v53 = vld [vmem:[%s1443_s1 + $0x80] sm:$0xff] }
  0x13   :  { %259 = vmatpush.msra.mxu0 %v734_v28  ;;  %v146_v54 = vld [vmem:[%s1443_s1] sm:$0xff]  ;;  %v727_v56 = vld [vmem:[%s1443_s1 + $0x118] sm:$0xff]  ;;  %v726_v57 = vld [vmem:[%s1443_s1 + $0x110] sm:$0xff] }
  0x14   :  { %184 = vmatpush.msrb.mxu2 %v718_v23  ;;  %216 = vmatpush.msra.mxu3 %v153_v30  ;;  %v728_v55 = vld [vmem:[%s1443_s1 + $0x120] sm:$0xff]  ;;  %v725_v58 = vld [vmem:[%s1443_s1 + $0x108] sm:$0xff]  ;;  %v1108_v10 = vld [vmem:[%s1446_s5 + $0x58] sm:$0xff] }
  0x15   :  { %260 = vmatpush.msra.mxu0 %v733_v35  ;;  %v724_v59 = vld [vmem:[%s1443_s1 + $0x100] sm:$0xff]  ;;  %v1115_v11 = vld [vmem:[%s1446_s5 + $0x50] sm:$0xff]  ;;  %v1122_v12 = vld [vmem:[%s1446_s5 + $0x48] sm:$0xff] }
  0x16   :  { %185 = vmatpush.msrb.mxu2 %v717_v26  ;;  %217 = vmatpush.msra.mxu3 %v152_v34  ;;  %v1101_v9 = vld [vmem:[%s1446_s5 + $0x60] sm:$0xff]  ;;  %v1136_v16 = vld [vmem:[%s1446_s5 + $0x38] sm:$0xff]  ;;  %v1143_v17 = vld [vmem:[%s1446_s5 + $0x30] sm:$0xff] }
  0x17   :  { %261 = vmatpush.msra.mxu0 %v732_v38  ;;  %v1129_v14 = vld [vmem:[%s1446_s5 + $0x40] sm:$0xff]  ;;  %v1150_v20 = vld [vmem:[%s1446_s5 + $0x28] sm:$0xff]  ;;  %v1164_v24 = vld [vmem:[%s1446_s5 + $0x18] sm:$0xff] }
  0x18   :  { %186 = vmatpush.msrb.mxu2 %v716_v29  ;;  %218 = vmatpush.msra.mxu3 %v151_v37  ;;  %v1157_v22 = vld [vmem:[%s1446_s5 + $0x20] sm:$0xff]  ;;  %v1169_v25 = vld [vmem:[%s1446_s5 + $0x10] sm:$0xff]  ;;  %v1176_v27 = vld [vmem:[%s1446_s5 + $0x8] sm:$0xff] }
  0x19   :  { %702 = vmatmul.msk.f32.gmra.mxu2 %vm63_vm0, %v973_v31  ;;  %706 = vmatmul.msk.f32.gmra.mxu1 %vm63_vm0, %v978_v32  ;;  %v1183_v28 = vld [vmem:[%s1446_s5] sm:$0xff] }
  0x1a   :  { %187 = vmatpush.msrb.mxu2 %v715_v33  ;;  %219 = vmatpush.msra.mxu3 %v150_v40 }
  0x1b   :  { %262 = vmatpush.msra.mxu0 %v731_v41 }
  0x1c   :  { %188 = vmatpush.msrb.mxu2 %v714_v36  ;;  %220 = vmatpush.msra.mxu3 %v149_v43 }
  0x1d   :  { %263 = vmatpush.msra.mxu0 %v730_v48 }
  0x1e   :  { %189 = vmatpush.msrb.mxu2 %v713_v39  ;;  %221 = vmatpush.msra.mxu3 %v148_v47 }
  0x1f   :  { %264 = vmatpush.msra.mxu0 %v729_v51 }
  0x20   :  { %190 = vmatpush.msrb.mxu2 %v712_v42  ;;  %222 = vmatpush.msra.mxu3 %v147_v50 }
  0x21   :  { %703 = vmatmul.msk.f32.gmra.mxu2 %vm63_vm0, %v1020_v44  ;;  %707 = vmatmul.msk.f32.gmra.mxu1 %vm63_vm0, %v1025_v45 }
  0x22   :  { %191 = vmatpush.msrb.mxu2 %v711_v46  ;;  %223 = vmatpush.msra.mxu3 %v146_v54 }
  0x23   :  { %265 = vmatpush.msra.mxu0 %v728_v55 }
  0x24   :  { %192 = vmatpush.msrb.mxu2 %v710_v49 }
  0x25   :  { %266 = vmatpush.msra.mxu0 %v727_v56 }
  0x26   :  { %193 = vmatpush.msrb.mxu2 %v709_v52 }
  0x27   :  { %267 = vmatpush.msra.mxu0 %v726_v57 }
  0x28   :  { %194 = vmatpush.msrb.mxu2 %v708_v53 }
  0x29   :  { %195 = vmatmul.f32.vlgmr.msrb.gmra.mxu2 %v867_v3  ;;  %268 = vmatpush.msra.mxu0 %v725_v58 }
  0x2b   :  { %269 = vmatpush.msra.mxu0 %v724_v59 }
  0x31   :  { %198 = vmatmul.f32.gmra.mxu2 %v860_v2  ;;  %v1094_v2 = vld [vmem:[%s1446_s5 + $0x68] sm:$0xff] }
  0x39   :  { %201 = vmatmul.f32.gmra.mxu2 %v853_v1  ;;  %v1087_v1 = vld [vmem:[%s1446_s5 + $0x70] sm:$0xff] }
  0x41   :  { %204 = vmatmul.f32.gmra.mxu2 %v848_v0  ;;  %v1080_v0 = vld [vmem:[%s1446_s5 + $0x78] sm:$0xff] }
  0x42   :  { %296 = vmatpush.msrb.mxu1 %v1080_v0  ;;  %335 = vmatpush.msrb.mxu3 %v1080_v0 }
  0x44   :  { %297 = vmatpush.msrb.mxu1 %v1087_v1  ;;  %336 = vmatpush.msrb.mxu3 %v1087_v1 }
  0x46   :  { %298 = vmatpush.msrb.mxu1 %v1094_v2  ;;  %337 = vmatpush.msrb.mxu3 %v1094_v2 }
  0x48   :  { %299 = vmatpush.msrb.mxu1 %v1101_v9  ;;  %338 = vmatpush.msrb.mxu3 %v1101_v9 }
  0x4a   :  { %300 = vmatpush.msrb.mxu1 %v1108_v10  ;;  %339 = vmatpush.msrb.mxu3 %v1108_v10 }
  0x4c   :  { %301 = vmatpush.msrb.mxu1 %v1115_v11  ;;  %340 = vmatpush.msrb.mxu3 %v1115_v11 }
  0x4e   :  { %302 = vmatpush.msrb.mxu1 %v1122_v12  ;;  %341 = vmatpush.msrb.mxu3 %v1122_v12 }
  0x50   :  { %303 = vmatpush.msrb.mxu1 %v1129_v14  ;;  %342 = vmatpush.msrb.mxu3 %v1129_v14 }
  0x52   :  { %304 = vmatpush.msrb.mxu1 %v1136_v16  ;;  %343 = vmatpush.msrb.mxu3 %v1136_v16 }
  0x54   :  { %305 = vmatpush.msrb.mxu1 %v1143_v17  ;;  %344 = vmatpush.msrb.mxu3 %v1143_v17 }
  0x56   :  { %306 = vmatpush.msrb.mxu1 %v1150_v20  ;;  %345 = vmatpush.msrb.mxu3 %v1150_v20 }
  0x58   :  { %307 = vmatpush.msrb.mxu1 %v1157_v22  ;;  %346 = vmatpush.msrb.mxu3 %v1157_v22 }
  0x5a   :  { %308 = vmatpush.msrb.mxu1 %v1164_v24  ;;  %347 = vmatpush.msrb.mxu3 %v1164_v24 }
  0x5c   :  { %309 = vmatpush.msrb.mxu1 %v1169_v25  ;;  %348 = vmatpush.msrb.mxu3 %v1169_v25 }
  0x5e   :  { %310 = vmatpush.msrb.mxu1 %v1176_v27  ;;  %349 = vmatpush.msrb.mxu3 %v1176_v27 }
  0x60   :  { %311 = vmatpush.msrb.mxu1 %v1183_v28  ;;  %350 = vmatpush.msrb.mxu3 %v1183_v28 }
  0x86   :  { %v134_v60 = vpop.f32.mrf.mxu1 }
  0x87   :  { %270 = vmatmul.f32.vlgmr.msra.gmra.mxu0 %v134_v60 }
  0x8c   :  { %v93_v61 = vpop.f32.mrf.mxu2 }
  0x8d   :  { %224 = vmatmul.f32.vlgmr.msra.gmra.mxu3 %v93_v61 }
  0x8e   :  { %v137_v62 = vpop.f32.mrf.mxu1 }
  0x8f   :  { %273 = vmatmul.f32.gmra.mxu0 %v137_v62 }
  0x94   :  { %v96_v63 = vpop.f32.mrf.mxu2 }
  0x95   :  { %227 = vmatmul.f32.gmra.mxu3 %v96_v63 }
  0x96   :  { %v140_v3 = vpop.f32.mrf.mxu1 }
  0x97   :  { %276 = vmatmul.f32.gmra.mxu0 %v140_v3 }
  0x9c   :  { %v99_v4 = vpop.f32.mrf.mxu2 }
  0x9d   :  { %230 = vmatmul.f32.gmra.mxu3 %v99_v4 }
  0x9e   :  { %v143_v7 = vpop.f32.mrf.mxu1 }
  0x9f   :  { %279 = vmatmul.f32.gmra.mxu0 %v143_v7 }
  0xa4   :  { %v102_v8 = vpop.f32.mrf.mxu2 }
  0xa5   :  { %233 = vmatmul.f32.gmra.mxu3 %v102_v8 }
  0xac   :  { %v196_v13 = vpop.f32.mrf.mxu2 }
  0xb4   :  { %v199_v23 = vpop.f32.mrf.mxu2 }
  0xbc   :  { %v202_v30 = vpop.f32.mrf.mxu2 }
  0xc4   :  { %v205_v39 = vpop.f32.mrf.mxu2 }
 0x104   :  { %v271_v15 = vpop.f32.mrf.mxu0 }
 0x10c   :  { %v274_v26 = vpop.f32.mrf.mxu0 }
 0x110   :  { %v225_v21 = vpop.f32.mrf.mxu3 }
 0x111   :  { %v226_v36 = vadd.f32 %v225_v21, %v196_v13 }
 0x113   :  { %v283_v40 = vadd.f32 %v271_v15, %v226_v36  ;;  %v762_v36 = vld [vmem:[%s1448_s2 + $0xf0] sm:$0xff] }
 0x114   :  { %v277_v33 = vpop.f32.mrf.mxu0 }
 0x118   :  { %v228_v29 = vpop.f32.mrf.mxu3 }
 0x119   :  { %v229_v35 = vadd.f32 %v228_v29, %v199_v23 }
 0x11b   :  { %v284_v38 = vadd.f32 %v274_v26, %v229_v35  ;;  %v763_v35 = vld [vmem:[%s1448_s2 + $0xf8] sm:$0xff] }
 0x11c   :  { %v280_v43 = vpop.f32.mrf.mxu0  ;;  %479 = vmatpush.msrb.mxu0 %v763_v35 }
 0x11d   :  { %v287_v46 = vadd.f32 %v284_v38, %v283_v40 }
 0x11e   :  { %480 = vmatpush.msrb.mxu0 %v762_v36 }
 0x120   :  { %v231_v34 = vpop.f32.mrf.mxu3 }
 0x121   :  { %v232_v37 = vadd.f32 %v231_v34, %v202_v30 }
 0x123   :  { %v285_v41 = vadd.f32 %v277_v33, %v232_v37  ;;  %v761_v37 = vld [vmem:[%s1448_s2 + $0xe8] sm:$0xff] }
 0x124   :  { %481 = vmatpush.msrb.mxu0 %v761_v37 }
 0x125   :  { %v288_v48 = vadd.f32 %v287_v46, %v285_v41  ;;  %v754_v46 = vld [vmem:[%s1448_s2 + $0xb0] sm:$0xff] }
 0x128   :  { %v234_v42 = vpop.f32.mrf.mxu3 }
 0x129   :  { %v235_v47 = vadd.f32 %v234_v42, %v205_v39  ;;  %v759_v39 = vld [vmem:[%s1448_s2 + $0xd8] sm:$0xff]  ;;  %v756_v42 = vld [vmem:[%s1448_s2 + $0xc0] sm:$0xff] }
 0x12b   :  { %v286_v49 = vadd.f32 %v280_v43, %v235_v47  ;;  %v755_v43 = vld [vmem:[%s1448_s2 + $0xb8] sm:$0xff]  ;;  %v753_v47 = vld [vmem:[%s1448_s2 + $0xa8] sm:$0xff] }
 0x12d   :  { %v289_v50 = vadd.f32 %v288_v48, %v286_v49  ;;  %v752_v48 = vld [vmem:[%s1448_s2 + $0xa0] sm:$0xff] }
 0x12f   :  { %v290_v51 = vrot.slane %v289_v50, 4 }
 0x131   :  { %v291_v52 = vadd.f32 %v290_v51, %v289_v50  ;;  %v750_v50 = vld [vmem:[%s1448_s2 + $0x90] sm:$0xff]  ;;  %v749_v51 = vld [vmem:[%s1448_s2 + $0x88] sm:$0xff] }
 0x133   :  { %v292_v53 = vrot.slane %v291_v52, 2 }
 0x135   :  { %v293_v54 = vadd.f32 %v292_v53, %v291_v52  ;;  %v748_v52 = vld [vmem:[%s1448_s2 + $0x80] sm:$0xff] }
 0x137   :  { %v294_v55 = vrot.slane %v293_v54, 1 }
 0x139   :  { %v295_v56 = vadd.f32 %v294_v55, %v293_v54 }
 0x13b   :  { %312 = vmatmul.f32.vlgmr.msrb.gmra.mxu1 %v295_v56 }
 0x1b8   :  { %v313_v57 = vpop.f32.mrf.mxu1 }
 0x1b9   :  { %v316_v58 = vmul.f32 0.001953125, %v313_v57 }
 0x1bb   :  { %v317_v59 = vperm.slane %v316_v58, 0 }
 0x1bd   :  { %v1189_v60 = vsub.f32 %v283_v40, %v317_v59  ;;  %v1191_v61 = vsub.f32 %v284_v38, %v317_v59  ;;  %v1193_v62 = vsub.f32 %v285_v41, %v317_v59  ;;  %v1195_v63 = vsub.f32 %v286_v49, %v317_v59  ;;  %v760_v38 = vld [vmem:[%s1448_s2 + $0xe0] sm:$0xff]  ;;  %v758_v40 = vld [vmem:[%s1448_s2 + $0xd0] sm:$0xff]  ;;  %v757_v41 = vld [vmem:[%s1448_s2 + $0xc8] sm:$0xff] }
 0x1be   :  { %482 = vmatpush.msrb.mxu0 %v760_v38  ;;  %v751_v49 = vld [vmem:[%s1448_s2 + $0x98] sm:$0xff] }
 0x1bf   :  { %v322_v3 = vmul.f32 %v1189_v60, %v1189_v60  ;;  %v323_v4 = vmul.f32 %v1191_v61, %v1191_v61  ;;  %v324_v7 = vmul.f32 %v1193_v62, %v1193_v62  ;;  %v325_v13 = vmul.f32 %v1195_v63, %v1195_v63 }
 0x1c0   :  { %483 = vmatpush.msrb.mxu0 %v759_v39  ;;  %v777_v39 = vld [vmem:[%s1448_s2 + $0x168] sm:$0xff] }
 0x1c1   :  { %v326_v8 = vadd.f32 %v323_v4, %v322_v3  ;;  %v356_v4 = vld [vmem:[%s1449_s6] sm:$0x1] }
 0x1c2   :  { %484 = vmatpush.msrb.mxu0 %v758_v40  ;;  %v461_v40 = vld [vmem:[%s1448_s2 + $0x78] sm:$0xff] }
 0x1c3   :  { %v327_v15 = vadd.f32 %v326_v8, %v324_v7 }
 0x1c4   :  { %485 = vmatpush.msrb.mxu0 %v757_v41  ;;  %v776_v41 = vld [vmem:[%s1448_s2 + $0x160] sm:$0xff] }
 0x1c5   :  { %v328_v21 = vadd.f32 %v327_v15, %v325_v13 }
 0x1c6   :  { %486 = vmatpush.msrb.mxu0 %v756_v42  ;;  %v460_v42 = vld [vmem:[%s1448_s2 + $0x70] sm:$0xff] }
 0x1c7   :  { %v329_v23 = vrot.slane %v328_v21, 4 }
 0x1c8   :  { %487 = vmatpush.msrb.mxu0 %v755_v43  ;;  %v775_v43 = vld [vmem:[%s1448_s2 + $0x158] sm:$0xff] }
 0x1c9   :  { %v330_v26 = vadd.f32 %v329_v23, %v328_v21  ;;  %v780_v21 = vld [vmem:[%s1447_s7] ss:$0 sm:$0xff] }
 0x1ca   :  { %488 = vmatpush.msrb.mxu0 %v754_v46  ;;  %v459_v46 = vld [vmem:[%s1448_s2 + $0x68] sm:$0xff] }
 0x1cb   :  { %v331_v29 = vrot.slane %v330_v26, 2 }
 0x1cc   :  { %489 = vmatpush.msrb.mxu0 %v753_v47  ;;  %v773_v47 = vld [vmem:[%s1448_s2 + $0x148] sm:$0xff] }
 0x1cd   :  { %v332_v30 = vadd.f32 %v331_v29, %v330_v26 }
 0x1ce   :  { %490 = vmatpush.msrb.mxu0 %v752_v48  ;;  %v457_v48 = vld [vmem:[%s1448_s2 + $0x58] sm:$0xff] }
 0x1cf   :  { %v333_v33 = vrot.slane %v332_v30, 1 }
 0x1d0   :  { %491 = vmatpush.msrb.mxu0 %v751_v49  ;;  %v771_v49 = vld [vmem:[%s1448_s2 + $0x138] sm:$0xff] }
 0x1d1   :  { %v334_v34 = vadd.f32 %v333_v33, %v332_v30 }
 0x1d2   :  { %492 = vmatpush.msrb.mxu0 %v750_v50 }
 0x1d3   :  { %351 = vmatmul.f32.vlgmr.msrb.gmra.mxu3 %v334_v34 }
 0x1d4   :  { %493 = vmatpush.msrb.mxu0 %v749_v51 }
 0x1d6   :  { %494 = vmatpush.msrb.mxu0 %v748_v52 }
 0x1d8   :  { %635 = vmatpush.msra.mxu0 %v1080_v0 }
 0x1da   :  { %636 = vmatpush.msra.mxu0 %v1087_v1 }
 0x1dc   :  { %637 = vmatpush.msra.mxu0 %v1094_v2 }
 0x1de   :  { %638 = vmatpush.msra.mxu0 %v1101_v9 }
 0x1e0   :  { %639 = vmatpush.msra.mxu0 %v1108_v10 }
 0x1e2   :  { %640 = vmatpush.msra.mxu0 %v1115_v11 }
 0x1e4   :  { %641 = vmatpush.msra.mxu0 %v1122_v12 }
 0x1e6   :  { %642 = vmatpush.msra.mxu0 %v1129_v14 }
 0x1e8   :  { %643 = vmatpush.msra.mxu0 %v1136_v16 }
 0x1ea   :  { %644 = vmatpush.msra.mxu0 %v1143_v17 }
 0x1ec   :  { %645 = vmatpush.msra.mxu0 %v1150_v20 }
 0x1ee   :  { %646 = vmatpush.msra.mxu0 %v1157_v22 }
 0x1f0   :  { %647 = vmatpush.msra.mxu0 %v1164_v24 }
 0x1f2   :  { %648 = vmatpush.msra.mxu0 %v1169_v25 }
 0x1f4   :  { %649 = vmatpush.msra.mxu0 %v1176_v27 }
 0x1f6   :  { %650 = vmatpush.msra.mxu0 %v1183_v28 }
 0x256   :  { %v352_v53 = vpop.f32.mrf.mxu3 }
 0x257   :  { %v355_v54 = vmul.f32 0.001953125, %v352_v53 }
 0x259   :  { %v357_v55 = vadd.f32 1e-05, %v355_v54 }
 0x25b   :  { %782 = vrsqrt.f32 %v357_v55  ;;  %vm364_vm2 = vweird.f32 %v357_v55 }
 0x261   :  { %v783_v56 = vpop.eup %782 }
 0x262   :  { %v359_v57 = vmul.f32 %v783_v56, %v357_v55  ;;  %vm365_vm1 = vweird.f32 %v783_v56 }
 0x263   :  { %vm366_vm3 = vmor %vm364_vm2, %vm365_vm1 }
 0x264   :  { %v360_v58 = vmul.f32 %v783_v56, %v359_v57 }
 0x266   :  { %v361_v59 = vmul.f32 0.5, %v360_v58 }
 0x268   :  { %v362_v3 = vsub.f32 1.5, %v361_v59 }
 0x26a   :  { %v363_v7 = vmul.f32 %v783_v56, %v362_v3 }
 0x26c   :  { %v367_v8 = vsel %vm366_vm3, %v783_v56, %v363_v7 }
 0x26d   :  { %v368_v13 = vmul.f32 %v367_v8, %v356_v4 }
 0x26f   :  { %v370_v15 = vperm.slane %v368_v13, 0 }
 0x271   :  { %v375_v23 = vmul.f32 %v370_v15, %v1195_v63  ;;  %v372_v26 = vmul.f32 %v370_v15, %v1189_v60  ;;  %v374_v29 = vmul.f32 %v370_v15, %v1193_v62  ;;  %v373_v30 = vmul.f32 %v370_v15, %v1191_v61  ;;  %v779_v61 = vld [vmem:[%s1448_s2 + $0x178] sm:$0xff]  ;;  %v778_v62 = vld [vmem:[%s1448_s2 + $0x170] sm:$0xff] }
 0x272   :  { %554 = vmatpush.msra.mxu2 %v779_v61 }
 0x273   :  { %v383_v33 = vadd.f32 %v780_v21, %v375_v23  ;;  %v380_v34 = vadd.f32 %v780_v21, %v372_v26  ;;  %v382_v35 = vadd.f32 %v780_v21, %v374_v29  ;;  %v381_v38 = vadd.f32 %v780_v21, %v373_v30 }
 0x274   :  { %555 = vmatpush.msra.mxu2 %v778_v62 }
 0x275   :  { %v1278_v36 = vmax.f32 %v383_v33, 0.0  ;;  %v384_v37 = vmax.f32 %v380_v34, 0.0  ;;  %v386_v60 = vmax.f32 %v382_v35, 0.0  ;;  %v385_v63 = vmax.f32 %v381_v38, 0.0 }
 0x276   :  { %556 = vmatpush.msra.mxu2 %v777_v39 }
 0x277   :  { %400 = vmatpush.msra.mxu1 %v1278_v36  ;;  %429 = vmatpush.msra.mxu3 %v1278_v36 }
 0x278   :  { %495 = vmatmul.f32.vlgmr.msrb.gmra.mxu0 %v384_v37  ;;  %557 = vmatpush.msra.mxu2 %v776_v41 }
 0x279   :  { %401 = vmatpush.msra.mxu1 %v386_v60  ;;  %430 = vmatpush.msra.mxu3 %v386_v60 }
 0x27a   :  { %558 = vmatpush.msra.mxu2 %v775_v43 }
 0x27b   :  { %402 = vmatpush.msra.mxu1 %v385_v63  ;;  %431 = vmatpush.msra.mxu3 %v385_v63 }
 0x27d   :  { %403 = vmatpush.msra.mxu1 %v384_v37  ;;  %432 = vmatpush.msra.mxu3 %v384_v37 }
 0x27e   :  { %740 = vmatmul.msk.f32.vlgmr.msra.gmra.mxu1 %vm63_vm0, %v876_v5  ;;  %744 = vmatmul.msk.f32.vlgmr.msra.gmra.mxu3 %vm63_vm0, %v882_v6  ;;  %v774_v5 = vld [vmem:[%s1448_s2 + $0x150] sm:$0xff]  ;;  %v458_v6 = vld [vmem:[%s1448_s2 + $0x60] sm:$0xff] }
 0x27f   :  { %508 = vmatpush.msrb.mxu1 %v461_v40  ;;  %596 = vmatpush.msrb.mxu3 %v1080_v0  ;;  %v772_v0 = vld [vmem:[%s1448_s2 + $0x140] sm:$0xff] }
 0x280   :  { %498 = vmatmul.f32.gmra.mxu0 %v385_v63  ;;  %559 = vmatpush.msra.mxu2 %v774_v5 }
 0x281   :  { %509 = vmatpush.msrb.mxu1 %v460_v42  ;;  %597 = vmatpush.msrb.mxu3 %v1087_v1  ;;  %v456_v1 = vld [vmem:[%s1448_s2 + $0x50] sm:$0xff] }
 0x282   :  { %560 = vmatpush.msra.mxu2 %v773_v47 }
 0x283   :  { %510 = vmatpush.msrb.mxu1 %v459_v46  ;;  %598 = vmatpush.msrb.mxu3 %v1094_v2  ;;  %v455_v2 = vld [vmem:[%s1448_s2 + $0x48] sm:$0xff] }
 0x284   :  { %561 = vmatpush.msra.mxu2 %v772_v0 }
 0x285   :  { %511 = vmatpush.msrb.mxu1 %v458_v6  ;;  %599 = vmatpush.msrb.mxu3 %v1101_v9  ;;  %v452_v9 = vld [vmem:[%s1448_s2 + $0x30] sm:$0xff] }
 0x286   :  { %741 = vmatmul.msk.f32.gmra.mxu1 %vm63_vm0, %v926_v18  ;;  %745 = vmatmul.msk.f32.gmra.mxu3 %vm63_vm0, %v931_v19  ;;  %v454_v18 = vld [vmem:[%s1448_s2 + $0x40] sm:$0xff]  ;;  %v453_v19 = vld [vmem:[%s1448_s2 + $0x38] sm:$0xff] }
 0x287   :  { %512 = vmatpush.msrb.mxu1 %v457_v48  ;;  %562 = vmatpush.msra.mxu2 %v771_v49 }
 0x288   :  { %501 = vmatmul.f32.gmra.mxu0 %v386_v60  ;;  %600 = vmatpush.msrb.mxu3 %v1108_v10  ;;  %v451_v10 = vld [vmem:[%s1448_s2 + $0x28] sm:$0xff] }
 0x289   :  { %513 = vmatpush.msrb.mxu1 %v456_v1 }
 0x28a   :  { %601 = vmatpush.msrb.mxu3 %v1115_v11  ;;  %v769_v11 = vld [vmem:[%s1448_s2 + $0x128] sm:$0xff] }
 0x28b   :  { %514 = vmatpush.msrb.mxu1 %v455_v2 }
 0x28c   :  { %602 = vmatpush.msrb.mxu3 %v1122_v12  ;;  %v447_v12 = vld [vmem:[%s1448_s2 + $0x8] sm:$0xff] }
 0x28d   :  { %515 = vmatpush.msrb.mxu1 %v454_v18 }
 0x28e   :  { %742 = vmatmul.msk.f32.gmra.mxu1 %vm63_vm0, %v973_v31  ;;  %746 = vmatmul.msk.f32.gmra.mxu3 %vm63_vm0, %v978_v32  ;;  %v450_v31 = vld [vmem:[%s1448_s2 + $0x20] sm:$0xff]  ;;  %v449_v32 = vld [vmem:[%s1448_s2 + $0x18] sm:$0xff] }
 0x28f   :  { %516 = vmatpush.msrb.mxu1 %v453_v19  ;;  %603 = vmatpush.msrb.mxu3 %v1129_v14  ;;  %v768_v14 = vld [vmem:[%s1448_s2 + $0x120] sm:$0xff] }
 0x290   :  { %504 = vmatmul.f32.gmra.mxu0 %v1278_v36 }
 0x291   :  { %517 = vmatpush.msrb.mxu1 %v452_v9  ;;  %604 = vmatpush.msrb.mxu3 %v1136_v16  ;;  %v446_v16 = vld [vmem:[%s1448_s2] sm:$0xff] }
 0x293   :  { %518 = vmatpush.msrb.mxu1 %v451_v10  ;;  %605 = vmatpush.msrb.mxu3 %v1143_v17  ;;  %v767_v17 = vld [vmem:[%s1448_s2 + $0x118] sm:$0xff] }
 0x295   :  { %519 = vmatpush.msrb.mxu1 %v450_v31  ;;  %606 = vmatpush.msrb.mxu3 %v1150_v20  ;;  %v766_v20 = vld [vmem:[%s1448_s2 + $0x110] sm:$0xff] }
 0x296   :  { %743 = vmatmul.msk.f32.gmra.mxu1 %vm63_vm0, %v1020_v44  ;;  %747 = vmatmul.msk.f32.gmra.mxu3 %vm63_vm0, %v1025_v45  ;;  %v770_v44 = vld [vmem:[%s1448_s2 + $0x130] sm:$0xff] }
 0x297   :  { %607 = vmatpush.msrb.mxu3 %v1157_v22  ;;  %v448_v45 = vld [vmem:[%s1448_s2 + $0x10] sm:$0xff]  ;;  %520 = vmatpush.msrb.mxu1 %v449_v32  ;;  %v765_v22 = vld [vmem:[%s1448_s2 + $0x108] sm:$0xff] }
 0x298   :  { %563 = vmatpush.msra.mxu2 %v770_v44 }
 0x299   :  { %608 = vmatpush.msrb.mxu3 %v1164_v24  ;;  %521 = vmatpush.msrb.mxu1 %v448_v45  ;;  %v764_v24 = vld [vmem:[%s1448_s2 + $0x100] sm:$0xff] }
 0x29a   :  { %564 = vmatpush.msra.mxu2 %v769_v11 }
 0x29b   :  { %609 = vmatpush.msrb.mxu3 %v1169_v25  ;;  %522 = vmatpush.msrb.mxu1 %v447_v12 }
 0x29c   :  { %565 = vmatpush.msra.mxu2 %v768_v14 }
 0x29d   :  { %610 = vmatpush.msrb.mxu3 %v1176_v27  ;;  %523 = vmatpush.msrb.mxu1 %v446_v16 }
 0x29e   :  { %566 = vmatpush.msra.mxu2 %v767_v17 }
 0x29f   :  { %611 = vmatpush.msrb.mxu3 %v1183_v28 }
 0x2a0   :  { %567 = vmatpush.msra.mxu2 %v766_v20 }
 0x2a2   :  { %568 = vmatpush.msra.mxu2 %v765_v22 }
 0x2a4   :  { %569 = vmatpush.msra.mxu2 %v764_v24 }
 0x2f5   :  { %v496_v56 = vpop.f32.mrf.mxu0 }
 0x2fb   :  { %v405_v25 = vpop.f32.mrf.mxu1 }
 0x2fc   :  { %524 = vmatmul.f32.vlgmr.msrb.gmra.mxu1 %v405_v25 }
 0x2fd   :  { %v499_v59 = vpop.f32.mrf.mxu0 }
 0x301   :  { %v434_v27 = vpop.f32.mrf.mxu3 }
 0x302   :  { %570 = vmatmul.f32.vlgmr.msra.gmra.mxu2 %v434_v27  ;;  %v656_v27 = vld [vmem:[%s1451_s8] sm:$0x1] }
 0x303   :  { %v408_v28 = vpop.f32.mrf.mxu1 }
 0x304   :  { %527 = vmatmul.f32.gmra.mxu1 %v408_v28 }
 0x305   :  { %v502_v7 = vpop.f32.mrf.mxu0 }
 0x309   :  { %v437_v50 = vpop.f32.mrf.mxu3 }
 0x30a   :  { %573 = vmatmul.f32.gmra.mxu2 %v437_v50 }
 0x30b   :  { %v411_v51 = vpop.f32.mrf.mxu1 }
 0x30c   :  { %530 = vmatmul.f32.gmra.mxu1 %v411_v51 }
 0x30d   :  { %v505_v33 = vpop.f32.mrf.mxu0 }
 0x311   :  { %v440_v52 = vpop.f32.mrf.mxu3 }
 0x312   :  { %576 = vmatmul.f32.gmra.mxu2 %v440_v52 }
 0x313   :  { %v414_v53 = vpop.f32.mrf.mxu1 }
 0x314   :  { %533 = vmatmul.f32.gmra.mxu1 %v414_v53  ;;  %v781_v53 = vld [vmem:[%s1450_s9] ss:$0 sm:$0xff] }
 0x319   :  { %v443_v54 = vpop.f32.mrf.mxu3 }
 0x31a   :  { %579 = vmatmul.f32.gmra.mxu2 %v443_v54 }
 0x379   :  { %v525_v55 = vpop.f32.mrf.mxu1 }
 0x37a   :  { %v526_v15 = vadd.f32 %v525_v55, %v496_v56 }
 0x381   :  { %v528_v57 = vpop.f32.mrf.mxu1 }
 0x382   :  { %v529_v13 = vadd.f32 %v528_v57, %v499_v59 }
 0x385   :  { %v571_v58 = vpop.f32.mrf.mxu2 }
 0x386   :  { %v583_v29 = vadd.f32 %v571_v58, %v526_v15 }
 0x389   :  { %v531_v4 = vpop.f32.mrf.mxu1 }
 0x38a   :  { %v532_v21 = vadd.f32 %v531_v4, %v502_v7  ;;  %v786_v7 = vld [vmem:[%s1442_s0] sm:$0xff] }
 0x38d   :  { %v574_v3 = vpop.f32.mrf.mxu2 }
 0x38e   :  { %v584_v23 = vadd.f32 %v574_v3, %v529_v13  ;;  %v787_v13 = vld [vmem:[%s1442_s0 + $0x8] sm:$0xff] }
 0x390   :  { %v587_v34 = vadd.f32 %v584_v23, %v583_v29 }
 0x391   :  { %v534_v26 = vpop.f32.mrf.mxu1 }
 0x392   :  { %v535_v35 = vadd.f32 %v534_v26, %v505_v33  ;;  %v789_v26 = vld [vmem:[%s1442_s0 + $0x18] sm:$0xff] }
 0x395   :  { %v577_v8 = vpop.f32.mrf.mxu2 }
 0x396   :  { %v585_v30 = vadd.f32 %v577_v8, %v532_v21  ;;  %v788_v21 = vld [vmem:[%s1442_s0 + $0x10] sm:$0xff] }
 0x398   :  { %v588_v37 = vadd.f32 %v587_v34, %v585_v30 }
 0x39d   :  { %v580_v36 = vpop.f32.mrf.mxu2 }
 0x39e   :  { %v586_v38 = vadd.f32 %v580_v36, %v535_v35 }
 0x3a0   :  { %v589_v60 = vadd.f32 %v588_v37, %v586_v38 }
 0x3a2   :  { %v590_v61 = vrot.slane %v589_v60, 4 }
 0x3a4   :  { %v591_v62 = vadd.f32 %v590_v61, %v589_v60 }
 0x3a6   :  { %v592_v63 = vrot.slane %v591_v62, 2 }
 0x3a8   :  { %v593_v39 = vadd.f32 %v592_v63, %v591_v62 }
 0x3aa   :  { %v594_v40 = vrot.slane %v593_v39, 1 }
 0x3ac   :  { %v595_v41 = vadd.f32 %v594_v40, %v593_v39 }
 0x3ae   :  { %612 = vmatmul.f32.vlgmr.msrb.gmra.mxu3 %v595_v41 }
 0x431   :  { %v613_v42 = vpop.f32.mrf.mxu3 }
 0x432   :  { %v616_v43 = vmul.f32 0.001953125, %v613_v42 }
 0x434   :  { %v617_v46 = vperm.slane %v616_v43, 0 }
 0x436   :  { %v618_v5 = vsub.f32 %v583_v29, %v617_v46  ;;  %v619_v6 = vsub.f32 %v584_v23, %v617_v46  ;;  %v620_v47 = vsub.f32 %v585_v30, %v617_v46  ;;  %v621_v48 = vsub.f32 %v586_v38, %v617_v46 }
 0x438   :  { %v622_v0 = vmul.f32 %v618_v5, %v618_v5  ;;  %v623_v1 = vmul.f32 %v619_v6, %v619_v6  ;;  %v624_v49 = vmul.f32 %v620_v47, %v620_v47  ;;  %v625_v18 = vmul.f32 %v621_v48, %v621_v48 }
 0x43a   :  { %v626_v2 = vadd.f32 %v623_v1, %v622_v0 }
 0x43c   :  { %v627_v19 = vadd.f32 %v626_v2, %v624_v49 }
 0x43e   :  { %v628_v9 = vadd.f32 %v627_v19, %v625_v18 }
 0x440   :  { %v629_v10 = vrot.slane %v628_v9, 4 }
 0x442   :  { %v630_v31 = vadd.f32 %v629_v10, %v628_v9 }
 0x444   :  { %v631_v32 = vrot.slane %v630_v31, 2 }
 0x446   :  { %v632_v44 = vadd.f32 %v631_v32, %v630_v31 }
 0x448   :  { %v633_v45 = vrot.slane %v632_v44, 1 }
 0x44a   :  { %v634_v11 = vadd.f32 %v633_v45, %v632_v44 }
 0x44c   :  { %651 = vmatmul.f32.vlgmr.msra.gmra.mxu0 %v634_v11 }
 0x4c9   :  { %v652_v12 = vpop.f32.mrf.mxu0 }
 0x4ca   :  { %v655_v14 = vmul.f32 0.001953125, %v652_v12 }
 0x4cc   :  { %v657_v16 = vadd.f32 1e-05, %v655_v14 }
 0x4ce   :  { %784 = vrsqrt.f32 %v657_v16  ;;  %vm664_vm5 = vweird.f32 %v657_v16 }
 0x4d4   :  { %v785_v17 = vpop.eup %784 }
 0x4d5   :  { %v659_v20 = vmul.f32 %v785_v17, %v657_v16  ;;  %vm665_vm4 = vweird.f32 %v785_v17 }
 0x4d6   :  { %vm666_vm6 = vmor %vm664_vm5, %vm665_vm4 }
 0x4d7   :  { %v660_v22 = vmul.f32 %v785_v17, %v659_v20 }
 0x4d9   :  { %v661_v24 = vmul.f32 0.5, %v660_v22 }
 0x4db   :  { %v662_v25 = vsub.f32 1.5, %v661_v24 }
 0x4dd   :  { %v663_v28 = vmul.f32 %v785_v17, %v662_v25 }
 0x4df   :  { %v667_v50 = vsel %vm666_vm6, %v785_v17, %v663_v28 }
 0x4e0   :  { %v668_v51 = vmul.f32 %v667_v50, %v656_v27 }
 0x4e2   :  { %v670_v52 = vperm.slane %v668_v51, 0 }
 0x4e4   :  { %v672_v54 = vmul.f32 %v670_v52, %v618_v5  ;;  %v673_v55 = vmul.f32 %v670_v52, %v619_v6  ;;  %v674_v56 = vmul.f32 %v670_v52, %v620_v47  ;;  %v675_v57 = vmul.f32 %v670_v52, %v621_v48 }
 0x4e6   :  { %v680_v58 = vadd.f32 %v781_v53, %v672_v54  ;;  %v681_v59 = vadd.f32 %v781_v53, %v673_v55  ;;  %v682_v3 = vadd.f32 %v781_v53, %v674_v56  ;;  %v683_v4 = vadd.f32 %v781_v53, %v675_v57 }
 0x4e8   :  { %v684_v8 = vadd.f32 %v786_v7, %v680_v58  ;;  %v685_v15 = vadd.f32 %v787_v13, %v681_v59  ;;  %v686_v23 = vadd.f32 %v788_v21, %v682_v3  ;;  %v687_v29 = vadd.f32 %v789_v26, %v683_v4 }
 0x4ea   :  { %v688_v30 = vmax.f32 %v684_v8, 0.0  ;;  %v689_v33 = vmax.f32 %v685_v15, 0.0  ;;  %v690_v34 = vmax.f32 %v686_v23, 0.0  ;;  %v691_v35 = vmax.f32 %v687_v29, 0.0 }
 0x4ec   :  { %692 = vst [vmem:[%s1452_s10] sm:$0xff] %v688_v30 }
 0x4ed   :  { %693 = vst [vmem:[%s1452_s10 + $0x8] sm:$0xff] %v689_v33 }
 0x4ee   :  { %694 = vst [vmem:[%s1452_s10 + $0x10] sm:$0xff] %v690_v34 }
 0x4ef   :  { %695 = vst [vmem:[%s1452_s10 + $0x18] sm:$0xff] %v691_v35 }

</bundles_post_ra>
